<compile_context>
chip_gen: v6e
topology: v6e:2x2x1
jax: 0.10.0
libtpu: 0.0.40
codegen_flags: <defaults>
</compile_context>

<pallas_src>
import functools

import jax
import jax.numpy as jnp
from jax.experimental import pallas as pl
from jax.experimental.pallas import tpu as pltpu

BN_EPS = 1e-5


# ------------------------------ static layout ------------------------------ #
def _layer_table(P, Channel, z_dim):
    # (name, fout, has_bn) in the exact order the kernel consumes weights.
    return (
        ("l1", 32 * P, True),        # fc1 / bn1
        ("l2", 16 * P, True),        # fc2 / bn2
        ("l3", 4 * P, True),         # fc3 / bn3
        ("l45", 2 * z_dim, False),   # fc4 | fc5 fused
        ("l9", 32 * P, True),        # fc9 / bn9
        ("l10", 16 * P, True),       # fc10 / bn10
        ("l11", 4 * P, True),        # fc11 / bn11
        ("l12", 4 * P, True),        # fc12 / bn12
        ("l13", P, False),           # fc13
        ("l6", 4 * P, True),         # fc6 / bn6
        ("l7", 64 * P, True),        # fc7 / bn7
        ("l8", Channel * P, False),  # fc8
    )


def _round_up(x, m):
    return (x + m - 1) // m * m


def _vector_layout(P, Channel, z_dim):
    """Row layout of the packed bias/gamma/beta slab: name -> (b_row, g_row, beta_row, fout)."""
    layout = {}
    row = 0
    for name, fout, has_bn in _layer_table(P, Channel, z_dim):
        b_row = row
        row += 1
        if has_bn:
            g_row, be_row = row, row + 1
            row += 2
        else:
            g_row = be_row = -1
        layout[name] = (b_row, g_row, be_row, fout)
    return layout, row


# --------------------------------- kernel ---------------------------------- #
def pgmsu_kernel(x_ref, eps_ref,
                 w1, w2, w3, w45, w9, w10, w11, w12, w13, w6, w7, w8,
                 vec_ref, out_ref,
                 *, P, Channel, z_dim, layout, mm_dtype, out_pad):
    def vec(row, width):                       # (1, width) slice of the packed param slab
        return vec_ref[row:row + 1, :width]

    def linear(x, w_ref, name):
        b_row, _, _, fout = layout[name]
        h = jnp.dot(x.astype(mm_dtype), w_ref[...],
                    preferred_element_type=jnp.float32)          # MXU, f32 accumulate
        return h + vec(b_row, fout)

    def bn(h, name):                           # BatchNorm1d, training mode, per-tile stats
        _, g_row, be_row, fout = layout[name]
        mean = jnp.mean(h, axis=0, keepdims=True)
        var = jnp.mean(h * h, axis=0, keepdims=True) - mean * mean   # E[h^2] - E[h]^2
        return (h - mean) * jax.lax.rsqrt(var + BN_EPS) * vec(g_row, fout) + vec(be_row, fout)

    def relu(h):                               # F.leaky_relu(., 0.0) == relu
        return jnp.maximum(h, 0.0)

    x = x_ref[...]                             # (tn, Channel), f32
    tn = x.shape[0]

    # ----- encoder_z -----
    h = relu(bn(linear(x, w1, "l1"), "l1"))
    h = relu(bn(linear(h, w2, "l2"), "l2"))
    h = relu(bn(linear(h, w3, "l3"), "l3"))
    mlv = linear(h, w45, "l45")                # (tn, 2*z_dim) = [mu | log_var]
    mu = mlv[:, :z_dim]
    log_var = mlv[:, z_dim:2 * z_dim]

    # ----- encoder_a -----
    h = relu(bn(linear(x, w9, "l9"), "l9"))
    h = relu(bn(linear(h, w10, "l10"), "l10"))
    h = relu(bn(linear(h, w11, "l11"), "l11"))
    h = relu(bn(linear(h, w12, "l12"), "l12"))
    logits = linear(h, w13, "l13")             # (tn, P)
    logits = logits - jnp.max(logits, axis=1, keepdims=True)
    ex = jnp.exp(logits)
    a = ex * pl.reciprocal(jnp.sum(ex, axis=1, keepdims=True), approx=True)   # EUP recip

    # ----- reparameterize -----
    z = mu + eps_ref[...] * jnp.exp(0.5 * log_var)       # (tn, z_dim)

    # ----- decoder -----
    h = relu(bn(linear(z, w6, "l6"), "l6"))
    h = relu(bn(linear(h, w7, "l7"), "l7"))
    em = jax.nn.sigmoid(linear(h, w8, "l8"))   # (tn, P*Channel), row-major [p, c]

    # ----- y_hat[n, c] = sum_p a[n, p] * em[n, p*Channel + c] -----
    # Two tiny lane-dense MXU contractions with constant 0/1 selection matrices
    # (no per-p lane slicing / broadcasts, no reshapes).
    PC = P * Channel
    col = jax.lax.broadcasted_iota(jnp.int32, (P, PC), 1)
    row = jax.lax.broadcasted_iota(jnp.int32, (P, PC), 0)
    sel_expand = ((col >= row * Channel) &
                  (col < (row + 1) * Channel)).astype(jnp.float32)      # (P, PC)
    r2 = jax.lax.broadcasted_iota(jnp.int32, (PC, Channel), 0)
    c2 = jax.lax.broadcasted_iota(jnp.int32, (PC, Channel), 1)
    diff = r2 - c2
    sel_reduce = functools.reduce(
        jnp.logical_or, [diff == p * Channel for p in range(P)]).astype(jnp.float32)  # (PC, C)
    a_rep = jnp.dot(a, sel_expand, preferred_element_type=jnp.float32)            # (tn, PC)
    y_hat = jnp.dot(a_rep * em, sel_reduce, preferred_element_type=jnp.float32)   # (tn, C)

    # ----- single lane-dense output slab: [mu | log_var | a | y_hat | em | pad] -----
    pieces = [mlv, a, y_hat, em]
    if out_pad:
        pieces.append(jnp.zeros((tn, out_pad), jnp.float32))
    out_ref[...] = jnp.concatenate(pieces, axis=1)


# ------------------------------ param packing ------------------------------ #
def pack_params(params, P, Channel, z_dim, mm_dtype):
    layout, n_rows = _vector_layout(P, Channel, z_dim)
    merged = {
        "l1": params["fc1"], "l2": params["fc2"], "l3": params["fc3"],
        "l45": {"w": jnp.concatenate([params["fc4"]["w"], params["fc5"]["w"]], axis=1),
                "b": jnp.concatenate([params["fc4"]["b"], params["fc5"]["b"]], axis=0)},
        "l9": params["fc9"], "l10": params["fc10"], "l11": params["fc11"],
        "l12": params["fc12"], "l13": params["fc13"],
        "l6": params["fc6"], "l7": params["fc7"], "l8": params["fc8"],
    }
    max_fout = max(fout for _, fout, _ in _layer_table(P, Channel, z_dim))
    slab = jnp.zeros((_round_up(n_rows, 8), _round_up(max_fout, 128)), jnp.float32)
    weights = []
    for name, fout, has_bn in _layer_table(P, Channel, z_dim):
        p = merged[name]
        b_row, g_row, be_row, _ = layout[name]
        weights.append(p["w"].astype(mm_dtype))
        slab = slab.at[b_row, :fout].set(p["b"])
        if has_bn:
            slab = slab.at[g_row, :fout].set(p["gamma"])
            slab = slab.at[be_row, :fout].set(p["beta"])
    return weights, slab


# -------------------------------- wrapper ----------------------------------- #
def pgmsu_forward(x, eps, params, *, P, Channel, z_dim,
                  tile_n=256, mm_dtype=jnp.bfloat16):
    N = x.shape[0]
    layout, _ = _vector_layout(P, Channel, z_dim)
    weights, vec_slab = pack_params(params, P, Channel, z_dim, mm_dtype)

    tile_n = min(tile_n, N)
    if N % tile_n != 0 or (tile_n % 8 != 0 and tile_n != N):
        # TODO(synk): pad-and-mask path for ragged N; fall back to a single tile.
        tile_n = N
    grid = (N // tile_n,)

    payload = 2 * z_dim + P + Channel + P * Channel
    out_w = _round_up(payload, 128)              # lane-dense output slab width

    def _const_spec(arr):
        return pl.BlockSpec(arr.shape, lambda i: (0, 0))

    in_specs = ([pl.BlockSpec((tile_n, Channel), lambda i: (i, 0)),
                 pl.BlockSpec((tile_n, z_dim), lambda i: (i, 0))]
                + [_const_spec(w) for w in weights]
                + [_const_spec(vec_slab)])
    out_specs = pl.BlockSpec((tile_n, out_w), lambda i: (i, 0))

    kernel = functools.partial(
        pgmsu_kernel, P=P, Channel=Channel, z_dim=z_dim, layout=layout,
        mm_dtype=mm_dtype, out_pad=out_w - payload)

    out = pl.pallas_call(
        kernel,
        grid=grid,
        in_specs=in_specs,
        out_specs=out_specs,
        out_shape=jax.ShapeDtypeStruct((N, out_w), jnp.float32),
        compiler_params=pltpu.CompilerParams(
            dimension_semantics=("parallel",),          # 2x across v7x's two TensorCores
            vmem_limit_bytes=32 * 1024 * 1024),         # fits v7x's 64 MiB with headroom
    )(x, eps, *weights, vec_slab)

    # Split the lane-dense slab (cheap XLA slices).
    o = 0
    mu = out[:, o:o + z_dim]; o += z_dim
    log_var = out[:, o:o + z_dim]; o += z_dim
    a = out[:, o:o + P]; o += P
    y_hat = out[:, o:o + Channel]; o += Channel
    em = out[:, o:o + P * Channel]

    em_tensor = em.reshape(N, P, Channel)        # em.view(-1, P, Channel)
    if N == 1:                                   # torch.squeeze(em_tensor, dim=0)
        em_tensor = em_tensor[0]
    return y_hat, mu, log_var, a, em_tensor


# ------------------------- deterministic parameter init --------------------- #
def init_params(key, P, Channel, z_dim):
    """Per-layer params mirroring the PyTorch module (weights stored (fin, fout))."""
    specs = [
        ("fc1", Channel, 32 * P, True), ("fc2", 32 * P, 16 * P, True),
        ("fc3", 16 * P, 4 * P, True), ("fc4", 4 * P, z_dim, False),
        ("fc5", 4 * P, z_dim, False),
        ("fc9", Channel, 32 * P, True), ("fc10", 32 * P, 16 * P, True),
        ("fc11", 16 * P, 4 * P, True), ("fc12", 4 * P, 4 * P, True),
        ("fc13", 4 * P, P, False),
        ("fc6", z_dim, 4 * P, True), ("fc7", 4 * P, 64 * P, True),
        ("fc8", 64 * P, Channel * P, False),
    ]
    keys = jax.random.split(key, len(specs))
    params = {}
    for k, (name, fin, fout, has_bn) in zip(keys, specs):
        kw, kb = jax.random.split(k)
        layer = {"w": jax.random.normal(kw, (fin, fout), jnp.float32) / jnp.sqrt(fin),
                 "b": jax.random.normal(kb, (fout,), jnp.float32) * 0.01}
        if has_bn:
            layer["gamma"] = jnp.ones((fout,), jnp.float32)
            layer["beta"] = jnp.zeros((fout,), jnp.float32)
        params[name] = layer
    return params


# ---------------------------------- main ------------------------------------ #
if __name__ == "__main__":
    P, Channel, z_dim = 4, 16, 4
    N = 256                      # >=128 rows per tile keeps MXU rows / vreg sublanes busy

    key = jax.random.PRNGKey(0)
    kx, keps, kp = jax.random.split(key, 3)
    x = jax.random.uniform(kx, (N, Channel), jnp.float32)      # hyperspectral pixels
    eps = jax.random.normal(keps, (N, z_dim), jnp.float32)     # reparameterization noise
    params = init_params(kp, P, Channel, z_dim)

    y_hat, mu, log_var, a, em_tensor = jax.block_until_ready(
        pgmsu_forward(x, eps, params, P=P, Channel=Channel, z_dim=z_dim))

    assert y_hat.shape == (N, Channel)
    assert mu.shape == (N, z_dim) and log_var.shape == (N, z_dim)
    assert a.shape == (N, P)
    assert em_tensor.shape == (N, P, Channel)
    # abundances from the softmax head sum to ~1 (approx EUP reciprocal + bf16 matmuls)
    assert jnp.allclose(jnp.sum(a, axis=1), 1.0, atol=1e-2)
    assert bool(jnp.all(jnp.isfinite(y_hat)))

    print("KERNEL_OK")
</pallas_src>

<mosaic_0001>
module attributes {stable_mosaic.version = 11 : i64} {
  func.func @pgmsu_kernel(%arg0: i32, %arg1: memref<256x16xf32, #tpu.memory_space<vmem>>, %arg2: memref<256x4xf32, #tpu.memory_space<vmem>>, %arg3: memref<16x128xbf16, #tpu.memory_space<vmem>>, %arg4: memref<128x64xbf16, #tpu.memory_space<vmem>>, %arg5: memref<64x16xbf16, #tpu.memory_space<vmem>>, %arg6: memref<16x8xbf16, #tpu.memory_space<vmem>>, %arg7: memref<16x128xbf16, #tpu.memory_space<vmem>>, %arg8: memref<128x64xbf16, #tpu.memory_space<vmem>>, %arg9: memref<64x16xbf16, #tpu.memory_space<vmem>>, %arg10: memref<16x16xbf16, #tpu.memory_space<vmem>>, %arg11: memref<16x4xbf16, #tpu.memory_space<vmem>>, %arg12: memref<4x16xbf16, #tpu.memory_space<vmem>>, %arg13: memref<16x256xbf16, #tpu.memory_space<vmem>>, %arg14: memref<256x64xbf16, #tpu.memory_space<vmem>>, %arg15: memref<32x256xf32, #tpu.memory_space<vmem>>, %arg16: memref<256x128xf32, #tpu.memory_space<vmem>>) attributes {dimension_semantics = [#tpu.dimension_semantics<parallel>], iteration_bounds = array<i64: 1>, scalar_prefetch = 0 : i64, scratch_operands = 0 : i64, tpu.core_type = #tpu.core_type<tc>, window_params = [{transform_indices = @transform_0, window_bounds = array<i64: 256, 16>}, {transform_indices = @transform_1, window_bounds = array<i64: 256, 4>}, {pipeline_mode = #tpu.pipeline_mode<synchronous>, transform_indices = @transform_2, window_bounds = array<i64: 16, 128>}, {pipeline_mode = #tpu.pipeline_mode<synchronous>, transform_indices = @transform_3, window_bounds = array<i64: 128, 64>}, {pipeline_mode = #tpu.pipeline_mode<synchronous>, transform_indices = @transform_4, window_bounds = array<i64: 64, 16>}, {pipeline_mode = #tpu.pipeline_mode<synchronous>, transform_indices = @transform_5, window_bounds = array<i64: 16, 8>}, {pipeline_mode = #tpu.pipeline_mode<synchronous>, transform_indices = @transform_6, window_bounds = array<i64: 16, 128>}, {pipeline_mode = #tpu.pipeline_mode<synchronous>, transform_indices = @transform_7, window_bounds = array<i64: 128, 64>}, {pipeline_mode = #tpu.pipeline_mode<synchronous>, transform_indices = @transform_8, window_bounds = array<i64: 64, 16>}, {pipeline_mode = #tpu.pipeline_mode<synchronous>, transform_indices = @transform_9, window_bounds = array<i64: 16, 16>}, {pipeline_mode = #tpu.pipeline_mode<synchronous>, transform_indices = @transform_10, window_bounds = array<i64: 16, 4>}, {pipeline_mode = #tpu.pipeline_mode<synchronous>, transform_indices = @transform_11, window_bounds = array<i64: 4, 16>}, {pipeline_mode = #tpu.pipeline_mode<synchronous>, transform_indices = @transform_12, window_bounds = array<i64: 16, 256>}, {pipeline_mode = #tpu.pipeline_mode<synchronous>, transform_indices = @transform_13, window_bounds = array<i64: 256, 64>}, {pipeline_mode = #tpu.pipeline_mode<synchronous>, transform_indices = @transform_14, window_bounds = array<i64: 32, 256>}, {transform_indices = @transform_15, window_bounds = array<i64: 256, 128>}]} {
    %c0 = arith.constant 0 : index
    %c0_0 = arith.constant 0 : index
    %0 = vector.load %arg1[%c0, %c0_0] : memref<256x16xf32, #tpu.memory_space<vmem>>, vector<256x16xf32>
    %1 = arith.truncf %0 : vector<256x16xf32> to vector<256x16xbf16>
    %c0_1 = arith.constant 0 : index
    %c0_2 = arith.constant 0 : index
    %2 = vector.load %arg3[%c0_1, %c0_2] : memref<16x128xbf16, #tpu.memory_space<vmem>>, vector<16x128xbf16>
    %cst = arith.constant dense<0.000000e+00> : vector<256x128xf32>
    %3 = tpu.matmul %1, %2, %cst {dimension_numbers = #tpu.dot_dimension_numbers<[1], [0], [0], [1], [0, 0, 1, 1], [], []>} : vector<256x16xbf16>, vector<16x128xbf16>, vector<256x128xf32> -> vector<256x128xf32>
    %c0_3 = arith.constant 0 : index
    %c0_4 = arith.constant 0 : index
    %4 = vector.load %arg15[%c0_3, %c0_4] : memref<32x256xf32, #tpu.memory_space<vmem>>, vector<1x128xf32>
    %5 = vector.broadcast %4 : vector<1x128xf32> to vector<256x128xf32>
    %6 = arith.addf %3, %5 : vector<256x128xf32>
    %cst_5 = arith.constant dense<0.000000e+00> : vector<128xf32>
    %7 = vector.multi_reduction <add>, %6, %cst_5 [0] : vector<256x128xf32> to vector<128xf32>
    %8 = vector.shape_cast %7 : vector<128xf32> to vector<1x128xf32>
    %cst_6 = arith.constant 2.560000e+02 : f32
    %9 = vector.broadcast %cst_6 : f32 to vector<1x128xf32>
    %10 = arith.divf %8, %9 : vector<1x128xf32>
    %11 = arith.mulf %6, %6 : vector<256x128xf32>
    %cst_7 = arith.constant dense<0.000000e+00> : vector<128xf32>
    %12 = vector.multi_reduction <add>, %11, %cst_7 [0] : vector<256x128xf32> to vector<128xf32>
    %13 = vector.shape_cast %12 : vector<128xf32> to vector<1x128xf32>
    %cst_8 = arith.constant 2.560000e+02 : f32
    %14 = vector.broadcast %cst_8 : f32 to vector<1x128xf32>
    %15 = arith.divf %13, %14 : vector<1x128xf32>
    %16 = arith.mulf %10, %10 : vector<1x128xf32>
    %17 = arith.subf %15, %16 : vector<1x128xf32>
    %18 = vector.broadcast %10 : vector<1x128xf32> to vector<256x128xf32>
    %19 = arith.subf %6, %18 : vector<256x128xf32>
    %cst_9 = arith.constant 9.99999974E-6 : f32
    %20 = vector.broadcast %cst_9 : f32 to vector<1x128xf32>
    %21 = arith.addf %17, %20 : vector<1x128xf32>
    %22 = math.rsqrt %21 : vector<1x128xf32>
    %23 = vector.broadcast %22 : vector<1x128xf32> to vector<256x128xf32>
    %24 = arith.mulf %19, %23 : vector<256x128xf32>
    %c1 = arith.constant 1 : index
    %c0_10 = arith.constant 0 : index
    %25 = vector.load %arg15[%c1, %c0_10] : memref<32x256xf32, #tpu.memory_space<vmem>>, vector<1x128xf32>
    %26 = vector.broadcast %25 : vector<1x128xf32> to vector<256x128xf32>
    %27 = arith.mulf %24, %26 : vector<256x128xf32>
    %c2 = arith.constant 2 : index
    %c0_11 = arith.constant 0 : index
    %28 = vector.load %arg15[%c2, %c0_11] : memref<32x256xf32, #tpu.memory_space<vmem>>, vector<1x128xf32>
    %29 = vector.broadcast %28 : vector<1x128xf32> to vector<256x128xf32>
    %30 = arith.addf %27, %29 : vector<256x128xf32>
    %cst_12 = arith.constant 0.000000e+00 : f32
    %31 = vector.broadcast %cst_12 : f32 to vector<256x128xf32>
    %32 = arith.maximumf %30, %31 : vector<256x128xf32>
    %33 = arith.truncf %32 : vector<256x128xf32> to vector<256x128xbf16>
    %c0_13 = arith.constant 0 : index
    %c0_14 = arith.constant 0 : index
    %34 = vector.load %arg4[%c0_13, %c0_14] : memref<128x64xbf16, #tpu.memory_space<vmem>>, vector<128x64xbf16>
    %cst_15 = arith.constant dense<0.000000e+00> : vector<256x64xf32>
    %35 = tpu.matmul %33, %34, %cst_15 {dimension_numbers = #tpu.dot_dimension_numbers<[1], [0], [0], [1], [0, 0, 1, 1], [], []>} : vector<256x128xbf16>, vector<128x64xbf16>, vector<256x64xf32> -> vector<256x64xf32>
    %c3 = arith.constant 3 : index
    %c0_16 = arith.constant 0 : index
    %36 = vector.load %arg15[%c3, %c0_16] : memref<32x256xf32, #tpu.memory_space<vmem>>, vector<1x64xf32>
    %37 = vector.broadcast %36 : vector<1x64xf32> to vector<256x64xf32>
    %38 = arith.addf %35, %37 : vector<256x64xf32>
    %cst_17 = arith.constant dense<0.000000e+00> : vector<64xf32>
    %39 = vector.multi_reduction <add>, %38, %cst_17 [0] : vector<256x64xf32> to vector<64xf32>
    %40 = vector.shape_cast %39 : vector<64xf32> to vector<1x64xf32>
    %cst_18 = arith.constant 2.560000e+02 : f32
    %41 = vector.broadcast %cst_18 : f32 to vector<1x64xf32>
    %42 = arith.divf %40, %41 : vector<1x64xf32>
    %43 = arith.mulf %38, %38 : vector<256x64xf32>
    %cst_19 = arith.constant dense<0.000000e+00> : vector<64xf32>
    %44 = vector.multi_reduction <add>, %43, %cst_19 [0] : vector<256x64xf32> to vector<64xf32>
    %45 = vector.shape_cast %44 : vector<64xf32> to vector<1x64xf32>
    %cst_20 = arith.constant 2.560000e+02 : f32
    %46 = vector.broadcast %cst_20 : f32 to vector<1x64xf32>
    %47 = arith.divf %45, %46 : vector<1x64xf32>
    %48 = arith.mulf %42, %42 : vector<1x64xf32>
    %49 = arith.subf %47, %48 : vector<1x64xf32>
    %50 = vector.broadcast %42 : vector<1x64xf32> to vector<256x64xf32>
    %51 = arith.subf %38, %50 : vector<256x64xf32>
    %cst_21 = arith.constant 9.99999974E-6 : f32
    %52 = vector.broadcast %cst_21 : f32 to vector<1x64xf32>
    %53 = arith.addf %49, %52 : vector<1x64xf32>
    %54 = math.rsqrt %53 : vector<1x64xf32>
    %55 = vector.broadcast %54 : vector<1x64xf32> to vector<256x64xf32>
    %56 = arith.mulf %51, %55 : vector<256x64xf32>
    %c4 = arith.constant 4 : index
    %c0_22 = arith.constant 0 : index
    %57 = vector.load %arg15[%c4, %c0_22] : memref<32x256xf32, #tpu.memory_space<vmem>>, vector<1x64xf32>
    %58 = vector.broadcast %57 : vector<1x64xf32> to vector<256x64xf32>
    %59 = arith.mulf %56, %58 : vector<256x64xf32>
    %c5 = arith.constant 5 : index
    %c0_23 = arith.constant 0 : index
    %60 = vector.load %arg15[%c5, %c0_23] : memref<32x256xf32, #tpu.memory_space<vmem>>, vector<1x64xf32>
    %61 = vector.broadcast %60 : vector<1x64xf32> to vector<256x64xf32>
    %62 = arith.addf %59, %61 : vector<256x64xf32>
    %cst_24 = arith.constant 0.000000e+00 : f32
    %63 = vector.broadcast %cst_24 : f32 to vector<256x64xf32>
    %64 = arith.maximumf %62, %63 : vector<256x64xf32>
    %65 = arith.truncf %64 : vector<256x64xf32> to vector<256x64xbf16>
    %c0_25 = arith.constant 0 : index
    %c0_26 = arith.constant 0 : index
    %66 = vector.load %arg5[%c0_25, %c0_26] : memref<64x16xbf16, #tpu.memory_space<vmem>>, vector<64x16xbf16>
    %cst_27 = arith.constant dense<0.000000e+00> : vector<256x16xf32>
    %67 = tpu.matmul %65, %66, %cst_27 {dimension_numbers = #tpu.dot_dimension_numbers<[1], [0], [0], [1], [0, 0, 1, 1], [], []>} : vector<256x64xbf16>, vector<64x16xbf16>, vector<256x16xf32> -> vector<256x16xf32>
    %c6 = arith.constant 6 : index
    %c0_28 = arith.constant 0 : index
    %68 = vector.load %arg15[%c6, %c0_28] : memref<32x256xf32, #tpu.memory_space<vmem>>, vector<1x16xf32>
    %69 = vector.broadcast %68 : vector<1x16xf32> to vector<256x16xf32>
    %70 = arith.addf %67, %69 : vector<256x16xf32>
    %cst_29 = arith.constant dense<0.000000e+00> : vector<16xf32>
    %71 = vector.multi_reduction <add>, %70, %cst_29 [0] : vector<256x16xf32> to vector<16xf32>
    %72 = vector.shape_cast %71 : vector<16xf32> to vector<1x16xf32>
    %cst_30 = arith.constant 2.560000e+02 : f32
    %73 = vector.broadcast %cst_30 : f32 to vector<1x16xf32>
    %74 = arith.divf %72, %73 : vector<1x16xf32>
    %75 = arith.mulf %70, %70 : vector<256x16xf32>
    %cst_31 = arith.constant dense<0.000000e+00> : vector<16xf32>
    %76 = vector.multi_reduction <add>, %75, %cst_31 [0] : vector<256x16xf32> to vector<16xf32>
    %77 = vector.shape_cast %76 : vector<16xf32> to vector<1x16xf32>
    %cst_32 = arith.constant 2.560000e+02 : f32
    %78 = vector.broadcast %cst_32 : f32 to vector<1x16xf32>
    %79 = arith.divf %77, %78 : vector<1x16xf32>
    %80 = arith.mulf %74, %74 : vector<1x16xf32>
    %81 = arith.subf %79, %80 : vector<1x16xf32>
    %82 = vector.broadcast %74 : vector<1x16xf32> to vector<256x16xf32>
    %83 = arith.subf %70, %82 : vector<256x16xf32>
    %cst_33 = arith.constant 9.99999974E-6 : f32
    %84 = vector.broadcast %cst_33 : f32 to vector<1x16xf32>
    %85 = arith.addf %81, %84 : vector<1x16xf32>
    %86 = math.rsqrt %85 : vector<1x16xf32>
    %87 = vector.broadcast %86 : vector<1x16xf32> to vector<256x16xf32>
    %88 = arith.mulf %83, %87 : vector<256x16xf32>
    %c7 = arith.constant 7 : index
    %c0_34 = arith.constant 0 : index
    %89 = vector.load %arg15[%c7, %c0_34] : memref<32x256xf32, #tpu.memory_space<vmem>>, vector<1x16xf32>
    %90 = vector.broadcast %89 : vector<1x16xf32> to vector<256x16xf32>
    %91 = arith.mulf %88, %90 : vector<256x16xf32>
    %c8 = arith.constant 8 : index
    %c0_35 = arith.constant 0 : index
    %92 = vector.load %arg15[%c8, %c0_35] : memref<32x256xf32, #tpu.memory_space<vmem>>, vector<1x16xf32>
    %93 = vector.broadcast %92 : vector<1x16xf32> to vector<256x16xf32>
    %94 = arith.addf %91, %93 : vector<256x16xf32>
    %cst_36 = arith.constant 0.000000e+00 : f32
    %95 = vector.broadcast %cst_36 : f32 to vector<256x16xf32>
    %96 = arith.maximumf %94, %95 : vector<256x16xf32>
    %97 = arith.truncf %96 : vector<256x16xf32> to vector<256x16xbf16>
    %c0_37 = arith.constant 0 : index
    %c0_38 = arith.constant 0 : index
    %98 = vector.load %arg6[%c0_37, %c0_38] : memref<16x8xbf16, #tpu.memory_space<vmem>>, vector<16x8xbf16>
    %cst_39 = arith.constant dense<0.000000e+00> : vector<256x8xf32>
    %99 = tpu.matmul %97, %98, %cst_39 {dimension_numbers = #tpu.dot_dimension_numbers<[1], [0], [0], [1], [0, 0, 1, 1], [], []>} : vector<256x16xbf16>, vector<16x8xbf16>, vector<256x8xf32> -> vector<256x8xf32>
    %c9 = arith.constant 9 : index
    %c0_40 = arith.constant 0 : index
    %100 = vector.load %arg15[%c9, %c0_40] : memref<32x256xf32, #tpu.memory_space<vmem>>, vector<1x8xf32>
    %101 = vector.broadcast %100 : vector<1x8xf32> to vector<256x8xf32>
    %102 = arith.addf %99, %101 : vector<256x8xf32>
    %103 = vector.extract_strided_slice %102 {offsets = [0, 0], sizes = [256, 4], strides = [1, 1]} : vector<256x8xf32> to vector<256x4xf32>
    %104 = vector.extract_strided_slice %102 {offsets = [0, 4], sizes = [256, 4], strides = [1, 1]} : vector<256x8xf32> to vector<256x4xf32>
    %105 = arith.truncf %0 : vector<256x16xf32> to vector<256x16xbf16>
    %c0_41 = arith.constant 0 : index
    %c0_42 = arith.constant 0 : index
    %106 = vector.load %arg7[%c0_41, %c0_42] : memref<16x128xbf16, #tpu.memory_space<vmem>>, vector<16x128xbf16>
    %cst_43 = arith.constant dense<0.000000e+00> : vector<256x128xf32>
    %107 = tpu.matmul %105, %106, %cst_43 {dimension_numbers = #tpu.dot_dimension_numbers<[1], [0], [0], [1], [0, 0, 1, 1], [], []>} : vector<256x16xbf16>, vector<16x128xbf16>, vector<256x128xf32> -> vector<256x128xf32>
    %c10 = arith.constant 10 : index
    %c0_44 = arith.constant 0 : index
    %108 = vector.load %arg15[%c10, %c0_44] : memref<32x256xf32, #tpu.memory_space<vmem>>, vector<1x128xf32>
    %109 = vector.broadcast %108 : vector<1x128xf32> to vector<256x128xf32>
    %110 = arith.addf %107, %109 : vector<256x128xf32>
    %cst_45 = arith.constant dense<0.000000e+00> : vector<128xf32>
    %111 = vector.multi_reduction <add>, %110, %cst_45 [0] : vector<256x128xf32> to vector<128xf32>
    %112 = vector.shape_cast %111 : vector<128xf32> to vector<1x128xf32>
    %cst_46 = arith.constant 2.560000e+02 : f32
    %113 = vector.broadcast %cst_46 : f32 to vector<1x128xf32>
    %114 = arith.divf %112, %113 : vector<1x128xf32>
    %115 = arith.mulf %110, %110 : vector<256x128xf32>
    %cst_47 = arith.constant dense<0.000000e+00> : vector<128xf32>
    %116 = vector.multi_reduction <add>, %115, %cst_47 [0] : vector<256x128xf32> to vector<128xf32>
    %117 = vector.shape_cast %116 : vector<128xf32> to vector<1x128xf32>
    %cst_48 = arith.constant 2.560000e+02 : f32
    %118 = vector.broadcast %cst_48 : f32 to vector<1x128xf32>
    %119 = arith.divf %117, %118 : vector<1x128xf32>
    %120 = arith.mulf %114, %114 : vector<1x128xf32>
    %121 = arith.subf %119, %120 : vector<1x128xf32>
    %122 = vector.broadcast %114 : vector<1x128xf32> to vector<256x128xf32>
    %123 = arith.subf %110, %122 : vector<256x128xf32>
    %cst_49 = arith.constant 9.99999974E-6 : f32
    %124 = vector.broadcast %cst_49 : f32 to vector<1x128xf32>
    %125 = arith.addf %121, %124 : vector<1x128xf32>
    %126 = math.rsqrt %125 : vector<1x128xf32>
    %127 = vector.broadcast %126 : vector<1x128xf32> to vector<256x128xf32>
    %128 = arith.mulf %123, %127 : vector<256x128xf32>
    %c11 = arith.constant 11 : index
    %c0_50 = arith.constant 0 : index
    %129 = vector.load %arg15[%c11, %c0_50] : memref<32x256xf32, #tpu.memory_space<vmem>>, vector<1x128xf32>
    %130 = vector.broadcast %129 : vector<1x128xf32> to vector<256x128xf32>
    %131 = arith.mulf %128, %130 : vector<256x128xf32>
    %c12 = arith.constant 12 : index
    %c0_51 = arith.constant 0 : index
    %132 = vector.load %arg15[%c12, %c0_51] : memref<32x256xf32, #tpu.memory_space<vmem>>, vector<1x128xf32>
    %133 = vector.broadcast %132 : vector<1x128xf32> to vector<256x128xf32>
    %134 = arith.addf %131, %133 : vector<256x128xf32>
    %cst_52 = arith.constant 0.000000e+00 : f32
    %135 = vector.broadcast %cst_52 : f32 to vector<256x128xf32>
    %136 = arith.maximumf %134, %135 : vector<256x128xf32>
    %137 = arith.truncf %136 : vector<256x128xf32> to vector<256x128xbf16>
    %c0_53 = arith.constant 0 : index
    %c0_54 = arith.constant 0 : index
    %138 = vector.load %arg8[%c0_53, %c0_54] : memref<128x64xbf16, #tpu.memory_space<vmem>>, vector<128x64xbf16>
    %cst_55 = arith.constant dense<0.000000e+00> : vector<256x64xf32>
    %139 = tpu.matmul %137, %138, %cst_55 {dimension_numbers = #tpu.dot_dimension_numbers<[1], [0], [0], [1], [0, 0, 1, 1], [], []>} : vector<256x128xbf16>, vector<128x64xbf16>, vector<256x64xf32> -> vector<256x64xf32>
    %c13 = arith.constant 13 : index
    %c0_56 = arith.constant 0 : index
    %140 = vector.load %arg15[%c13, %c0_56] : memref<32x256xf32, #tpu.memory_space<vmem>>, vector<1x64xf32>
    %141 = vector.broadcast %140 : vector<1x64xf32> to vector<256x64xf32>
    %142 = arith.addf %139, %141 : vector<256x64xf32>
    %cst_57 = arith.constant dense<0.000000e+00> : vector<64xf32>
    %143 = vector.multi_reduction <add>, %142, %cst_57 [0] : vector<256x64xf32> to vector<64xf32>
    %144 = vector.shape_cast %143 : vector<64xf32> to vector<1x64xf32>
    %cst_58 = arith.constant 2.560000e+02 : f32
    %145 = vector.broadcast %cst_58 : f32 to vector<1x64xf32>
    %146 = arith.divf %144, %145 : vector<1x64xf32>
    %147 = arith.mulf %142, %142 : vector<256x64xf32>
    %cst_59 = arith.constant dense<0.000000e+00> : vector<64xf32>
    %148 = vector.multi_reduction <add>, %147, %cst_59 [0] : vector<256x64xf32> to vector<64xf32>
    %149 = vector.shape_cast %148 : vector<64xf32> to vector<1x64xf32>
    %cst_60 = arith.constant 2.560000e+02 : f32
    %150 = vector.broadcast %cst_60 : f32 to vector<1x64xf32>
    %151 = arith.divf %149, %150 : vector<1x64xf32>
    %152 = arith.mulf %146, %146 : vector<1x64xf32>
    %153 = arith.subf %151, %152 : vector<1x64xf32>
    %154 = vector.broadcast %146 : vector<1x64xf32> to vector<256x64xf32>
    %155 = arith.subf %142, %154 : vector<256x64xf32>
    %cst_61 = arith.constant 9.99999974E-6 : f32
    %156 = vector.broadcast %cst_61 : f32 to vector<1x64xf32>
    %157 = arith.addf %153, %156 : vector<1x64xf32>
    %158 = math.rsqrt %157 : vector<1x64xf32>
    %159 = vector.broadcast %158 : vector<1x64xf32> to vector<256x64xf32>
    %160 = arith.mulf %155, %159 : vector<256x64xf32>
    %c14 = arith.constant 14 : index
    %c0_62 = arith.constant 0 : index
    %161 = vector.load %arg15[%c14, %c0_62] : memref<32x256xf32, #tpu.memory_space<vmem>>, vector<1x64xf32>
    %162 = vector.broadcast %161 : vector<1x64xf32> to vector<256x64xf32>
    %163 = arith.mulf %160, %162 : vector<256x64xf32>
    %c15 = arith.constant 15 : index
    %c0_63 = arith.constant 0 : index
    %164 = vector.load %arg15[%c15, %c0_63] : memref<32x256xf32, #tpu.memory_space<vmem>>, vector<1x64xf32>
    %165 = vector.broadcast %164 : vector<1x64xf32> to vector<256x64xf32>
    %166 = arith.addf %163, %165 : vector<256x64xf32>
    %cst_64 = arith.constant 0.000000e+00 : f32
    %167 = vector.broadcast %cst_64 : f32 to vector<256x64xf32>
    %168 = arith.maximumf %166, %167 : vector<256x64xf32>
    %169 = arith.truncf %168 : vector<256x64xf32> to vector<256x64xbf16>
    %c0_65 = arith.constant 0 : index
    %c0_66 = arith.constant 0 : index
    %170 = vector.load %arg9[%c0_65, %c0_66] : memref<64x16xbf16, #tpu.memory_space<vmem>>, vector<64x16xbf16>
    %cst_67 = arith.constant dense<0.000000e+00> : vector<256x16xf32>
    %171 = tpu.matmul %169, %170, %cst_67 {dimension_numbers = #tpu.dot_dimension_numbers<[1], [0], [0], [1], [0, 0, 1, 1], [], []>} : vector<256x64xbf16>, vector<64x16xbf16>, vector<256x16xf32> -> vector<256x16xf32>
    %c16 = arith.constant 16 : index
    %c0_68 = arith.constant 0 : index
    %172 = vector.load %arg15[%c16, %c0_68] : memref<32x256xf32, #tpu.memory_space<vmem>>, vector<1x16xf32>
    %173 = vector.broadcast %172 : vector<1x16xf32> to vector<256x16xf32>
    %174 = arith.addf %171, %173 : vector<256x16xf32>
    %cst_69 = arith.constant dense<0.000000e+00> : vector<16xf32>
    %175 = vector.multi_reduction <add>, %174, %cst_69 [0] : vector<256x16xf32> to vector<16xf32>
    %176 = vector.shape_cast %175 : vector<16xf32> to vector<1x16xf32>
    %cst_70 = arith.constant 2.560000e+02 : f32
    %177 = vector.broadcast %cst_70 : f32 to vector<1x16xf32>
    %178 = arith.divf %176, %177 : vector<1x16xf32>
    %179 = arith.mulf %174, %174 : vector<256x16xf32>
    %cst_71 = arith.constant dense<0.000000e+00> : vector<16xf32>
    %180 = vector.multi_reduction <add>, %179, %cst_71 [0] : vector<256x16xf32> to vector<16xf32>
    %181 = vector.shape_cast %180 : vector<16xf32> to vector<1x16xf32>
    %cst_72 = arith.constant 2.560000e+02 : f32
    %182 = vector.broadcast %cst_72 : f32 to vector<1x16xf32>
    %183 = arith.divf %181, %182 : vector<1x16xf32>
    %184 = arith.mulf %178, %178 : vector<1x16xf32>
    %185 = arith.subf %183, %184 : vector<1x16xf32>
    %186 = vector.broadcast %178 : vector<1x16xf32> to vector<256x16xf32>
    %187 = arith.subf %174, %186 : vector<256x16xf32>
    %cst_73 = arith.constant 9.99999974E-6 : f32
    %188 = vector.broadcast %cst_73 : f32 to vector<1x16xf32>
    %189 = arith.addf %185, %188 : vector<1x16xf32>
    %190 = math.rsqrt %189 : vector<1x16xf32>
    %191 = vector.broadcast %190 : vector<1x16xf32> to vector<256x16xf32>
    %192 = arith.mulf %187, %191 : vector<256x16xf32>
    %c17 = arith.constant 17 : index
    %c0_74 = arith.constant 0 : index
    %193 = vector.load %arg15[%c17, %c0_74] : memref<32x256xf32, #tpu.memory_space<vmem>>, vector<1x16xf32>
    %194 = vector.broadcast %193 : vector<1x16xf32> to vector<256x16xf32>
    %195 = arith.mulf %192, %194 : vector<256x16xf32>
    %c18 = arith.constant 18 : index
    %c0_75 = arith.constant 0 : index
    %196 = vector.load %arg15[%c18, %c0_75] : memref<32x256xf32, #tpu.memory_space<vmem>>, vector<1x16xf32>
    %197 = vector.broadcast %196 : vector<1x16xf32> to vector<256x16xf32>
    %198 = arith.addf %195, %197 : vector<256x16xf32>
    %cst_76 = arith.constant 0.000000e+00 : f32
    %199 = vector.broadcast %cst_76 : f32 to vector<256x16xf32>
    %200 = arith.maximumf %198, %199 : vector<256x16xf32>
    %201 = arith.truncf %200 : vector<256x16xf32> to vector<256x16xbf16>
    %c0_77 = arith.constant 0 : index
    %c0_78 = arith.constant 0 : index
    %202 = vector.load %arg10[%c0_77, %c0_78] : memref<16x16xbf16, #tpu.memory_space<vmem>>, vector<16x16xbf16>
    %cst_79 = arith.constant dense<0.000000e+00> : vector<256x16xf32>
    %203 = tpu.matmul %201, %202, %cst_79 {dimension_numbers = #tpu.dot_dimension_numbers<[1], [0], [0], [1], [0, 0, 1, 1], [], []>} : vector<256x16xbf16>, vector<16x16xbf16>, vector<256x16xf32> -> vector<256x16xf32>
    %c19 = arith.constant 19 : index
    %c0_80 = arith.constant 0 : index
    %204 = vector.load %arg15[%c19, %c0_80] : memref<32x256xf32, #tpu.memory_space<vmem>>, vector<1x16xf32>
    %205 = vector.broadcast %204 : vector<1x16xf32> to vector<256x16xf32>
    %206 = arith.addf %203, %205 : vector<256x16xf32>
    %cst_81 = arith.constant dense<0.000000e+00> : vector<16xf32>
    %207 = vector.multi_reduction <add>, %206, %cst_81 [0] : vector<256x16xf32> to vector<16xf32>
    %208 = vector.shape_cast %207 : vector<16xf32> to vector<1x16xf32>
    %cst_82 = arith.constant 2.560000e+02 : f32
    %209 = vector.broadcast %cst_82 : f32 to vector<1x16xf32>
    %210 = arith.divf %208, %209 : vector<1x16xf32>
    %211 = arith.mulf %206, %206 : vector<256x16xf32>
    %cst_83 = arith.constant dense<0.000000e+00> : vector<16xf32>
    %212 = vector.multi_reduction <add>, %211, %cst_83 [0] : vector<256x16xf32> to vector<16xf32>
    %213 = vector.shape_cast %212 : vector<16xf32> to vector<1x16xf32>
    %cst_84 = arith.constant 2.560000e+02 : f32
    %214 = vector.broadcast %cst_84 : f32 to vector<1x16xf32>
    %215 = arith.divf %213, %214 : vector<1x16xf32>
    %216 = arith.mulf %210, %210 : vector<1x16xf32>
    %217 = arith.subf %215, %216 : vector<1x16xf32>
    %218 = vector.broadcast %210 : vector<1x16xf32> to vector<256x16xf32>
    %219 = arith.subf %206, %218 : vector<256x16xf32>
    %cst_85 = arith.constant 9.99999974E-6 : f32
    %220 = vector.broadcast %cst_85 : f32 to vector<1x16xf32>
    %221 = arith.addf %217, %220 : vector<1x16xf32>
    %222 = math.rsqrt %221 : vector<1x16xf32>
    %223 = vector.broadcast %222 : vector<1x16xf32> to vector<256x16xf32>
    %224 = arith.mulf %219, %223 : vector<256x16xf32>
    %c20 = arith.constant 20 : index
    %c0_86 = arith.constant 0 : index
    %225 = vector.load %arg15[%c20, %c0_86] : memref<32x256xf32, #tpu.memory_space<vmem>>, vector<1x16xf32>
    %226 = vector.broadcast %225 : vector<1x16xf32> to vector<256x16xf32>
    %227 = arith.mulf %224, %226 : vector<256x16xf32>
    %c21 = arith.constant 21 : index
    %c0_87 = arith.constant 0 : index
    %228 = vector.load %arg15[%c21, %c0_87] : memref<32x256xf32, #tpu.memory_space<vmem>>, vector<1x16xf32>
    %229 = vector.broadcast %228 : vector<1x16xf32> to vector<256x16xf32>
    %230 = arith.addf %227, %229 : vector<256x16xf32>
    %cst_88 = arith.constant 0.000000e+00 : f32
    %231 = vector.broadcast %cst_88 : f32 to vector<256x16xf32>
    %232 = arith.maximumf %230, %231 : vector<256x16xf32>
    %233 = arith.truncf %232 : vector<256x16xf32> to vector<256x16xbf16>
    %c0_89 = arith.constant 0 : index
    %c0_90 = arith.constant 0 : index
    %234 = vector.load %arg11[%c0_89, %c0_90] : memref<16x4xbf16, #tpu.memory_space<vmem>>, vector<16x4xbf16>
    %cst_91 = arith.constant dense<0.000000e+00> : vector<256x4xf32>
    %235 = tpu.matmul %233, %234, %cst_91 {dimension_numbers = #tpu.dot_dimension_numbers<[1], [0], [0], [1], [0, 0, 1, 1], [], []>} : vector<256x16xbf16>, vector<16x4xbf16>, vector<256x4xf32> -> vector<256x4xf32>
    %c22 = arith.constant 22 : index
    %c0_92 = arith.constant 0 : index
    %236 = vector.load %arg15[%c22, %c0_92] : memref<32x256xf32, #tpu.memory_space<vmem>>, vector<1x4xf32>
    %237 = vector.broadcast %236 : vector<1x4xf32> to vector<256x4xf32>
    %238 = arith.addf %235, %237 : vector<256x4xf32>
    %cst_93 = arith.constant dense<0xFF800000> : vector<256xf32>
    %239 = vector.multi_reduction <maximumf>, %238, %cst_93 [1] : vector<256x4xf32> to vector<256xf32>
    %240 = vector.shape_cast %239 : vector<256xf32> to vector<256x1xf32>
    %241 = vector.broadcast %240 : vector<256x1xf32> to vector<256x4xf32>
    %242 = arith.subf %238, %241 : vector<256x4xf32>
    %243 = math.exp %242 : vector<256x4xf32>
    %cst_94 = arith.constant dense<0.000000e+00> : vector<256xf32>
    %244 = vector.multi_reduction <add>, %243, %cst_94 [1] : vector<256x4xf32> to vector<256xf32>
    %245 = vector.shape_cast %244 : vector<256xf32> to vector<256x1xf32>
    %246 = tpu.reciprocal %245 {approx = true} : vector<256x1xf32> -> vector<256x1xf32>
    %247 = vector.broadcast %246 : vector<256x1xf32> to vector<256x4xf32>
    %248 = arith.mulf %243, %247 : vector<256x4xf32>
    %c0_95 = arith.constant 0 : index
    %c0_96 = arith.constant 0 : index
    %249 = vector.load %arg2[%c0_95, %c0_96] : memref<256x4xf32, #tpu.memory_space<vmem>>, vector<256x4xf32>
    %cst_97 = arith.constant 5.000000e-01 : f32
    %250 = vector.broadcast %cst_97 : f32 to vector<256x4xf32>
    %251 = arith.mulf %250, %104 : vector<256x4xf32>
    %252 = math.exp %251 : vector<256x4xf32>
    %253 = arith.mulf %249, %252 : vector<256x4xf32>
    %254 = arith.addf %103, %253 : vector<256x4xf32>
    %255 = arith.truncf %254 : vector<256x4xf32> to vector<256x4xbf16>
    %c0_98 = arith.constant 0 : index
    %c0_99 = arith.constant 0 : index
    %256 = vector.load %arg12[%c0_98, %c0_99] : memref<4x16xbf16, #tpu.memory_space<vmem>>, vector<4x16xbf16>
    %cst_100 = arith.constant dense<0.000000e+00> : vector<256x16xf32>
    %257 = tpu.matmul %255, %256, %cst_100 {dimension_numbers = #tpu.dot_dimension_numbers<[1], [0], [0], [1], [0, 0, 1, 1], [], []>} : vector<256x4xbf16>, vector<4x16xbf16>, vector<256x16xf32> -> vector<256x16xf32>
    %c23 = arith.constant 23 : index
    %c0_101 = arith.constant 0 : index
    %258 = vector.load %arg15[%c23, %c0_101] : memref<32x256xf32, #tpu.memory_space<vmem>>, vector<1x16xf32>
    %259 = vector.broadcast %258 : vector<1x16xf32> to vector<256x16xf32>
    %260 = arith.addf %257, %259 : vector<256x16xf32>
    %cst_102 = arith.constant dense<0.000000e+00> : vector<16xf32>
    %261 = vector.multi_reduction <add>, %260, %cst_102 [0] : vector<256x16xf32> to vector<16xf32>
    %262 = vector.shape_cast %261 : vector<16xf32> to vector<1x16xf32>
    %cst_103 = arith.constant 2.560000e+02 : f32
    %263 = vector.broadcast %cst_103 : f32 to vector<1x16xf32>
    %264 = arith.divf %262, %263 : vector<1x16xf32>
    %265 = arith.mulf %260, %260 : vector<256x16xf32>
    %cst_104 = arith.constant dense<0.000000e+00> : vector<16xf32>
    %266 = vector.multi_reduction <add>, %265, %cst_104 [0] : vector<256x16xf32> to vector<16xf32>
    %267 = vector.shape_cast %266 : vector<16xf32> to vector<1x16xf32>
    %cst_105 = arith.constant 2.560000e+02 : f32
    %268 = vector.broadcast %cst_105 : f32 to vector<1x16xf32>
    %269 = arith.divf %267, %268 : vector<1x16xf32>
    %270 = arith.mulf %264, %264 : vector<1x16xf32>
    %271 = arith.subf %269, %270 : vector<1x16xf32>
    %272 = vector.broadcast %264 : vector<1x16xf32> to vector<256x16xf32>
    %273 = arith.subf %260, %272 : vector<256x16xf32>
    %cst_106 = arith.constant 9.99999974E-6 : f32
    %274 = vector.broadcast %cst_106 : f32 to vector<1x16xf32>
    %275 = arith.addf %271, %274 : vector<1x16xf32>
    %276 = math.rsqrt %275 : vector<1x16xf32>
    %277 = vector.broadcast %276 : vector<1x16xf32> to vector<256x16xf32>
    %278 = arith.mulf %273, %277 : vector<256x16xf32>
    %c24 = arith.constant 24 : index
    %c0_107 = arith.constant 0 : index
    %279 = vector.load %arg15[%c24, %c0_107] : memref<32x256xf32, #tpu.memory_space<vmem>>, vector<1x16xf32>
    %280 = vector.broadcast %279 : vector<1x16xf32> to vector<256x16xf32>
    %281 = arith.mulf %278, %280 : vector<256x16xf32>
    %c25 = arith.constant 25 : index
    %c0_108 = arith.constant 0 : index
    %282 = vector.load %arg15[%c25, %c0_108] : memref<32x256xf32, #tpu.memory_space<vmem>>, vector<1x16xf32>
    %283 = vector.broadcast %282 : vector<1x16xf32> to vector<256x16xf32>
    %284 = arith.addf %281, %283 : vector<256x16xf32>
    %cst_109 = arith.constant 0.000000e+00 : f32
    %285 = vector.broadcast %cst_109 : f32 to vector<256x16xf32>
    %286 = arith.maximumf %284, %285 : vector<256x16xf32>
    %287 = arith.truncf %286 : vector<256x16xf32> to vector<256x16xbf16>
    %c0_110 = arith.constant 0 : index
    %c0_111 = arith.constant 0 : index
    %288 = vector.load %arg13[%c0_110, %c0_111] : memref<16x256xbf16, #tpu.memory_space<vmem>>, vector<16x256xbf16>
    %cst_112 = arith.constant dense<0.000000e+00> : vector<256x256xf32>
    %289 = tpu.matmul %287, %288, %cst_112 {dimension_numbers = #tpu.dot_dimension_numbers<[1], [0], [0], [1], [0, 0, 1, 1], [], []>} : vector<256x16xbf16>, vector<16x256xbf16>, vector<256x256xf32> -> vector<256x256xf32>
    %c26 = arith.constant 26 : index
    %c0_113 = arith.constant 0 : index
    %290 = vector.load %arg15[%c26, %c0_113] : memref<32x256xf32, #tpu.memory_space<vmem>>, vector<1x256xf32>
    %291 = vector.broadcast %290 : vector<1x256xf32> to vector<256x256xf32>
    %292 = arith.addf %289, %291 : vector<256x256xf32>
    %cst_114 = arith.constant dense<0.000000e+00> : vector<256xf32>
    %293 = vector.multi_reduction <add>, %292, %cst_114 [0] : vector<256x256xf32> to vector<256xf32>
    %294 = vector.shape_cast %293 : vector<256xf32> to vector<1x256xf32>
    %cst_115 = arith.constant 2.560000e+02 : f32
    %295 = vector.broadcast %cst_115 : f32 to vector<1x256xf32>
    %296 = arith.divf %294, %295 : vector<1x256xf32>
    %297 = arith.mulf %292, %292 : vector<256x256xf32>
    %cst_116 = arith.constant dense<0.000000e+00> : vector<256xf32>
    %298 = vector.multi_reduction <add>, %297, %cst_116 [0] : vector<256x256xf32> to vector<256xf32>
    %299 = vector.shape_cast %298 : vector<256xf32> to vector<1x256xf32>
    %cst_117 = arith.constant 2.560000e+02 : f32
    %300 = vector.broadcast %cst_117 : f32 to vector<1x256xf32>
    %301 = arith.divf %299, %300 : vector<1x256xf32>
    %302 = arith.mulf %296, %296 : vector<1x256xf32>
    %303 = arith.subf %301, %302 : vector<1x256xf32>
    %304 = vector.broadcast %296 : vector<1x256xf32> to vector<256x256xf32>
    %305 = arith.subf %292, %304 : vector<256x256xf32>
    %cst_118 = arith.constant 9.99999974E-6 : f32
    %306 = vector.broadcast %cst_118 : f32 to vector<1x256xf32>
    %307 = arith.addf %303, %306 : vector<1x256xf32>
    %308 = math.rsqrt %307 : vector<1x256xf32>
    %309 = vector.broadcast %308 : vector<1x256xf32> to vector<256x256xf32>
    %310 = arith.mulf %305, %309 : vector<256x256xf32>
    %c27 = arith.constant 27 : index
    %c0_119 = arith.constant 0 : index
    %311 = vector.load %arg15[%c27, %c0_119] : memref<32x256xf32, #tpu.memory_space<vmem>>, vector<1x256xf32>
    %312 = vector.broadcast %311 : vector<1x256xf32> to vector<256x256xf32>
    %313 = arith.mulf %310, %312 : vector<256x256xf32>
    %c28 = arith.constant 28 : index
    %c0_120 = arith.constant 0 : index
    %314 = vector.load %arg15[%c28, %c0_120] : memref<32x256xf32, #tpu.memory_space<vmem>>, vector<1x256xf32>
    %315 = vector.broadcast %314 : vector<1x256xf32> to vector<256x256xf32>
    %316 = arith.addf %313, %315 : vector<256x256xf32>
    %cst_121 = arith.constant 0.000000e+00 : f32
    %317 = vector.broadcast %cst_121 : f32 to vector<256x256xf32>
    %318 = arith.maximumf %316, %317 : vector<256x256xf32>
    %319 = arith.truncf %318 : vector<256x256xf32> to vector<256x256xbf16>
    %c0_122 = arith.constant 0 : index
    %c0_123 = arith.constant 0 : index
    %320 = vector.load %arg14[%c0_122, %c0_123] : memref<256x64xbf16, #tpu.memory_space<vmem>>, vector<256x64xbf16>
    %cst_124 = arith.constant dense<0.000000e+00> : vector<256x64xf32>
    %321 = tpu.matmul %319, %320, %cst_124 {dimension_numbers = #tpu.dot_dimension_numbers<[1], [0], [0], [1], [0, 0, 1, 1], [], []>} : vector<256x256xbf16>, vector<256x64xbf16>, vector<256x64xf32> -> vector<256x64xf32>
    %c29 = arith.constant 29 : index
    %c0_125 = arith.constant 0 : index
    %322 = vector.load %arg15[%c29, %c0_125] : memref<32x256xf32, #tpu.memory_space<vmem>>, vector<1x64xf32>
    %323 = vector.broadcast %322 : vector<1x64xf32> to vector<256x64xf32>
    %324 = arith.addf %321, %323 : vector<256x64xf32>
    %325 = arith.negf %324 : vector<256x64xf32>
    %326 = math.exp %325 : vector<256x64xf32>
    %cst_126 = arith.constant 1.000000e+00 : f32
    %327 = vector.broadcast %cst_126 : f32 to vector<256x64xf32>
    %328 = arith.addf %327, %326 : vector<256x64xf32>
    %329 = arith.divf %327, %328 : vector<256x64xf32>
    %330 = tpu.iota {dimensions = array<i32: 1>} : vector<4x64xi32>
    %331 = tpu.iota {dimensions = array<i32: 0>} : vector<4x64xi32>
    %c16_i32 = arith.constant 16 : i32
    %332 = vector.broadcast %c16_i32 : i32 to vector<4x64xi32>
    %333 = arith.muli %331, %332 : vector<4x64xi32>
    %334 = arith.cmpi sge, %330, %333 : vector<4x64xi32>
    %c1_i32 = arith.constant 1 : i32
    %335 = vector.broadcast %c1_i32 : i32 to vector<4x64xi32>
    %336 = arith.addi %331, %335 : vector<4x64xi32>
    %c16_i32_127 = arith.constant 16 : i32
    %337 = vector.broadcast %c16_i32_127 : i32 to vector<4x64xi32>
    %338 = arith.muli %336, %337 : vector<4x64xi32>
    %339 = arith.cmpi slt, %330, %338 : vector<4x64xi32>
    %340 = arith.andi %334, %339 : vector<4x64xi1>
    %341 = arith.extui %340 : vector<4x64xi1> to vector<4x64xi32>
    %342 = arith.sitofp %341 : vector<4x64xi32> to vector<4x64xf32>
    %343 = tpu.iota {dimensions = array<i32: 0>} : vector<64x16xi32>
    %344 = tpu.iota {dimensions = array<i32: 1>} : vector<64x16xi32>
    %345 = arith.subi %343, %344 : vector<64x16xi32>
    %c0_i32 = arith.constant 0 : i32
    %346 = vector.broadcast %c0_i32 : i32 to vector<64x16xi32>
    %347 = arith.cmpi eq, %345, %346 : vector<64x16xi32>
    %c16_i32_128 = arith.constant 16 : i32
    %348 = vector.broadcast %c16_i32_128 : i32 to vector<64x16xi32>
    %349 = arith.cmpi eq, %345, %348 : vector<64x16xi32>
    %c32_i32 = arith.constant 32 : i32
    %350 = vector.broadcast %c32_i32 : i32 to vector<64x16xi32>
    %351 = arith.cmpi eq, %345, %350 : vector<64x16xi32>
    %c48_i32 = arith.constant 48 : i32
    %352 = vector.broadcast %c48_i32 : i32 to vector<64x16xi32>
    %353 = arith.cmpi eq, %345, %352 : vector<64x16xi32>
    %354 = arith.ori %347, %349 : vector<64x16xi1>
    %355 = arith.ori %354, %351 : vector<64x16xi1>
    %356 = arith.ori %355, %353 : vector<64x16xi1>
    %357 = arith.extui %356 : vector<64x16xi1> to vector<64x16xi32>
    %358 = arith.sitofp %357 : vector<64x16xi32> to vector<64x16xf32>
    %cst_129 = arith.constant dense<0.000000e+00> : vector<256x64xf32>
    %359 = tpu.matmul %248, %342, %cst_129 {dimension_numbers = #tpu.dot_dimension_numbers<[1], [0], [0], [1], [0, 0, 1, 1], [], []>} : vector<256x4xf32>, vector<4x64xf32>, vector<256x64xf32> -> vector<256x64xf32>
    %360 = arith.mulf %359, %329 : vector<256x64xf32>
    %cst_130 = arith.constant dense<0.000000e+00> : vector<256x16xf32>
    %361 = tpu.matmul %360, %358, %cst_130 {dimension_numbers = #tpu.dot_dimension_numbers<[1], [0], [0], [1], [0, 0, 1, 1], [], []>} : vector<256x64xf32>, vector<64x16xf32>, vector<256x16xf32> -> vector<256x16xf32>
    %cst_131 = arith.constant 0.000000e+00 : f32
    %362 = vector.broadcast %cst_131 : f32 to vector<256x36xf32>
    %363 = tpu.concatenate %102, %248, %361, %329, %362 in 1 : vector<256x8xf32>, vector<256x4xf32>, vector<256x16xf32>, vector<256x64xf32>, vector<256x36xf32> -> vector<256x128xf32>
    %c0_132 = arith.constant 0 : index
    %c0_133 = arith.constant 0 : index
    %364 = vector.load %arg16[%c0_132, %c0_133] : memref<256x128xf32, #tpu.memory_space<vmem>>, vector<256x128xf32>
    tpu.vector_store %arg16[%c0_132, %c0_133], %363 {strides = array<i32>} : memref<256x128xf32, #tpu.memory_space<vmem>>, vector<256x128xf32>,
    return
  }
  func.func @transform_0(%arg0: i32) -> (i32, i32) {
    %c0_i32 = arith.constant 0 : i32
    %c0_i32_0 = arith.constant 0 : i32
    return %arg0, %c0_i32 : i32, i32
  }
  func.func @transform_1(%arg0: i32) -> (i32, i32) {
    %c0_i32 = arith.constant 0 : i32
    %c0_i32_0 = arith.constant 0 : i32
    return %arg0, %c0_i32 : i32, i32
  }
  func.func @transform_2(%arg0: i32) -> (i32, i32) {
    %c0_i32 = arith.constant 0 : i32
    %c0_i32_0 = arith.constant 0 : i32
    %c0_i32_1 = arith.constant 0 : i32
    return %c0_i32, %c0_i32_0 : i32, i32
  }
  func.func @transform_3(%arg0: i32) -> (i32, i32) {
    %c0_i32 = arith.constant 0 : i32
    %c0_i32_0 = arith.constant 0 : i32
    %c0_i32_1 = arith.constant 0 : i32
    return %c0_i32, %c0_i32_0 : i32, i32
  }
  func.func @transform_4(%arg0: i32) -> (i32, i32) {
    %c0_i32 = arith.constant 0 : i32
    %c0_i32_0 = arith.constant 0 : i32
    %c0_i32_1 = arith.constant 0 : i32
    return %c0_i32, %c0_i32_0 : i32, i32
  }
  func.func @transform_5(%arg0: i32) -> (i32, i32) {
    %c0_i32 = arith.constant 0 : i32
    %c0_i32_0 = arith.constant 0 : i32
    %c0_i32_1 = arith.constant 0 : i32
    return %c0_i32, %c0_i32_0 : i32, i32
  }
  func.func @transform_6(%arg0: i32) -> (i32, i32) {
    %c0_i32 = arith.constant 0 : i32
    %c0_i32_0 = arith.constant 0 : i32
    %c0_i32_1 = arith.constant 0 : i32
    return %c0_i32, %c0_i32_0 : i32, i32
  }
  func.func @transform_7(%arg0: i32) -> (i32, i32) {
    %c0_i32 = arith.constant 0 : i32
    %c0_i32_0 = arith.constant 0 : i32
    %c0_i32_1 = arith.constant 0 : i32
    return %c0_i32, %c0_i32_0 : i32, i32
  }
  func.func @transform_8(%arg0: i32) -> (i32, i32) {
    %c0_i32 = arith.constant 0 : i32
    %c0_i32_0 = arith.constant 0 : i32
    %c0_i32_1 = arith.constant 0 : i32
    return %c0_i32, %c0_i32_0 : i32, i32
  }
  func.func @transform_9(%arg0: i32) -> (i32, i32) {
    %c0_i32 = arith.constant 0 : i32
    %c0_i32_0 = arith.constant 0 : i32
    %c0_i32_1 = arith.constant 0 : i32
    return %c0_i32, %c0_i32_0 : i32, i32
  }
  func.func @transform_10(%arg0: i32) -> (i32, i32) {
    %c0_i32 = arith.constant 0 : i32
    %c0_i32_0 = arith.constant 0 : i32
    %c0_i32_1 = arith.constant 0 : i32
    return %c0_i32, %c0_i32_0 : i32, i32
  }
  func.func @transform_11(%arg0: i32) -> (i32, i32) {
    %c0_i32 = arith.constant 0 : i32
    %c0_i32_0 = arith.constant 0 : i32
    %c0_i32_1 = arith.constant 0 : i32
    return %c0_i32, %c0_i32_0 : i32, i32
  }
  func.func @transform_12(%arg0: i32) -> (i32, i32) {
    %c0_i32 = arith.constant 0 : i32
    %c0_i32_0 = arith.constant 0 : i32
    %c0_i32_1 = arith.constant 0 : i32
    return %c0_i32, %c0_i32_0 : i32, i32
  }
  func.func @transform_13(%arg0: i32) -> (i32, i32) {
    %c0_i32 = arith.constant 0 : i32
    %c0_i32_0 = arith.constant 0 : i32
    %c0_i32_1 = arith.constant 0 : i32
    return %c0_i32, %c0_i32_0 : i32, i32
  }
  func.func @transform_14(%arg0: i32) -> (i32, i32) {
    %c0_i32 = arith.constant 0 : i32
    %c0_i32_0 = arith.constant 0 : i32
    %c0_i32_1 = arith.constant 0 : i32
    return %c0_i32, %c0_i32_0 : i32, i32
  }
  func.func @transform_15(%arg0: i32) -> (i32, i32) {
    %c0_i32 = arith.constant 0 : i32
    %c0_i32_0 = arith.constant 0 : i32
    return %arg0, %c0_i32 : i32, i32
  }
}

</mosaic_0001>

<bundles_post_ra>
// kernel: tpu_custom_call.1
= control target key start
LH: loop header
LB: loop body
LE: loop exit
PB: predicated region body
PF: predicated region fallthrough
CT: control target
= control target key end

     0   :  { %vm109_vm0 = vcmask 130048   ;;  %s16889_s0 = inlined_call_operand.vmem [shape: f32[256,16], index: 0, kind: input, shape index: {}]   ;;  %s16890_s1 = inlined_call_operand.vmem [shape: f32[256,4], index: 1, kind: input, shape index: {}]   ;;  %s16891_s2 = inlined_call_operand.vmem [shape: bf16[16,128], index: 2, kind: input, shape index: {}]   ;;  %s16892_s3 = inlined_call_operand.vmem [shape: bf16[128,64], index: 3, kind: input, shape index: {}]   ;;  %s16893_s4 = inlined_call_operand.vmem [shape: bf16[64,16], index: 4, kind: input, shape index: {}]   ;;  %s16894_s5 = inlined_call_operand.vmem [shape: bf16[16,8], index: 5, kind: input, shape index: {}]   ;;  %s16895_s6 = inlined_call_operand.vmem [shape: bf16[16,128], index: 6, kind: input, shape index: {}]   ;;  %s16896_s7 = inlined_call_operand.vmem [shape: bf16[128,64], index: 7, kind: input, shape index: {}]   ;;  %s16897_s8 = inlined_call_operand.vmem [shape: bf16[64,16], index: 8, kind: input, shape index: {}]   ;;  %s16898_s9 = inlined_call_operand.vmem [shape: bf16[16,16], index: 9, kind: input, shape index: {}]   ;;  %s16899_s10 = inlined_call_operand.vmem [shape: bf16[16,4], index: 10, kind: input, shape index: {}]   ;;  %s16900_s11 = inlined_call_operand.vmem [shape: bf16[4,16], index: 11, kind: input, shape index: {}]   ;;  %s16901_s12 = inlined_call_operand.vmem [shape: bf16[16,256], index: 12, kind: input, shape index: {}]   ;;  %s16902_s13 = inlined_call_operand.vmem [shape: bf16[256,64], index: 13, kind: input, shape index: {}]   ;;  %s16903_s14 = inlined_call_operand.vmem [shape: f32[32,256], index: 14, kind: input, shape index: {}]   ;;  %s16904_s15 = inlined_call_operand.hbm [shape: f32[256,128], index: 15, kind: output, shape index: {}]  }
   0x1   :  { %v9551_v0 = vld [vmem:[%s16891_s2] sm:$0xff]   ;;  %v53_v2 = vld [vmem:[%s16889_s0 + $0x8] sm:$0xff]  ;;  %v54_v3 = vld [vmem:[%s16889_s0 + $0x10] sm:$0xff] }
   0x2   :  { %v52_v1 = vld [vmem:[%s16889_s0] sm:$0xff]  ;;  %9031 = vmatprep.subr.bf16.mxu0 %v9551_v0  ;;  %v55_v5 = vld [vmem:[%s16889_s0 + $0x18] sm:$0xff]  ;;  %v57_v7 = vld [vmem:[%s16889_s0 + $0x28] sm:$0xff] }
   0x3   :  { %v10062_v4 = vpack.c.bf16 %v53_v2, %v52_v1  ;;  %v56_v6 = vld [vmem:[%s16889_s0 + $0x20] sm:$0xff]  ;;  %9032 = vmatpush3.bf16.msra.mxu0 %v9551_v0  ;;  %v10073_v8 = vpack.c.bf16 %v55_v5, %v54_v3  ;;  %v58_v10 = vld [vmem:[%s16889_s0 + $0x30] sm:$0xff]  ;;  %v59_v11 = vld [vmem:[%s16889_s0 + $0x38] sm:$0xff] }
   0x4   :  { %v10075_v9 = vpack.c.bf16 %v57_v7, %v56_v6  ;;  %v60_v12 = vld [vmem:[%s16889_s0 + $0x40] sm:$0xff]  ;;  %v61_v13 = vld [vmem:[%s16889_s0 + $0x48] sm:$0xff]  ;;  %v10095_v14 = vpack.c.bf16 %v59_v11, %v58_v10  ;;  %v62_v16 = vld [vmem:[%s16889_s0 + $0x50] sm:$0xff] }
   0x5   :  { %9033 = vmatprep.mubr.msk.bf16.mxu0 %vm109_vm0, %v10062_v4  ;;  %v10097_v15 = vpack.c.bf16 %v61_v13, %v60_v12  ;;  %v63_v17 = vld [vmem:[%s16889_s0 + $0x58] sm:$0xff]  ;;  %v64_v18 = vld [vmem:[%s16889_s0 + $0x60] sm:$0xff]  ;;  %v65_v19 = vld [vmem:[%s16889_s0 + $0x68] sm:$0xff] }
   0x6   :  { %9034 = vmatmul.mubr.msk.bf16.vlgmr.msra.gmra.mxu0 %vm109_vm0, %v10073_v8  ;;  %v10115_v20 = vpack.c.bf16 %v63_v17, %v62_v16  ;;  %v10117_v21 = vpack.c.bf16 %v65_v19, %v64_v18  ;;  %v66_v22 = vld [vmem:[%s16889_s0 + $0x70] sm:$0xff]  ;;  %v67_v23 = vld [vmem:[%s16889_s0 + $0x78] sm:$0xff]  ;;  %v68_v24 = vld [vmem:[%s16889_s0 + $0x80] sm:$0xff] }
   0x7   :  { %9037 = vmatprep.mubr.msk.bf16.mxu0 %vm109_vm0, %v10075_v9  ;;  %v69_v25 = vld [vmem:[%s16889_s0 + $0x88] sm:$0xff]  ;;  %v10135_v26 = vpack.c.bf16 %v67_v23, %v66_v22  ;;  %v70_v28 = vld [vmem:[%s16889_s0 + $0x90] sm:$0xff]  ;;  %v71_v29 = vld [vmem:[%s16889_s0 + $0x98] sm:$0xff] }
   0x8   :  { %v10137_v27 = vpack.c.bf16 %v69_v25, %v68_v24  ;;  %v72_v30 = vld [vmem:[%s16889_s0 + $0xa0] sm:$0xff]  ;;  %v73_v31 = vld [vmem:[%s16889_s0 + $0xa8] sm:$0xff]  ;;  %v10155_v32 = vpack.c.bf16 %v71_v29, %v70_v28  ;;  %v74_v34 = vld [vmem:[%s16889_s0 + $0xb0] sm:$0xff] }
   0x9   :  { %v10157_v33 = vpack.c.bf16 %v73_v31, %v72_v30  ;;  %v75_v35 = vld [vmem:[%s16889_s0 + $0xb8] sm:$0xff]  ;;  %v76_v36 = vld [vmem:[%s16889_s0 + $0xc0] sm:$0xff]  ;;  %v77_v37 = vld [vmem:[%s16889_s0 + $0xc8] sm:$0xff] }
   0xa   :  { %17120 = vst [vmem:[#allocation5_spill] sm:$0xff] %v10137_v27  ;;  %17121 = vst [vmem:[#allocation6_spill] sm:$0xff] %v10155_v32 }
   0xb   :  { %17122 = vst [vmem:[#allocation7_spill] sm:$0xff] %v10157_v33 }
   0xe   :  { %9038 = vmatmul.mubr.msk.bf16.gmra.mxu0 %vm109_vm0, %v10095_v14 }
   0xf   :  { %9041 = vmatprep.mubr.msk.bf16.mxu0 %vm109_vm0, %v10097_v15 }
  0x16   :  { %9042 = vmatmul.mubr.msk.bf16.gmra.mxu0 %vm109_vm0, %v10115_v20 }
  0x17   :  { %9045 = vmatprep.mubr.msk.bf16.mxu0 %vm109_vm0, %v10117_v21 }
  0x1e   :  { %9046 = vmatmul.mubr.msk.bf16.gmra.mxu0 %vm109_vm0, %v10135_v26 }
  0x1f   :  { %9049 = vmatprep.mubr.msk.bf16.mxu0 %vm109_vm0, %v10137_v27 }
  0x26   :  { %9050 = vmatmul.mubr.msk.bf16.gmra.mxu0 %vm109_vm0, %v10155_v32 }
  0x27   :  { %9053 = vmatprep.mubr.msk.bf16.mxu0 %vm109_vm0, %v10157_v33 }
  0x28   :  { %20 = vsyncpa [#allocation3], 0  ;;  %v10175_v38 = vpack.c.bf16 %v75_v35, %v74_v34  ;;  %v10177_v39 = vpack.c.bf16 %v77_v37, %v76_v36  ;;  %v78_v40 = vld [vmem:[%s16889_s0 + $0xd0] sm:$0xff]  ;;  %v79_v41 = vld [vmem:[%s16889_s0 + $0xd8] sm:$0xff]  ;;  %vm836_vm1 = vcmask 523264   ;;  %s9961_s29 = smov 124  }
  0x29   :  { %v80_v42 = vld [vmem:[%s16889_s0 + $0xe0] sm:$0xff]  ;;  %v81_v43 = vld [vmem:[%s16889_s0 + $0xe8] sm:$0xff]  ;;  %v10195_v44 = vpack.c.bf16 %v79_v41, %v78_v40  ;;  %v82_v46 = vld [vmem:[%s16889_s0 + $0xf0] sm:$0xff]  ;;  %vm5170_vm2 = vcmask 1041408   ;;  %vm4431_vm3 = vcmask 31744   ;;  %vm7234_vm7 = vcmask 1043456  }
  0x2a   :  { %17123 = vst [vmem:[#allocation8_spill] sm:$0xff] %v10175_v38  ;;  %17124 = vst [vmem:[#allocation9_spill] sm:$0xff] %v10177_v39  ;;  %v10197_v45 = vpack.c.bf16 %v81_v43, %v80_v42  ;;  %v83_v47 = vld [vmem:[%s16889_s0 + $0xf8] sm:$0xff]  ;;  %v9553_v50 = vld [vmem:[%s16892_s3 + $0x30] sm:$0xff]   ;;  %s9964_s23 = smov 8  }
  0x2b   :  { %17125 = vst [vmem:[#allocation10_spill] sm:$0xff] %v10195_v44  ;;  %v10209_v48 = vpack.c.bf16 %v83_v47, %v82_v46  ;;  %v9552_v49 = vld [vmem:[%s16892_s3 + $0x38] sm:$0xff]   ;;  %v9554_v51 = vld [vmem:[%s16892_s3 + $0x28] sm:$0xff]   ;;  %v9555_v52 = vld [vmem:[%s16892_s3 + $0x20] sm:$0xff]  }
  0x2c   :  { %17126 = vst [vmem:[#allocation11_spill] sm:$0xff] %v10197_v45  ;;  %9065 = vmatprep.subr.bf16.mxu1 %v9552_v49  ;;  %v9556_v53 = vld [vmem:[%s16892_s3 + $0x18] sm:$0xff]   ;;  %v9557_v54 = vld [vmem:[%s16892_s3 + $0x10] sm:$0xff]   ;;  %v9558_v55 = vld [vmem:[%s16892_s3 + $0x8] sm:$0xff]  }
  0x2d   :  { %17127 = vst [vmem:[#allocation12_spill] sm:$0xff] %v10209_v48  ;;  %9066 = vmatpush3.bf16.msra.mxu1 %v9552_v49  ;;  %v9559_v56 = vld [vmem:[%s16892_s3] sm:$0xff]  }
  0x2e   :  { %9054 = vmatmul.mubr.msk.bf16.gmra.mxu0 %vm109_vm0, %v10175_v38  ;;  %9067 = vmatprep.subr.bf16.mxu1 %v9553_v50  ;;  %v10240_v59 = vld [vmem:[%s16903_s14] ss:$0 sm:$0xff] }
  0x2f   :  { %9057 = vmatprep.mubr.msk.bf16.mxu0 %vm109_vm0, %v10177_v39 }
  0x31   :  { %9068 = vmatpush3.bf16.msra.mxu1 %v9553_v50 }
  0x32   :  { %9069 = vmatprep.subr.bf16.mxu1 %v9554_v51 }
  0x35   :  { %9070 = vmatpush3.bf16.msra.mxu1 %v9554_v51 }
  0x36   :  { %9058 = vmatmul.mubr.msk.bf16.gmra.mxu0 %vm109_vm0, %v10195_v44  ;;  %9071 = vmatprep.subr.bf16.mxu1 %v9555_v52 }
  0x37   :  { %9061 = vmatprep.mubr.msk.bf16.mxu0 %vm109_vm0, %v10197_v45 }
  0x39   :  { %9072 = vmatpush3.bf16.msra.mxu1 %v9555_v52 }
  0x3a   :  { %9073 = vmatprep.subr.bf16.mxu1 %v9556_v53 }
  0x3d   :  { %9074 = vmatpush3.bf16.msra.mxu1 %v9556_v53 }
  0x3e   :  { %9062 = vmatmul.mubr.msk.bf16.gmra.mxu0 %vm109_vm0, %v10209_v48  ;;  %9075 = vmatprep.subr.bf16.mxu1 %v9557_v54 }
  0x41   :  { %9076 = vmatpush3.bf16.msra.mxu1 %v9557_v54 }
  0x42   :  { %9077 = vmatprep.subr.bf16.mxu1 %v9558_v55 }
  0x45   :  { %9078 = vmatpush3.bf16.msra.mxu1 %v9558_v55 }
  0x46   :  { %9079 = vmatprep.subr.bf16.mxu1 %v9559_v56 }
  0x49   :  { %9080 = vmatpush3.bf16.msra.mxu1 %v9559_v56 }
  0xc6   :  { %v9035_v57 = vpop.f32.mrf.mxu0 }
  0xc7   :  { %v10246_v63 = vadd.f32 %v9035_v57, %v10240_v59 }
  0xc8   :  { %v192_v58 = vpop.f32.mrf.mxu0 }
  0xc9   :  { %v10243_v61 = vadd.f32 %v192_v58, %v10240_v59  ;;  %v360_v10 = vmul.f32 %v10246_v63, %v10246_v63 }
  0xca   :  { %v9036_v60 = vpop.f32.mrf.mxu0 }
  0xcb   :  { %v358_v2 = vmul.f32 %v10243_v61, %v10243_v61  ;;  %v10254_v3 = vadd.f32 %v9036_v60, %v10240_v59 }
  0xcc   :  { %v195_v62 = vpop.f32.mrf.mxu0 }
  0xcd   :  { %v10249_v0 = vadd.f32 %v195_v62, %v10240_v59  ;;  %v361_v17 = vmul.f32 %v10254_v3, %v10254_v3 }
  0xce   :  { %v9039_v1 = vpop.f32.mrf.mxu0 }
  0xcf   :  { %v319_v5 = vadd.f32 %v10249_v0, %v10243_v61  ;;  %v359_v6 = vmul.f32 %v10249_v0, %v10249_v0  ;;  %v10270_v22 = vadd.f32 %v9039_v1, %v10240_v59 }
  0xd0   :  { %v208_v7 = vpop.f32.mrf.mxu0 }
  0xd1   :  { %v320_v11 = vadd.f32 %v319_v5, %v10246_v63  ;;  %v390_v12 = vadd.f32 %v359_v6, %v358_v2  ;;  %v10264_v13 = vadd.f32 %v208_v7, %v10240_v59  ;;  %v364_v40 = vmul.f32 %v10270_v22, %v10270_v22 }
  0xd2   :  { %v9040_v16 = vpop.f32.mrf.mxu0 }
  0xd3   :  { %v391_v18 = vadd.f32 %v390_v12, %v360_v10  ;;  %v321_v19 = vadd.f32 %v320_v11, %v10254_v3  ;;  %v362_v25 = vmul.f32 %v10264_v13, %v10264_v13  ;;  %v10279_v34 = vadd.f32 %v9040_v16, %v10240_v59 }
  0xd4   :  { %v211_v23 = vpop.f32.mrf.mxu0 }
  0xd5   :  { %v322_v24 = vadd.f32 %v321_v19, %v10264_v13  ;;  %v392_v28 = vadd.f32 %v391_v18, %v361_v17  ;;  %v10276_v29 = vadd.f32 %v211_v23, %v10240_v59  ;;  %v365_v47 = vmul.f32 %v10279_v34, %v10279_v34 }
  0xd6   :  { %v9043_v30 = vpop.f32.mrf.mxu0 }
  0xd7   :  { %v393_v31 = vadd.f32 %v392_v28, %v362_v25  ;;  %v323_v35 = vadd.f32 %v322_v24, %v10276_v29  ;;  %v363_v36 = vmul.f32 %v10276_v29, %v10276_v29  ;;  %v10294_v51 = vadd.f32 %v9043_v30, %v10240_v59 }
  0xd8   :  { %v224_v37 = vpop.f32.mrf.mxu0 }
  0xd9   :  { %v324_v41 = vadd.f32 %v323_v35, %v10270_v22  ;;  %v394_v42 = vadd.f32 %v393_v31, %v363_v36  ;;  %v10288_v43 = vadd.f32 %v224_v37, %v10240_v59  ;;  %v368_v5 = vmul.f32 %v10294_v51, %v10294_v51 }
  0xda   :  { %v9044_v46 = vpop.f32.mrf.mxu0 }
  0xdb   :  { %v395_v49 = vadd.f32 %v394_v42, %v364_v40  ;;  %v325_v50 = vadd.f32 %v324_v41, %v10279_v34  ;;  %v366_v54 = vmul.f32 %v10288_v43, %v10288_v43  ;;  %v10303_v60 = vadd.f32 %v9044_v46, %v10240_v59 }
  0xdc   :  { %v227_v52 = vpop.f32.mrf.mxu0 }
  0xdd   :  { %v326_v53 = vadd.f32 %v325_v50, %v10288_v43  ;;  %v396_v55 = vadd.f32 %v395_v49, %v365_v47  ;;  %v10300_v56 = vadd.f32 %v227_v52, %v10240_v59  ;;  %v369_v12 = vmul.f32 %v10303_v60, %v10303_v60 }
  0xde   :  { %v9047_v57 = vpop.f32.mrf.mxu0 }
  0xdf   :  { %v397_v58 = vadd.f32 %v396_v55, %v366_v54  ;;  %v327_v62 = vadd.f32 %v326_v53, %v10300_v56  ;;  %v367_v1 = vmul.f32 %v10300_v56, %v10300_v56  ;;  %v10318_v18 = vadd.f32 %v9047_v57, %v10240_v59 }
  0xe0   :  { %v240_v2 = vpop.f32.mrf.mxu0 }
  0xe1   :  { %v328_v6 = vadd.f32 %v327_v62, %v10294_v51  ;;  %v398_v7 = vadd.f32 %v397_v58, %v367_v1  ;;  %v10312_v10 = vadd.f32 %v240_v2, %v10240_v59  ;;  %v372_v41 = vmul.f32 %v10318_v18, %v10318_v18 }
  0xe2   :  { %v9048_v11 = vpop.f32.mrf.mxu0 }
  0xe3   :  { %v399_v16 = vadd.f32 %v398_v7, %v368_v5  ;;  %v329_v17 = vadd.f32 %v328_v6, %v10303_v60  ;;  %v370_v24 = vmul.f32 %v10312_v10, %v10312_v10  ;;  %v10327_v35 = vadd.f32 %v9048_v11, %v10240_v59 }
  0xe4   :  { %v243_v19 = vpop.f32.mrf.mxu0 }
  0xe5   :  { %v330_v23 = vadd.f32 %v329_v17, %v10312_v10  ;;  %v400_v25 = vadd.f32 %v399_v16, %v369_v12  ;;  %v10324_v28 = vadd.f32 %v243_v19, %v10240_v59  ;;  %v373_v50 = vmul.f32 %v10327_v35, %v10327_v35 }
  0xe6   :  { %v9051_v30 = vpop.f32.mrf.mxu0 }
  0xe7   :  { %v401_v31 = vadd.f32 %v400_v25, %v370_v24  ;;  %v331_v36 = vadd.f32 %v330_v23, %v10324_v28  ;;  %v371_v37 = vmul.f32 %v10324_v28, %v10324_v28  ;;  %v10342_v54 = vadd.f32 %v9051_v30, %v10240_v59 }
  0xe8   :  { %v256_v40 = vpop.f32.mrf.mxu0 }
  0xe9   :  { %v332_v42 = vadd.f32 %v331_v36, %v10318_v18  ;;  %v402_v46 = vadd.f32 %v401_v31, %v371_v37  ;;  %v10336_v47 = vadd.f32 %v256_v40, %v10240_v59  ;;  %v376_v16 = vmul.f32 %v10342_v54, %v10342_v54 }
  0xea   :  { %v9052_v49 = vpop.f32.mrf.mxu0 }
  0xeb   :  { %v403_v52 = vadd.f32 %v402_v46, %v372_v41  ;;  %v333_v53 = vadd.f32 %v332_v42, %v10327_v35  ;;  %v374_v58 = vmul.f32 %v10336_v47, %v10336_v47  ;;  %v10351_v6 = vadd.f32 %v9052_v49, %v10240_v59 }
  0xec   :  { %v259_v55 = vpop.f32.mrf.mxu0 }
  0xed   :  { %v334_v57 = vadd.f32 %v333_v53, %v10336_v47  ;;  %v404_v62 = vadd.f32 %v403_v52, %v373_v50  ;;  %v10348_v1 = vadd.f32 %v259_v55, %v10240_v59  ;;  %v377_v25 = vmul.f32 %v10351_v6, %v10351_v6 }
  0xee   :  { %v9055_v2 = vpop.f32.mrf.mxu0 }
  0xef   :  { %v405_v5 = vadd.f32 %v404_v62, %v374_v58  ;;  %v335_v7 = vadd.f32 %v334_v57, %v10348_v1  ;;  %v375_v11 = vmul.f32 %v10348_v1, %v10348_v1  ;;  %v10366_v36 = vadd.f32 %v9055_v2, %v10240_v59 }
  0xf0   :  { %v272_v12 = vpop.f32.mrf.mxu0 }
  0xf1   :  { %v336_v17 = vadd.f32 %v335_v7, %v10342_v54  ;;  %v406_v19 = vadd.f32 %v405_v5, %v375_v11  ;;  %v10360_v23 = vadd.f32 %v272_v12, %v10240_v59  ;;  %v380_v58 = vmul.f32 %v10366_v36, %v10366_v36 }
  0xf2   :  { %v9056_v24 = vpop.f32.mrf.mxu0 }
  0xf3   :  { %v407_v30 = vadd.f32 %v406_v19, %v376_v16  ;;  %v337_v31 = vadd.f32 %v336_v17, %v10351_v6  ;;  %v378_v41 = vmul.f32 %v10360_v23, %v10360_v23  ;;  %v10375_v52 = vadd.f32 %v9056_v24, %v10240_v59 }
  0xf4   :  { %v275_v37 = vpop.f32.mrf.mxu0 }
  0xf5   :  { %v338_v40 = vadd.f32 %v337_v31, %v10360_v23  ;;  %v408_v42 = vadd.f32 %v407_v30, %v377_v25  ;;  %v10372_v46 = vadd.f32 %v275_v37, %v10240_v59  ;;  %v381_v11 = vmul.f32 %v10375_v52, %v10375_v52 }
  0xf6   :  { %v9059_v49 = vpop.f32.mrf.mxu0 }
  0xf7   :  { %v409_v50 = vadd.f32 %v408_v42, %v378_v41  ;;  %v339_v53 = vadd.f32 %v338_v40, %v10372_v46  ;;  %v379_v55 = vmul.f32 %v10372_v46, %v10372_v46  ;;  %v10390_v17 = vadd.f32 %v9059_v49, %v10240_v59 }
  0xf8   :  { %v288_v57 = vpop.f32.mrf.mxu0 }
  0xf9   :  { %v340_v62 = vadd.f32 %v339_v53, %v10366_v36  ;;  %v410_v2 = vadd.f32 %v409_v50, %v379_v55  ;;  %v10384_v5 = vadd.f32 %v288_v57, %v10240_v59  ;;  %v384_v53 = vmul.f32 %v10390_v17, %v10390_v17 }
  0xfa   :  { %v9060_v7 = vpop.f32.mrf.mxu0 }
  0xfb   :  { %v411_v12 = vadd.f32 %v410_v2, %v380_v58  ;;  %v341_v16 = vadd.f32 %v340_v62, %v10375_v52  ;;  %v382_v25 = vmul.f32 %v10384_v5, %v10384_v5  ;;  %v10399_v41 = vadd.f32 %v9060_v7, %v10240_v59 }
  0xfc   :  { %v291_v19 = vpop.f32.mrf.mxu0 }
  0xfd   :  { %v342_v24 = vadd.f32 %v341_v16, %v10384_v5  ;;  %v412_v30 = vadd.f32 %v411_v12, %v381_v11  ;;  %v10396_v31 = vadd.f32 %v291_v19, %v10240_v59  ;;  %v385_v2 = vmul.f32 %v10399_v41, %v10399_v41 }
  0xfe   :  { %v9063_v37 = vpop.f32.mrf.mxu0 }
  0xff   :  { %v413_v40 = vadd.f32 %v412_v30, %v382_v25  ;;  %v343_v42 = vadd.f32 %v342_v24, %v10396_v31  ;;  %v383_v49 = vmul.f32 %v10396_v31, %v10396_v31  ;;  %v10414_v12 = vadd.f32 %v9063_v37, %v10240_v59 }
 0x100   :  { %v304_v50 = vpop.f32.mrf.mxu0 }
 0x101   :  { %v344_v55 = vadd.f32 %v343_v42, %v10390_v17  ;;  %v414_v57 = vadd.f32 %v413_v40, %v383_v49  ;;  %v10408_v58 = vadd.f32 %v304_v50, %v10240_v59  ;;  %v388_v50 = vmul.f32 %v10414_v12, %v10414_v12 }
 0x102   :  { %v9064_v62 = vpop.f32.mrf.mxu0 }
 0x103   :  { %v415_v7 = vadd.f32 %v414_v57, %v384_v53  ;;  %v345_v11 = vadd.f32 %v344_v55, %v10399_v41  ;;  %v386_v24 = vmul.f32 %v10408_v58, %v10408_v58  ;;  %v10423_v42 = vadd.f32 %v9064_v62, %v10240_v59 }
 0x104   :  { %v307_v16 = vpop.f32.mrf.mxu0 }
 0x105   :  { %v346_v19 = vadd.f32 %v345_v11, %v10408_v58  ;;  %v416_v25 = vadd.f32 %v415_v7, %v385_v2  ;;  %v10420_v30 = vadd.f32 %v307_v16, %v10240_v59  ;;  %v389_v57 = vmul.f32 %v10423_v42, %v10423_v42 }
 0x107   :  { %v417_v40 = vadd.f32 %v416_v25, %v386_v24  ;;  %v347_v49 = vadd.f32 %v346_v19, %v10420_v30  ;;  %v387_v37 = vmul.f32 %v10420_v30, %v10420_v30 }
 0x109   :  { %v348_v53 = vadd.f32 %v347_v49, %v10414_v12  ;;  %v418_v55 = vadd.f32 %v417_v40, %v387_v37 }
 0x10b   :  { %v349_v2 = vadd.f32 %v348_v53, %v10423_v42  ;;  %v419_v7 = vadd.f32 %v418_v55, %v388_v50 }
 0x10d   :  { %v350_v11 = vrot.slane %v349_v2, 4  ;;  %v420_v59 = vadd.f32 %v419_v7, %v389_v57 }
 0x10f   :  { %v351_v62 = vadd.f32 %v350_v11, %v349_v2  ;;  %v421_v16 = vrot.slane %v420_v59, 4 }
 0x111   :  { %v352_v19 = vrot.slane %v351_v62, 2  ;;  %v422_v24 = vadd.f32 %v421_v16, %v420_v59 }
 0x113   :  { %v353_v25 = vadd.f32 %v352_v19, %v351_v62  ;;  %v423_v48 = vrot.slane %v422_v24, 2 }
 0x115   :  { %v354_v45 = vrot.slane %v353_v25, 1  ;;  %v424_v44 = vadd.f32 %v423_v48, %v422_v24 }
 0x117   :  { %v355_v39 = vadd.f32 %v354_v45, %v353_v25  ;;  %v425_v38 = vrot.slane %v424_v44, 1 }
 0x119   :  { %v10434_v49 = vmul.f32 0.00390625, %v355_v39  ;;  %v426_v40 = vadd.f32 %v425_v38, %v424_v44 }
 0x11b   :  { %v427_v37 = vmul.f32 0.00390625, %v426_v40  ;;  %v428_v53 = vmul.f32 %v10434_v49, %v10434_v49  ;;  %v459_v50 = vsub.f32 %v10420_v30, %v10434_v49  ;;  %v456_v2 = vsub.f32 %v10390_v17, %v10434_v49 }
 0x11c   :  { %v457_v45 = vsub.f32 %v10399_v41, %v10434_v49  ;;  %v458_v39 = vsub.f32 %v10408_v58, %v10434_v49  ;;  %v460_v38 = vsub.f32 %v10414_v12, %v10434_v49  ;;  %v461_v44 = vsub.f32 %v10423_v42, %v10434_v49 }
 0x11d   :  { %v429_v55 = vsub.f32 %v427_v37, %v428_v53  ;;  %v430_v48 = vsub.f32 %v10243_v61, %v10434_v49  ;;  %v431_v30 = vsub.f32 %v10249_v0, %v10434_v49  ;;  %v432_v17 = vsub.f32 %v10246_v63, %v10434_v49 }
 0x11e   :  { %v433_v41 = vsub.f32 %v10254_v3, %v10434_v49  ;;  %v434_v58 = vsub.f32 %v10264_v13, %v10434_v49  ;;  %v435_v12 = vsub.f32 %v10276_v29, %v10434_v49  ;;  %v436_v42 = vsub.f32 %v10270_v22, %v10434_v49 }
 0x11f   :  { %v462_v57 = vadd.f32 1e-05, %v429_v55  ;;  %v437_v61 = vsub.f32 %v10279_v34, %v10434_v49  ;;  %v438_v0 = vsub.f32 %v10288_v43, %v10434_v49  ;;  %v439_v63 = vsub.f32 %v10300_v56, %v10434_v49 }
 0x120   :  { %v440_v3 = vsub.f32 %v10294_v51, %v10434_v49  ;;  %v441_v13 = vsub.f32 %v10303_v60, %v10434_v49  ;;  %v442_v29 = vsub.f32 %v10312_v10, %v10434_v49  ;;  %v443_v22 = vsub.f32 %v10324_v28, %v10434_v49 }
 0x121   :  { %9599 = vrsqrt.f32 %v462_v57  ;;  %v444_v34 = vsub.f32 %v10318_v18, %v10434_v49  ;;  %v445_v43 = vsub.f32 %v10327_v35, %v10434_v49  ;;  %v446_v56 = vsub.f32 %v10336_v47, %v10434_v49 }
 0x122   :  { %v447_v51 = vsub.f32 %v10348_v1, %v10434_v49  ;;  %v448_v60 = vsub.f32 %v10342_v54, %v10434_v49  ;;  %v449_v10 = vsub.f32 %v10351_v6, %v10434_v49  ;;  %v450_v28 = vsub.f32 %v10360_v23, %v10434_v49 }
 0x123   :  { %v451_v18 = vsub.f32 %v10372_v46, %v10434_v49  ;;  %v452_v35 = vsub.f32 %v10366_v36, %v10434_v49  ;;  %v453_v47 = vsub.f32 %v10375_v52, %v10434_v49  ;;  %v454_v1 = vsub.f32 %v10384_v5, %v10434_v49 }
 0x124   :  { %v455_v54 = vsub.f32 %v10396_v31, %v10434_v49 }
 0x12e   :  { %v9600_v7 = vpop.eup %9599 }
 0x12f   :  { %v10502_v6 = vmul.f32 %v9600_v7, %v459_v50  ;;  %v466_v11 = vmul.f32 %v9600_v7, %v432_v17  ;;  %v467_v23 = vmul.f32 %v9600_v7, %v433_v41  ;;  %v468_v59 = vmul.f32 %v9600_v7, %v434_v58 }
 0x130   :  { %v469_v62 = vmul.f32 %v9600_v7, %v435_v12  ;;  %v470_v46 = vmul.f32 %v9600_v7, %v436_v42  ;;  %v471_v16 = vmul.f32 %v9600_v7, %v437_v61  ;;  %v472_v19 = vmul.f32 %v9600_v7, %v438_v0  ;;  %v10525_v12 = vld [vmem:[%s16903_s14 + $0x1] ss:$0 sm:$0xff] }
 0x131   :  { %v473_v24 = vmul.f32 %v9600_v7, %v439_v63  ;;  %v474_v36 = vmul.f32 %v9600_v7, %v440_v3  ;;  %v475_v25 = vmul.f32 %v9600_v7, %v441_v13  ;;  %v476_v40 = vmul.f32 %v9600_v7, %v442_v29 }
 0x132   :  { %v477_v52 = vmul.f32 %v9600_v7, %v443_v22  ;;  %v478_v37 = vmul.f32 %v9600_v7, %v444_v34  ;;  %v479_v53 = vmul.f32 %v9600_v7, %v445_v43  ;;  %v10504_v5 = vmul.f32 %v9600_v7, %v446_v56  ;;  %v10542_v34 = vld [vmem:[%s16903_s14 + $0x2] ss:$0 sm:$0xff] }
 0x133   :  { %v10506_v55 = vmul.f32 %v9600_v7, %v447_v51  ;;  %v10508_v31 = vmul.f32 %v9600_v7, %v448_v60  ;;  %v10510_v49 = vmul.f32 %v9600_v7, %v449_v10  ;;  %v10512_v50 = vmul.f32 %v9600_v7, %v450_v28 }
 0x134   :  { %v10514_v57 = vmul.f32 %v9600_v7, %v451_v18  ;;  %v10516_v17 = vmul.f32 %v9600_v7, %v452_v35  ;;  %v10518_v41 = vmul.f32 %v9600_v7, %v453_v47  ;;  %v10520_v58 = vmul.f32 %v9600_v7, %v454_v1 }
 0x135   :  { %v10527_v42 = vmul.f32 %v9600_v7, %v455_v54  ;;  %v10529_v61 = vmul.f32 %v9600_v7, %v456_v2  ;;  %v10531_v0 = vmul.f32 %v9600_v7, %v457_v45  ;;  %v10533_v63 = vmul.f32 %v9600_v7, %v458_v39 }
 0x136   :  { %v10535_v3 = vmul.f32 %v9600_v7, %v460_v38  ;;  %v10537_v13 = vmul.f32 %v9600_v7, %v461_v44  ;;  %v464_v29 = vmul.f32 %v9600_v7, %v430_v48  ;;  %v465_v22 = vmul.f32 %v9600_v7, %v431_v30 }
 0x137   :  { %v499_v43 = vmul.f32 %v10525_v12, %v466_v11  ;;  %v500_v2 = vmul.f32 %v10525_v12, %v467_v23  ;;  %v501_v45 = vmul.f32 %v10525_v12, %v468_v59  ;;  %v502_v39 = vmul.f32 %v10525_v12, %v469_v62 }
 0x138   :  { %v497_v38 = vmul.f32 %v10525_v12, %v464_v29  ;;  %v498_v44 = vmul.f32 %v10525_v12, %v465_v22  ;;  %v503_v48 = vmul.f32 %v10525_v12, %v470_v46  ;;  %v504_v30 = vmul.f32 %v10525_v12, %v471_v16 }
 0x139   :  { %v532_v56 = vadd.f32 %v10542_v34, %v499_v43  ;;  %v533_v51 = vadd.f32 %v10542_v34, %v500_v2  ;;  %v534_v60 = vadd.f32 %v10542_v34, %v501_v45  ;;  %v535_v10 = vadd.f32 %v10542_v34, %v502_v39 }
 0x13a   :  { %v530_v28 = vadd.f32 %v10542_v34, %v497_v38  ;;  %v531_v18 = vadd.f32 %v10542_v34, %v498_v44  ;;  %v536_v7 = vadd.f32 %v10542_v34, %v503_v48  ;;  %v537_v35 = vadd.f32 %v10542_v34, %v504_v30 }
 0x13b   :  { %v564_v47 = vmax.f32 %v532_v56, 0.0  ;;  %v565_v1 = vmax.f32 %v533_v51, 0.0  ;;  %v566_v54 = vmax.f32 %v534_v60, 0.0  ;;  %v567_v11 = vmax.f32 %v535_v10, 0.0 }
 0x13c   :  { %v562_v23 = vmax.f32 %v530_v28, 0.0  ;;  %v563_v59 = vmax.f32 %v531_v18, 0.0  ;;  %v568_v62 = vmax.f32 %v536_v7, 0.0  ;;  %v569_v46 = vmax.f32 %v537_v35, 0.0 }
 0x13d   :  { %v595_v16 = vpack.c.bf16 %v565_v1, %v564_v47  ;;  %v596_v29 = vpack.c.bf16 %v567_v11, %v566_v54  ;;  %v505_v22 = vmul.f32 %v10525_v12, %v472_v19  ;;  %v506_v43 = vmul.f32 %v10525_v12, %v473_v24 }
 0x13e   :  { %v594_v2 = vpack.c.bf16 %v563_v59, %v562_v23  ;;  %v597_v45 = vpack.c.bf16 %v569_v46, %v568_v62  ;;  %v507_v39 = vmul.f32 %v10525_v12, %v474_v36  ;;  %v508_v38 = vmul.f32 %v10525_v12, %v475_v25 }
 0x13f   :  { %v538_v44 = vadd.f32 %v10542_v34, %v505_v22  ;;  %v539_v48 = vadd.f32 %v10542_v34, %v506_v43  ;;  %v509_v30 = vmul.f32 %v10525_v12, %v476_v40  ;;  %v510_v56 = vmul.f32 %v10525_v12, %v477_v52 }
 0x140   :  { %9081 = vmatprep.mubr.bf16.mxu1 %v594_v2  ;;  %v540_v51 = vadd.f32 %v10542_v34, %v507_v39  ;;  %v541_v19 = vadd.f32 %v10542_v34, %v508_v38  ;;  %v511_v24 = vmul.f32 %v10525_v12, %v478_v37  ;;  %v512_v60 = vmul.f32 %v10525_v12, %v479_v53 }
 0x141   :  { %9082 = vmatmul.mubr.bf16.vlgmr.msra.gmra.mxu1 %v595_v16  ;;  %v570_v36 = vmax.f32 %v538_v44, 0.0  ;;  %v571_v25 = vmax.f32 %v539_v48, 0.0  ;;  %v542_v10 = vadd.f32 %v10542_v34, %v509_v30  ;;  %v543_v28 = vadd.f32 %v10542_v34, %v510_v56 }
 0x142   :  { %9085 = vmatprep.mubr.bf16.mxu1 %v596_v29  ;;  %v572_v40 = vmax.f32 %v540_v51, 0.0  ;;  %v573_v18 = vmax.f32 %v541_v19, 0.0  ;;  %v544_v52 = vadd.f32 %v10542_v34, %v511_v24  ;;  %v545_v7 = vadd.f32 %v10542_v34, %v512_v60 }
 0x143   :  { %v598_v35 = vpack.c.bf16 %v571_v25, %v570_v36  ;;  %v574_v47 = vmax.f32 %v542_v10, 0.0  ;;  %v575_v1 = vmax.f32 %v543_v28, 0.0  ;;  %v513_v37 = vmul.f32 %v10525_v12, %v10504_v5 }
 0x144   :  { %v599_v53 = vpack.c.bf16 %v573_v18, %v572_v40  ;;  %v576_v54 = vmax.f32 %v544_v52, 0.0  ;;  %v577_v11 = vmax.f32 %v545_v7, 0.0  ;;  %v514_v23 = vmul.f32 %v10525_v12, %v10506_v55 }
 0x145   :  { %v600_v59 = vpack.c.bf16 %v575_v1, %v574_v47  ;;  %v546_v62 = vadd.f32 %v10542_v34, %v513_v37  ;;  %v515_v46 = vmul.f32 %v10525_v12, %v10508_v31  ;;  %v516_v16 = vmul.f32 %v10525_v12, %v10510_v49 }
 0x146   :  { %v601_v29 = vpack.c.bf16 %v577_v11, %v576_v54  ;;  %v547_v22 = vadd.f32 %v10542_v34, %v514_v23  ;;  %v517_v5 = vmul.f32 %v10525_v12, %v10512_v50  ;;  %v518_v43 = vmul.f32 %v10525_v12, %v10514_v57 }
 0x147   :  { %v578_v2 = vmax.f32 %v546_v62, 0.0  ;;  %v548_v55 = vadd.f32 %v10542_v34, %v515_v46  ;;  %v549_v39 = vadd.f32 %v10542_v34, %v516_v16  ;;  %v519_v31 = vmul.f32 %v10525_v12, %v10516_v17 }
 0x148   :  { %v579_v38 = vmax.f32 %v547_v22, 0.0  ;;  %v550_v49 = vadd.f32 %v10542_v34, %v517_v5  ;;  %v551_v44 = vadd.f32 %v10542_v34, %v518_v43  ;;  %v520_v48 = vmul.f32 %v10525_v12, %v10518_v41 }
 0x149   :  { %9086 = vmatmul.mubr.bf16.gmra.mxu1 %v597_v45  ;;  %v580_v50 = vmax.f32 %v548_v55, 0.0  ;;  %v581_v30 = vmax.f32 %v549_v39, 0.0  ;;  %v552_v57 = vadd.f32 %v10542_v34, %v519_v31  ;;  %v521_v56 = vmul.f32 %v10525_v12, %v10520_v58  ;;  %v9563_v55 = vld [vmem:[%s16893_s4] sm:$0xff]  }
 0x14a   :  { %9089 = vmatprep.mubr.bf16.mxu1 %v598_v35  ;;  %v602_v51 = vpack.c.bf16 %v579_v38, %v578_v2  ;;  %v582_v19 = vmax.f32 %v550_v49, 0.0  ;;  %v583_v17 = vmax.f32 %v551_v44, 0.0  ;;  %v553_v24 = vadd.f32 %v10542_v34, %v520_v48  ;;  %v10650_v44 = vld [vmem:[%s16895_s6] sm:$0xff]  }
 0x14b   :  { %v603_v60 = vpack.c.bf16 %v581_v30, %v580_v50  ;;  %v584_v36 = vmax.f32 %v552_v57, 0.0  ;;  %v522_v25 = vmul.f32 %v10525_v12, %v10527_v42  ;;  %v554_v41 = vadd.f32 %v10542_v34, %v521_v56 }
 0x14c   :  { %v604_v45 = vpack.c.bf16 %v583_v17, %v582_v19  ;;  %v585_v10 = vmax.f32 %v553_v24, 0.0  ;;  %v523_v28 = vmul.f32 %v10525_v12, %v10529_v61  ;;  %v524_v58 = vmul.f32 %v10525_v12, %v10531_v0 }
 0x14d   :  { %v555_v40 = vadd.f32 %v10542_v34, %v522_v25  ;;  %v586_v18 = vmax.f32 %v554_v41, 0.0  ;;  %v525_v52 = vmul.f32 %v10525_v12, %v10533_v63  ;;  %v526_v7 = vmul.f32 %v10525_v12, %v10502_v6 }
 0x14e   :  { %v605_v42 = vpack.c.bf16 %v585_v10, %v584_v36  ;;  %v556_v35 = vadd.f32 %v10542_v34, %v523_v28  ;;  %v557_v47 = vadd.f32 %v10542_v34, %v524_v58  ;;  %v527_v61 = vmul.f32 %v10525_v12, %v10535_v3 }
 0x14f   :  { %v587_v1 = vmax.f32 %v555_v40, 0.0  ;;  %v558_v0 = vadd.f32 %v10542_v34, %v525_v52  ;;  %v559_v37 = vadd.f32 %v10542_v34, %v526_v7  ;;  %v528_v54 = vmul.f32 %v10525_v12, %v10537_v13  ;;  %v9560_v12 = vld [vmem:[%s16893_s4 + $0x18] sm:$0xff]   ;;  %v9561_v13 = vld [vmem:[%s16893_s4 + $0x10] sm:$0xff]  }
 0x150   :  { %v588_v63 = vmax.f32 %v556_v35, 0.0  ;;  %v589_v11 = vmax.f32 %v557_v47, 0.0  ;;  %v560_v6 = vadd.f32 %v10542_v34, %v527_v61  ;;  %9113 = vmatprep.subr.bf16.mxu0 %v9560_v12 }
 0x151   :  { %9090 = vmatmul.mubr.bf16.gmra.mxu1 %v599_v53  ;;  %v606_v23 = vpack.c.bf16 %v587_v1, %v586_v18  ;;  %v590_v62 = vmax.f32 %v558_v0, 0.0  ;;  %v591_v46 = vmax.f32 %v559_v37, 0.0  ;;  %v561_v16 = vadd.f32 %v10542_v34, %v528_v54  ;;  %9114 = vmatpush3.bf16.msra.mxu0 %v9560_v12  ;;  %v9562_v34 = vld [vmem:[%s16893_s4 + $0x8] sm:$0xff]  }
 0x152   :  { %9093 = vmatprep.mubr.bf16.mxu1 %v600_v59  ;;  %v607_v3 = vpack.c.bf16 %v589_v11, %v588_v63  ;;  %v592_v22 = vmax.f32 %v560_v6, 0.0  ;;  %9115 = vmatprep.subr.bf16.mxu0 %v9561_v13  ;;  %v10636_v59 = vld [vmem:[%s16903_s14 + $0x3] ss:$0 sm:$0xff] }
 0x153   :  { %v608_v5 = vpack.c.bf16 %v591_v46, %v590_v62  ;;  %v593_v43 = vmax.f32 %v561_v16, 0.0 }
 0x155   :  { %v609_v2 = vpack.c.bf16 %v593_v43, %v592_v22  ;;  %9116 = vmatpush3.bf16.msra.mxu0 %v9561_v13 }
 0x156   :  { %9117 = vmatprep.subr.bf16.mxu0 %v9562_v34 }
 0x159   :  { %9094 = vmatmul.mubr.bf16.gmra.mxu1 %v601_v29  ;;  %9118 = vmatpush3.bf16.msra.mxu0 %v9562_v34 }
 0x15a   :  { %9097 = vmatprep.mubr.bf16.mxu1 %v602_v51  ;;  %9119 = vmatprep.subr.bf16.mxu0 %v9563_v55 }
 0x15d   :  { %9120 = vmatpush3.bf16.msra.mxu0 %v9563_v55 }
 0x15e   :  { %9187 = vmatprep.subr.bf16.mxu0 %v10650_v44 }
 0x161   :  { %9098 = vmatmul.mubr.bf16.gmra.mxu1 %v603_v60 }
 0x162   :  { %9101 = vmatprep.mubr.bf16.mxu1 %v604_v45 }
 0x169   :  { %9102 = vmatmul.mubr.bf16.gmra.mxu1 %v605_v42 }
 0x16a   :  { %9105 = vmatprep.mubr.bf16.mxu1 %v606_v23 }
 0x171   :  { %9106 = vmatmul.mubr.bf16.gmra.mxu1 %v607_v3 }
 0x172   :  { %9109 = vmatprep.mubr.bf16.mxu1 %v608_v5 }
 0x179   :  { %9110 = vmatmul.mubr.bf16.gmra.mxu1 %v609_v2 }
 0x201   :  { %v9083_v53 = vpop.f32.mrf.mxu1 }
 0x202   :  { %v10645_v38 = vadd.f32 %v9083_v53, %v10636_v59 }
 0x203   :  { %v709_v29 = vpop.f32.mrf.mxu1 }
 0x204   :  { %v10642_v39 = vadd.f32 %v709_v29, %v10636_v59  ;;  %v909_v56 = vmul.f32 %v10645_v38, %v10645_v38  ;;  %v840_v24 = vsel %vm836_vm1, %v10645_v38, 0.0 }
 0x205   :  { %v9084_v31 = vpop.f32.mrf.mxu1 }
 0x206   :  { %v907_v48 = vmul.f32 %v10642_v39, %v10642_v39  ;;  %v10655_v50 = vadd.f32 %v9084_v31, %v10636_v59  ;;  %v837_v51 = vsel %vm836_vm1, %v10642_v39, 0.0  ;;  %v942_v18 = vsel %vm836_vm1, %v909_v56, 0.0 }
 0x207   :  { %v712_v49 = vpop.f32.mrf.mxu1 }
 0x208   :  { %v10658_v30 = vadd.f32 %v712_v49, %v10636_v59  ;;  %v939_v25 = vsel %vm836_vm1, %v907_v48, 0.0  ;;  %v910_v41 = vmul.f32 %v10655_v50, %v10655_v50  ;;  %v842_v52 = vsel %vm836_vm1, %v10655_v50, 0.0 }
 0x209   :  { %v9087_v57 = vpop.f32.mrf.mxu1 }
 0x20a   :  { %v838_v19 = vsel %vm836_vm1, %v10658_v30, 0.0  ;;  %v908_v17 = vmul.f32 %v10658_v30, %v10658_v30  ;;  %v10682_v7 = vadd.f32 %v9087_v57, %v10636_v59  ;;  %v944_v1 = vsel %vm836_vm1, %v910_v41, 0.0 }
 0x20b   :  { %v839_v60 = vadd.f32 %v838_v19, %v837_v51  ;;  %v725_v36 = vpop.f32.mrf.mxu1 }
 0x20c   :  { %v940_v45 = vsel %vm836_vm1, %v908_v17, 0.0  ;;  %v10676_v10 = vadd.f32 %v725_v36, %v10636_v59  ;;  %v913_v23 = vmul.f32 %v10682_v7, %v10682_v7  ;;  %v848_v43 = vsel %vm836_vm1, %v10682_v7, 0.0 }
 0x20d   :  { %v841_v28 = vadd.f32 %v840_v24, %v839_v60  ;;  %v941_v58 = vadd.f32 %v940_v45, %v939_v25  ;;  %v9088_v40 = vpop.f32.mrf.mxu1 }
 0x20e   :  { %v911_v42 = vmul.f32 %v10676_v10, %v10676_v10  ;;  %v844_v0 = vsel %vm836_vm1, %v10676_v10, 0.0  ;;  %v10690_v37 = vadd.f32 %v9088_v40, %v10636_v59  ;;  %v950_v55 = vsel %vm836_vm1, %v913_v23, 0.0 }
 0x20f   :  { %v943_v35 = vadd.f32 %v942_v18, %v941_v58  ;;  %v843_v47 = vadd.f32 %v842_v52, %v841_v28  ;;  %v728_v61 = vpop.f32.mrf.mxu1 }
 0x210   :  { %v10693_v54 = vadd.f32 %v728_v61, %v10636_v59  ;;  %v946_v62 = vsel %vm836_vm1, %v911_v42, 0.0  ;;  %v914_v2 = vmul.f32 %v10690_v37, %v10690_v37  ;;  %v850_v31 = vsel %vm836_vm1, %v10690_v37, 0.0 }
 0x211   :  { %v845_v63 = vadd.f32 %v844_v0, %v843_v47  ;;  %v945_v11 = vadd.f32 %v944_v1, %v943_v35  ;;  %v9091_v6 = vpop.f32.mrf.mxu1 }
 0x212   :  { %v846_v46 = vsel %vm836_vm1, %v10693_v54, 0.0  ;;  %v912_v16 = vmul.f32 %v10693_v54, %v10693_v54  ;;  %v10714_v49 = vadd.f32 %v9091_v6, %v10636_v59  ;;  %v952_v19 = vsel %vm836_vm1, %v914_v2, 0.0 }
 0x213   :  { %v947_v3 = vadd.f32 %v946_v62, %v945_v11  ;;  %v847_v22 = vadd.f32 %v846_v46, %v845_v63  ;;  %v741_v5 = vpop.f32.mrf.mxu1 }
 0x214   :  { %v948_v12 = vsel %vm836_vm1, %v912_v16, 0.0  ;;  %v10708_v13 = vadd.f32 %v741_v5, %v10636_v59  ;;  %v917_v45 = vmul.f32 %v10714_v49, %v10714_v49  ;;  %v856_v35 = vsel %vm836_vm1, %v10714_v49, 0.0 }
 0x215   :  { %v849_v34 = vadd.f32 %v848_v43, %v847_v22  ;;  %v949_v53 = vadd.f32 %v948_v12, %v947_v3  ;;  %v9092_v29 = vpop.f32.mrf.mxu1 }
 0x216   :  { %v915_v48 = vmul.f32 %v10708_v13, %v10708_v13  ;;  %v852_v17 = vsel %vm836_vm1, %v10708_v13, 0.0  ;;  %v10722_v24 = vadd.f32 %v9092_v29, %v10636_v59  ;;  %v958_v6 = vsel %vm836_vm1, %v917_v45, 0.0 }
 0x217   :  { %v951_v57 = vadd.f32 %v950_v55, %v949_v53  ;;  %v851_v56 = vadd.f32 %v850_v31, %v849_v34  ;;  %v744_v51 = vpop.f32.mrf.mxu1 }
 0x218   :  { %v10725_v60 = vadd.f32 %v744_v51, %v10636_v59  ;;  %v954_v28 = vsel %vm836_vm1, %v915_v48, 0.0  ;;  %v918_v47 = vmul.f32 %v10722_v24, %v10722_v24  ;;  %v858_v23 = vsel %vm836_vm1, %v10722_v24, 0.0 }
 0x219   :  { %v853_v36 = vadd.f32 %v852_v17, %v851_v56  ;;  %v953_v25 = vadd.f32 %v952_v19, %v951_v57  ;;  %v9095_v41 = vpop.f32.mrf.mxu1 }
 0x21a   :  { %v854_v58 = vsel %vm836_vm1, %v10725_v60, 0.0  ;;  %v916_v40 = vmul.f32 %v10725_v60, %v10725_v60  ;;  %v10746_v62 = vadd.f32 %v9095_v41, %v10636_v59  ;;  %v960_v5 = vsel %vm836_vm1, %v918_v47, 0.0 }
 0x21b   :  { %v955_v18 = vadd.f32 %v954_v28, %v953_v25  ;;  %v855_v52 = vadd.f32 %v854_v58, %v853_v36  ;;  %v757_v42 = vpop.f32.mrf.mxu1 }
 0x21c   :  { %v956_v61 = vsel %vm836_vm1, %v916_v40, 0.0  ;;  %v10740_v1 = vadd.f32 %v757_v42, %v10636_v59  ;;  %v921_v55 = vmul.f32 %v10746_v62, %v10746_v62  ;;  %v864_v17 = vsel %vm836_vm1, %v10746_v62, 0.0 }
 0x21d   :  { %v857_v0 = vadd.f32 %v856_v35, %v855_v52  ;;  %v957_v63 = vadd.f32 %v956_v61, %v955_v18  ;;  %v9096_v11 = vpop.f32.mrf.mxu1 }
 0x21e   :  { %v919_v46 = vmul.f32 %v10740_v1, %v10740_v1  ;;  %v860_v43 = vsel %vm836_vm1, %v10740_v1, 0.0  ;;  %v10754_v2 = vadd.f32 %v9096_v11, %v10636_v59  ;;  %v966_v40 = vsel %vm836_vm1, %v921_v55, 0.0 }
 0x21f   :  { %v959_v16 = vadd.f32 %v958_v6, %v957_v63  ;;  %v859_v3 = vadd.f32 %v858_v23, %v857_v0  ;;  %v760_v22 = vpop.f32.mrf.mxu1 }
 0x220   :  { %v10757_v12 = vadd.f32 %v760_v22, %v10636_v59  ;;  %v962_v31 = vsel %vm836_vm1, %v919_v46, 0.0  ;;  %v922_v36 = vmul.f32 %v10754_v2, %v10754_v2  ;;  %v866_v18 = vsel %vm836_vm1, %v10754_v2, 0.0 }
 0x221   :  { %v861_v34 = vadd.f32 %v860_v43, %v859_v3  ;;  %v961_v53 = vadd.f32 %v960_v5, %v959_v16  ;;  %v9099_v29 = vpop.f32.mrf.mxu1 }
 0x222   :  { %v862_v48 = vsel %vm836_vm1, %v10757_v12, 0.0  ;;  %v920_v57 = vmul.f32 %v10757_v12, %v10757_v12  ;;  %v10778_v52 = vadd.f32 %v9099_v29, %v10636_v59  ;;  %v968_v0 = vsel %vm836_vm1, %v922_v36, 0.0 }
 0x223   :  { %v963_v56 = vadd.f32 %v962_v31, %v961_v53  ;;  %v863_v51 = vadd.f32 %v862_v48, %v861_v34  ;;  %v773_v19 = vpop.f32.mrf.mxu1 }
 0x224   :  { %v964_v25 = vsel %vm836_vm1, %v920_v57, 0.0  ;;  %v10772_v41 = vadd.f32 %v773_v19, %v10636_v59  ;;  %v925_v3 = vmul.f32 %v10778_v52, %v10778_v52  ;;  %v872_v55 = vsel %vm836_vm1, %v10778_v52, 0.0 }
 0x225   :  { %v865_v45 = vadd.f32 %v864_v17, %v863_v51  ;;  %v965_v28 = vadd.f32 %v964_v25, %v963_v56  ;;  %v9100_v58 = vpop.f32.mrf.mxu1 }
 0x226   :  { %v923_v42 = vmul.f32 %v10772_v41, %v10772_v41  ;;  %v868_v63 = vsel %vm836_vm1, %v10772_v41, 0.0  ;;  %v10786_v11 = vadd.f32 %v9100_v58, %v10636_v59  ;;  %v974_v17 = vsel %vm836_vm1, %v925_v3, 0.0 }
 0x227   :  { %v967_v35 = vadd.f32 %v966_v40, %v965_v28  ;;  %v867_v47 = vadd.f32 %v866_v18, %v865_v45  ;;  %v776_v61 = vpop.f32.mrf.mxu1 }
 0x228   :  { %v10789_v6 = vadd.f32 %v776_v61, %v10636_v59  ;;  %v970_v22 = vsel %vm836_vm1, %v923_v42, 0.0  ;;  %v926_v31 = vmul.f32 %v10786_v11, %v10786_v11  ;;  %v874_v36 = vsel %vm836_vm1, %v10786_v11, 0.0 }
 0x229   :  { %v869_v23 = vadd.f32 %v868_v63, %v867_v47  ;;  %v969_v46 = vadd.f32 %v968_v0, %v967_v35  ;;  %v9103_v16 = vpop.f32.mrf.mxu1 }
 0x22a   :  { %v870_v5 = vsel %vm836_vm1, %v10789_v6, 0.0  ;;  %v924_v43 = vmul.f32 %v10789_v6, %v10789_v6  ;;  %v10810_v25 = vadd.f32 %v9103_v16, %v10636_v59  ;;  %v976_v18 = vsel %vm836_vm1, %v926_v31, 0.0 }
 0x22b   :  { %v971_v34 = vadd.f32 %v970_v22, %v969_v46  ;;  %v871_v53 = vadd.f32 %v870_v5, %v869_v23  ;;  %v789_v29 = vpop.f32.mrf.mxu1 }
 0x22c   :  { %v972_v48 = vsel %vm836_vm1, %v924_v43, 0.0  ;;  %v10804_v57 = vadd.f32 %v789_v29, %v10636_v59  ;;  %v929_v23 = vmul.f32 %v10810_v25, %v10810_v25 }
 0x22d   :  { %v873_v56 = vadd.f32 %v872_v55, %v871_v53  ;;  %v973_v51 = vadd.f32 %v972_v48, %v971_v34  ;;  %v9104_v19 = vpop.f32.mrf.mxu1  ;;  %v880_v34 = vsel %vm836_vm1, %v10810_v25, 0.0 }
 0x22e   :  { %v927_v45 = vmul.f32 %v10804_v57, %v10804_v57  ;;  %v876_v42 = vsel %vm836_vm1, %v10804_v57, 0.0  ;;  %v10818_v35 = vadd.f32 %v9104_v19, %v10636_v59 }
 0x22f   :  { %v975_v28 = vadd.f32 %v974_v17, %v973_v51  ;;  %v875_v58 = vadd.f32 %v874_v36, %v873_v56  ;;  %v792_v40 = vpop.f32.mrf.mxu1  ;;  %v982_v51 = vsel %vm836_vm1, %v929_v23, 0.0 }
 0x230   :  { %v10821_v47 = vadd.f32 %v792_v40, %v10636_v59  ;;  %v978_v46 = vsel %vm836_vm1, %v927_v45, 0.0  ;;  %v930_v53 = vmul.f32 %v10818_v35, %v10818_v35  ;;  %v882_v19 = vsel %vm836_vm1, %v10818_v35, 0.0 }
 0x231   :  { %v877_v61 = vadd.f32 %v876_v42, %v875_v58  ;;  %v977_v0 = vadd.f32 %v976_v18, %v975_v28  ;;  %v9107_v63 = vpop.f32.mrf.mxu1 }
 0x232   :  { %v878_v16 = vsel %vm836_vm1, %v10821_v47, 0.0  ;;  %v928_v3 = vmul.f32 %v10821_v47, %v10821_v47  ;;  %v10842_v17 = vadd.f32 %v9107_v63, %v10636_v59  ;;  %v984_v40 = vsel %vm836_vm1, %v930_v53, 0.0 }
 0x233   :  { %v979_v22 = vadd.f32 %v978_v46, %v977_v0  ;;  %v879_v5 = vadd.f32 %v878_v16, %v877_v61  ;;  %v805_v43 = vpop.f32.mrf.mxu1 }
 0x234   :  { %v980_v29 = vsel %vm836_vm1, %v928_v3, 0.0  ;;  %v10836_v55 = vadd.f32 %v805_v43, %v10636_v59  ;;  %v933_v46 = vmul.f32 %v10842_v17, %v10842_v17  ;;  %v888_v53 = vsel %vm836_vm1, %v10842_v17, 0.0 }
 0x235   :  { %v881_v31 = vadd.f32 %v880_v34, %v879_v5  ;;  %v981_v48 = vadd.f32 %v980_v29, %v979_v22  ;;  %v9108_v56 = vpop.f32.mrf.mxu1 }
 0x236   :  { %v931_v36 = vmul.f32 %v10836_v55, %v10836_v55  ;;  %v884_v18 = vsel %vm836_vm1, %v10836_v55, 0.0  ;;  %v10850_v42 = vadd.f32 %v9108_v56, %v10636_v59 }
 0x237   :  { %v983_v45 = vadd.f32 %v982_v51, %v981_v48  ;;  %v883_v28 = vadd.f32 %v882_v19, %v881_v31  ;;  %v808_v58 = vpop.f32.mrf.mxu1 }
 0x238   :  { %v10853_v61 = vadd.f32 %v808_v58, %v10636_v59  ;;  %v986_v16 = vsel %vm836_vm1, %v931_v36, 0.0  ;;  %v934_v29 = vmul.f32 %v10850_v42, %v10850_v42  ;;  %v990_v36 = vsel %vm836_vm1, %v933_v46, 0.0 }
 0x239   :  { %v885_v0 = vadd.f32 %v884_v18, %v883_v28  ;;  %v985_v63 = vadd.f32 %v984_v40, %v983_v45  ;;  %v9111_v23 = vpop.f32.mrf.mxu1  ;;  %v890_v45 = vsel %vm836_vm1, %v10850_v42, 0.0 }
 0x23a   :  { %v886_v3 = vsel %vm836_vm1, %v10853_v61, 0.0  ;;  %v932_v22 = vmul.f32 %v10853_v61, %v10853_v61  ;;  %v10874_v28 = vadd.f32 %v9111_v23, %v10636_v59 }
 0x23b   :  { %v987_v5 = vadd.f32 %v986_v16, %v985_v63  ;;  %v887_v43 = vadd.f32 %v886_v3, %v885_v0  ;;  %v821_v34 = vpop.f32.mrf.mxu1  ;;  %v992_v63 = vsel %vm836_vm1, %v934_v29, 0.0 }
 0x23c   :  { %v988_v31 = vsel %vm836_vm1, %v932_v22, 0.0  ;;  %v10868_v48 = vadd.f32 %v821_v34, %v10636_v59 }
 0x23d   :  { %v889_v56 = vadd.f32 %v888_v53, %v887_v43  ;;  %v989_v51 = vadd.f32 %v988_v31, %v987_v5  ;;  %v9112_v19 = vpop.f32.mrf.mxu1  ;;  %v937_v5 = vmul.f32 %v10874_v28, %v10874_v28 }
 0x23e   :  { %v935_v58 = vmul.f32 %v10868_v48, %v10868_v48  ;;  %v892_v16 = vsel %vm836_vm1, %v10868_v48, 0.0  ;;  %v10882_v3 = vadd.f32 %v9112_v19, %v10636_v59 }
 0x23f   :  { %v991_v40 = vadd.f32 %v990_v36, %v989_v51  ;;  %v891_v18 = vadd.f32 %v890_v45, %v889_v56  ;;  %v824_v0 = vpop.f32.mrf.mxu1  ;;  %v896_v56 = vsel %vm836_vm1, %v10874_v28, 0.0  ;;  %v998_v45 = vsel %vm836_vm1, %v937_v5, 0.0 }
 0x240   :  { %v10885_v46 = vadd.f32 %v824_v0, %v10636_v59  ;;  %v994_v43 = vsel %vm836_vm1, %v935_v58, 0.0  ;;  %v938_v59 = vmul.f32 %v10882_v3, %v10882_v3  ;;  %v898_v58 = vsel %vm836_vm1, %v10882_v3, 0.0 }
 0x241   :  { %v893_v22 = vadd.f32 %v892_v16, %v891_v18  ;;  %v993_v23 = vadd.f32 %v992_v63, %v991_v40 }
 0x242   :  { %v894_v34 = vsel %vm836_vm1, %v10885_v46, 0.0  ;;  %v936_v53 = vmul.f32 %v10885_v46, %v10885_v46  ;;  %v1000_v0 = vsel %vm836_vm1, %v938_v59, 0.0 }
 0x243   :  { %v995_v29 = vadd.f32 %v994_v43, %v993_v23  ;;  %v895_v31 = vadd.f32 %v894_v34, %v893_v22 }
 0x244   :  { %v996_v51 = vsel %vm836_vm1, %v936_v53, 0.0 }
 0x245   :  { %v897_v19 = vadd.f32 %v896_v56, %v895_v31  ;;  %v997_v36 = vadd.f32 %v996_v51, %v995_v29 }
 0x247   :  { %v899_v40 = vadd.f32 %v898_v58, %v897_v19  ;;  %v999_v18 = vadd.f32 %v998_v45, %v997_v36 }
 0x249   :  { %v900_v63 = vrot.slane %v899_v40, 4  ;;  %v1001_v16 = vadd.f32 %v1000_v0, %v999_v18 }
 0x24b   :  { %v901_v22 = vadd.f32 %v900_v63, %v899_v40  ;;  %v1002_v23 = vrot.slane %v1001_v16, 4 }
 0x24d   :  { %v902_v43 = vrot.slane %v901_v22, 2  ;;  %v1003_v34 = vadd.f32 %v1002_v23, %v1001_v16 }
 0x24f   :  { %v903_v33 = vadd.f32 %v902_v43, %v901_v22  ;;  %v1004_v32 = vrot.slane %v1003_v34, 2 }
 0x251   :  { %v904_v53 = vrot.slane %v903_v33, 1  ;;  %v1005_v31 = vadd.f32 %v1004_v32, %v1003_v34 }
 0x253   :  { %v905_v29 = vadd.f32 %v904_v53, %v903_v33  ;;  %v1006_v56 = vrot.slane %v1005_v31, 1 }
 0x255   :  { %v10903_v5 = vmul.f32 0.00390625, %v905_v29  ;;  %v1007_v51 = vadd.f32 %v1006_v56, %v1005_v31 }
 0x257   :  { %v1008_v27 = vmul.f32 0.00390625, %v1007_v51  ;;  %v1009_v19 = vmul.f32 %v10903_v5, %v10903_v5  ;;  %v1040_v59 = vsub.f32 %v10885_v46, %v10903_v5  ;;  %v1037_v58 = vsub.f32 %v10842_v17, %v10903_v5 }
 0x258   :  { %v1038_v32 = vsub.f32 %v10850_v42, %v10903_v5  ;;  %v1039_v33 = vsub.f32 %v10868_v48, %v10903_v5  ;;  %v1041_v40 = vsub.f32 %v10874_v28, %v10903_v5  ;;  %v1042_v18 = vsub.f32 %v10882_v3, %v10903_v5 }
 0x259   :  { %v1010_v36 = vsub.f32 %v1008_v27, %v1009_v19  ;;  %v1011_v27 = vsub.f32 %v10642_v39, %v10903_v5  ;;  %v1012_v46 = vsub.f32 %v10658_v30, %v10903_v5  ;;  %v1013_v17 = vsub.f32 %v10645_v38, %v10903_v5 }
 0x25a   :  { %v1014_v42 = vsub.f32 %v10655_v50, %v10903_v5  ;;  %v1015_v48 = vsub.f32 %v10676_v10, %v10903_v5  ;;  %v1016_v28 = vsub.f32 %v10693_v54, %v10903_v5  ;;  %v1017_v3 = vsub.f32 %v10682_v7, %v10903_v5 }
 0x25b   :  { %v1043_v45 = vadd.f32 1e-05, %v1010_v36  ;;  %v1018_v39 = vsub.f32 %v10690_v37, %v10903_v5  ;;  %v1019_v30 = vsub.f32 %v10708_v13, %v10903_v5  ;;  %v1020_v38 = vsub.f32 %v10725_v60, %v10903_v5 }
 0x25c   :  { %v1021_v50 = vsub.f32 %v10714_v49, %v10903_v5  ;;  %v1022_v10 = vsub.f32 %v10722_v24, %v10903_v5  ;;  %v1023_v54 = vsub.f32 %v10740_v1, %v10903_v5  ;;  %v1024_v7 = vsub.f32 %v10757_v12, %v10903_v5 }
 0x25d   :  { %9601 = vrsqrt.f32 %v1043_v45  ;;  %v1025_v37 = vsub.f32 %v10746_v62, %v10903_v5  ;;  %v1026_v13 = vsub.f32 %v10754_v2, %v10903_v5  ;;  %v1027_v60 = vsub.f32 %v10772_v41, %v10903_v5  ;;  %v10964_v62 = vld [vmem:[%s16903_s14 + $0x4] ss:$0 sm:$0xff] }
 0x25e   :  { %v1028_v49 = vsub.f32 %v10789_v6, %v10903_v5  ;;  %v1029_v24 = vsub.f32 %v10778_v52, %v10903_v5  ;;  %v1030_v1 = vsub.f32 %v10786_v11, %v10903_v5  ;;  %v1031_v12 = vsub.f32 %v10804_v57, %v10903_v5 }
 0x25f   :  { %v1032_v2 = vsub.f32 %v10821_v47, %v10903_v5  ;;  %v1033_v41 = vsub.f32 %v10810_v25, %v10903_v5  ;;  %v1034_v52 = vsub.f32 %v10818_v35, %v10903_v5  ;;  %v1035_v11 = vsub.f32 %v10836_v55, %v10903_v5 }
 0x260   :  { %v1036_v57 = vsub.f32 %v10853_v61, %v10903_v5 }
 0x26a   :  { %v9602_v0 = vpop.eup %9601 }
 0x26b   :  { %v1074_v6 = vmul.f32 %v9602_v0, %v1040_v59  ;;  %v1045_v63 = vmul.f32 %v9602_v0, %v1011_v27  ;;  %v1046_v16 = vmul.f32 %v9602_v0, %v1012_v46  ;;  %v1047_v22 = vmul.f32 %v9602_v0, %v1013_v17 }
 0x26c   :  { %v1048_v23 = vmul.f32 %v9602_v0, %v1014_v42  ;;  %v1049_v43 = vmul.f32 %v9602_v0, %v1015_v48  ;;  %v1050_v34 = vmul.f32 %v9602_v0, %v1016_v28  ;;  %v1051_v25 = vmul.f32 %v9602_v0, %v1017_v3 }
 0x26d   :  { %v10977_v47 = vmul.f32 %v10964_v62, %v1074_v6  ;;  %v1052_v53 = vmul.f32 %v9602_v0, %v1018_v39  ;;  %v1053_v31 = vmul.f32 %v9602_v0, %v1019_v30  ;;  %v1054_v35 = vmul.f32 %v9602_v0, %v1020_v38 }
 0x26e   :  { %v1055_v29 = vmul.f32 %v9602_v0, %v1021_v50  ;;  %v1056_v56 = vmul.f32 %v9602_v0, %v1022_v10  ;;  %v1057_v55 = vmul.f32 %v9602_v0, %v1023_v54  ;;  %v1058_v51 = vmul.f32 %v9602_v0, %v1024_v7 }
 0x26f   :  { %v1059_v19 = vmul.f32 %v9602_v0, %v1025_v37  ;;  %v1060_v59 = vmul.f32 %v9602_v0, %v1026_v13  ;;  %v1061_v61 = vmul.f32 %v9602_v0, %v1027_v60  ;;  %v1062_v5 = vmul.f32 %v9602_v0, %v1028_v49 }
 0x270   :  { %v1063_v36 = vmul.f32 %v9602_v0, %v1029_v24  ;;  %v1064_v45 = vmul.f32 %v9602_v0, %v1030_v1  ;;  %v1065_v27 = vmul.f32 %v9602_v0, %v1031_v12  ;;  %v1066_v46 = vmul.f32 %v9602_v0, %v1032_v2 }
 0x271   :  { %v1067_v17 = vmul.f32 %v9602_v0, %v1033_v41  ;;  %v1068_v42 = vmul.f32 %v9602_v0, %v1034_v52  ;;  %v1069_v48 = vmul.f32 %v9602_v0, %v1035_v11  ;;  %v1070_v28 = vmul.f32 %v9602_v0, %v1036_v57  ;;  %v11000_v52 = vld [vmem:[%s16903_s14 + $0x5] ss:$0 sm:$0xff] }
 0x272   :  { %v1071_v3 = vmul.f32 %v9602_v0, %v1037_v58  ;;  %v1072_v39 = vmul.f32 %v9602_v0, %v1038_v32  ;;  %v1075_v30 = vmul.f32 %v9602_v0, %v1041_v40  ;;  %v1073_v38 = vmul.f32 %v9602_v0, %v1039_v33 }
 0x273   :  { %v1076_v50 = vmul.f32 %v9602_v0, %v1042_v18  ;;  %v1078_v10 = vmul.f32 %v10964_v62, %v1045_v63  ;;  %v1079_v54 = vmul.f32 %v10964_v62, %v1046_v16  ;;  %v1080_v7 = vmul.f32 %v10964_v62, %v1047_v22 }
 0x274   :  { %v1081_v37 = vmul.f32 %v10964_v62, %v1048_v23  ;;  %v1082_v13 = vmul.f32 %v10964_v62, %v1049_v43  ;;  %v1083_v60 = vmul.f32 %v10964_v62, %v1050_v34  ;;  %v1084_v49 = vmul.f32 %v10964_v62, %v1051_v25 }
 0x275   :  { %v1085_v58 = vmul.f32 %v10964_v62, %v1052_v53  ;;  %v1086_v32 = vmul.f32 %v10964_v62, %v1053_v31  ;;  %v1087_v33 = vmul.f32 %v10964_v62, %v1054_v35  ;;  %v1088_v40 = vmul.f32 %v10964_v62, %v1055_v29 }
 0x276   :  { %v1089_v18 = vmul.f32 %v10964_v62, %v1056_v56  ;;  %v1090_v24 = vmul.f32 %v10964_v62, %v1057_v55  ;;  %v1091_v1 = vmul.f32 %v10964_v62, %v1058_v51  ;;  %v1092_v12 = vmul.f32 %v10964_v62, %v1059_v19 }
 0x277   :  { %v1093_v0 = vmul.f32 %v10964_v62, %v1060_v59  ;;  %v1094_v2 = vmul.f32 %v10964_v62, %v1061_v61  ;;  %v1095_v41 = vmul.f32 %v10964_v62, %v1062_v5  ;;  %v1096_v11 = vmul.f32 %v10964_v62, %v1063_v36 }
 0x278   :  { %v1097_v6 = vmul.f32 %v10964_v62, %v1064_v45  ;;  %v1098_v57 = vmul.f32 %v10964_v62, %v1065_v27  ;;  %v1099_v63 = vmul.f32 %v10964_v62, %v1066_v46  ;;  %v1100_v16 = vmul.f32 %v10964_v62, %v1067_v17 }
 0x279   :  { %v1101_v22 = vmul.f32 %v10964_v62, %v1068_v42  ;;  %v11009_v23 = vmul.f32 %v10964_v62, %v1069_v48  ;;  %v11012_v43 = vmul.f32 %v10964_v62, %v1070_v28  ;;  %v11015_v34 = vmul.f32 %v10964_v62, %v1071_v3 }
 0x27a   :  { %v11018_v25 = vmul.f32 %v10964_v62, %v1072_v39  ;;  %v11021_v53 = vmul.f32 %v10964_v62, %v1073_v38  ;;  %v11024_v31 = vmul.f32 %v10964_v62, %v1075_v30  ;;  %v1113_v35 = vadd.f32 %v11000_v52, %v1080_v7 }
 0x27b   :  { %v1114_v29 = vadd.f32 %v11000_v52, %v1081_v37  ;;  %v1111_v56 = vadd.f32 %v11000_v52, %v1078_v10  ;;  %v1112_v55 = vadd.f32 %v11000_v52, %v1079_v54  ;;  %v1115_v51 = vadd.f32 %v11000_v52, %v1082_v13 }
 0x27c   :  { %v1116_v19 = vadd.f32 %v11000_v52, %v1083_v60  ;;  %v1117_v59 = vadd.f32 %v11000_v52, %v1084_v49  ;;  %v1118_v61 = vadd.f32 %v11000_v52, %v1085_v58  ;;  %v1145_v5 = vmax.f32 %v1113_v35, 0.0 }
 0x27d   :  { %v1146_v36 = vmax.f32 %v1114_v29, 0.0  ;;  %v1143_v45 = vmax.f32 %v1111_v56, 0.0  ;;  %v1144_v27 = vmax.f32 %v1112_v55, 0.0  ;;  %v1147_v46 = vmax.f32 %v1115_v51, 0.0 }
 0x27e   :  { %v1148_v17 = vmax.f32 %v1116_v19, 0.0  ;;  %v1149_v42 = vmax.f32 %v1117_v59, 0.0  ;;  %v1150_v48 = vmax.f32 %v1118_v61, 0.0  ;;  %v1119_v39 = vadd.f32 %v11000_v52, %v1086_v32 }
 0x27f   :  { %v1176_v28 = vpack.c.bf16 %v1146_v36, %v1145_v5  ;;  %v1175_v3 = vpack.c.bf16 %v1144_v27, %v1143_v45  ;;  %v1120_v30 = vadd.f32 %v11000_v52, %v1087_v33  ;;  %v1109_v38 = vmul.f32 %v10964_v62, %v1076_v50 }
 0x280   :  { %v1177_v10 = vpack.c.bf16 %v1148_v17, %v1147_v46  ;;  %v11038_v54 = vadd.f32 %v11000_v52, %v1088_v40  ;;  %v11041_v7 = vadd.f32 %v11000_v52, %v1089_v18  ;;  %v1151_v37 = vmax.f32 %v1119_v39, 0.0 }
 0x281   :  { %9121 = vmatprep.mubr.msk.bf16.mxu0 %vm836_vm1, %v1175_v3  ;;  %v1152_v13 = vmax.f32 %v1120_v30, 0.0  ;;  %v1123_v60 = vadd.f32 %v11000_v52, %v1090_v24  ;;  %v1124_v49 = vadd.f32 %v11000_v52, %v1091_v1  ;;  %v1178_v58 = vpack.c.bf16 %v1150_v48, %v1149_v42 }
 0x282   :  { %9122 = vmatmul.mubr.msk.bf16.vlgmr.msra.gmra.mxu0 %vm836_vm1, %v1176_v28  ;;  %v1153_v62 = vmax.f32 %v11038_v54, 0.0  ;;  %v1125_v50 = vadd.f32 %v11000_v52, %v1092_v12  ;;  %v1126_v32 = vadd.f32 %v11000_v52, %v1093_v0  ;;  %v1154_v33 = vmax.f32 %v11041_v7, 0.0 }
 0x283   :  { %9125 = vmatprep.mubr.msk.bf16.mxu0 %vm836_vm1, %v1177_v10  ;;  %9188 = vmatpush3.bf16.msra.mxu0 %v10650_v44  ;;  %v1155_v40 = vmax.f32 %v1123_v60, 0.0  ;;  %v1156_v18 = vmax.f32 %v1124_v49, 0.0  ;;  %v1127_v24 = vadd.f32 %v11000_v52, %v1094_v2  ;;  %v1179_v1 = vpack.c.bf16 %v1152_v13, %v1151_v37 }
 0x284   :  { %v1157_v35 = vmax.f32 %v1125_v50, 0.0  ;;  %v1158_v29 = vmax.f32 %v1126_v32, 0.0  ;;  %v1128_v56 = vadd.f32 %v11000_v52, %v1095_v41  ;;  %v1129_v12 = vadd.f32 %v11000_v52, %v1096_v11 }
 0x285   :  { %v1181_v55 = vpack.c.bf16 %v1156_v18, %v1155_v40  ;;  %v1159_v51 = vmax.f32 %v1127_v24, 0.0  ;;  %v1130_v0 = vadd.f32 %v11000_v52, %v1097_v6  ;;  %v1131_v44 = vadd.f32 %v11000_v52, %v1098_v57 }
 0x286   :  { %v1182_v19 = vpack.c.bf16 %v1158_v29, %v1157_v35  ;;  %v1160_v59 = vmax.f32 %v1128_v56, 0.0  ;;  %v1132_v61 = vadd.f32 %v11000_v52, %v1099_v63  ;;  %v1161_v5 = vmax.f32 %v1129_v12, 0.0 }
 0x287   :  { %v1162_v36 = vmax.f32 %v1130_v0, 0.0  ;;  %v1133_v2 = vadd.f32 %v11000_v52, %v1100_v16  ;;  %v1134_v45 = vadd.f32 %v11000_v52, %v1101_v22  ;;  %v1163_v41 = vmax.f32 %v1131_v44, 0.0 }
 0x288   :  { %v1183_v27 = vpack.c.bf16 %v1160_v59, %v1159_v51  ;;  %v1164_v46 = vmax.f32 %v1132_v61, 0.0  ;;  %v1135_v11 = vadd.f32 %v11000_v52, %v11009_v23  ;;  %v1136_v57 = vadd.f32 %v11000_v52, %v11012_v43 }
 0x289   :  { %v1184_v17 = vpack.c.bf16 %v1162_v36, %v1161_v5  ;;  %v1165_v6 = vmax.f32 %v1133_v2, 0.0  ;;  %v1166_v42 = vmax.f32 %v1134_v45, 0.0  ;;  %v1137_v16 = vadd.f32 %v11000_v52, %v11015_v34 }
 0x28a   :  { %9126 = vmatmul.mubr.msk.bf16.gmra.mxu0 %vm836_vm1, %v1178_v58  ;;  %v1185_v63 = vpack.c.bf16 %v1164_v46, %v1163_v41  ;;  %v1167_v48 = vmax.f32 %v1135_v11, 0.0  ;;  %v1138_v22 = vadd.f32 %v11000_v52, %v11018_v25  ;;  %v1168_v23 = vmax.f32 %v1136_v57, 0.0 }
 0x28b   :  { %9129 = vmatprep.mubr.msk.bf16.mxu0 %vm836_vm1, %v1179_v1  ;;  %v1186_v28 = vpack.c.bf16 %v1166_v42, %v1165_v6  ;;  %v1139_v3 = vadd.f32 %v11000_v52, %v11021_v53  ;;  %v1140_v43 = vadd.f32 %v11000_v52, %v10977_v47  ;;  %v1169_v39 = vmax.f32 %v1137_v16, 0.0  ;;  %v9565_v47 = vld [vmem:[%s16894_s5] sm:$0xff]  }
 0x28c   :  { %v1170_v30 = vmax.f32 %v1138_v22, 0.0  ;;  %v1141_v10 = vadd.f32 %v11000_v52, %v11024_v31  ;;  %v1142_v34 = vadd.f32 %v11000_v52, %v1109_v38  ;;  %v1187_v54 = vpack.c.bf16 %v1168_v23, %v1167_v48  ;;  %9153 = vmatprep.subr.bf16.mxu1 %v9565_v47  ;;  %v11127_v53 = vld [vmem:[%s16903_s14 + $0x6] ss:$0 sm:$0xff] }
 0x28d   :  { %v1171_v7 = vmax.f32 %v1139_v3, 0.0  ;;  %v1172_v25 = vmax.f32 %v1140_v43, 0.0  ;;  %v1180_v58 = vpack.c.bf16 %v1154_v33, %v1153_v62  ;;  %9154 = vmatpush3.bf16.msra.mxu1 %v9565_v47 }
 0x28e   :  { %v1188_v37 = vpack.c.bf16 %v1170_v30, %v1169_v39  ;;  %v1173_v13 = vmax.f32 %v1141_v10, 0.0  ;;  %v1174_v60 = vmax.f32 %v1142_v34, 0.0 }
 0x28f   :  { %v1189_v49 = vpack.c.bf16 %v1172_v25, %v1171_v7 }
 0x290   :  { %v1190_v50 = vpack.c.bf16 %v1174_v60, %v1173_v13 }
 0x292   :  { %9130 = vmatmul.mubr.msk.bf16.gmra.mxu0 %vm836_vm1, %v1180_v58 }
 0x293   :  { %9133 = vmatprep.mubr.msk.bf16.mxu0 %vm836_vm1, %v1181_v55 }
 0x29a   :  { %9134 = vmatmul.mubr.msk.bf16.gmra.mxu0 %vm836_vm1, %v1182_v19 }
 0x29b   :  { %9137 = vmatprep.mubr.msk.bf16.mxu0 %vm836_vm1, %v1183_v27 }
 0x2a2   :  { %9138 = vmatmul.mubr.msk.bf16.gmra.mxu0 %vm836_vm1, %v1184_v17 }
 0x2a3   :  { %9141 = vmatprep.mubr.msk.bf16.mxu0 %vm836_vm1, %v1185_v63 }
 0x2aa   :  { %9142 = vmatmul.mubr.msk.bf16.gmra.mxu0 %vm836_vm1, %v1186_v28 }
 0x2ab   :  { %9145 = vmatprep.mubr.msk.bf16.mxu0 %vm836_vm1, %v1187_v54  ;;  %v11187_v54 = vld [vmem:[%s16896_s7 + $0x38] sm:$0xff]  }
 0x2ac   :  { %9221 = vmatprep.subr.bf16.mxu1 %v11187_v54 }
 0x2b2   :  { %9146 = vmatmul.mubr.msk.bf16.gmra.mxu0 %vm836_vm1, %v1188_v37 }
 0x2b3   :  { %9149 = vmatprep.mubr.msk.bf16.mxu0 %vm836_vm1, %v1189_v49 }
 0x2ba   :  { %9150 = vmatmul.mubr.msk.bf16.gmra.mxu0 %vm836_vm1, %v1190_v50 }
 0x2bb   :  { %9189 = vmatprep.mubr.msk.bf16.mxu0 %vm109_vm0, %v10062_v4  ;;  %v17128_v4 = vld [vmem:[#allocation5_spill] sm:$0xff] }
 0x2bc   :  { %17136 = vst [vmem:[#allocation5_spill] sm:$0xff] %v11187_v54 }
 0x2c2   :  { %9190 = vmatmul.mubr.msk.bf16.vlgmr.msra.gmra.mxu0 %vm109_vm0, %v10073_v8  ;;  %v17129_v8 = vld [vmem:[#allocation6_spill] sm:$0xff] }
 0x2c3   :  { %9193 = vmatprep.mubr.msk.bf16.mxu0 %vm109_vm0, %v10075_v9  ;;  %v17130_v9 = vld [vmem:[#allocation7_spill] sm:$0xff] }
 0x2ca   :  { %9194 = vmatmul.mubr.msk.bf16.gmra.mxu0 %vm109_vm0, %v10095_v14  ;;  %v17131_v14 = vld [vmem:[#allocation8_spill] sm:$0xff] }
 0x2cb   :  { %9197 = vmatprep.mubr.msk.bf16.mxu0 %vm109_vm0, %v10097_v15  ;;  %v17132_v15 = vld [vmem:[#allocation9_spill] sm:$0xff] }
 0x2d2   :  { %9198 = vmatmul.mubr.msk.bf16.gmra.mxu0 %vm109_vm0, %v10115_v20  ;;  %v17133_v20 = vld [vmem:[#allocation10_spill] sm:$0xff] }
 0x2d3   :  { %9201 = vmatprep.mubr.msk.bf16.mxu0 %vm109_vm0, %v10117_v21  ;;  %v17134_v21 = vld [vmem:[#allocation11_spill] sm:$0xff] }
 0x2da   :  { %9202 = vmatmul.mubr.msk.bf16.gmra.mxu0 %vm109_vm0, %v10135_v26  ;;  %v17135_v26 = vld [vmem:[#allocation12_spill] sm:$0xff] }
 0x2db   :  { %9205 = vmatprep.mubr.msk.bf16.mxu0 %vm109_vm0, %v17128_v4 }
 0x2e2   :  { %9206 = vmatmul.mubr.msk.bf16.gmra.mxu0 %vm109_vm0, %v17129_v8 }
 0x2e3   :  { %9209 = vmatprep.mubr.msk.bf16.mxu0 %vm109_vm0, %v17130_v9 }
 0x2ea   :  { %9210 = vmatmul.mubr.msk.bf16.gmra.mxu0 %vm109_vm0, %v17131_v14 }
 0x2eb   :  { %9213 = vmatprep.mubr.msk.bf16.mxu0 %vm109_vm0, %v17132_v15 }
 0x2f2   :  { %9214 = vmatmul.mubr.msk.bf16.gmra.mxu0 %vm109_vm0, %v17133_v20 }
 0x2f3   :  { %9217 = vmatprep.mubr.msk.bf16.mxu0 %vm109_vm0, %v17134_v21 }
 0x2fa   :  { %9218 = vmatmul.mubr.msk.bf16.gmra.mxu0 %vm109_vm0, %v17135_v26 }
 0x342   :  { %v9123_v52 = vpop.f32.mrf.mxu0 }
 0x343   :  { %v11133_v32 = vadd.f32 %v9123_v52, %v11127_v53 }
 0x344   :  { %v1306_v31 = vpop.f32.mrf.mxu0 }
 0x345   :  { %v11130_v38 = vadd.f32 %v1306_v31, %v11127_v53  ;;  %v1505_v35 = vmul.f32 %v11133_v32, %v11133_v32  ;;  %v1436_v51 = vsel %vm109_vm0, %v11133_v32, 0.0 }
 0x346   :  { %v9124_v62 = vpop.f32.mrf.mxu0 }
 0x347   :  { %v1503_v40 = vmul.f32 %v11130_v38, %v11130_v38  ;;  %v11138_v18 = vadd.f32 %v9124_v62, %v11127_v53  ;;  %v1433_v29 = vsel %vm109_vm0, %v11130_v38, 0.0  ;;  %v1538_v45 = vsel %vm109_vm0, %v1505_v35, 0.0 }
 0x348   :  { %v1309_v33 = vpop.f32.mrf.mxu0 }
 0x349   :  { %v11141_v24 = vadd.f32 %v1309_v33, %v11127_v53  ;;  %v1535_v19 = vsel %vm109_vm0, %v1503_v40, 0.0  ;;  %v1506_v59 = vmul.f32 %v11138_v18, %v11138_v18  ;;  %v1438_v27 = vsel %vm109_vm0, %v11138_v18, 0.0 }
 0x34a   :  { %v9127_v1 = vpop.f32.mrf.mxu0 }
 0x34b   :  { %v1434_v56 = vsel %vm109_vm0, %v11141_v24, 0.0  ;;  %v1504_v55 = vmul.f32 %v11141_v24, %v11141_v24  ;;  %v11164_v41 = vadd.f32 %v9127_v1, %v11127_v53  ;;  %v1540_v42 = vsel %vm109_vm0, %v1506_v59, 0.0 }
 0x34c   :  { %v1435_v12 = vadd.f32 %v1434_v56, %v1433_v29  ;;  %v1322_v0 = vpop.f32.mrf.mxu0 }
 0x34d   :  { %v1536_v44 = vsel %vm109_vm0, %v1504_v55, 0.0  ;;  %v11158_v61 = vadd.f32 %v1322_v0, %v11127_v53  ;;  %v1509_v23 = vmul.f32 %v11164_v41, %v11164_v41  ;;  %v1444_v7 = vsel %vm109_vm0, %v11164_v41, 0.0 }
 0x34e   :  { %v1437_v5 = vadd.f32 %v1436_v51, %v1435_v12  ;;  %v1537_v36 = vadd.f32 %v1536_v44, %v1535_v19  ;;  %v9128_v2 = vpop.f32.mrf.mxu0 }
 0x34f   :  { %v1507_v46 = vmul.f32 %v11158_v61, %v11158_v61  ;;  %v1440_v57 = vsel %vm109_vm0, %v11158_v61, 0.0  ;;  %v11172_v63 = vadd.f32 %v9128_v2, %v11127_v53  ;;  %v1546_v50 = vsel %vm109_vm0, %v1509_v23, 0.0 }
 0x350   :  { %v1539_v11 = vadd.f32 %v1538_v45, %v1537_v36  ;;  %v1439_v17 = vadd.f32 %v1438_v27, %v1437_v5  ;;  %v1325_v6 = vpop.f32.mrf.mxu0 }
 0x351   :  { %v11175_v48 = vadd.f32 %v1325_v6, %v11127_v53  ;;  %v1542_v3 = vsel %vm109_vm0, %v1507_v46, 0.0  ;;  %v1510_v25 = vmul.f32 %v11172_v63, %v11172_v63  ;;  %v1446_v4 = vsel %vm109_vm0, %v11172_v63, 0.0 }
 0x352   :  { %v1441_v16 = vadd.f32 %v1440_v57, %v1439_v17  ;;  %v1541_v22 = vadd.f32 %v1540_v42, %v1539_v11  ;;  %v9131_v28 = vpop.f32.mrf.mxu0 }
 0x353   :  { %v1442_v43 = vsel %vm109_vm0, %v11175_v48, 0.0  ;;  %v1508_v39 = vmul.f32 %v11175_v48, %v11175_v48  ;;  %v11202_v8 = vadd.f32 %v9131_v28, %v11127_v53  ;;  %v1548_v21 = vsel %vm109_vm0, %v1510_v25, 0.0 }
 0x354   :  { %v1543_v30 = vadd.f32 %v1542_v3, %v1541_v22  ;;  %v1443_v10 = vadd.f32 %v1442_v43, %v1441_v16  ;;  %v1338_v34 = vpop.f32.mrf.mxu0 }
 0x355   :  { %v1544_v37 = vsel %vm109_vm0, %v1508_v39, 0.0  ;;  %v11195_v13 = vadd.f32 %v1338_v34, %v11127_v53  ;;  %v1513_v40 = vmul.f32 %v11202_v8, %v11202_v8  ;;  %v1452_v12 = vsel %vm109_vm0, %v11202_v8, 0.0 }
 0x356   :  { %v1445_v60 = vadd.f32 %v1444_v7, %v1443_v10  ;;  %v1545_v49 = vadd.f32 %v1544_v37, %v1543_v30  ;;  %v9132_v58 = vpop.f32.mrf.mxu0 }
 0x357   :  { %v1511_v9 = vmul.f32 %v11195_v13, %v11195_v13  ;;  %v1448_v26 = vsel %vm109_vm0, %v11195_v13, 0.0  ;;  %v11210_v47 = vadd.f32 %v9132_v58, %v11127_v53  ;;  %v1554_v2 = vsel %vm109_vm0, %v1513_v40, 0.0 }
 0x358   :  { %v1547_v14 = vadd.f32 %v1546_v50, %v1545_v49  ;;  %v1447_v15 = vadd.f32 %v1446_v4, %v1445_v60  ;;  %v1341_v20 = vpop.f32.mrf.mxu0 }
 0x359   :  { %v11213_v52 = vadd.f32 %v1341_v20, %v11127_v53  ;;  %v1550_v1 = vsel %vm109_vm0, %v1511_v9, 0.0  ;;  %v1514_v0 = vmul.f32 %v11210_v47, %v11210_v47  ;;  %v1454_v45 = vsel %vm109_vm0, %v11210_v47, 0.0 }
 0x35a   :  { %v1449_v31 = vadd.f32 %v1448_v26, %v1447_v15  ;;  %v1549_v62 = vadd.f32 %v1548_v21, %v1547_v14  ;;  %v9135_v33 = vpop.f32.mrf.mxu0 }
 0x35b   :  { %v1450_v35 = vsel %vm109_vm0, %v11213_v52, 0.0  ;;  %v1512_v29 = vmul.f32 %v11213_v52, %v11213_v52  ;;  %v11234_v27 = vadd.f32 %v9135_v33, %v11127_v53  ;;  %v1556_v42 = vsel %vm109_vm0, %v1514_v0, 0.0 }
 0x35c   :  { %v1551_v56 = vadd.f32 %v1550_v1, %v1549_v62  ;;  %v1451_v55 = vadd.f32 %v1450_v35, %v1449_v31  ;;  %v1354_v51 = vpop.f32.mrf.mxu0 }
 0x35d   :  { %v1552_v19 = vsel %vm109_vm0, %v1512_v29, 0.0  ;;  %v11228_v59 = vadd.f32 %v1354_v51, %v11127_v53  ;;  %v1517_v43 = vmul.f32 %v11234_v27, %v11234_v27  ;;  %v1460_v37 = vsel %vm109_vm0, %v11234_v27, 0.0 }
 0x35e   :  { %v1453_v44 = vadd.f32 %v1452_v12, %v1451_v55  ;;  %v1553_v5 = vadd.f32 %v1552_v19, %v1551_v56  ;;  %v9136_v36 = vpop.f32.mrf.mxu0 }
 0x35f   :  { %v1515_v46 = vmul.f32 %v11228_v59, %v11228_v59  ;;  %v1456_v57 = vsel %vm109_vm0, %v11228_v59, 0.0  ;;  %v11242_v16 = vadd.f32 %v9136_v36, %v11127_v53  ;;  %v1562_v14 = vsel %vm109_vm0, %v1517_v43, 0.0 }
 0x360   :  { %v1555_v11 = vadd.f32 %v1554_v2, %v1553_v5  ;;  %v1455_v17 = vadd.f32 %v1454_v45, %v1453_v44  ;;  %v1357_v6 = vpop.f32.mrf.mxu0 }
 0x361   :  { %v11245_v22 = vadd.f32 %v1357_v6, %v11127_v53  ;;  %v1558_v39 = vsel %vm109_vm0, %v1515_v46, 0.0  ;;  %v1518_v60 = vmul.f32 %v11242_v16, %v11242_v16  ;;  %v1462_v15 = vsel %vm109_vm0, %v11242_v16, 0.0 }
 0x362   :  { %v1457_v28 = vadd.f32 %v1456_v57, %v1455_v17  ;;  %v1557_v23 = vadd.f32 %v1556_v42, %v1555_v11  ;;  %v9139_v3 = vpop.f32.mrf.mxu0 }
 0x363   :  { %v1458_v30 = vsel %vm109_vm0, %v11245_v22, 0.0  ;;  %v1516_v10 = vmul.f32 %v11245_v22, %v11245_v22  ;;  %v11266_v20 = vadd.f32 %v9139_v3, %v11127_v53  ;;  %v1564_v33 = vsel %vm109_vm0, %v1518_v60, 0.0 }
 0x364   :  { %v1559_v34 = vadd.f32 %v1558_v39, %v1557_v23  ;;  %v1459_v7 = vadd.f32 %v1458_v30, %v1457_v28  ;;  %v1370_v25 = vpop.f32.mrf.mxu0 }
 0x365   :  { %v1560_v49 = vsel %vm109_vm0, %v1516_v10, 0.0  ;;  %v11260_v58 = vadd.f32 %v1370_v25, %v11127_v53  ;;  %v1521_v51 = vmul.f32 %v11266_v20, %v11266_v20  ;;  %v1468_v2 = vsel %vm109_vm0, %v11266_v20, 0.0 }
 0x366   :  { %v1461_v50 = vadd.f32 %v1460_v37, %v1459_v7  ;;  %v1561_v4 = vadd.f32 %v1560_v49, %v1559_v34  ;;  %v9140_v9 = vpop.f32.mrf.mxu0 }
 0x367   :  { %v1519_v21 = vmul.f32 %v11260_v58, %v11260_v58  ;;  %v1464_v40 = vsel %vm109_vm0, %v11260_v58, 0.0  ;;  %v11274_v1 = vadd.f32 %v9140_v9, %v11127_v53  ;;  %v1570_v57 = vsel %vm109_vm0, %v1521_v51, 0.0 }
 0x368   :  { %v1563_v26 = vadd.f32 %v1562_v14, %v1561_v4  ;;  %v1463_v31 = vadd.f32 %v1462_v15, %v1461_v50  ;;  %v1373_v62 = vpop.f32.mrf.mxu0 }
 0x369   :  { %v11277_v35 = vadd.f32 %v1373_v62, %v11127_v53  ;;  %v1566_v12 = vsel %vm109_vm0, %v1519_v21, 0.0  ;;  %v1522_v45 = vmul.f32 %v11274_v1, %v11274_v1  ;;  %v1470_v28 = vsel %vm109_vm0, %v11274_v1, 0.0 }
 0x36a   :  { %v1465_v29 = vadd.f32 %v1464_v40, %v1463_v31  ;;  %v1565_v56 = vadd.f32 %v1564_v33, %v1563_v26  ;;  %v9143_v55 = vpop.f32.mrf.mxu0 }
 0x36b   :  { %v1466_v0 = vsel %vm109_vm0, %v11277_v35, 0.0  ;;  %v1520_v19 = vmul.f32 %v11277_v35, %v11277_v35  ;;  %v11298_v23 = vadd.f32 %v9143_v55, %v11127_v53  ;;  %v1572_v10 = vsel %vm109_vm0, %v1522_v45, 0.0 }
 0x36c   :  { %v1567_v44 = vadd.f32 %v1566_v12, %v1565_v56  ;;  %v1467_v5 = vadd.f32 %v1466_v0, %v1465_v29  ;;  %v1386_v36 = vpop.f32.mrf.mxu0 }
 0x36d   :  { %v1568_v46 = vsel %vm109_vm0, %v1520_v19, 0.0  ;;  %v11292_v11 = vadd.f32 %v1386_v36, %v11127_v53  ;;  %v1525_v50 = vmul.f32 %v11298_v23, %v11298_v23  ;;  %v1476_v31 = vsel %vm109_vm0, %v11298_v23, 0.0 }
 0x36e   :  { %v1469_v17 = vadd.f32 %v1468_v2, %v1467_v5  ;;  %v1569_v6 = vadd.f32 %v1568_v46, %v1567_v44  ;;  %v9144_v42 = vpop.f32.mrf.mxu0 }
 0x36f   :  { %v1523_v3 = vmul.f32 %v11292_v11, %v11292_v11  ;;  %v1472_v34 = vsel %vm109_vm0, %v11292_v11, 0.0  ;;  %v11306_v7 = vadd.f32 %v9144_v42, %v11127_v53  ;;  %v1578_v51 = vsel %vm109_vm0, %v1525_v50, 0.0 }
 0x370   :  { %v1571_v43 = vadd.f32 %v1570_v57, %v1569_v6  ;;  %v1471_v39 = vadd.f32 %v1470_v28, %v1469_v17  ;;  %v1389_v30 = vpop.f32.mrf.mxu0 }
 0x371   :  { %v11309_v25 = vadd.f32 %v1389_v30, %v11127_v53  ;;  %v1574_v4 = vsel %vm109_vm0, %v1523_v3, 0.0  ;;  %v1526_v62 = vmul.f32 %v11306_v7, %v11306_v7  ;;  %v1478_v12 = vsel %vm109_vm0, %v11306_v7, 0.0 }
 0x372   :  { %v1473_v37 = vadd.f32 %v1472_v34, %v1471_v39  ;;  %v1573_v60 = vadd.f32 %v1572_v10, %v1571_v43  ;;  %v9147_v49 = vpop.f32.mrf.mxu0 }
 0x373   :  { %v1474_v9 = vsel %vm109_vm0, %v11309_v25, 0.0  ;;  %v1524_v14 = vmul.f32 %v11309_v25, %v11309_v25  ;;  %v11330_v0 = vadd.f32 %v9147_v49, %v11127_v53  ;;  %v1580_v2 = vsel %vm109_vm0, %v1526_v62, 0.0 }
 0x374   :  { %v1575_v15 = vadd.f32 %v1574_v4, %v1573_v60  ;;  %v1475_v21 = vadd.f32 %v1474_v9, %v1473_v37  ;;  %v1402_v26 = vpop.f32.mrf.mxu0 }
 0x375   :  { %v1576_v33 = vsel %vm109_vm0, %v1524_v14, 0.0  ;;  %v11324_v40 = vadd.f32 %v1402_v26, %v11127_v53  ;;  %v1529_v28 = vmul.f32 %v11330_v0, %v11330_v0  ;;  %v1484_v37 = vsel %vm109_vm0, %v11330_v0, 0.0 }
 0x376   :  { %v1477_v29 = vadd.f32 %v1476_v31, %v1475_v21  ;;  %v1577_v56 = vadd.f32 %v1576_v33, %v1575_v15  ;;  %v9148_v55 = vpop.f32.mrf.mxu0 }
 0x377   :  { %v1527_v19 = vmul.f32 %v11324_v40, %v11324_v40  ;;  %v1480_v45 = vsel %vm109_vm0, %v11324_v40, 0.0  ;;  %v11338_v46 = vadd.f32 %v9148_v55, %v11127_v53  ;;  %v1586_v15 = vsel %vm109_vm0, %v1529_v28, 0.0 }
 0x378   :  { %v1579_v44 = vadd.f32 %v1578_v51, %v1577_v56  ;;  %v1479_v5 = vadd.f32 %v1478_v12, %v1477_v29  ;;  %v1405_v36 = vpop.f32.mrf.mxu0 }
 0x379   :  { %v11341_v17 = vadd.f32 %v1405_v36, %v11127_v53  ;;  %v1582_v3 = vsel %vm109_vm0, %v1527_v19, 0.0  ;;  %v1530_v60 = vmul.f32 %v11338_v46, %v11338_v46  ;;  %v1486_v21 = vsel %vm109_vm0, %v11338_v46, 0.0 }
 0x37a   :  { %v1481_v6 = vadd.f32 %v1480_v45, %v1479_v5  ;;  %v1581_v42 = vadd.f32 %v1580_v2, %v1579_v44  ;;  %v9151_v57 = vpop.f32.mrf.mxu0 }
 0x37b   :  { %v1482_v43 = vsel %vm109_vm0, %v11341_v17, 0.0  ;;  %v1528_v39 = vmul.f32 %v11341_v17, %v11341_v17  ;;  %v11362_v26 = vadd.f32 %v9151_v57, %v11127_v53  ;;  %v1588_v56 = vsel %vm109_vm0, %v1530_v60, 0.0 }
 0x37c   :  { %v1583_v30 = vadd.f32 %v1582_v3, %v1581_v42  ;;  %v1483_v10 = vadd.f32 %v1482_v43, %v1481_v6  ;;  %v1418_v34 = vpop.f32.mrf.mxu0 }
 0x37d   :  { %v1584_v49 = vsel %vm109_vm0, %v1528_v39, 0.0  ;;  %v11356_v50 = vadd.f32 %v1418_v34, %v11127_v53  ;;  %v1533_v36 = vmul.f32 %v11362_v26, %v11362_v26  ;;  %v1492_v3 = vsel %vm109_vm0, %v11362_v26, 0.0 }
 0x37e   :  { %v1485_v4 = vadd.f32 %v1484_v37, %v1483_v10  ;;  %v1585_v9 = vadd.f32 %v1584_v49, %v1583_v30  ;;  %v9152_v14 = vpop.f32.mrf.mxu0 }
 0x37f   :  { %v1531_v31 = vmul.f32 %v11356_v50, %v11356_v50  ;;  %v1488_v55 = vsel %vm109_vm0, %v11356_v50, 0.0  ;;  %v11370_v51 = vadd.f32 %v9152_v14, %v11127_v53  ;;  %v1594_v37 = vsel %vm109_vm0, %v1533_v36, 0.0 }
 0x380   :  { %v1587_v62 = vadd.f32 %v1586_v15, %v1585_v9  ;;  %v1487_v33 = vadd.f32 %v1486_v21, %v1485_v4  ;;  %v1421_v29 = vpop.f32.mrf.mxu0 }
 0x381   :  { %v11373_v12 = vadd.f32 %v1421_v29, %v11127_v53  ;;  %v1590_v2 = vsel %vm109_vm0, %v1531_v31, 0.0  ;;  %v11385_v53 = vld [vmem:[%s16903_s14 + $0x12] ss:$0 sm:$0xff]  ;;  %v1534_v43 = vmul.f32 %v11370_v51, %v11370_v51  ;;  %v1494_v60 = vsel %vm109_vm0, %v11370_v51, 0.0 }
 0x382   :  { %v1489_v19 = vadd.f32 %v1488_v55, %v1487_v33  ;;  %v1589_v44 = vadd.f32 %v1588_v56, %v1587_v62  ;;  %v9191_v5 = vpop.f32.mrf.mxu0 }
 0x383   :  { %v1490_v45 = vsel %vm109_vm0, %v11373_v12, 0.0  ;;  %v1532_v6 = vmul.f32 %v11373_v12, %v11373_v12  ;;  %v1596_v15 = vsel %vm109_vm0, %v1534_v43, 0.0  ;;  %v11400_v21 = vadd.f32 %v9191_v5, %v11385_v53 }
 0x384   :  { %v1591_v42 = vadd.f32 %v1590_v2, %v1589_v44  ;;  %v1491_v57 = vadd.f32 %v1490_v45, %v1489_v19  ;;  %v2048_v28 = vpop.f32.mrf.mxu0 }
 0x385   :  { %v1592_v39 = vsel %vm109_vm0, %v1532_v6, 0.0  ;;  %v11396_v49 = vadd.f32 %v2048_v28, %v11385_v53  ;;  %17138 = vst [vmem:[#allocation7_spill] sm:$0xff] %v11400_v21  ;;  %v2215_v45 = vmul.f32 %v11400_v21, %v11400_v21 }
 0x386   :  { %v1493_v30 = vadd.f32 %v1492_v3, %v1491_v57  ;;  %v1593_v10 = vadd.f32 %v1592_v39, %v1591_v42  ;;  %v9192_v34 = vpop.f32.mrf.mxu0 }
 0x387   :  { %17137 = vst [vmem:[#allocation6_spill] sm:$0xff] %v11396_v49  ;;  %v2213_v56 = vmul.f32 %v11396_v49, %v11396_v49  ;;  %v11408_v55 = vadd.f32 %v9192_v34, %v11385_v53 }
 0x388   :  { %v1495_v4 = vadd.f32 %v1494_v60, %v1493_v30  ;;  %v1595_v9 = vadd.f32 %v1594_v37, %v1593_v10  ;;  %v2051_v14 = vpop.f32.mrf.mxu0 }
 0x389   :  { %v11403_v31 = vadd.f32 %v2051_v14, %v11385_v53  ;;  %17140 = vst [vmem:[#allocation9_spill] sm:$0xff] %v11408_v55  ;;  %v2216_v39 = vmul.f32 %v11408_v55, %v11408_v55 }
 0x38a   :  { %v1496_v62 = vrot.slane %v1495_v4, 4  ;;  %v1597_v33 = vadd.f32 %v1596_v15, %v1595_v9  ;;  %v9195_v29 = vpop.f32.mrf.mxu0 }
 0x38b   :  { %17139 = vst [vmem:[#allocation8_spill] sm:$0xff] %v11403_v31  ;;  %v2175_v19 = vadd.f32 %v11403_v31, %v11396_v49  ;;  %v2214_v44 = vmul.f32 %v11403_v31, %v11403_v31 }
 0x38c   :  { %v1497_v5 = vadd.f32 %v1496_v62, %v1495_v4  ;;  %v1598_v36 = vrot.slane %v1597_v33, 4  ;;  %v2064_v2 = vpop.f32.mrf.mxu0 }
 0x38d   :  { %v2176_v6 = vadd.f32 %v2175_v19, %v11400_v21  ;;  %v2245_v42 = vadd.f32 %v2214_v44, %v2213_v56  ;;  %v11418_v57 = vadd.f32 %v2064_v2, %v11385_v53 }
 0x38e   :  { %v1498_v28 = vrot.slane %v1497_v5, 2  ;;  %v1599_v3 = vadd.f32 %v1598_v36, %v1597_v33  ;;  %v9196_v43 = vpop.f32.mrf.mxu0 }
 0x38f   :  { %17141 = vst [vmem:[#allocation10_spill] sm:$0xff] %v11418_v57  ;;  %v2246_v30 = vadd.f32 %v2245_v42, %v2215_v45  ;;  %v2177_v10 = vadd.f32 %v2176_v6, %v11408_v55  ;;  %v2217_v9 = vmul.f32 %v11418_v57, %v11418_v57  ;;  %v11433_v6 = vadd.f32 %v9195_v29, %v11385_v53 }
 0x390   :  { %v1499_v34 = vadd.f32 %v1498_v28, %v1497_v5  ;;  %v1600_v37 = vrot.slane %v1599_v3, 2  ;;  %v2067_v60 = vpop.f32.mrf.mxu0 }
 0x391   :  { %v2178_v4 = vadd.f32 %v2177_v10, %v11418_v57  ;;  %v2247_v14 = vadd.f32 %v2246_v30, %v2216_v39  ;;  %v11427_v15 = vadd.f32 %v2067_v60, %v11385_v53  ;;  %17143 = vst [vmem:[#allocation12_spill] sm:$0xff] %v11433_v6  ;;  %v11438_v30 = vadd.f32 %v9196_v43, %v11385_v53 }
 0x392   :  { %v1500_v62 = vrot.slane %v1499_v34, 1  ;;  %v1601_v33 = vadd.f32 %v1600_v37, %v1599_v3  ;;  %v9199_v56 = vpop.f32.mrf.mxu0  ;;  %v2219_v43 = vmul.f32 %v11433_v6, %v11433_v6 }
 0x393   :  { %17142 = vst [vmem:[#allocation11_spill] sm:$0xff] %v11427_v15  ;;  %v2248_v19 = vadd.f32 %v2247_v14, %v2217_v9  ;;  %v2179_v44 = vadd.f32 %v2178_v4, %v11427_v15  ;;  %v2218_v5 = vmul.f32 %v11427_v15, %v11427_v15  ;;  %17144 = vst [vmem:[#allocation13_spill] sm:$0xff] %v11438_v30 }
 0x394   :  { %v1501_v36 = vadd.f32 %v1500_v62, %v1499_v34  ;;  %v1602_v2 = vrot.slane %v1601_v33, 1  ;;  %v2080_v45 = vpop.f32.mrf.mxu0  ;;  %v11442_v37 = vadd.f32 %v9199_v56, %v11385_v53 }
 0x395   :  { %v2180_v3 = vadd.f32 %v2179_v44, %v11433_v6  ;;  %v2249_v10 = vadd.f32 %v2248_v19, %v2218_v5  ;;  %v11449_v4 = vadd.f32 %v2080_v45, %v11385_v53 }
 0x396   :  { %v11435_v42 = vmul.f32 0.00390625, %v1501_v36  ;;  %v1603_v28 = vadd.f32 %v1602_v2, %v1601_v33  ;;  %v9200_v39 = vpop.f32.mrf.mxu0  ;;  %17145 = vst [vmem:[#allocation14_spill] sm:$0xff] %v11442_v37  ;;  %v2220_v33 = vmul.f32 %v11438_v30, %v11438_v30  ;;  %v2223_v19 = vmul.f32 %v11442_v37, %v11442_v37 }
 0x397   :  { %17146 = vst [vmem:[#allocation15_spill] sm:$0xff] %v11449_v4  ;;  %v2250_v56 = vadd.f32 %v2249_v10, %v2219_v43  ;;  %v2181_v5 = vadd.f32 %v2180_v3, %v11438_v30  ;;  %v2221_v36 = vmul.f32 %v11449_v4, %v11449_v4  ;;  %v11461_v2 = vadd.f32 %v9200_v39, %v11385_v53 }
 0x398   :  { %v1604_v60 = vmul.f32 0.00390625, %v1603_v28  ;;  %v1605_v34 = vmul.f32 %v11435_v42, %v11435_v42  ;;  %v2083_v9 = vpop.f32.mrf.mxu0  ;;  %v1627_v10 = vsub.f32 %v11292_v11, %v11435_v42  ;;  %v1628_v11 = vsub.f32 %v11309_v25, %v11435_v42 }
 0x399   :  { %17147 = vst [vmem:[#allocation16_spill] sm:$0xff] %v11461_v2  ;;  %v2251_v29 = vadd.f32 %v2250_v56, %v2220_v33  ;;  %v1632_v25 = vsub.f32 %v11341_v17, %v11435_v42  ;;  %v17159_v15 = vsub.f32 %v11373_v12, %v11435_v42  ;;  %v17160_v55 = vsub.f32 %v11130_v38, %v11435_v42 }
 0x39a   :  { %v1606_v14 = vsub.f32 %v1604_v60, %v1605_v34  ;;  %v9203_v62 = vpop.f32.mrf.mxu0  ;;  %v11505_v60 = vadd.f32 %v2083_v9, %v11385_v53  ;;  %v17163_v12 = vsub.f32 %v11133_v32, %v11435_v42  ;;  %v17164_v38 = vsub.f32 %v11138_v18, %v11435_v42 }
 0x39b   :  { %v2252_v56 = vadd.f32 %v2251_v29, %v2221_v36  ;;  %v17165_v49 = vsub.f32 %v11158_v61, %v11435_v42  ;;  %v17167_v54 = vsub.f32 %v11175_v48, %v11435_v42  ;;  %v17170_v61 = vsub.f32 %v11195_v13, %v11435_v42 }
 0x39c   :  { %v1639_v44 = vadd.f32 1e-05, %v1606_v14  ;;  %v2096_v45 = vpop.f32.mrf.mxu0  ;;  %17148 = vst [vmem:[#allocation17_spill] sm:$0xff] %v11505_v60  ;;  %v2222_v39 = vmul.f32 %v11505_v60, %v11505_v60  ;;  %v17172_v48 = vsub.f32 %v11202_v8, %v11435_v42  ;;  %v17175_v13 = vsub.f32 %v11245_v22, %v11435_v42 }
 0x39d   :  { %v11526_v29 = vadd.f32 %v2096_v45, %v11385_v53  ;;  %v17177_v8 = vsub.f32 %v11242_v16, %v11435_v42  ;;  %v17180_v22 = vsub.f32 %v11266_v20, %v11435_v42 }
 0x39e   :  { %9603 = vrsqrt.f32 %v1639_v44  ;;  %v9204_v14 = vpop.f32.mrf.mxu0  ;;  %v2182_v44 = vadd.f32 %v2181_v5, %v11449_v4  ;;  %v11523_v5 = vadd.f32 %v9203_v62, %v11385_v53  ;;  %v2253_v34 = vadd.f32 %v2252_v56, %v2222_v39 }
 0x39f   :  { %17150 = vst [vmem:[#allocation19_spill] sm:$0xff] %v11526_v29  ;;  %v11529_v36 = vadd.f32 %v9204_v14, %v11385_v53  ;;  %v1629_v62 = vsub.f32 %v11298_v23, %v11435_v42  ;;  %v2224_v23 = vmul.f32 %v11461_v2, %v11461_v2 }
 0x3a0   :  { %v2099_v28 = vpop.f32.mrf.mxu0  ;;  %v2183_v9 = vadd.f32 %v2182_v44, %v11505_v60  ;;  %17149 = vst [vmem:[#allocation18_spill] sm:$0xff] %v11523_v5  ;;  %v2254_v39 = vadd.f32 %v2253_v34, %v2223_v19 }
 0x3a1   :  { %17151 = vst [vmem:[#allocation20_spill] sm:$0xff] %v11529_v36  ;;  %v11533_v44 = vadd.f32 %v2099_v28, %v11385_v53  ;;  %v1630_v28 = vsub.f32 %v11306_v7, %v11435_v42  ;;  %v11566_v7 = vmul.f32 %v11526_v29, %v11526_v29 }
 0x3a2   :  { %v9207_v30 = vpop.f32.mrf.mxu0  ;;  %v2184_v43 = vadd.f32 %v2183_v9, %v11442_v37  ;;  %v11588_v37 = vadd.f32 %v2254_v39, %v2224_v23 }
 0x3a3   :  { %17152 = vst [vmem:[#allocation21_spill] sm:$0xff] %v11533_v44  ;;  %v11536_v33 = vadd.f32 %v9207_v30, %v11385_v53  ;;  %v1631_v30 = vsub.f32 %v11324_v40, %v11435_v42  ;;  %v11570_v40 = vmul.f32 %v11529_v36, %v11529_v36  ;;  %v11574_v17 = vmul.f32 %v11533_v44, %v11533_v44 }
 0x3a4   :  { %v2112_v3 = vpop.f32.mrf.mxu0  ;;  %v2185_v56 = vadd.f32 %v2184_v43, %v11461_v2 }
 0x3a5   :  { %17153 = vst [vmem:[#allocation22_spill] sm:$0xff] %v11536_v33  ;;  %v11543_v45 = vadd.f32 %v2112_v3, %v11385_v53  ;;  %v11578_v19 = vmul.f32 %v11536_v33, %v11536_v33 }
 0x3a6   :  { %v9208_v60 = vpop.f32.mrf.mxu0  ;;  %v11586_v2 = vadd.f32 %v2185_v56, %v11526_v29  ;;  %v17162_v29 = vsub.f32 %v11141_v24, %v11435_v42 }
 0x3a7   :  { %17154 = vst [vmem:[#allocation23_spill] sm:$0xff] %v11543_v45  ;;  %v11546_v14 = vadd.f32 %v9208_v60, %v11385_v53  ;;  %v11559_v60 = vmul.f32 %v11523_v5, %v11523_v5  ;;  %17157 = vst [vmem:[#allocation26_spill] sm:$0xff] %v11578_v19  ;;  %v11592_v4 = vmul.f32 %v11543_v45, %v11543_v45 }
 0x3a8   :  { %v2115_v9 = vpop.f32.mrf.mxu0 }
 0x3a9   :  { %17155 = vst [vmem:[#allocation24_spill] sm:$0xff] %v11546_v14  ;;  %v11562_v3 = vadd.f32 %v2115_v9, %v11385_v53  ;;  %v11583_v9 = vld [vmem:[%s16903_s14 + $0x7] ss:$0 sm:$0xff]  ;;  %v11596_v6 = vmul.f32 %v11546_v14, %v11546_v14 }
 0x3aa   :  { %v9211_v34 = vpop.f32.mrf.mxu0 }
 0x3ab   :  { %17156 = vst [vmem:[#allocation25_spill] sm:$0xff] %v11562_v3  ;;  %v9604_v43 = vpop.eup %9603  ;;  %17158 = vst [vmem:[#allocation27_spill] sm:$0xff] %v11596_v6  ;;  %v11606_v39 = vmul.f32 %v11562_v3, %v11562_v3  ;;  %v11609_v56 = vadd.f32 %v9211_v34, %v11385_v53 }
 0x3ac   :  { %v1670_v57 = vmul.f32 %v9604_v43, %v17159_v15  ;;  %v1641_v21 = vmul.f32 %v9604_v43, %v17160_v55  ;;  %v11611_v23 = vpop.f32.mrf.mxu0  ;;  %v1642_v31 = vmul.f32 %v9604_v43, %v17162_v29  ;;  %v1643_v15 = vmul.f32 %v9604_v43, %v17163_v12 }
 0x3ad   :  { %17161 = vst [vmem:[#allocation28_spill] sm:$0xff] %v11606_v39  ;;  %v1644_v55 = vmul.f32 %v9604_v43, %v17164_v38  ;;  %v1645_v6 = vmul.f32 %v9604_v43, %v17165_v49  ;;  %v1646_v24 = vmul.f32 %v9604_v43, %v17167_v54  ;;  %v17168_v29 = vsub.f32 %v11164_v41, %v11435_v42 }
 0x3ae   :  { %v11626_v34 = vmul.f32 %v11583_v9, %v1670_v57  ;;  %v17169_v12 = vsub.f32 %v11172_v63, %v11435_v42  ;;  %v11637_v38 = vpop.f32.mrf.mxu0  ;;  %v1649_v49 = vmul.f32 %v9604_v43, %v17170_v61  ;;  %v17171_v57 = vsub.f32 %v11213_v52, %v11435_v42 }
 0x3af   :  { %v1647_v32 = vmul.f32 %v9604_v43, %v17168_v29  ;;  %v1651_v54 = vmul.f32 %v9604_v43, %v17172_v48  ;;  %v17173_v41 = vsub.f32 %v11210_v47, %v11435_v42  ;;  %v17174_v63 = vsub.f32 %v11228_v59, %v11435_v42 }
 0x3b0   :  { %17166 = vst [vmem:[#allocation29_spill] sm:$0xff] %v11626_v34  ;;  %v1648_v18 = vmul.f32 %v9604_v43, %v17169_v12  ;;  %v1650_v34 = vmul.f32 %v9604_v43, %v17171_v57  ;;  %v1654_v61 = vmul.f32 %v9604_v43, %v17175_v13  ;;  %v17176_v52 = vsub.f32 %v11234_v27, %v11435_v42  ;;  %v2131_v14 = vpop.f32.mrf.mxu0 }
 0x3b1   :  { %v1652_v29 = vmul.f32 %v9604_v43, %v17173_v41  ;;  %v1653_v12 = vmul.f32 %v9604_v43, %v17174_v63  ;;  %v1656_v48 = vmul.f32 %v9604_v43, %v17177_v8  ;;  %v17178_v47 = vsub.f32 %v11260_v58, %v11435_v42 }
 0x3b2   :  { %v1655_v57 = vmul.f32 %v9604_v43, %v17176_v52  ;;  %v17179_v59 = vsub.f32 %v11277_v35, %v11435_v42  ;;  %v1659_v13 = vmul.f32 %v9604_v43, %v17180_v22  ;;  %v17181_v27 = vsub.f32 %v11274_v1, %v11435_v42  ;;  %v9215_v33 = vpop.f32.mrf.mxu0 }
 0x3b3   :  { %v1657_v41 = vmul.f32 %v9604_v43, %v17178_v47  ;;  %v1661_v19 = vmul.f32 %v9604_v43, %v1627_v10  ;;  %v1662_v16 = vmul.f32 %v9604_v43, %v1628_v11  ;;  %v1663_v8 = vmul.f32 %v9604_v43, %v1629_v62 }
 0x3b4   :  { %v1658_v63 = vmul.f32 %v9604_v43, %v17179_v59  ;;  %v1660_v52 = vmul.f32 %v9604_v43, %v17181_v27  ;;  %v1664_v39 = vmul.f32 %v9604_v43, %v1630_v28  ;;  %v1665_v3 = vmul.f32 %v9604_v43, %v1631_v30 }
 0x3b5   :  { %v1666_v58 = vmul.f32 %v9604_v43, %v1632_v25  ;;  %v17182_v47 = vsub.f32 %v11330_v0, %v11435_v42  ;;  %v17183_v59 = vsub.f32 %v11362_v26, %v11435_v42  ;;  %v17184_v22 = vsub.f32 %v11338_v46, %v11435_v42  ;;  %v2144_v0 = vpop.f32.mrf.mxu0 }
 0x3b6   :  { %v17185_v10 = vsub.f32 %v11356_v50, %v11435_v42  ;;  %v17186_v62 = vsub.f32 %v11370_v51, %v11435_v42  ;;  %v1674_v30 = vmul.f32 %v11583_v9, %v1641_v21  ;;  %v1675_v25 = vmul.f32 %v11583_v9, %v1642_v31 }
 0x3b7   :  { %v1667_v35 = vmul.f32 %v9604_v43, %v17182_v47  ;;  %v1671_v20 = vmul.f32 %v9604_v43, %v17183_v59  ;;  %v1668_v1 = vmul.f32 %v9604_v43, %v17184_v22  ;;  %v1676_v26 = vmul.f32 %v11583_v9, %v1643_v15  ;;  %v9216_v21 = vpop.f32.mrf.mxu0 }
 0x3b8   :  { %v1669_v11 = vmul.f32 %v9604_v43, %v17185_v10  ;;  %v1672_v28 = vmul.f32 %v9604_v43, %v17186_v62  ;;  %v1677_v27 = vmul.f32 %v11583_v9, %v1644_v55  ;;  %v1678_v46 = vmul.f32 %v11583_v9, %v1645_v6 }
 0x3b9   :  { %v1679_v47 = vmul.f32 %v11583_v9, %v1646_v24  ;;  %v11697_v50 = vmul.f32 %v11583_v9, %v1647_v32  ;;  %v11700_v59 = vmul.f32 %v11583_v9, %v1648_v18  ;;  %v11703_v51 = vmul.f32 %v11583_v9, %v1649_v49  ;;  %v2147_v32 = vpop.f32.mrf.mxu0  ;;  %v11732_v18 = vld [vmem:[%s16903_s14 + $0x10] ss:$0 sm:$0xff] }
 0x3ba   :  { %v11706_v31 = vmul.f32 %v11583_v9, %v1650_v34  ;;  %v11709_v42 = vmul.f32 %v11583_v9, %v1651_v54  ;;  %v11712_v6 = vmul.f32 %v11583_v9, %v1652_v29  ;;  %v11715_v43 = vmul.f32 %v11583_v9, %v1653_v12 }
 0x3bb   :  { %v11718_v15 = vmul.f32 %v11583_v9, %v1654_v61  ;;  %v11721_v55 = vmul.f32 %v11583_v9, %v1655_v57  ;;  %v11724_v24 = vmul.f32 %v11583_v9, %v1656_v48  ;;  %v11727_v34 = vmul.f32 %v11583_v9, %v1657_v41 }
 0x3bc   :  { %v11735_v49 = vmul.f32 %v11583_v9, %v1658_v63  ;;  %v11738_v54 = vmul.f32 %v11583_v9, %v1659_v13  ;;  %v11741_v29 = vmul.f32 %v11583_v9, %v1660_v52  ;;  %v11744_v12 = vmul.f32 %v11583_v9, %v1661_v19  ;;  %v9219_v63 = vpop.f32.mrf.mxu0 }
 0x3bd   :  { %v11747_v61 = vmul.f32 %v11583_v9, %v1662_v16  ;;  %v11750_v57 = vmul.f32 %v11583_v9, %v1663_v8  ;;  %v11753_v48 = vmul.f32 %v11583_v9, %v1664_v39  ;;  %v11756_v41 = vmul.f32 %v11583_v9, %v1665_v3 }
 0x3be   :  { %v11759_v13 = vmul.f32 %v11583_v9, %v1666_v58  ;;  %v11762_v52 = vmul.f32 %v11583_v9, %v1667_v35  ;;  %v11765_v19 = vmul.f32 %v11583_v9, %v1668_v1  ;;  %v11768_v16 = vmul.f32 %v11583_v9, %v1669_v11 }
 0x3bf   :  { %v1709_v8 = vadd.f32 %v11732_v18, %v1676_v26  ;;  %v1710_v39 = vadd.f32 %v11732_v18, %v1677_v27  ;;  %v2256_v3 = vadd.f32 %v11588_v37, %v11566_v7  ;;  %v2187_v58 = vadd.f32 %v11586_v2, %v11533_v44  ;;  %v2160_v7 = vpop.f32.mrf.mxu0 }
 0x3c0   :  { %v11777_v22 = vmul.f32 %v11583_v9, %v1671_v20  ;;  %v11781_v35 = vadd.f32 %v11611_v23, %v11385_v53  ;;  %v11785_v1 = vadd.f32 %v11637_v38, %v11385_v53  ;;  %v11788_v10 = vadd.f32 %v2131_v14, %v11385_v53 }
 0x3c1   :  { %v1741_v11 = vmax.f32 %v1709_v8, 0.0  ;;  %v1742_v62 = vmax.f32 %v1710_v39, 0.0  ;;  %v2188_v37 = vadd.f32 %v2187_v58, %v11523_v5  ;;  %v2257_v2 = vadd.f32 %v2256_v3, %v11574_v17 }
 0x3c2   :  { %17187 = vst [vmem:[#allocation30_spill] sm:$0xff] %v11781_v35  ;;  %v11793_v20 = vmul.f32 %v11583_v9, %v1672_v28  ;;  %v11797_v23 = vmul.f32 %v11609_v56, %v11609_v56  ;;  %v2233_v38 = vmul.f32 %v11781_v35, %v11781_v35  ;;  %v11802_v14 = vadd.f32 %v9215_v33, %v11385_v53 }
 0x3c3   :  { %v2258_v26 = vadd.f32 %v2257_v2, %v11559_v60  ;;  %v2189_v27 = vadd.f32 %v2188_v37, %v11529_v36  ;;  %v11808_v17 = vmul.f32 %v11785_v1, %v11785_v1  ;;  %v11812_v9 = vmul.f32 %v11788_v10, %v11788_v10  ;;  %v9220_v2 = vpop.f32.mrf.mxu0  ;;  %v17188_v36 = vld [vmem:[#allocation25_spill] sm:$0xff] }
 0x3c4   :  { %v1772_v28 = vpack.c.bf16 %v1742_v62, %v1741_v11  ;;  %v11815_v8 = vadd.f32 %v2144_v0, %v11385_v53  ;;  %v1707_v39 = vadd.f32 %v11732_v18, %v1674_v30  ;;  %v1708_v33 = vadd.f32 %v11732_v18, %v1675_v25 }
 0x3c5   :  { %v2190_v60 = vadd.f32 %v2189_v27, %v11543_v45  ;;  %v2259_v3 = vadd.f32 %v2258_v26, %v11570_v40  ;;  %v11822_v58 = vadd.f32 %v9216_v21, %v11385_v53  ;;  %v1711_v37 = vadd.f32 %v11732_v18, %v1678_v46 }
 0x3c6   :  { %v11827_v11 = vmul.f32 %v11802_v14, %v11802_v14  ;;  %v1739_v0 = vmax.f32 %v1707_v39, 0.0  ;;  %v1740_v62 = vmax.f32 %v1708_v33, 0.0  ;;  %v1712_v30 = vadd.f32 %v11732_v18, %v1679_v47  ;;  %v17189_v39 = vld [vmem:[#allocation22_spill] sm:$0xff]  ;;  %v17190_v47 = vld [vmem:[#allocation28_spill] sm:$0xff] }
 0x3c7   :  { %v2260_v25 = vadd.f32 %v2259_v3, %v11592_v4  ;;  %v2191_v27 = vadd.f32 %v2190_v60, %v17188_v36  ;;  %v1743_v45 = vmax.f32 %v1711_v37, 0.0  ;;  %v11833_v40 = vadd.f32 %v2147_v32, %v11385_v53  ;;  %v9567_v60 = vld [vmem:[%s16896_s7 + $0x30] sm:$0xff]   ;;  %v2163_v3 = vpop.f32.mrf.mxu0 }
 0x3c8   :  { %v11837_v46 = vmul.f32 %v11815_v8, %v11815_v8  ;;  %v1771_v21 = vpack.c.bf16 %v1740_v62, %v1739_v0  ;;  %v1744_v26 = vmax.f32 %v1712_v30, 0.0  ;;  %v11840_v5 = vadd.f32 %v2160_v7, %v11385_v53 }
 0x3c9   :  { %v2192_v33 = vadd.f32 %v2191_v27, %v17189_v39  ;;  %v2261_v44 = vadd.f32 %v2260_v25, %v17190_v47  ;;  %v11846_v4 = vmul.f32 %v11822_v58, %v11822_v58  ;;  %v11849_v32 = vadd.f32 %v9219_v63, %v11385_v53  ;;  %v17191_v63 = vld [vmem:[#allocation26_spill] sm:$0xff]  ;;  %v17192_v25 = vld [vmem:[#allocation24_spill] sm:$0xff]  ;;  %v17194_v47 = vld [vmem:[#allocation27_spill] sm:$0xff] }
 0x3ca   :  { %9155 = vmatprep.mubr.msk.bf16.mxu1 %vm109_vm0, %v1771_v21  ;;  %v1773_v7 = vpack.c.bf16 %v1744_v26, %v1743_v45  ;;  %v11857_v37 = vmul.f32 %v11833_v40, %v11833_v40  ;;  %v11860_v0 = vadd.f32 %v9220_v2, %v11385_v53  ;;  %v1713_v62 = vadd.f32 %v11732_v18, %v11697_v50  ;;  %v17193_v26 = vld [vmem:[#allocation5_spill] sm:$0xff] }
 0x3cb   :  { %v2262_v30 = vadd.f32 %v2261_v44, %v17191_v63  ;;  %v2193_v27 = vadd.f32 %v2192_v33, %v17192_v25  ;;  %9156 = vmatmul.mubr.msk.bf16.vlgmr.msra.gmra.mxu1 %vm109_vm0, %v1772_v28  ;;  %v11869_v21 = vmul.f32 %v11840_v5, %v11840_v5  ;;  %v1714_v45 = vadd.f32 %v11732_v18, %v11700_v59 }
 0x3cc   :  { %9222 = vmatpush3.bf16.msra.mxu1 %v17193_v26  ;;  %9159 = vmatprep.mubr.msk.bf16.mxu1 %vm109_vm0, %v1773_v7  ;;  %v1745_v2 = vmax.f32 %v1713_v62, 0.0  ;;  %v1715_v50 = vadd.f32 %v11732_v18, %v11703_v51  ;;  %v1716_v44 = vadd.f32 %v11732_v18, %v11706_v31  ;;  %v11880_v28 = vadd.f32 %v2163_v3, %v11385_v53  ;;  %v9568_v7 = vld [vmem:[%s16896_s7 + $0x28] sm:$0xff]  }
 0x3cd   :  { %v2194_v33 = vadd.f32 %v2193_v27, %v11781_v35  ;;  %v2263_v63 = vadd.f32 %v2262_v30, %v17194_v47  ;;  %9223 = vmatprep.subr.bf16.mxu1 %v9567_v60  ;;  %v1746_v59 = vmax.f32 %v1714_v45, 0.0  ;;  %v1717_v62 = vadd.f32 %v11732_v18, %v11709_v42 }
 0x3ce   :  { %v1747_v51 = vmax.f32 %v1715_v50, 0.0  ;;  %v1748_v26 = vmax.f32 %v1716_v44, 0.0  ;;  %v11891_v31 = vmul.f32 %v11880_v28, %v11880_v28  ;;  %v1718_v53 = vadd.f32 %v11732_v18, %v11712_v6  ;;  %v9569_v6 = vld [vmem:[%s16896_s7 + $0x20] sm:$0xff]  }
 0x3cf   :  { %v2264_v3 = vadd.f32 %v2263_v63, %v2233_v38  ;;  %v2195_v30 = vadd.f32 %v2194_v33, %v11788_v10  ;;  %v1774_v27 = vpack.c.bf16 %v1746_v59, %v1745_v2  ;;  %v1749_v45 = vmax.f32 %v1717_v62, 0.0 }
 0x3d0   :  { %9224 = vmatpush3.bf16.msra.mxu1 %v9567_v60  ;;  %v1775_v47 = vpack.c.bf16 %v1748_v26, %v1747_v51  ;;  %v1750_v35 = vmax.f32 %v1718_v53, 0.0  ;;  %v1719_v42 = vadd.f32 %v11732_v18, %v11715_v43  ;;  %v1720_v50 = vadd.f32 %v11732_v18, %v11718_v15  ;;  %v9570_v26 = vld [vmem:[%s16896_s7 + $0x18] sm:$0xff]  }
 0x3d1   :  { %v2196_v44 = vadd.f32 %v2195_v30, %v11609_v56  ;;  %v2265_v25 = vadd.f32 %v2264_v3, %v11812_v9  ;;  %9225 = vmatprep.subr.bf16.mxu1 %v9568_v7  ;;  %v1721_v38 = vadd.f32 %v11732_v18, %v11721_v55  ;;  %v1722_v60 = vadd.f32 %v11732_v18, %v11724_v24 }
 0x3d2   :  { %v1776_v2 = vpack.c.bf16 %v1750_v35, %v1749_v45  ;;  %v1751_v43 = vmax.f32 %v1719_v42, 0.0  ;;  %v1752_v33 = vmax.f32 %v1720_v50, 0.0  ;;  %v1723_v15 = vadd.f32 %v11732_v18, %v11727_v34 }
 0x3d3   :  { %v2266_v63 = vadd.f32 %v2265_v25, %v11797_v23  ;;  %v2197_v9 = vadd.f32 %v2196_v44, %v11785_v1  ;;  %9160 = vmatmul.mubr.msk.bf16.gmra.mxu1 %vm109_vm0, %v1774_v27  ;;  %v1753_v59 = vmax.f32 %v1721_v38, 0.0  ;;  %v1754_v62 = vmax.f32 %v1722_v60, 0.0 }
 0x3d4   :  { %9163 = vmatprep.mubr.msk.bf16.mxu1 %vm109_vm0, %v1775_v47  ;;  %9226 = vmatpush3.bf16.msra.mxu1 %v9568_v7  ;;  %v1777_v55 = vpack.c.bf16 %v1752_v33, %v1751_v43  ;;  %v1724_v24 = vadd.f32 %v11732_v18, %v11735_v49  ;;  %v1755_v35 = vmax.f32 %v1723_v15, 0.0  ;;  %v1725_v51 = vadd.f32 %v11732_v18, %v11738_v54 }
 0x3d5   :  { %v2198_v34 = vadd.f32 %v2197_v9, %v11815_v8  ;;  %v2267_v23 = vadd.f32 %v2266_v63, %v11808_v17  ;;  %9227 = vmatprep.subr.bf16.mxu1 %v9569_v6  ;;  %v11921_v25 = vpack.c.bf16 %v1754_v62, %v1753_v59  ;;  %v1726_v7 = vadd.f32 %v11732_v18, %v11741_v29 }
 0x3d6   :  { %v1756_v53 = vmax.f32 %v1724_v24, 0.0  ;;  %v1757_v49 = vmax.f32 %v1725_v51, 0.0  ;;  %v1727_v3 = vadd.f32 %v11732_v18, %v11744_v12  ;;  %v1728_v54 = vadd.f32 %v11732_v18, %v11747_v61 }
 0x3d7   :  { %v2268_v17 = vadd.f32 %v2267_v23, %v11837_v46  ;;  %v2199_v30 = vadd.f32 %v2198_v34, %v11833_v40  ;;  %v1758_v27 = vmax.f32 %v1726_v7, 0.0  ;;  %v1729_v45 = vadd.f32 %v11732_v18, %v11750_v57  ;;  %v9571_v46 = vld [vmem:[%s16896_s7 + $0x10] sm:$0xff]  }
 0x3d8   :  { %9228 = vmatpush3.bf16.msra.mxu1 %v9569_v6  ;;  %v1779_v47 = vpack.c.bf16 %v1756_v53, %v1755_v35  ;;  %v1759_v42 = vmax.f32 %v1727_v3, 0.0  ;;  %v1760_v29 = vmax.f32 %v1728_v54, 0.0  ;;  %v1730_v50 = vadd.f32 %v11732_v18, %v11753_v48 }
 0x3d9   :  { %v2200_v12 = vadd.f32 %v2199_v30, %v11802_v14  ;;  %v2269_v44 = vadd.f32 %v2268_v17, %v11857_v37  ;;  %9229 = vmatprep.subr.bf16.mxu1 %v9570_v26  ;;  %v1780_v61 = vpack.c.bf16 %v1758_v27, %v1757_v49  ;;  %v1761_v38 = vmax.f32 %v1729_v45, 0.0 }
 0x3da   :  { %v1781_v60 = vpack.c.bf16 %v1760_v29, %v1759_v42  ;;  %v1762_v57 = vmax.f32 %v1730_v50, 0.0  ;;  %v1731_v6 = vadd.f32 %v11732_v18, %v11756_v41  ;;  %v1732_v43 = vadd.f32 %v11732_v18, %v11759_v13 }
 0x3db   :  { %v2270_v48 = vadd.f32 %v2269_v44, %v11827_v11  ;;  %v2201_v33 = vadd.f32 %v2200_v12, %v11822_v58  ;;  %9164 = vmatmul.mubr.msk.bf16.gmra.mxu1 %vm109_vm0, %v1776_v2  ;;  %v1733_v37 = vadd.f32 %v11732_v18, %v11762_v52  ;;  %v1734_v15 = vadd.f32 %v11732_v18, %v11765_v19  ;;  %v9572_v52 = vld [vmem:[%s16896_s7 + $0x8] sm:$0xff]  }
 0x3dc   :  { %9167 = vmatprep.mubr.msk.bf16.mxu1 %vm109_vm0, %v1777_v55  ;;  %9230 = vmatpush3.bf16.msra.mxu1 %v9570_v26  ;;  %v1782_v63 = vpack.c.bf16 %v1762_v57, %v1761_v38  ;;  %v1763_v41 = vmax.f32 %v1731_v6, 0.0  ;;  %v1764_v9 = vmax.f32 %v1732_v43, 0.0  ;;  %v1735_v13 = vadd.f32 %v11732_v18, %v11768_v16  ;;  %v17195_v55 = vld [vmem:[#allocation29_spill] sm:$0xff] }
 0x3dd   :  { %v2202_v11 = vadd.f32 %v2201_v33, %v11840_v5  ;;  %v2271_v59 = vadd.f32 %v2270_v48, %v11846_v4  ;;  %9231 = vmatprep.subr.bf16.mxu1 %v9571_v46  ;;  %v1765_v2 = vmax.f32 %v1733_v37, 0.0  ;;  %v1766_v19 = vmax.f32 %v1734_v15, 0.0 }
 0x3de   :  { %v1783_v62 = vpack.c.bf16 %v1764_v9, %v1763_v41  ;;  %v1736_v24 = vadd.f32 %v11732_v18, %v17195_v55  ;;  %v1767_v35 = vmax.f32 %v1735_v13, 0.0  ;;  %v1737_v51 = vadd.f32 %v11732_v18, %v11777_v22  ;;  %v9573_v22 = vld [vmem:[%s16896_s7] sm:$0xff]   ;;  %s9968_s7 = smov [#allocation2]  }
 0x3df   :  { %v2272_v16 = vadd.f32 %v2271_v59, %v11869_v21  ;;  %v2203_v34 = vadd.f32 %v2202_v11, %v11880_v28  ;;  %v1784_v4 = vpack.c.bf16 %v1766_v19, %v1765_v2  ;;  %v1738_v23 = vadd.f32 %v11732_v18, %v11793_v20  ;;  %v17197_v11 = vld [vmem:[#allocation8_spill] sm:$0xff]  ;;  %s8337_s24 = sshll.u32 %s9968_s7, 4  ;;  %s8338_s24 = int_to_ptr.vmem [resolvable:$true] %s8337_s24 }
 0x3e0   :  { %9232 = vmatpush3.bf16.msra.mxu1 %v9571_v46  ;;  %v1768_v26 = vmax.f32 %v1736_v24, 0.0  ;;  %v1769_v7 = vmax.f32 %v1737_v51, 0.0  ;;  %v2243_v53 = vmul.f32 %v11849_v32, %v11849_v32  ;;  %v2244_v18 = vmul.f32 %v11860_v0, %v11860_v0  ;;  %s9939_s25 = scalar_lea.vmem %s8338_s24, 4096  ;;  %p9944_p1 = scmp.lt.s32.totalorder %s8338_s24, %s8338_s24 }
 0x3e1   :  { %v2204_v49 = vadd.f32 %v2203_v34, %v11849_v32  ;;  %v2273_v3 = vadd.f32 %v2272_v16, %v11891_v31  ;;  %9233 = vmatprep.subr.bf16.mxu1 %v9572_v52  ;;  %v1770_v21 = vmax.f32 %v1738_v23, 0.0  ;;  %v17203_v16 = vld [vmem:[#allocation13_spill] sm:$0xff]  ;;  %p9940_p0 = scmp.ne.s32.totalorder %s8338_s24, %s9939_s25  ;;  %p9945_p2 = scmp.lt.s32.totalorder %s9939_s25, %s9939_s25 }
 0x3e2   :  { %v1785_v54 = vpack.c.bf16 %v1768_v26, %v1767_v35  ;;  %v17202_v35 = vld [vmem:[#allocation12_spill] sm:$0xff]  ;;  %v17205_v26 = vld [vmem:[#allocation17_spill] sm:$0xff] }
 0x3e3   :  { %v2205_v20 = vadd.f32 %v2204_v49, %v11860_v0  ;;  %v2274_v17 = vadd.f32 %v2273_v3, %v2243_v53  ;;  %9168 = vmatmul.mubr.msk.bf16.gmra.mxu1 %vm109_vm0, %v11921_v25  ;;  %v1786_v30 = vpack.c.bf16 %v1770_v21, %v1769_v7  ;;  %v17206_v53 = vld [vmem:[#allocation14_spill] sm:$0xff]  ;;  %v17207_v3 = vld [vmem:[#allocation16_spill] sm:$0xff]  ;;  %v17208_v21 = vld [vmem:[#allocation19_spill] sm:$0xff]  ;;  %p9946_p3 = por %p9945_p2, %p9944_p1 }
 0x3e4   :  { %9171 = vmatprep.mubr.msk.bf16.mxu1 %vm109_vm0, %v1779_v47  ;;  %9234 = vmatpush3.bf16.msra.mxu1 %v9572_v52  ;;  %v17198_v52 = vld [vmem:[#allocation7_spill] sm:$0xff] }
 0x3e5   :  { %v2206_v31 = vrot.slane %v2205_v20, 4  ;;  %v2275_v27 = vadd.f32 %v2274_v17, %v2244_v18  ;;  %9235 = vmatprep.subr.bf16.mxu1 %v9573_v22  ;;  %v17209_v18 = vld [vmem:[#allocation21_spill] sm:$0xff]  ;;  %p9947_p4 = pnand %p9946_p3, %p9940_p0 }
 0x3e7   :  { %v2207_v45 = vadd.f32 %v2206_v31, %v2205_v20  ;;  %v2276_v42 = vrot.slane %v2275_v27, 4 }
 0x3e8   :  { %9236 = vmatpush3.bf16.msra.mxu1 %v9573_v22 }
 0x3e9   :  { %v2208_v29 = vrot.slane %v2207_v45, 2  ;;  %v2277_v50 = vadd.f32 %v2276_v42, %v2275_v27  ;;  %v17211_v27 = vld [vmem:[#allocation20_spill] sm:$0xff]  ;;  %v17212_v42 = vld [vmem:[#allocation23_spill] sm:$0xff] }
 0x3eb   :  { %v2209_v12 = vadd.f32 %v2208_v29, %v2207_v45  ;;  %v2278_v44 = vrot.slane %v2277_v50, 2  ;;  %9172 = vmatmul.mubr.msk.bf16.gmra.mxu1 %vm109_vm0, %v1780_v61 }
 0x3ec   :  { %9175 = vmatprep.mubr.msk.bf16.mxu1 %vm109_vm0, %v1781_v60 }
 0x3ed   :  { %v2210_v46 = vrot.slane %v2209_v12, 1  ;;  %v2279_v25 = vadd.f32 %v2278_v44, %v2277_v50  ;;  %v17213_v44 = vld [vmem:[#allocation24_spill] sm:$0xff] }
 0x3ef   :  { %v2211_v38 = vadd.f32 %v2210_v46, %v2209_v12  ;;  %v2280_v57 = vrot.slane %v2279_v25, 1 }
 0x3f1   :  { %v11985_v47 = vmul.f32 0.00390625, %v2211_v38  ;;  %v2281_v6 = vadd.f32 %v2280_v57, %v2279_v25  ;;  %v17214_v25 = vld [vmem:[#allocation30_spill] sm:$0xff] }
 0x3f3   :  { %v2282_v43 = vmul.f32 0.00390625, %v2281_v6  ;;  %v2283_v48 = vmul.f32 %v11985_v47, %v11985_v47  ;;  %v2314_v33 = vsub.f32 %v11880_v28, %v11985_v47  ;;  %9176 = vmatmul.mubr.msk.bf16.gmra.mxu1 %vm109_vm0, %v1782_v63  ;;  %v2311_v37 = vsub.f32 %v11802_v14, %v11985_v47  ;;  %v17196_v63 = vld [vmem:[#allocation6_spill] sm:$0xff] }
 0x3f4   :  { %9179 = vmatprep.mubr.msk.bf16.mxu1 %vm109_vm0, %v1783_v62  ;;  %v2312_v15 = vsub.f32 %v11822_v58, %v11985_v47  ;;  %v2313_v41 = vsub.f32 %v11840_v5, %v11985_v47  ;;  %v2315_v9 = vsub.f32 %v11849_v32, %v11985_v47  ;;  %v2316_v28 = vsub.f32 %v11860_v0, %v11985_v47  ;;  %v17199_v32 = vld [vmem:[#allocation9_spill] sm:$0xff]  ;;  %v17200_v62 = vld [vmem:[#allocation10_spill] sm:$0xff]  ;;  %v17201_v0 = vld [vmem:[#allocation11_spill] sm:$0xff] }
 0x3f5   :  { %v2284_v61 = vsub.f32 %v2282_v43, %v2283_v48  ;;  %v2285_v13 = vsub.f32 %v17196_v63, %v11985_v47  ;;  %v2286_v59 = vsub.f32 %v17197_v11, %v11985_v47  ;;  %v2287_v2 = vsub.f32 %v17198_v52, %v11985_v47 }
 0x3f6   :  { %v2288_v19 = vsub.f32 %v17199_v32, %v11985_v47  ;;  %v2289_v55 = vsub.f32 %v17200_v62, %v11985_v47  ;;  %v2290_v24 = vsub.f32 %v17201_v0, %v11985_v47  ;;  %v2291_v51 = vsub.f32 %v17202_v35, %v11985_v47  ;;  %v12073_v0 = vld [vmem:[%s16903_s14 + $0x13] ss:$0 sm:$0xff] }
 0x3f7   :  { %v2317_v60 = vadd.f32 1e-05, %v2284_v61  ;;  %v2292_v34 = vsub.f32 %v17203_v16, %v11985_v47  ;;  %v2294_v7 = vsub.f32 %v17205_v26, %v11985_v47  ;;  %v2295_v49 = vsub.f32 %v17206_v53, %v11985_v47 }
 0x3f8   :  { %v2296_v22 = vsub.f32 %v17207_v3, %v11985_v47  ;;  %v2298_v20 = vsub.f32 %v17209_v18, %v11985_v47  ;;  %v2300_v45 = vsub.f32 %v17211_v27, %v11985_v47  ;;  %v2301_v29 = vsub.f32 %v17212_v42, %v11985_v47 }
 0x3f9   :  { %9605 = vrsqrt.f32 %v2317_v60  ;;  %v2302_v50 = vsub.f32 %v17188_v36, %v11985_v47  ;;  %v2303_v12 = vsub.f32 %v17189_v39, %v11985_v47  ;;  %v2304_v46 = vsub.f32 %v17213_v44, %v11985_v47 }
 0x3fa   :  { %v2305_v38 = vsub.f32 %v17214_v25, %v11985_v47  ;;  %v2306_v57 = vsub.f32 %v11788_v10, %v11985_v47  ;;  %v2307_v6 = vsub.f32 %v11609_v56, %v11985_v47  ;;  %v2308_v43 = vsub.f32 %v11785_v1, %v11985_v47 }
 0x3fb   :  { %9180 = vmatmul.mubr.msk.bf16.gmra.mxu1 %vm109_vm0, %v1784_v4  ;;  %v17204_v4 = vld [vmem:[#allocation15_spill] sm:$0xff]  ;;  %v2309_v36 = vsub.f32 %v11815_v8, %v11985_v47  ;;  %v2310_v39 = vsub.f32 %v11833_v40, %v11985_v47 }
 0x3fc   :  { %9183 = vmatprep.mubr.msk.bf16.mxu1 %vm109_vm0, %v1785_v54  ;;  %v2293_v23 = vsub.f32 %v17204_v4, %v11985_v47  ;;  %v2297_v54 = vsub.f32 %v17208_v21, %v11985_v47 }
 0x403   :  { %9184 = vmatmul.mubr.msk.bf16.gmra.mxu1 %vm109_vm0, %v1786_v30  ;;  %v17210_v30 = vld [vmem:[#allocation18_spill] sm:$0xff] }
 0x404   :  { %v2299_v31 = vsub.f32 %v17210_v30, %v11985_v47 }
 0x406   :  { %v12034_v17 = vpop.eup %9605 }
 0x407   :  { %v12061_v48 = vmul.f32 %v12034_v17, %v2314_v33  ;;  %v2319_v61 = vmul.f32 %v12034_v17, %v2285_v13  ;;  %v2320_v60 = vmul.f32 %v12034_v17, %v2286_v59  ;;  %v2321_v63 = vmul.f32 %v12034_v17, %v2287_v2 }
 0x408   :  { %v2322_v11 = vmul.f32 %v12034_v17, %v2288_v19  ;;  %v2323_v52 = vmul.f32 %v12034_v17, %v2289_v55  ;;  %v2324_v32 = vmul.f32 %v12034_v17, %v2290_v24  ;;  %v2325_v62 = vmul.f32 %v12034_v17, %v2291_v51  ;;  %v12086_v51 = vld [vmem:[%s16903_s14 + $0x14] ss:$0 sm:$0xff] }
 0x409   :  { %v2326_v33 = vmul.f32 %v12034_v17, %v2292_v34  ;;  %v2327_v13 = vmul.f32 %v12034_v17, %v2293_v23  ;;  %v2328_v59 = vmul.f32 %v12034_v17, %v2294_v7  ;;  %v2329_v2 = vmul.f32 %v12034_v17, %v2295_v49 }
 0x40a   :  { %v2330_v19 = vmul.f32 %v12034_v17, %v2296_v22  ;;  %v2331_v55 = vmul.f32 %v12034_v17, %v2297_v54  ;;  %v2332_v24 = vmul.f32 %v12034_v17, %v2298_v20  ;;  %v2333_v35 = vmul.f32 %v12034_v17, %v2299_v31 }
 0x40b   :  { %v2334_v16 = vmul.f32 %v12034_v17, %v2300_v45  ;;  %v12090_v34 = vmul.f32 %v12034_v17, %v2301_v29  ;;  %v12093_v4 = vmul.f32 %v12034_v17, %v2315_v9  ;;  %v12096_v23 = vmul.f32 %v12034_v17, %v2316_v28 }
 0x40c   :  { %v2354_v26 = vmul.f32 %v12073_v0, %v2321_v63  ;;  %v2355_v7 = vmul.f32 %v12073_v0, %v2322_v11  ;;  %v2352_v53 = vmul.f32 %v12073_v0, %v2319_v61  ;;  %v2353_v49 = vmul.f32 %v12073_v0, %v2320_v60 }
 0x40d   :  { %v2356_v3 = vmul.f32 %v12073_v0, %v2323_v52  ;;  %v2357_v22 = vmul.f32 %v12073_v0, %v2324_v32  ;;  %v2358_v21 = vmul.f32 %v12073_v0, %v2325_v62  ;;  %v2359_v9 = vmul.f32 %v12073_v0, %v2326_v33 }
 0x40e   :  { %v2387_v54 = vadd.f32 %v12086_v51, %v2354_v26  ;;  %v2388_v28 = vadd.f32 %v12086_v51, %v2355_v7  ;;  %v2385_v18 = vadd.f32 %v12086_v51, %v2352_v53  ;;  %v2386_v20 = vadd.f32 %v12086_v51, %v2353_v49 }
 0x40f   :  { %v2336_v30 = vmul.f32 %v12034_v17, %v2302_v50  ;;  %v12112_v31 = vmul.f32 %v12034_v17, %v2303_v12  ;;  %v2389_v27 = vadd.f32 %v12086_v51, %v2356_v3  ;;  %v2390_v45 = vadd.f32 %v12086_v51, %v2357_v22 }
 0x410   :  { %v2419_v42 = vmax.f32 %v2387_v54, 0.0  ;;  %v2420_v29 = vmax.f32 %v2388_v28, 0.0  ;;  %v2417_v44 = vmax.f32 %v2385_v18, 0.0  ;;  %v2418_v61 = vmax.f32 %v2386_v20, 0.0 }
 0x411   :  { %v12117_v60 = vmul.f32 %v12034_v17, %v2304_v46  ;;  %v2421_v63 = vmax.f32 %v2389_v27, 0.0  ;;  %v2422_v11 = vmax.f32 %v2390_v45, 0.0  ;;  %v2391_v52 = vadd.f32 %v12086_v51, %v2358_v21 }
 0x412   :  { %v2449_v32 = vpack.c.bf16 %v2418_v61, %v2417_v44  ;;  %v2392_v50 = vadd.f32 %v12086_v51, %v2359_v9  ;;  %v2360_v12 = vmul.f32 %v12073_v0, %v2327_v13  ;;  %v2361_v62 = vmul.f32 %v12073_v0, %v2328_v59 }
 0x413   :  { %v2450_v33 = vpack.c.bf16 %v2420_v29, %v2419_v42  ;;  %v2451_v26 = vpack.c.bf16 %v2422_v11, %v2421_v63  ;;  %v2362_v7 = vmul.f32 %v12073_v0, %v2329_v2  ;;  %v2363_v53 = vmul.f32 %v12073_v0, %v2330_v19 }
 0x414   :  { %9237 = vmatprep.mubr.bf16.mxu1 %v2449_v32  ;;  %v2393_v46 = vadd.f32 %v12086_v51, %v2360_v12  ;;  %v2394_v49 = vadd.f32 %v12086_v51, %v2361_v62  ;;  %v2364_v3 = vmul.f32 %v12073_v0, %v2331_v55  ;;  %v2365_v22 = vmul.f32 %v12073_v0, %v2332_v24 }
 0x415   :  { %v2339_v13 = vmul.f32 %v12034_v17, %v2305_v38  ;;  %v2340_v59 = vmul.f32 %v12034_v17, %v2306_v57  ;;  %9238 = vmatmul.mubr.bf16.vlgmr.msra.gmra.mxu1 %v2450_v33  ;;  %v2395_v2 = vadd.f32 %v12086_v51, %v2362_v7  ;;  %v2396_v19 = vadd.f32 %v12086_v51, %v2363_v53 }
 0x416   :  { %v2341_v55 = vmul.f32 %v12034_v17, %v2307_v6  ;;  %9241 = vmatprep.mubr.bf16.mxu1 %v2451_v26  ;;  %v2397_v25 = vadd.f32 %v12086_v51, %v2364_v3  ;;  %v2398_v38 = vadd.f32 %v12086_v51, %v2365_v22  ;;  %v2366_v24 = vmul.f32 %v12073_v0, %v2333_v35 }
 0x417   :  { %v2342_v10 = vmul.f32 %v12034_v17, %v2308_v43  ;;  %v2343_v57 = vmul.f32 %v12034_v17, %v2309_v36  ;;  %v2423_v56 = vmax.f32 %v2391_v52, 0.0  ;;  %v2424_v21 = vmax.f32 %v2392_v50, 0.0 }
 0x418   :  { %v2344_v6 = vmul.f32 %v12034_v17, %v2310_v39  ;;  %v2425_v9 = vmax.f32 %v2393_v46, 0.0  ;;  %v2426_v54 = vmax.f32 %v2394_v49, 0.0  ;;  %v2367_v35 = vmul.f32 %v12073_v0, %v2334_v16 }
 0x419   :  { %v2345_v1 = vmul.f32 %v12034_v17, %v2311_v37  ;;  %v2346_v8 = vmul.f32 %v12034_v17, %v2312_v15  ;;  %v2427_v43 = vmax.f32 %v2395_v2, 0.0  ;;  %v2428_v36 = vmax.f32 %v2396_v19, 0.0 }
 0x41a   :  { %v2347_v40 = vmul.f32 %v12034_v17, %v2313_v41  ;;  %v2429_v39 = vmax.f32 %v2397_v25, 0.0  ;;  %v2430_v28 = vmax.f32 %v2398_v38, 0.0  ;;  %v12172_v16 = vadd.f32 %v12086_v51, %v2366_v24 }
 0x41b   :  { %v2452_v14 = vpack.c.bf16 %v2424_v21, %v2423_v56  ;;  %v2368_v37 = vmul.f32 %v12073_v0, %v12090_v34  ;;  %v2372_v58 = vmul.f32 %v12073_v0, %v2339_v13  ;;  %v2373_v15 = vmul.f32 %v12073_v0, %v2340_v59 }
 0x41c   :  { %v2453_v18 = vpack.c.bf16 %v2426_v54, %v2425_v9  ;;  %v2400_v20 = vadd.f32 %v12086_v51, %v2367_v35  ;;  %v2369_v5 = vmul.f32 %v12073_v0, %v2336_v30  ;;  %v2374_v47 = vmul.f32 %v12073_v0, %v2341_v55 }
 0x41d   :  { %9242 = vmatmul.mubr.bf16.gmra.mxu1 %v2452_v14  ;;  %v2454_v41 = vpack.c.bf16 %v2428_v36, %v2427_v43  ;;  %v2405_v17 = vadd.f32 %v12086_v51, %v2372_v58  ;;  %v2406_v27 = vadd.f32 %v12086_v51, %v2373_v15  ;;  %v2375_v45 = vmul.f32 %v12073_v0, %v2342_v10 }
 0x41e   :  { %9245 = vmatprep.mubr.bf16.mxu1 %v2453_v18  ;;  %v2455_v34 = vpack.c.bf16 %v2430_v28, %v2429_v39  ;;  %v2431_v42 = vmax.f32 %v12172_v16, 0.0  ;;  %v2407_v29 = vadd.f32 %v12086_v51, %v2374_v47  ;;  %v2376_v44 = vmul.f32 %v12073_v0, %v2343_v57 }
 0x41f   :  { %v2401_v30 = vadd.f32 %v12086_v51, %v2368_v37  ;;  %v2437_v61 = vmax.f32 %v2405_v17, 0.0  ;;  %v2438_v63 = vmax.f32 %v2406_v27, 0.0  ;;  %v2408_v11 = vadd.f32 %v12086_v51, %v2375_v45 }
 0x420   :  { %v2402_v52 = vadd.f32 %v12086_v51, %v2369_v5  ;;  %v2439_v32 = vmax.f32 %v2407_v29, 0.0  ;;  %v2377_v50 = vmul.f32 %v12073_v0, %v2344_v6  ;;  %v2409_v12 = vadd.f32 %v12086_v51, %v2376_v44  ;;  %v9574_v29 = vld [vmem:[%s16897_s8 + $0x18] sm:$0xff]  }
 0x421   :  { %v2459_v62 = vpack.c.bf16 %v2438_v63, %v2437_v61  ;;  %v2440_v33 = vmax.f32 %v2408_v11, 0.0  ;;  %v2378_v26 = vmul.f32 %v12073_v0, %v2345_v1  ;;  %v2379_v7 = vmul.f32 %v12073_v0, %v2346_v8  ;;  %9269 = vmatprep.subr.bf16.mxu0 %v9574_v29 }
 0x422   :  { %v2410_v53 = vadd.f32 %v12086_v51, %v2377_v50  ;;  %v2441_v46 = vmax.f32 %v2409_v12, 0.0  ;;  %v2380_v49 = vmul.f32 %v12073_v0, %v2347_v40  ;;  %v2381_v3 = vmul.f32 %v12073_v0, %v12061_v48  ;;  %9270 = vmatpush3.bf16.msra.mxu0 %v9574_v29 }
 0x423   :  { %v2460_v22 = vpack.c.bf16 %v2440_v33, %v2439_v32  ;;  %v2411_v13 = vadd.f32 %v12086_v51, %v2378_v26  ;;  %v2412_v59 = vadd.f32 %v12086_v51, %v2379_v7  ;;  %v2382_v2 = vmul.f32 %v12073_v0, %v12093_v4 }
 0x424   :  { %v2442_v19 = vmax.f32 %v2410_v53, 0.0  ;;  %v2413_v55 = vadd.f32 %v12086_v51, %v2380_v49  ;;  %v2414_v25 = vadd.f32 %v12086_v51, %v2381_v3  ;;  %v2383_v38 = vmul.f32 %v12073_v0, %v12096_v23 }
 0x425   :  { %9246 = vmatmul.mubr.bf16.gmra.mxu1 %v2454_v41  ;;  %v2432_v24 = vmax.f32 %v2400_v20, 0.0  ;;  %v2443_v10 = vmax.f32 %v2411_v13, 0.0  ;;  %v2444_v48 = vmax.f32 %v2412_v59, 0.0  ;;  %v2415_v57 = vadd.f32 %v12086_v51, %v2382_v2 }
 0x426   :  { %9249 = vmatprep.mubr.bf16.mxu1 %v2455_v34  ;;  %v2461_v56 = vpack.c.bf16 %v2442_v19, %v2441_v46  ;;  %v2445_v21 = vmax.f32 %v2413_v55, 0.0  ;;  %v2446_v6 = vmax.f32 %v2414_v25, 0.0  ;;  %v2416_v4 = vadd.f32 %v12086_v51, %v2383_v38 }
 0x427   :  { %v2370_v9 = vmul.f32 %v12073_v0, %v12112_v31  ;;  %v2371_v54 = vmul.f32 %v12073_v0, %v12117_v60  ;;  %v2462_v35 = vpack.c.bf16 %v2444_v48, %v2443_v10  ;;  %v2447_v23 = vmax.f32 %v2415_v57, 0.0  ;;  %v12217_v0 = vld [vmem:[%s16903_s14 + $0x11] ss:$0 sm:$0xff] }
 0x428   :  { %v2433_v1 = vmax.f32 %v2401_v30, 0.0  ;;  %v2434_v8 = vmax.f32 %v2402_v52, 0.0  ;;  %v2463_v43 = vpack.c.bf16 %v2446_v6, %v2445_v21  ;;  %v2448_v36 = vmax.f32 %v2416_v4, 0.0 }
 0x429   :  { %v2456_v39 = vpack.c.bf16 %v2432_v24, %v2431_v42  ;;  %v2403_v28 = vadd.f32 %v12086_v51, %v2370_v9  ;;  %v2404_v16 = vadd.f32 %v12086_v51, %v2371_v54 }
 0x42a   :  { %v2464_v40 = vpack.c.bf16 %v2448_v36, %v2447_v23  ;;  %v2457_v14 = vpack.c.bf16 %v2434_v8, %v2433_v1 }
 0x42b   :  { %v2435_v37 = vmax.f32 %v2403_v28, 0.0  ;;  %v2436_v31 = vmax.f32 %v2404_v16, 0.0 }
 0x42d   :  { %9250 = vmatmul.mubr.bf16.gmra.mxu1 %v2456_v39  ;;  %v2458_v58 = vpack.c.bf16 %v2436_v31, %v2435_v37 }
 0x42e   :  { %9253 = vmatprep.mubr.bf16.mxu1 %v2457_v14 }
 0x435   :  { %9254 = vmatmul.mubr.bf16.gmra.mxu1 %v2458_v58 }
 0x436   :  { %9257 = vmatprep.mubr.bf16.mxu1 %v2459_v62 }
 0x43d   :  { %9258 = vmatmul.mubr.bf16.gmra.mxu1 %v2460_v22 }
 0x43e   :  { %9261 = vmatprep.mubr.bf16.mxu1 %v2461_v56 }
 0x445   :  { %9262 = vmatmul.mubr.bf16.gmra.mxu1 %v2462_v35 }
 0x446   :  { %9265 = vmatprep.mubr.bf16.mxu1 %v2463_v43 }
 0x44d   :  { %9266 = vmatmul.mubr.bf16.gmra.mxu1 %v2464_v40 }
 0x48b   :  { %v9157_v60 = vpop.f32.mrf.mxu1 }
 0x48c   :  { %v12220_v51 = vadd.f32 %v9157_v60, %v12217_v0 }
 0x48d   :  { %v1878_v15 = vpop.f32.mrf.mxu1 }
 0x48e   :  { %17215 = vst [vmem:[#allocation25_spill] sm:$0xff] %v12220_v51  ;;  %v4818_v18 = vmul.f32 0.5, %v12220_v51  ;;  %v12224_v20 = vadd.f32 %v1878_v15, %v12217_v0 }
 0x48f   :  { %v9158_v5 = vpop.f32.mrf.mxu1 }
 0x490   :  { %17216 = vst [vmem:[#allocation22_spill] sm:$0xff] %v12224_v20  ;;  %v4852_v47 = vmul.f32 1.442695, %v4818_v18  ;;  %v4816_v41 = vmul.f32 0.5, %v12224_v20  ;;  %v12228_v17 = vadd.f32 %v9158_v5, %v12217_v0 }
 0x491   :  { %v1881_v27 = vpop.f32.mrf.mxu1 }
 0x492   :  { %17217 = vst [vmem:[#allocation28_spill] sm:$0xff] %v12228_v17  ;;  %9607 = vpow2.f32 %v4852_v47  ;;  %v4848_v45 = vmul.f32 1.442695, %v4816_v41  ;;  %v4819_v34 = vmul.f32 0.5, %v12228_v17  ;;  %v12232_v42 = vadd.f32 %v1881_v27, %v12217_v0 }
 0x493   :  { %v9161_v44 = vpop.f32.mrf.mxu1 }
 0x494   :  { %17218 = vst [vmem:[#allocation26_spill] sm:$0xff] %v12232_v42  ;;  %9609 = vpow2.f32 %v4848_v45  ;;  %v4854_v30 = vmul.f32 1.442695, %v4819_v34  ;;  %v4817_v61 = vmul.f32 0.5, %v12232_v42  ;;  %v12239_v63 = vadd.f32 %v9161_v44, %v12217_v0 }
 0x495   :  { %v1894_v11 = vpop.f32.mrf.mxu1 }
 0x496   :  { %17219 = vst [vmem:[#allocation5_spill] sm:$0xff] %v12239_v63  ;;  %9611 = vpow2.f32 %v4854_v30  ;;  %v4850_v52 = vmul.f32 1.442695, %v4817_v61  ;;  %v12242_v32 = vadd.f32 %v1894_v11, %v12217_v0  ;;  %v4822_v50 = vmul.f32 0.5, %v12239_v63 }
 0x497   :  { %v9162_v12 = vpop.f32.mrf.mxu1 }
 0x498   :  { %17220 = vst [vmem:[#allocation27_spill] sm:$0xff] %v12242_v32  ;;  %9613 = vpow2.f32 %v4850_v52  ;;  %v4820_v62 = vmul.f32 0.5, %v12242_v32  ;;  %v12247_v33 = vadd.f32 %v9162_v12, %v12217_v0  ;;  %v4860_v46 = vmul.f32 1.442695, %v4822_v50 }
 0x499   :  { %v1897_v26 = vpop.f32.mrf.mxu1 }
 0x49a   :  { %17221 = vst [vmem:[#allocation29_spill] sm:$0xff] %v12247_v33  ;;  %v4856_v7 = vmul.f32 1.442695, %v4820_v62  ;;  %v12250_v53 = vadd.f32 %v1897_v26, %v12217_v0  ;;  %v4823_v49 = vmul.f32 0.5, %v12247_v33 }
 0x49b   :  { %v9165_v3 = vpop.f32.mrf.mxu1 }
 0x49c   :  { %17222 = vst [vmem:[#allocation6_spill] sm:$0xff] %v12250_v53  ;;  %9615 = vpow2.f32 %v4856_v7  ;;  %v4821_v22 = vmul.f32 0.5, %v12250_v53  ;;  %v12255_v13 = vadd.f32 %v9165_v3, %v12217_v0  ;;  %v4862_v25 = vmul.f32 1.442695, %v4823_v49 }
 0x49d   :  { %v1910_v59 = vpop.f32.mrf.mxu1  ;;  %9617 = vpow2.f32 %v4860_v46 }
 0x49e   :  { %17223 = vst [vmem:[#allocation8_spill] sm:$0xff] %v12255_v13  ;;  %v4858_v2 = vmul.f32 1.442695, %v4821_v22  ;;  %v12258_v19 = vadd.f32 %v1910_v59, %v12217_v0  ;;  %v4826_v38 = vmul.f32 0.5, %v12255_v13 }
 0x49f   :  { %v9608_v55 = vpop.eup %9607  ;;  %v9166_v24 = vpop.f32.mrf.mxu1 }
 0x4a0   :  { %17224 = vst [vmem:[#allocation7_spill] sm:$0xff] %v12258_v19  ;;  %9619 = vpow2.f32 %v4858_v2  ;;  %v4824_v10 = vmul.f32 0.5, %v12258_v19  ;;  %v12263_v48 = vadd.f32 %v9166_v24, %v12217_v0  ;;  %4948 = vrot.lane.b32.xlu1 %v9608_v55, %s9961_s29  ;;  %v4868_v9 = vmul.f32 1.442695, %v4826_v38 }
 0x4a1   :  { %v9610_v57 = vpop.eup %9609  ;;  %v1913_v56 = vpop.f32.mrf.mxu1  ;;  %9621 = vpow2.f32 %v4862_v25 }
 0x4a2   :  { %17225 = vst [vmem:[#allocation9_spill] sm:$0xff] %v12263_v48  ;;  %v4864_v21 = vmul.f32 1.442695, %v4824_v10  ;;  %v12267_v6 = vadd.f32 %v1913_v56, %v12217_v0  ;;  %4944 = vrot.lane.b32.xlu0 %v9610_v57, %s9961_s29  ;;  %v4827_v54 = vmul.f32 0.5, %v12263_v48 }
 0x4a3   :  { %v9612_v4 = vpop.eup %9611  ;;  %v9169_v35 = vpop.f32.mrf.mxu1 }
 0x4a4   :  { %17226 = vst [vmem:[#allocation10_spill] sm:$0xff] %v12267_v6  ;;  %9623 = vpow2.f32 %v4864_v21  ;;  %v4825_v23 = vmul.f32 0.5, %v12267_v6  ;;  %v12273_v1 = vadd.f32 %v9169_v35, %v12217_v0  ;;  %4950 = vrot.lane.b32.xlu1 %v9612_v4, %s9961_s29  ;;  %v4870_v39 = vmul.f32 1.442695, %v4827_v54 }
 0x4a5   :  { %v9614_v8 = vpop.eup %9613  ;;  %v1926_v43 = vpop.f32.mrf.mxu1  ;;  %9625 = vpow2.f32 %v4868_v9 }
 0x4a6   :  { %17227 = vst [vmem:[#allocation11_spill] sm:$0xff] %v12273_v1  ;;  %v4866_v36 = vmul.f32 1.442695, %v4825_v23  ;;  %v12277_v40 = vadd.f32 %v1926_v43, %v12217_v0  ;;  %4946 = vrot.lane.b32.xlu0 %v9614_v8, %s9961_s29  ;;  %v4830_v28 = vmul.f32 0.5, %v12273_v1 }
 0x4a7   :  { %v9170_v16 = vpop.f32.mrf.mxu1 }
 0x4a8   :  { %17228 = vst [vmem:[#allocation12_spill] sm:$0xff] %v12277_v40  ;;  %9627 = vpow2.f32 %v4866_v36  ;;  %v4828_v14 = vmul.f32 0.5, %v12277_v40  ;;  %v12283_v37 = vadd.f32 %v9170_v16, %v12217_v0  ;;  %v4876_v18 = vmul.f32 1.442695, %v4830_v28 }
 0x4a9   :  { %v9616_v31 = vpop.eup %9615  ;;  %v1929_v58 = vpop.f32.mrf.mxu1  ;;  %9629 = vpow2.f32 %v4870_v39 }
 0x4aa   :  { %17229 = vst [vmem:[#allocation13_spill] sm:$0xff] %v12283_v37  ;;  %v4872_v60 = vmul.f32 1.442695, %v4828_v14  ;;  %v12286_v15 = vadd.f32 %v1929_v58, %v12217_v0  ;;  %4952 = vrot.lane.b32.xlu0 %v9616_v31, %s9961_s29  ;;  %v4831_v5 = vmul.f32 0.5, %v12283_v37  ;;  %v9618_v41 = vpop.eup %9617 }
 0x4ab   :  { %v9173_v47 = vpop.f32.mrf.mxu1 }
 0x4ac   :  { %17230 = vst [vmem:[#allocation15_spill] sm:$0xff] %v12286_v15  ;;  %9631 = vpow2.f32 %v4872_v60  ;;  %v4829_v27 = vmul.f32 0.5, %v12286_v15  ;;  %v12292_v45 = vadd.f32 %v9173_v47, %v12217_v0  ;;  %v4878_v61 = vmul.f32 1.442695, %v4831_v5 }
 0x4ad   :  { %v9620_v34 = vpop.eup %9619  ;;  %v1942_v29 = vpop.f32.mrf.mxu1  ;;  %9633 = vpow2.f32 %v4876_v18 }
 0x4ae   :  { %17231 = vst [vmem:[#allocation17_spill] sm:$0xff] %v12292_v45  ;;  %v4874_v44 = vmul.f32 1.442695, %v4829_v27  ;;  %v12295_v30 = vadd.f32 %v1942_v29, %v12217_v0  ;;  %4954 = vrot.lane.b32.xlu1 %v9620_v34, %s9961_s29  ;;  %4956 = vrot.lane.b32.xlu0 %v9618_v41, %s9961_s29  ;;  %v4834_v11 = vmul.f32 0.5, %v12292_v45  ;;  %v9622_v50 = vpop.eup %9621 }
 0x4af   :  { %v9174_v52 = vpop.f32.mrf.mxu1 }
 0x4b0   :  { %17232 = vst [vmem:[#allocation14_spill] sm:$0xff] %v12295_v30  ;;  %9635 = vpow2.f32 %v4874_v44  ;;  %v4832_v12 = vmul.f32 0.5, %v12295_v30  ;;  %v12302_v62 = vadd.f32 %v9174_v52, %v12217_v0  ;;  %v4884_v3 = vmul.f32 1.442695, %v4834_v11 }
 0x4b1   :  { %v9624_v26 = vpop.eup %9623  ;;  %v1945_v7 = vpop.f32.mrf.mxu1  ;;  %9637 = vpow2.f32 %v4878_v61 }
 0x4b2   :  { %17233 = vst [vmem:[#allocation16_spill] sm:$0xff] %v12302_v62  ;;  %v4880_v46 = vmul.f32 1.442695, %v4832_v12  ;;  %v12305_v49 = vadd.f32 %v1945_v7, %v12217_v0  ;;  %4958 = vrot.lane.b32.xlu1 %v9622_v50, %s9961_s29  ;;  %4960 = vrot.lane.b32.xlu0 %v9624_v26, %s9961_s29  ;;  %v4835_v22 = vmul.f32 0.5, %v12302_v62  ;;  %v9626_v2 = vpop.eup %9625 }
 0x4b3   :  { %v9177_v59 = vpop.f32.mrf.mxu1 }
 0x4b4   :  { %17234 = vst [vmem:[#allocation19_spill] sm:$0xff] %v12305_v49  ;;  %9639 = vpow2.f32 %v4880_v46  ;;  %v4833_v55 = vmul.f32 0.5, %v12305_v49  ;;  %v12312_v25 = vadd.f32 %v9177_v59, %v12217_v0  ;;  %v4886_v56 = vmul.f32 1.442695, %v4835_v22 }
 0x4b5   :  { %v9628_v38 = vpop.eup %9627  ;;  %v1958_v24 = vpop.f32.mrf.mxu1  ;;  %9641 = vpow2.f32 %v4884_v3 }
 0x4b6   :  { %17235 = vst [vmem:[#allocation21_spill] sm:$0xff] %v12312_v25  ;;  %v4882_v10 = vmul.f32 1.442695, %v4833_v55  ;;  %v12315_v57 = vadd.f32 %v1958_v24, %v12217_v0  ;;  %4962 = vrot.lane.b32.xlu1 %v9628_v38, %s9961_s29  ;;  %4964 = vrot.lane.b32.xlu0 %v9626_v2, %s9961_s29  ;;  %v4838_v21 = vmul.f32 0.5, %v12312_v25  ;;  %v9630_v9 = vpop.eup %9629 }
 0x4b7   :  { %v9178_v4 = vpop.f32.mrf.mxu1 }
 0x4b8   :  { %17236 = vst [vmem:[#allocation18_spill] sm:$0xff] %v12315_v57  ;;  %9643 = vpow2.f32 %v4882_v10  ;;  %v4836_v54 = vmul.f32 0.5, %v12315_v57  ;;  %v12322_v35 = vadd.f32 %v9178_v4, %v12217_v0  ;;  %v4892_v39 = vmul.f32 1.442695, %v4838_v21 }
 0x4b9   :  { %v9632_v23 = vpop.eup %9631  ;;  %v1961_v8 = vpop.f32.mrf.mxu1  ;;  %9645 = vpow2.f32 %v4886_v56 }
 0x4ba   :  { %17237 = vst [vmem:[#allocation20_spill] sm:$0xff] %v12322_v35  ;;  %v4888_v43 = vmul.f32 1.442695, %v4836_v54  ;;  %v12325_v36 = vadd.f32 %v1961_v8, %v12217_v0  ;;  %4966 = vrot.lane.b32.xlu1 %v9630_v9, %s9961_s29  ;;  %4968 = vrot.lane.b32.xlu0 %v9632_v23, %s9961_s29  ;;  %v4839_v28 = vmul.f32 0.5, %v12322_v35  ;;  %v9634_v14 = vpop.eup %9633 }
 0x4bb   :  { %v9181_v16 = vpop.f32.mrf.mxu1 }
 0x4bc   :  { %17238 = vst [vmem:[#allocation23_spill] sm:$0xff] %v12325_v36  ;;  %9647 = vpow2.f32 %v4888_v43  ;;  %v4837_v31 = vmul.f32 0.5, %v12325_v36  ;;  %v12332_v58 = vadd.f32 %v9181_v16, %v12217_v0  ;;  %v4894_v41 = vmul.f32 1.442695, %v4839_v28 }
 0x4bd   :  { %v9636_v60 = vpop.eup %9635  ;;  %v1974_v18 = vpop.f32.mrf.mxu1  ;;  %9649 = vpow2.f32 %v4892_v39 }
 0x4be   :  { %17239 = vst [vmem:[#allocation24_spill] sm:$0xff] %v12332_v58  ;;  %v4890_v5 = vmul.f32 1.442695, %v4837_v31  ;;  %v12335_v47 = vadd.f32 %v1974_v18, %v12217_v0  ;;  %4970 = vrot.lane.b32.xlu1 %v9636_v60, %s9961_s29  ;;  %4972 = vrot.lane.b32.xlu0 %v9634_v14, %s9961_s29  ;;  %v4842_v27 = vmul.f32 0.5, %v12332_v58  ;;  %v9638_v29 = vpop.eup %9637 }
 0x4bf   :  { %v9182_v34 = vpop.f32.mrf.mxu1 }
 0x4c0   :  { %17240 = vst [vmem:[#allocation30_spill] sm:$0xff] %v12335_v47  ;;  %9651 = vpow2.f32 %v4890_v5  ;;  %v4840_v44 = vmul.f32 0.5, %v12335_v47  ;;  %v12342_v61 = vadd.f32 %v9182_v34, %v12217_v0  ;;  %v4900_v26 = vmul.f32 1.442695, %v4842_v27 }
 0x4c1   :  { %v9640_v11 = vpop.eup %9639  ;;  %v1977_v52 = vpop.f32.mrf.mxu1  ;;  %9653 = vpow2.f32 %v4894_v41 }
 0x4c2   :  { %17241 = vst [vmem:[#allocation31_spill] sm:$0xff] %v12342_v61  ;;  %v4896_v50 = vmul.f32 1.442695, %v4840_v44  ;;  %v12345_v12 = vadd.f32 %v1977_v52, %v12217_v0  ;;  %4974 = vrot.lane.b32.xlu1 %v9638_v29, %s9961_s29  ;;  %4976 = vrot.lane.b32.xlu0 %v9640_v11, %s9961_s29  ;;  %v4843_v7 = vmul.f32 0.5, %v12342_v61  ;;  %v9642_v3 = vpop.eup %9641  ;;  %v9575_v29 = vld [vmem:[%s16897_s8 + $0x10] sm:$0xff]   ;;  %v9576_v52 = vld [vmem:[%s16897_s8 + $0x8] sm:$0xff]  }
 0x4c3   :  { %v9185_v46 = vpop.f32.mrf.mxu1  ;;  %9271 = vmatprep.subr.bf16.mxu0 %v9575_v29 }
 0x4c4   :  { %17242 = vst [vmem:[#allocation32_spill] sm:$0xff] %v12345_v12  ;;  %9655 = vpow2.f32 %v4896_v50  ;;  %v4841_v22 = vmul.f32 0.5, %v12345_v12  ;;  %v12352_v59 = vadd.f32 %v9185_v46, %v12217_v0  ;;  %v4902_v10 = vmul.f32 1.442695, %v4843_v7  ;;  %9272 = vmatpush3.bf16.msra.mxu0 %v9575_v29 }
 0x4c5   :  { %v9644_v2 = vpop.eup %9643  ;;  %v1990_v55 = vpop.f32.mrf.mxu1  ;;  %9657 = vpow2.f32 %v4900_v26  ;;  %v12386_v26 = vld [vmem:[%s16903_s14 + $0x15] ss:$0 sm:$0xff]  ;;  %9273 = vmatprep.subr.bf16.mxu0 %v9576_v52 }
 0x4c6   :  { %17243 = vst [vmem:[#allocation33_spill] sm:$0xff] %v12352_v59  ;;  %v4898_v38 = vmul.f32 1.442695, %v4841_v22  ;;  %v12355_v24 = vadd.f32 %v1990_v55, %v12217_v0  ;;  %4978 = vrot.lane.b32.xlu1 %v9644_v2, %s9961_s29  ;;  %4980 = vrot.lane.b32.xlu0 %v9642_v3, %s9961_s29  ;;  %v4846_v56 = vmul.f32 0.5, %v12352_v59  ;;  %v9646_v4 = vpop.eup %9645  ;;  %v9577_v2 = vld [vmem:[%s16897_s8] sm:$0xff]  }
 0x4c7   :  { %v9186_v21 = vpop.f32.mrf.mxu1 }
 0x4c8   :  { %17244 = vst [vmem:[#allocation34_spill] sm:$0xff] %v12355_v24  ;;  %9659 = vpow2.f32 %v4898_v38  ;;  %v4844_v9 = vmul.f32 0.5, %v12355_v24  ;;  %v12362_v54 = vadd.f32 %v9186_v21, %v12217_v0  ;;  %v4908_v28 = vmul.f32 1.442695, %v4846_v56  ;;  %9274 = vmatpush3.bf16.msra.mxu0 %v9576_v52 }
 0x4c9   :  { %v9648_v23 = vpop.eup %9647  ;;  %v1993_v8 = vpop.f32.mrf.mxu1  ;;  %9661 = vpow2.f32 %v4902_v10  ;;  %9275 = vmatprep.subr.bf16.mxu0 %v9577_v2 }
 0x4ca   :  { %17245 = vst [vmem:[#allocation35_spill] sm:$0xff] %v12362_v54  ;;  %v4904_v43 = vmul.f32 1.442695, %v4844_v9  ;;  %v12365_v39 = vadd.f32 %v1993_v8, %v12217_v0  ;;  %4982 = vrot.lane.b32.xlu1 %v9646_v4, %s9961_s29  ;;  %4984 = vrot.lane.b32.xlu0 %v9648_v23, %s9961_s29  ;;  %v9650_v16 = vpop.eup %9649  ;;  %v4847_v14 = vmul.f32 0.5, %v12362_v54 }
 0x4cc   :  { %17246 = vst [vmem:[#allocation36_spill] sm:$0xff] %v12365_v39  ;;  %9663 = vpow2.f32 %v4904_v43  ;;  %v4845_v31 = vmul.f32 0.5, %v12365_v39  ;;  %v4910_v5 = vmul.f32 1.442695, %v4847_v14  ;;  %9276 = vmatpush3.bf16.msra.mxu0 %v9577_v2 }
 0x4cd   :  { %v9652_v60 = vpop.eup %9651  ;;  %9665 = vpow2.f32 %v4908_v28 }
 0x4ce   :  { %v4906_v18 = vmul.f32 1.442695, %v4845_v31  ;;  %4986 = vrot.lane.b32.xlu1 %v9652_v60, %s9961_s29  ;;  %4988 = vrot.lane.b32.xlu0 %v9650_v16, %s9961_s29  ;;  %v9654_v0 = vpop.eup %9653 }
 0x4d0   :  { %9667 = vpow2.f32 %v4906_v18 }
 0x4d1   :  { %v9656_v41 = vpop.eup %9655  ;;  %9669 = vpow2.f32 %v4910_v5 }
 0x4d2   :  { %4990 = vrot.lane.b32.xlu1 %v9654_v0, %s9961_s29  ;;  %4992 = vrot.lane.b32.xlu0 %v9656_v41, %s9961_s29  ;;  %v9658_v27 = vpop.eup %9657 }
 0x4d5   :  { %v9660_v34 = vpop.eup %9659  ;;  %v9239_v11 = vpop.f32.mrf.mxu1 }
 0x4d6   :  { %4994 = vrot.lane.b32.xlu1 %v9660_v34, %s9961_s29  ;;  %4996 = vrot.lane.b32.xlu0 %v9658_v27, %s9961_s29  ;;  %v9662_v44 = vpop.eup %9661  ;;  %v12397_v38 = vadd.f32 %v9239_v11, %v12386_v26 }
 0x4d7   :  { %v2564_v7 = vpop.f32.mrf.mxu1 }
 0x4d8   :  { %v12391_v46 = vadd.f32 %v2564_v7, %v12386_v26  ;;  %v2763_v8 = vmul.f32 %v12397_v38, %v12397_v38  ;;  %v2694_v14 = vsel %vm836_vm1, %v12397_v38, 0.0 }
 0x4d9   :  { %v9664_v50 = vpop.eup %9663  ;;  %v9240_v22 = vpop.f32.mrf.mxu1 }
 0x4da   :  { %4998 = vrot.lane.b32.xlu1 %v9662_v44, %s9961_s29  ;;  %5000 = vrot.lane.b32.xlu0 %v9664_v50, %s9961_s29  ;;  %v9666_v3 = vpop.eup %9665  ;;  %v2761_v56 = vmul.f32 %v12391_v46, %v12391_v46  ;;  %v12404_v21 = vadd.f32 %v9240_v22, %v12386_v26  ;;  %v2691_v43 = vsel %vm836_vm1, %v12391_v46, 0.0  ;;  %v2796_v44 = vsel %vm836_vm1, %v2763_v8, 0.0 }
 0x4db   :  { %v2567_v10 = vpop.f32.mrf.mxu1 }
 0x4dc   :  { %v12407_v4 = vadd.f32 %v2567_v10, %v12386_v26  ;;  %v2793_v18 = vsel %vm836_vm1, %v2761_v56, 0.0  ;;  %v2764_v0 = vmul.f32 %v12404_v21, %v12404_v21  ;;  %v2696_v11 = vsel %vm836_vm1, %v12404_v21, 0.0 }
 0x4dd   :  { %v9668_v55 = vpop.eup %9667  ;;  %v9243_v9 = vpop.f32.mrf.mxu1 }
 0x4de   :  { %5002 = vrot.lane.b32.xlu1 %v9668_v55, %s9961_s29  ;;  %5004 = vrot.lane.b32.xlu0 %v9666_v3, %s9961_s29  ;;  %v9670_v23 = vpop.eup %9669  ;;  %v2692_v28 = vsel %vm836_vm1, %v12407_v4, 0.0  ;;  %v2762_v16 = vmul.f32 %v12407_v4, %v12407_v4  ;;  %v12431_v52 = vadd.f32 %v9243_v9, %v12386_v26  ;;  %v2798_v55 = vsel %vm836_vm1, %v2764_v0, 0.0 }
 0x4df   :  { %v2693_v31 = vadd.f32 %v2692_v28, %v2691_v43  ;;  %v2580_v60 = vpop.f32.mrf.mxu1 }
 0x4e0   :  { %v2794_v5 = vsel %vm836_vm1, %v2762_v16, 0.0  ;;  %v12425_v41 = vadd.f32 %v2580_v60, %v12386_v26  ;;  %v2767_v43 = vmul.f32 %v12431_v52, %v12431_v52  ;;  %v2702_v0 = vsel %vm836_vm1, %v12431_v52, 0.0 }
 0x4e1   :  { %v2695_v27 = vadd.f32 %v2694_v14, %v2693_v31  ;;  %v2795_v34 = vadd.f32 %v2794_v5, %v2793_v18  ;;  %v9244_v29 = vpop.f32.mrf.mxu1 }
 0x4e2   :  { %5006 = vrot.lane.b32.xlu1 %v9670_v23, %s9961_s29  ;;  %v2765_v50 = vmul.f32 %v12425_v41, %v12425_v41  ;;  %v2698_v2 = vsel %vm836_vm1, %v12425_v41, 0.0  ;;  %v12439_v10 = vadd.f32 %v9244_v29, %v12386_v26 }
 0x4e3   :  { %v2797_v7 = vadd.f32 %v2796_v44, %v2795_v34  ;;  %v2697_v3 = vadd.f32 %v2696_v11, %v2695_v27  ;;  %v2583_v22 = vpop.f32.mrf.mxu1 }
 0x4e4   :  { %v12442_v56 = vadd.f32 %v2583_v22, %v12386_v26  ;;  %v2800_v28 = vsel %vm836_vm1, %v2765_v50, 0.0  ;;  %v2768_v5 = vmul.f32 %v12439_v10, %v12439_v10  ;;  %v2804_v50 = vsel %vm836_vm1, %v2767_v43, 0.0 }
 0x4e5   :  { %v2699_v23 = vadd.f32 %v2698_v2, %v2697_v3  ;;  %v2799_v9 = vadd.f32 %v2798_v55, %v2797_v7  ;;  %v9247_v8 = vpop.f32.mrf.mxu1  ;;  %v2704_v7 = vsel %vm836_vm1, %v12439_v10, 0.0 }
 0x4e6   :  { %v2700_v16 = vsel %vm836_vm1, %v12442_v56, 0.0  ;;  %v2766_v14 = vmul.f32 %v12442_v56, %v12442_v56  ;;  %v12463_v3 = vadd.f32 %v9247_v8, %v12386_v26 }
 0x4e7   :  { %v2801_v31 = vadd.f32 %v2800_v28, %v2799_v9  ;;  %v2701_v60 = vadd.f32 %v2700_v16, %v2699_v23  ;;  %v2596_v18 = vpop.f32.mrf.mxu1  ;;  %v2806_v9 = vsel %vm836_vm1, %v2768_v5, 0.0 }
 0x4e8   :  { %v2802_v27 = vsel %vm836_vm1, %v2766_v14, 0.0  ;;  %v12457_v34 = vadd.f32 %v2596_v18, %v12386_v26 }
 0x4e9   :  { %v2703_v29 = vadd.f32 %v2702_v0, %v2701_v60  ;;  %v2803_v44 = vadd.f32 %v2802_v27, %v2801_v31  ;;  %v9248_v11 = vpop.f32.mrf.mxu1  ;;  %v2771_v60 = vmul.f32 %v12463_v3, %v12463_v3 }
 0x4ea   :  { %v2769_v22 = vmul.f32 %v12457_v34, %v12457_v34  ;;  %v2706_v28 = vsel %vm836_vm1, %v12457_v34, 0.0  ;;  %v12471_v16 = vadd.f32 %v9248_v11, %v12386_v26  ;;  %v2710_v11 = vsel %vm836_vm1, %v12463_v3, 0.0 }
 0x4eb   :  { %v2805_v55 = vadd.f32 %v2804_v50, %v2803_v44  ;;  %v2705_v2 = vadd.f32 %v2704_v7, %v2703_v29  ;;  %v2599_v23 = vpop.f32.mrf.mxu1 }
 0x4ec   :  { %v12474_v43 = vadd.f32 %v2599_v23, %v12386_v26  ;;  %v2808_v18 = vsel %vm836_vm1, %v2769_v22, 0.0  ;;  %v2772_v50 = vmul.f32 %v12471_v16, %v12471_v16 }
 0x4ed   :  { %v2707_v14 = vadd.f32 %v2706_v28, %v2705_v2  ;;  %v2807_v8 = vadd.f32 %v2806_v9, %v2805_v55  ;;  %v9251_v31 = vpop.f32.mrf.mxu1  ;;  %v2812_v9 = vsel %vm836_vm1, %v2771_v60, 0.0  ;;  %v2712_v28 = vsel %vm836_vm1, %v12471_v16, 0.0 }
 0x4ee   :  { %v2708_v0 = vsel %vm836_vm1, %v12474_v43, 0.0  ;;  %v2770_v5 = vmul.f32 %v12474_v43, %v12474_v43 }
 0x4ef   :  { %v2809_v27 = vadd.f32 %v2808_v18, %v2807_v8  ;;  %v2709_v29 = vadd.f32 %v2708_v0, %v2707_v14  ;;  %v2612_v44 = vpop.f32.mrf.mxu1  ;;  %v12495_v14 = vadd.f32 %v9251_v31, %v12386_v26 }
 0x4f0   :  { %v2810_v7 = vsel %vm836_vm1, %v2770_v5, 0.0  ;;  %v12489_v55 = vadd.f32 %v2612_v44, %v12386_v26  ;;  %v2814_v44 = vsel %vm836_vm1, %v2772_v50, 0.0 }
 0x4f1   :  { %v2711_v22 = vadd.f32 %v2710_v11, %v2709_v29  ;;  %v2811_v2 = vadd.f32 %v2810_v7, %v2809_v27  ;;  %v9252_v23 = vpop.f32.mrf.mxu1  ;;  %v2775_v59 = vmul.f32 %v12495_v14, %v12495_v14 }
 0x4f2   :  { %v2773_v8 = vmul.f32 %v12489_v55, %v12489_v55  ;;  %v2714_v27 = vsel %vm836_vm1, %v12489_v55, 0.0  ;;  %v12503_v29 = vadd.f32 %v9252_v23, %v12386_v26 }
 0x4f3   :  { %v2813_v18 = vadd.f32 %v2812_v9, %v2811_v2  ;;  %v2713_v0 = vadd.f32 %v2712_v28, %v2711_v22  ;;  %v2615_v5 = vpop.f32.mrf.mxu1  ;;  %v2820_v24 = vsel %vm836_vm1, %v2775_v59, 0.0 }
 0x4f4   :  { %v12506_v60 = vadd.f32 %v2615_v5, %v12386_v26  ;;  %v2816_v22 = vsel %vm836_vm1, %v2773_v8, 0.0  ;;  %v2718_v5 = vsel %vm836_vm1, %v12495_v14, 0.0 }
 0x4f5   :  { %v2715_v11 = vadd.f32 %v2714_v27, %v2713_v0  ;;  %v2815_v31 = vadd.f32 %v2814_v44, %v2813_v18  ;;  %v9255_v7 = vpop.f32.mrf.mxu1  ;;  %v2776_v18 = vmul.f32 %v12503_v29, %v12503_v29 }
 0x4f6   :  { %v2716_v50 = vsel %vm836_vm1, %v12506_v60, 0.0  ;;  %v2774_v2 = vmul.f32 %v12506_v60, %v12506_v60 }
 0x4f7   :  { %v2817_v9 = vadd.f32 %v2816_v22, %v2815_v31  ;;  %v2717_v23 = vadd.f32 %v2716_v50, %v2715_v11  ;;  %v2628_v28 = vpop.f32.mrf.mxu1  ;;  %v2720_v11 = vsel %vm836_vm1, %v12503_v29, 0.0  ;;  %v12527_v31 = vadd.f32 %v9255_v7, %v12386_v26 }
 0x4f8   :  { %v2818_v0 = vsel %vm836_vm1, %v2774_v2, 0.0  ;;  %v12521_v44 = vadd.f32 %v2628_v28, %v12386_v26  ;;  %v2822_v28 = vsel %vm836_vm1, %v2776_v18, 0.0 }
 0x4f9   :  { %v2719_v8 = vadd.f32 %v2718_v5, %v2717_v23  ;;  %v2819_v27 = vadd.f32 %v2818_v0, %v2817_v9  ;;  %v9256_v54 = vpop.f32.mrf.mxu1  ;;  %v2779_v39 = vmul.f32 %v12527_v31, %v12527_v31 }
 0x4fa   :  { %v2777_v22 = vmul.f32 %v12521_v44, %v12521_v44  ;;  %v2722_v9 = vsel %vm836_vm1, %v12521_v44, 0.0  ;;  %v12535_v23 = vadd.f32 %v9256_v54, %v12386_v26 }
 0x4fb   :  { %v2821_v50 = vadd.f32 %v2820_v24, %v2819_v27  ;;  %v2721_v58 = vadd.f32 %v2720_v11, %v2719_v8  ;;  %v2631_v2 = vpop.f32.mrf.mxu1  ;;  %v2828_v47 = vsel %vm836_vm1, %v2779_v39, 0.0 }
 0x4fc   :  { %v12538_v59 = vadd.f32 %v2631_v2, %v12386_v26  ;;  %v2824_v24 = vsel %vm836_vm1, %v2777_v22, 0.0  ;;  %v2726_v2 = vsel %vm836_vm1, %v12527_v31, 0.0 }
 0x4fd   :  { %v2723_v5 = vadd.f32 %v2722_v9, %v2721_v58  ;;  %v2823_v7 = vadd.f32 %v2822_v28, %v2821_v50  ;;  %v9259_v0 = vpop.f32.mrf.mxu1  ;;  %v2780_v58 = vmul.f32 %v12535_v23, %v12535_v23 }
 0x4fe   :  { %v2724_v18 = vsel %vm836_vm1, %v12538_v59, 0.0  ;;  %v2778_v8 = vmul.f32 %v12538_v59, %v12538_v59 }
 0x4ff   :  { %v2825_v27 = vadd.f32 %v2824_v24, %v2823_v7  ;;  %v2725_v54 = vadd.f32 %v2724_v18, %v2723_v5  ;;  %v2644_v11 = vpop.f32.mrf.mxu1  ;;  %v2728_v5 = vsel %vm836_vm1, %v12535_v23, 0.0  ;;  %v12559_v7 = vadd.f32 %v9259_v0, %v12386_v26 }
 0x500   :  { %v2826_v50 = vsel %vm836_vm1, %v2778_v8, 0.0  ;;  %v12553_v28 = vadd.f32 %v2644_v11, %v12386_v26  ;;  %v2830_v11 = vsel %vm836_vm1, %v2780_v58, 0.0 }
 0x501   :  { %v2727_v22 = vadd.f32 %v2726_v2, %v2725_v54  ;;  %v2827_v9 = vadd.f32 %v2826_v50, %v2825_v27  ;;  %v9260_v61 = vpop.f32.mrf.mxu1  ;;  %v2783_v12 = vmul.f32 %v12559_v7, %v12559_v7 }
 0x502   :  { %v2781_v24 = vmul.f32 %v12553_v28, %v12553_v28  ;;  %v2730_v27 = vsel %vm836_vm1, %v12553_v28, 0.0  ;;  %v12567_v54 = vadd.f32 %v9260_v61, %v12386_v26 }
 0x503   :  { %v2829_v18 = vadd.f32 %v2828_v47, %v2827_v9  ;;  %v2729_v25 = vadd.f32 %v2728_v5, %v2727_v22  ;;  %v2647_v8 = vpop.f32.mrf.mxu1  ;;  %v2836_v57 = vsel %vm836_vm1, %v2783_v12, 0.0 }
 0x504   :  { %v12570_v39 = vadd.f32 %v2647_v8, %v12386_v26  ;;  %v2832_v47 = vsel %vm836_vm1, %v2781_v24, 0.0  ;;  %v2734_v8 = vsel %vm836_vm1, %v12559_v7, 0.0 }
 0x505   :  { %v2731_v2 = vadd.f32 %v2730_v27, %v2729_v25  ;;  %v2831_v0 = vadd.f32 %v2830_v11, %v2829_v18  ;;  %v9263_v50 = vpop.f32.mrf.mxu1  ;;  %v2784_v25 = vmul.f32 %v12567_v54, %v12567_v54 }
 0x506   :  { %v2732_v58 = vsel %vm836_vm1, %v12570_v39, 0.0  ;;  %v2782_v22 = vmul.f32 %v12570_v39, %v12570_v39 }
 0x507   :  { %v2833_v9 = vadd.f32 %v2832_v47, %v2831_v0  ;;  %v2733_v61 = vadd.f32 %v2732_v58, %v2731_v2  ;;  %v2660_v5 = vpop.f32.mrf.mxu1  ;;  %v2736_v2 = vsel %vm836_vm1, %v12567_v54, 0.0  ;;  %v12591_v0 = vadd.f32 %v9263_v50, %v12386_v26 }
 0x508   :  { %v2834_v18 = vsel %vm836_vm1, %v2782_v22, 0.0  ;;  %v12585_v11 = vadd.f32 %v2660_v5, %v12386_v26  ;;  %v2838_v5 = vsel %vm836_vm1, %v2784_v25, 0.0 }
 0x509   :  { %v2735_v24 = vadd.f32 %v2734_v8, %v2733_v61  ;;  %v2835_v27 = vadd.f32 %v2834_v18, %v2833_v9  ;;  %v9264_v35 = vpop.f32.mrf.mxu1  ;;  %v2787_v36 = vmul.f32 %v12591_v0, %v12591_v0 }
 0x50a   :  { %v2785_v47 = vmul.f32 %v12585_v11, %v12585_v11  ;;  %v2738_v9 = vsel %vm836_vm1, %v12585_v11, 0.0  ;;  %v12599_v61 = vadd.f32 %v9264_v35, %v12386_v26 }
 0x50b   :  { %v2837_v58 = vadd.f32 %v2836_v57, %v2835_v27  ;;  %v2737_v45 = vadd.f32 %v2736_v2, %v2735_v24  ;;  %v2663_v22 = vpop.f32.mrf.mxu1  ;;  %v2844_v30 = vsel %vm836_vm1, %v2787_v36, 0.0 }
 0x50c   :  { %v12602_v12 = vadd.f32 %v2663_v22, %v12386_v26  ;;  %v2840_v57 = vsel %vm836_vm1, %v2785_v47, 0.0  ;;  %v2742_v22 = vsel %vm836_vm1, %v12591_v0, 0.0 }
 0x50d   :  { %v2739_v8 = vadd.f32 %v2738_v9, %v2737_v45  ;;  %v2839_v50 = vadd.f32 %v2838_v5, %v2837_v58  ;;  %v9267_v18 = vpop.f32.mrf.mxu1  ;;  %v2788_v45 = vmul.f32 %v12599_v61, %v12599_v61 }
 0x50e   :  { %v2740_v25 = vsel %vm836_vm1, %v12602_v12, 0.0  ;;  %v2786_v24 = vmul.f32 %v12602_v12, %v12602_v12 }
 0x50f   :  { %v2841_v27 = vadd.f32 %v2840_v57, %v2839_v50  ;;  %v2741_v35 = vadd.f32 %v2740_v25, %v2739_v8  ;;  %v2676_v2 = vpop.f32.mrf.mxu1  ;;  %v2744_v8 = vsel %vm836_vm1, %v12599_v61, 0.0  ;;  %v12623_v50 = vadd.f32 %v9267_v18, %v12386_v26 }
 0x510   :  { %v2842_v58 = vsel %vm836_vm1, %v2786_v24, 0.0  ;;  %v12617_v5 = vadd.f32 %v2676_v2, %v12386_v26  ;;  %v2846_v2 = vsel %vm836_vm1, %v2788_v45, 0.0 }
 0x511   :  { %v2743_v47 = vadd.f32 %v2742_v22, %v2741_v35  ;;  %v2843_v9 = vadd.f32 %v2842_v58, %v2841_v27  ;;  %v9268_v62 = vpop.f32.mrf.mxu1  ;;  %v2791_v58 = vmul.f32 %v12623_v50, %v12623_v50 }
 0x512   :  { %v2789_v57 = vmul.f32 %v12617_v5, %v12617_v5  ;;  %v2746_v27 = vsel %vm836_vm1, %v12617_v5, 0.0  ;;  %v12631_v35 = vadd.f32 %v9268_v62, %v12386_v26  ;;  %v2750_v62 = vsel %vm836_vm1, %v12623_v50, 0.0 }
 0x513   :  { %v2845_v25 = vadd.f32 %v2844_v30, %v2843_v9  ;;  %v2745_v1 = vadd.f32 %v2744_v8, %v2743_v47  ;;  %v2679_v24 = vpop.f32.mrf.mxu1 }
 0x514   :  { %v12634_v36 = vadd.f32 %v2679_v24, %v12386_v26  ;;  %v2848_v30 = vsel %vm836_vm1, %v2789_v57, 0.0  ;;  %v2852_v57 = vsel %vm836_vm1, %v2791_v58, 0.0 }
 0x515   :  { %v2747_v22 = vadd.f32 %v2746_v27, %v2745_v1  ;;  %v2847_v18 = vadd.f32 %v2846_v2, %v2845_v25  ;;  %v2792_v1 = vmul.f32 %v12631_v35, %v12631_v35  ;;  %v2752_v2 = vsel %vm836_vm1, %v12631_v35, 0.0 }
 0x516   :  { %v2748_v47 = vsel %vm836_vm1, %v12634_v36, 0.0  ;;  %v2790_v45 = vmul.f32 %v12634_v36, %v12634_v36 }
 0x517   :  { %v2849_v9 = vadd.f32 %v2848_v30, %v2847_v18  ;;  %v2749_v8 = vadd.f32 %v2748_v47, %v2747_v22  ;;  %v2854_v18 = vsel %vm836_vm1, %v2792_v1, 0.0 }
 0x518   :  { %v2850_v26 = vsel %vm836_vm1, %v2790_v45, 0.0 }
 0x519   :  { %v2751_v25 = vadd.f32 %v2750_v62, %v2749_v8  ;;  %v2851_v24 = vadd.f32 %v2850_v26, %v2849_v9 }
 0x51b   :  { %v2753_v27 = vadd.f32 %v2752_v2, %v2751_v25  ;;  %v2853_v49 = vadd.f32 %v2852_v57, %v2851_v24 }
 0x51d   :  { %v2754_v22 = vrot.slane %v2753_v27, 4  ;;  %v2855_v30 = vadd.f32 %v2854_v18, %v2853_v49 }
 0x51f   :  { %v2755_v47 = vadd.f32 %v2754_v22, %v2753_v27  ;;  %v2856_v37 = vrot.slane %v2855_v30, 4 }
 0x521   :  { %v2756_v40 = vrot.slane %v2755_v47, 2  ;;  %v2857_v13 = vadd.f32 %v2856_v37, %v2855_v30 }
 0x523   :  { %v2757_v15 = vadd.f32 %v2756_v40, %v2755_v47  ;;  %v2858_v48 = vrot.slane %v2857_v13, 2 }
 0x525   :  { %v2758_v45 = vrot.slane %v2757_v15, 1  ;;  %v2859_v8 = vadd.f32 %v2858_v48, %v2857_v13 }
 0x527   :  { %v2759_v9 = vadd.f32 %v2758_v45, %v2757_v15  ;;  %v2860_v62 = vrot.slane %v2859_v8, 1 }
 0x529   :  { %v12652_v58 = vmul.f32 0.00390625, %v2759_v9  ;;  %v2861_v26 = vadd.f32 %v2860_v62, %v2859_v8 }
 0x52b   :  { %v2862_v19 = vmul.f32 0.00390625, %v2861_v26  ;;  %v2863_v25 = vmul.f32 %v12652_v58, %v12652_v58  ;;  %v2894_v49 = vsub.f32 %v12634_v36, %v12652_v58  ;;  %v2891_v40 = vsub.f32 %v12591_v0, %v12652_v58 }
 0x52c   :  { %v2892_v13 = vsub.f32 %v12599_v61, %v12652_v58  ;;  %v2893_v48 = vsub.f32 %v12617_v5, %v12652_v58  ;;  %v2895_v37 = vsub.f32 %v12623_v50, %v12652_v58  ;;  %v2896_v15 = vsub.f32 %v12631_v35, %v12652_v58 }
 0x52d   :  { %v2864_v1 = vsub.f32 %v2862_v19, %v2863_v25  ;;  %v2865_v19 = vsub.f32 %v12391_v46, %v12652_v58  ;;  %v2866_v36 = vsub.f32 %v12407_v4, %v12652_v58  ;;  %v2867_v57 = vsub.f32 %v12397_v38, %v12652_v58 }
 0x52e   :  { %v2868_v2 = vsub.f32 %v12404_v21, %v12652_v58  ;;  %v2869_v27 = vsub.f32 %v12425_v41, %v12652_v58  ;;  %v2870_v50 = vsub.f32 %v12442_v56, %v12652_v58  ;;  %v2871_v35 = vsub.f32 %v12431_v52, %v12652_v58 }
 0x52f   :  { %v2897_v24 = vadd.f32 1e-05, %v2864_v1  ;;  %v2872_v46 = vsub.f32 %v12439_v10, %v12652_v58  ;;  %v2873_v4 = vsub.f32 %v12457_v34, %v12652_v58  ;;  %v2874_v38 = vsub.f32 %v12474_v43, %v12652_v58 }
 0x530   :  { %v2875_v21 = vsub.f32 %v12463_v3, %v12652_v58  ;;  %v2876_v41 = vsub.f32 %v12471_v16, %v12652_v58  ;;  %v2877_v56 = vsub.f32 %v12489_v55, %v12652_v58  ;;  %v2878_v52 = vsub.f32 %v12506_v60, %v12652_v58 }
 0x531   :  { %9671 = vrsqrt.f32 %v2897_v24  ;;  %v2879_v10 = vsub.f32 %v12495_v14, %v12652_v58  ;;  %v2880_v34 = vsub.f32 %v12503_v29, %v12652_v58  ;;  %v2881_v43 = vsub.f32 %v12521_v44, %v12652_v58  ;;  %v12715_v29 = vld [vmem:[%s16903_s14 + $0x16] ss:$0 sm:$0xff] }
 0x532   :  { %v2882_v3 = vsub.f32 %v12538_v59, %v12652_v58  ;;  %v2883_v16 = vsub.f32 %v12527_v31, %v12652_v58  ;;  %v2884_v55 = vsub.f32 %v12535_v23, %v12652_v58  ;;  %v2885_v60 = vsub.f32 %v12553_v28, %v12652_v58 }
 0x533   :  { %v2886_v14 = vsub.f32 %v12570_v39, %v12652_v58  ;;  %v2887_v44 = vsub.f32 %v12559_v7, %v12652_v58  ;;  %v2888_v31 = vsub.f32 %v12567_v54, %v12652_v58  ;;  %v2889_v23 = vsub.f32 %v12585_v11, %v12652_v58 }
 0x534   :  { %v2890_v59 = vsub.f32 %v12602_v12, %v12652_v58 }
 0x53e   :  { %v9672_v18 = vpop.eup %9671 }
 0x53f   :  { %v2928_v22 = vmul.f32 %v9672_v18, %v2894_v49  ;;  %v2899_v28 = vmul.f32 %v9672_v18, %v2865_v19  ;;  %v2900_v30 = vmul.f32 %v9672_v18, %v2866_v36  ;;  %v2901_v39 = vmul.f32 %v9672_v18, %v2867_v57 }
 0x540   :  { %v12725_v47 = vmul.f32 %v9672_v18, %v2895_v37  ;;  %v2902_v45 = vmul.f32 %v9672_v18, %v2868_v2  ;;  %v2903_v8 = vmul.f32 %v9672_v18, %v2869_v27  ;;  %v2904_v9 = vmul.f32 %v9672_v18, %v2870_v50  ;;  %v12737_v50 = vld [vmem:[%s16903_s14 + $0x17] ss:$0 sm:$0xff] }
 0x541   :  { %v12727_v62 = vmul.f32 %v9672_v18, %v2896_v15  ;;  %v12730_v7 = vmul.f32 %v12715_v29, %v2928_v22  ;;  %v2905_v54 = vmul.f32 %v9672_v18, %v2871_v35  ;;  %v2906_v26 = vmul.f32 %v9672_v18, %v2872_v46 }
 0x542   :  { %v2907_v25 = vmul.f32 %v9672_v18, %v2873_v4  ;;  %v2908_v11 = vmul.f32 %v9672_v18, %v2874_v38  ;;  %v2909_v49 = vmul.f32 %v9672_v18, %v2875_v21  ;;  %v2910_v1 = vmul.f32 %v9672_v18, %v2876_v41 }
 0x543   :  { %v2911_v12 = vmul.f32 %v9672_v18, %v2877_v56  ;;  %v2912_v24 = vmul.f32 %v9672_v18, %v2878_v52  ;;  %v2913_v19 = vmul.f32 %v9672_v18, %v2879_v10  ;;  %v2914_v36 = vmul.f32 %v9672_v18, %v2880_v34 }
 0x544   :  { %v2915_v37 = vmul.f32 %v9672_v18, %v2881_v43  ;;  %v2916_v57 = vmul.f32 %v9672_v18, %v2882_v3  ;;  %v2917_v2 = vmul.f32 %v9672_v18, %v2883_v16  ;;  %v2934_v27 = vmul.f32 %v12715_v29, %v2901_v39 }
 0x545   :  { %v2935_v15 = vmul.f32 %v12715_v29, %v2902_v45  ;;  %v2918_v35 = vmul.f32 %v9672_v18, %v2884_v55  ;;  %v2919_v46 = vmul.f32 %v9672_v18, %v2885_v60  ;;  %v2920_v4 = vmul.f32 %v9672_v18, %v2886_v14 }
 0x546   :  { %v2921_v38 = vmul.f32 %v9672_v18, %v2887_v44  ;;  %v2922_v21 = vmul.f32 %v9672_v18, %v2888_v31  ;;  %v2923_v41 = vmul.f32 %v9672_v18, %v2889_v23  ;;  %v2924_v56 = vmul.f32 %v9672_v18, %v2890_v59 }
 0x547   :  { %v2925_v52 = vmul.f32 %v9672_v18, %v2891_v40  ;;  %v2926_v10 = vmul.f32 %v9672_v18, %v2892_v13  ;;  %v2927_v34 = vmul.f32 %v9672_v18, %v2893_v48  ;;  %v2932_v43 = vmul.f32 %v12715_v29, %v2899_v28 }
 0x548   :  { %v2933_v3 = vmul.f32 %v12715_v29, %v2900_v30  ;;  %v2936_v16 = vmul.f32 %v12715_v29, %v2903_v8  ;;  %v2937_v22 = vmul.f32 %v12715_v29, %v2904_v9  ;;  %v2967_v55 = vadd.f32 %v12737_v50, %v2934_v27 }
 0x549   :  { %v2968_v0 = vadd.f32 %v12737_v50, %v2935_v15  ;;  %v2938_v40 = vmul.f32 %v12715_v29, %v2905_v54  ;;  %v2939_v61 = vmul.f32 %v12715_v29, %v2906_v26  ;;  %v2940_v13 = vmul.f32 %v12715_v29, %v2907_v25 }
 0x54a   :  { %v2941_v5 = vmul.f32 %v12715_v29, %v2908_v11  ;;  %v2942_v58 = vmul.f32 %v12715_v29, %v2909_v49  ;;  %v2943_v48 = vmul.f32 %v12715_v29, %v2910_v1  ;;  %v2944_v18 = vmul.f32 %v12715_v29, %v2911_v12 }
 0x54b   :  { %v2945_v60 = vmul.f32 %v12715_v29, %v2912_v24  ;;  %v2946_v14 = vmul.f32 %v12715_v29, %v2913_v19  ;;  %v12764_v44 = vmul.f32 %v12715_v29, %v2914_v36  ;;  %v12767_v31 = vmul.f32 %v12715_v29, %v2915_v37 }
 0x54c   :  { %v12770_v23 = vmul.f32 %v12715_v29, %v2916_v57  ;;  %v2950_v59 = vmul.f32 %v12715_v29, %v2917_v2  ;;  %v2951_v28 = vmul.f32 %v12715_v29, %v2918_v35  ;;  %v2999_v30 = vmax.f32 %v2967_v55, 0.0 }
 0x54d   :  { %v3000_v39 = vmax.f32 %v2968_v0, 0.0  ;;  %v12775_v45 = vmul.f32 %v12715_v29, %v2919_v46  ;;  %v12778_v8 = vmul.f32 %v12715_v29, %v2920_v4  ;;  %v2965_v9 = vadd.f32 %v12737_v50, %v2932_v43 }
 0x54e   :  { %v2966_v54 = vadd.f32 %v12737_v50, %v2933_v3  ;;  %v2954_v26 = vmul.f32 %v12715_v29, %v2921_v38  ;;  %v2955_v25 = vmul.f32 %v12715_v29, %v2922_v21  ;;  %v2969_v11 = vadd.f32 %v12737_v50, %v2936_v16 }
 0x54f   :  { %v2970_v49 = vadd.f32 %v12737_v50, %v2937_v22  ;;  %v2958_v1 = vmul.f32 %v12715_v29, %v2925_v52  ;;  %v2959_v12 = vmul.f32 %v12715_v29, %v2926_v10  ;;  %v2997_v24 = vmax.f32 %v2965_v9, 0.0 }
 0x550   :  { %v2998_v19 = vmax.f32 %v2966_v54, 0.0  ;;  %v2962_v36 = vmul.f32 %v12715_v29, %v12725_v47  ;;  %v3030_v37 = vpack.c.bf16 %v3000_v39, %v2999_v30  ;;  %v3001_v57 = vmax.f32 %v2969_v11, 0.0 }
 0x551   :  { %v3002_v2 = vmax.f32 %v2970_v49, 0.0  ;;  %v2963_v27 = vmul.f32 %v12715_v29, %v12727_v62  ;;  %v2983_v15 = vadd.f32 %v12737_v50, %v2950_v59  ;;  %v2984_v35 = vadd.f32 %v12737_v50, %v2951_v28 }
 0x552   :  { %v3029_v46 = vpack.c.bf16 %v2998_v19, %v2997_v24  ;;  %v2956_v4 = vmul.f32 %v12715_v29, %v2923_v41  ;;  %v2987_v38 = vadd.f32 %v12737_v50, %v2954_v26  ;;  %v2971_v21 = vadd.f32 %v12737_v50, %v2938_v40 }
 0x553   :  { %v2972_v52 = vadd.f32 %v12737_v50, %v2939_v61  ;;  %v2988_v47 = vadd.f32 %v12737_v50, %v2955_v25  ;;  %v3031_v10 = vpack.c.bf16 %v3002_v2, %v3001_v57  ;;  %v2973_v62 = vadd.f32 %v12737_v50, %v2940_v13 }
 0x554   :  { %9277 = vmatprep.mubr.msk.bf16.mxu0 %vm836_vm1, %v3029_v46  ;;  %v2974_v43 = vadd.f32 %v12737_v50, %v2941_v5  ;;  %v2957_v3 = vmul.f32 %v12715_v29, %v2924_v56  ;;  %v2960_v16 = vmul.f32 %v12715_v29, %v2927_v34  ;;  %v2991_v41 = vadd.f32 %v12737_v50, %v2958_v1 }
 0x555   :  { %v2992_v22 = vadd.f32 %v12737_v50, %v2959_v12  ;;  %9278 = vmatmul.mubr.msk.bf16.vlgmr.msra.gmra.mxu0 %vm836_vm1, %v3030_v37  ;;  %v2995_v55 = vadd.f32 %v12737_v50, %v2962_v36  ;;  %v2996_v0 = vadd.f32 %v12737_v50, %v2963_v27  ;;  %v3015_v40 = vmax.f32 %v2983_v15, 0.0 }
 0x556   :  { %v3016_v61 = vmax.f32 %v2984_v35, 0.0  ;;  %9281 = vmatprep.mubr.msk.bf16.mxu0 %vm836_vm1, %v3031_v10  ;;  %v3019_v13 = vmax.f32 %v2987_v38, 0.0  ;;  %v3003_v5 = vmax.f32 %v2971_v21, 0.0  ;;  %v3004_v59 = vmax.f32 %v2972_v52, 0.0 }
 0x557   :  { %v2975_v56 = vadd.f32 %v12737_v50, %v2942_v58  ;;  %v3020_v29 = vmax.f32 %v2988_v47, 0.0  ;;  %v3005_v34 = vmax.f32 %v2973_v62, 0.0  ;;  %v3006_v28 = vmax.f32 %v2974_v43, 0.0 }
 0x558   :  { %v2977_v30 = vadd.f32 %v12737_v50, %v2944_v18  ;;  %v3023_v39 = vmax.f32 %v2991_v41, 0.0  ;;  %v3024_v9 = vmax.f32 %v2992_v22, 0.0  ;;  %v2976_v54 = vadd.f32 %v12737_v50, %v2943_v48 }
 0x559   :  { %v2978_v26 = vadd.f32 %v12737_v50, %v2945_v60  ;;  %v3027_v25 = vmax.f32 %v2995_v55, 0.0  ;;  %v3028_v11 = vmax.f32 %v2996_v0, 0.0  ;;  %v2979_v1 = vadd.f32 %v12737_v50, %v2946_v14 }
 0x55a   :  { %v3009_v49 = vmax.f32 %v2977_v30, 0.0  ;;  %v3032_v12 = vpack.c.bf16 %v3004_v59, %v3003_v5  ;;  %v3007_v24 = vmax.f32 %v2975_v56, 0.0  ;;  %v2980_v58 = vadd.f32 %v12737_v50, %v12764_v44  ;;  %v5120_v5 = vld [vmem:[%s16900_s11] sm:$0x3] }
 0x55b   :  { %v3010_v19 = vmax.f32 %v2978_v26, 0.0  ;;  %v3033_v36 = vpack.c.bf16 %v3006_v28, %v3005_v34  ;;  %v3011_v37 = vmax.f32 %v2979_v1, 0.0  ;;  %v2981_v18 = vadd.f32 %v12737_v50, %v12767_v31 }
 0x55c   :  { %v2982_v48 = vadd.f32 %v12737_v50, %v12770_v23  ;;  %v3008_v60 = vmax.f32 %v2976_v54, 0.0  ;;  %v3012_v2 = vmax.f32 %v2980_v58, 0.0  ;;  %v3038_v14 = vpack.c.bf16 %v3016_v61, %v3015_v40 }
 0x55d   :  { %9282 = vmatmul.mubr.msk.bf16.gmra.mxu0 %vm836_vm1, %v3032_v12  ;;  %v3035_v57 = vpack.c.bf16 %v3010_v19, %v3009_v49  ;;  %v3013_v27 = vmax.f32 %v2981_v18, 0.0  ;;  %v2985_v44 = vadd.f32 %v12737_v50, %v12775_v45  ;;  %v2986_v35 = vadd.f32 %v12737_v50, %v12778_v8 }
 0x55e   :  { %9285 = vmatprep.mubr.msk.bf16.mxu0 %vm836_vm1, %v3033_v36  ;;  %v3014_v15 = vmax.f32 %v2982_v48, 0.0  ;;  %v3036_v31 = vpack.c.bf16 %v3012_v2, %v3011_v37  ;;  %v3040_v46 = vpack.c.bf16 %v3020_v29, %v3019_v13  ;;  %v2989_v23 = vadd.f32 %v12737_v50, %v2956_v4 }
 0x55f   :  { %v2990_v38 = vadd.f32 %v12737_v50, %v2957_v3  ;;  %v3017_v52 = vmax.f32 %v2985_v44, 0.0  ;;  %v3018_v47 = vmax.f32 %v2986_v35, 0.0  ;;  %v3042_v10 = vpack.c.bf16 %v3024_v9, %v3023_v39  ;;  %v12849_v3 = vld [vmem:[%s16903_s14 + $0x20] ss:$0 sm:$0xff] }
 0x560   :  { %v3037_v21 = vpack.c.bf16 %v3014_v15, %v3013_v27  ;;  %v3021_v62 = vmax.f32 %v2989_v23, 0.0  ;;  %v2993_v41 = vadd.f32 %v12737_v50, %v2960_v16  ;;  %v2994_v45 = vadd.f32 %v12737_v50, %v12730_v7  ;;  %v9578_v7 = vld [vmem:[%s16898_s9] sm:$0xff]  }
 0x561   :  { %v3022_v43 = vmax.f32 %v2990_v38, 0.0  ;;  %v3039_v22 = vpack.c.bf16 %v3018_v47, %v3017_v52  ;;  %v3044_v55 = vpack.c.bf16 %v3028_v11, %v3027_v25  ;;  %v3034_v8 = vpack.c.bf16 %v3008_v60, %v3007_v24  ;;  %9309 = vmatprep.subr.bf16.mxu1 %v9578_v7 }
 0x562   :  { %v3025_v40 = vmax.f32 %v2993_v41, 0.0  ;;  %v3026_v61 = vmax.f32 %v2994_v45, 0.0  ;;  %9310 = vmatpush3.bf16.msra.mxu1 %v9578_v7  ;;  %v12860_v34 = vsel %vm5170_vm2, %v5120_v5, 0 }
 0x563   :  { %v3041_v0 = vpack.c.bf16 %v3022_v43, %v3021_v62  ;;  %9541 = vmatprep.subr.msk.bf16.mxu1 %vm5170_vm2, %v5120_v5 }
 0x564   :  { %v3043_v4 = vpack.c.bf16 %v3026_v61, %v3025_v40 }
 0x565   :  { %9286 = vmatmul.mubr.msk.bf16.gmra.mxu0 %vm836_vm1, %v3034_v8 }
 0x566   :  { %9289 = vmatprep.mubr.msk.bf16.mxu0 %vm836_vm1, %v3035_v57 }
 0x56d   :  { %9290 = vmatmul.mubr.msk.bf16.gmra.mxu0 %vm836_vm1, %v3036_v31 }
 0x56e   :  { %9293 = vmatprep.mubr.msk.bf16.mxu0 %vm836_vm1, %v3037_v21 }
 0x575   :  { %9294 = vmatmul.mubr.msk.bf16.gmra.mxu0 %vm836_vm1, %v3038_v14 }
 0x576   :  { %9297 = vmatprep.mubr.msk.bf16.mxu0 %vm836_vm1, %v3039_v22 }
 0x57d   :  { %9298 = vmatmul.mubr.msk.bf16.gmra.mxu0 %vm836_vm1, %v3040_v46 }
 0x57e   :  { %9301 = vmatprep.mubr.msk.bf16.mxu0 %vm836_vm1, %v3041_v0 }
 0x585   :  { %9302 = vmatmul.mubr.msk.bf16.gmra.mxu0 %vm836_vm1, %v3042_v10 }
 0x586   :  { %9305 = vmatprep.mubr.msk.bf16.mxu0 %vm836_vm1, %v3043_v4 }
 0x58d   :  { %9306 = vmatmul.mubr.msk.bf16.gmra.mxu0 %vm836_vm1, %v3044_v55 }
 0x615   :  { %v9279_v50 = vpop.f32.mrf.mxu0 }
 0x616   :  { %v12858_v56 = vadd.f32 %v9279_v50, %v12849_v3 }
 0x617   :  { %v3160_v16 = vpop.f32.mrf.mxu0 }
 0x618   :  { %v12852_v13 = vadd.f32 %v3160_v16, %v12849_v3  ;;  %v3359_v54 = vmul.f32 %v12858_v56, %v12858_v56  ;;  %v3290_v49 = vsel %vm109_vm0, %v12858_v56, 0.0 }
 0x619   :  { %v9280_v59 = vpop.f32.mrf.mxu0 }
 0x61a   :  { %v3357_v28 = vmul.f32 %v12852_v13, %v12852_v13  ;;  %v12865_v30 = vadd.f32 %v9280_v59, %v12849_v3  ;;  %v3287_v26 = vsel %vm109_vm0, %v12852_v13, 0.0  ;;  %v3392_v60 = vsel %vm109_vm0, %v3359_v54, 0.0 }
 0x61b   :  { %v3163_v29 = vpop.f32.mrf.mxu0 }
 0x61c   :  { %v12868_v39 = vadd.f32 %v3163_v29, %v12849_v3  ;;  %v3389_v24 = vsel %vm109_vm0, %v3357_v28, 0.0  ;;  %v3360_v19 = vmul.f32 %v12865_v30, %v12865_v30  ;;  %v3292_v57 = vsel %vm109_vm0, %v12865_v30, 0.0 }
 0x61d   :  { %v9283_v9 = vpop.f32.mrf.mxu0 }
 0x61e   :  { %v3288_v25 = vsel %vm109_vm0, %v12868_v39, 0.0  ;;  %v3358_v11 = vmul.f32 %v12868_v39, %v12868_v39  ;;  %v12891_v2 = vadd.f32 %v9283_v9, %v12849_v3  ;;  %v3394_v35 = vsel %vm109_vm0, %v3360_v19, 0.0 }
 0x61f   :  { %v3289_v1 = vadd.f32 %v3288_v25, %v3287_v26  ;;  %v3176_v12 = vpop.f32.mrf.mxu0 }
 0x620   :  { %v3390_v58 = vsel %vm109_vm0, %v3358_v11, 0.0  ;;  %v12885_v36 = vadd.f32 %v3176_v12, %v12849_v3  ;;  %v3363_v47 = vmul.f32 %v12891_v2, %v12891_v2  ;;  %v3298_v55 = vsel %vm109_vm0, %v12891_v2, 0.0 }
 0x621   :  { %v3291_v37 = vadd.f32 %v3290_v49, %v3289_v1  ;;  %v3391_v18 = vadd.f32 %v3390_v58, %v3389_v24  ;;  %v9284_v48 = vpop.f32.mrf.mxu0 }
 0x622   :  { %v3361_v14 = vmul.f32 %v12885_v36, %v12885_v36  ;;  %v3294_v31 = vsel %vm109_vm0, %v12885_v36, 0.0  ;;  %v12899_v46 = vadd.f32 %v9284_v48, %v12849_v3  ;;  %v3400_v50 = vsel %vm109_vm0, %v3363_v47, 0.0 }
 0x623   :  { %v3393_v27 = vadd.f32 %v3392_v60, %v3391_v18  ;;  %v3293_v15 = vadd.f32 %v3292_v57, %v3291_v37  ;;  %v3179_v44 = vpop.f32.mrf.mxu0 }
 0x624   :  { %v12902_v23 = vadd.f32 %v3179_v44, %v12849_v3  ;;  %v3396_v10 = vsel %vm109_vm0, %v3361_v14, 0.0  ;;  %v3364_v8 = vmul.f32 %v12899_v46, %v12899_v46  ;;  %v3300_v16 = vsel %vm109_vm0, %v12899_v46, 0.0 }
 0x625   :  { %v3295_v38 = vadd.f32 %v3294_v31, %v3293_v15  ;;  %v3395_v21 = vadd.f32 %v3394_v35, %v3393_v27  ;;  %v9287_v52 = vpop.f32.mrf.mxu0 }
 0x626   :  { %v3296_v62 = vsel %vm109_vm0, %v12902_v23, 0.0  ;;  %v3362_v43 = vmul.f32 %v12902_v23, %v12902_v23  ;;  %v12923_v5 = vadd.f32 %v9287_v52, %v12849_v3  ;;  %v3402_v54 = vsel %vm109_vm0, %v3364_v8, 0.0 }
 0x627   :  { %v3397_v41 = vadd.f32 %v3396_v10, %v3395_v21  ;;  %v3297_v45 = vadd.f32 %v3296_v62, %v3295_v38  ;;  %v3192_v22 = vpop.f32.mrf.mxu0 }
 0x628   :  { %v3398_v0 = vsel %vm109_vm0, %v3362_v43, 0.0  ;;  %v12917_v40 = vadd.f32 %v3192_v22, %v12849_v3  ;;  %v3367_v24 = vmul.f32 %v12923_v5, %v12923_v5  ;;  %v3306_v57 = vsel %vm109_vm0, %v12923_v5, 0.0 }
 0x629   :  { %v3299_v61 = vadd.f32 %v3298_v55, %v3297_v45  ;;  %v3399_v4 = vadd.f32 %v3398_v0, %v3397_v41  ;;  %v9288_v7 = vpop.f32.mrf.mxu0 }
 0x62a   :  { %v3365_v59 = vmul.f32 %v12917_v40, %v12917_v40  ;;  %v3302_v26 = vsel %vm109_vm0, %v12917_v40, 0.0  ;;  %v12931_v25 = vadd.f32 %v9288_v7, %v12849_v3  ;;  %v3408_v38 = vsel %vm109_vm0, %v3367_v24, 0.0 }
 0x62b   :  { %v3401_v29 = vadd.f32 %v3400_v50, %v3399_v4  ;;  %v3301_v28 = vadd.f32 %v3300_v16, %v3299_v61  ;;  %v3195_v9 = vpop.f32.mrf.mxu0 }
 0x62c   :  { %v12934_v11 = vadd.f32 %v3195_v9, %v12849_v3  ;;  %v3404_v19 = vsel %vm109_vm0, %v3365_v59, 0.0  ;;  %v3368_v14 = vmul.f32 %v12931_v25, %v12931_v25  ;;  %v3308_v21 = vsel %vm109_vm0, %v12931_v25, 0.0 }
 0x62d   :  { %v3303_v49 = vadd.f32 %v3302_v26, %v3301_v28  ;;  %v3403_v1 = vadd.f32 %v3402_v54, %v3401_v29  ;;  %v9291_v12 = vpop.f32.mrf.mxu0 }
 0x62e   :  { %v3304_v58 = vsel %vm109_vm0, %v12934_v11, 0.0  ;;  %v3366_v37 = vmul.f32 %v12934_v11, %v12934_v11  ;;  %v12955_v52 = vadd.f32 %v9291_v12, %v12849_v3  ;;  %v3410_v41 = vsel %vm109_vm0, %v3368_v14, 0.0 }
 0x62f   :  { %v3405_v18 = vadd.f32 %v3404_v19, %v3403_v1  ;;  %v3305_v48 = vadd.f32 %v3304_v58, %v3303_v49  ;;  %v3208_v60 = vpop.f32.mrf.mxu0 }
 0x630   :  { %v3406_v27 = vsel %vm109_vm0, %v3366_v37, 0.0  ;;  %v12949_v15 = vadd.f32 %v3208_v60, %v12849_v3  ;;  %v3371_v4 = vmul.f32 %v12955_v52, %v12955_v52  ;;  %v3314_v9 = vsel %vm109_vm0, %v12955_v52, 0.0 }
 0x631   :  { %v3307_v44 = vadd.f32 %v3306_v57, %v3305_v48  ;;  %v3407_v35 = vadd.f32 %v3406_v27, %v3405_v18  ;;  %v9292_v31 = vpop.f32.mrf.mxu0 }
 0x632   :  { %v3369_v47 = vmul.f32 %v12949_v15, %v12949_v15  ;;  %v3310_v45 = vsel %vm109_vm0, %v12949_v15, 0.0  ;;  %v12963_v22 = vadd.f32 %v9292_v31, %v12849_v3  ;;  %v3416_v19 = vsel %vm109_vm0, %v3371_v4, 0.0 }
 0x633   :  { %v3409_v10 = vadd.f32 %v3408_v38, %v3407_v35  ;;  %v3309_v62 = vadd.f32 %v3308_v21, %v3307_v44  ;;  %v3211_v43 = vpop.f32.mrf.mxu0 }
 0x634   :  { %v12966_v55 = vadd.f32 %v3211_v43, %v12849_v3  ;;  %v3412_v7 = vsel %vm109_vm0, %v3369_v47, 0.0  ;;  %v3372_v54 = vmul.f32 %v12963_v22, %v12963_v22  ;;  %v3316_v58 = vsel %vm109_vm0, %v12963_v22, 0.0 }
 0x635   :  { %v3311_v8 = vadd.f32 %v3310_v45, %v3309_v62  ;;  %v3411_v0 = vadd.f32 %v3410_v41, %v3409_v10  ;;  %v9295_v61 = vpop.f32.mrf.mxu0 }
 0x636   :  { %v3312_v50 = vsel %vm109_vm0, %v12966_v55, 0.0  ;;  %v3370_v16 = vmul.f32 %v12966_v55, %v12966_v55  ;;  %v12987_v37 = vadd.f32 %v9295_v61, %v12849_v3  ;;  %v3418_v14 = vsel %vm109_vm0, %v3372_v54, 0.0 }
 0x637   :  { %v3413_v59 = vadd.f32 %v3412_v7, %v3411_v0  ;;  %v3313_v29 = vadd.f32 %v3312_v50, %v3311_v8  ;;  %v3224_v28 = vpop.f32.mrf.mxu0 }
 0x638   :  { %v3414_v26 = vsel %vm109_vm0, %v3370_v16, 0.0  ;;  %v12981_v49 = vadd.f32 %v3224_v28, %v12849_v3  ;;  %v3375_v47 = vmul.f32 %v12987_v37, %v12987_v37  ;;  %v3322_v0 = vsel %vm109_vm0, %v12987_v37, 0.0 }
 0x639   :  { %v3315_v1 = vadd.f32 %v3314_v9, %v3313_v29  ;;  %v3415_v12 = vadd.f32 %v3414_v26, %v3413_v59  ;;  %v9296_v24 = vpop.f32.mrf.mxu0 }
 0x63a   :  { %v3373_v18 = vmul.f32 %v12981_v49, %v12981_v49  ;;  %v3318_v27 = vsel %vm109_vm0, %v12981_v49, 0.0  ;;  %v12995_v44 = vadd.f32 %v9296_v24, %v12849_v3  ;;  %v3424_v29 = vsel %vm109_vm0, %v3375_v47, 0.0 }
 0x63b   :  { %v3417_v48 = vadd.f32 %v3416_v19, %v3415_v12  ;;  %v3317_v60 = vadd.f32 %v3316_v58, %v3315_v1  ;;  %v3227_v57 = vpop.f32.mrf.mxu0 }
 0x63c   :  { %v12998_v35 = vadd.f32 %v3227_v57, %v12849_v3  ;;  %v3420_v10 = vsel %vm109_vm0, %v3373_v18, 0.0  ;;  %v3376_v61 = vmul.f32 %v12995_v44, %v12995_v44  ;;  %v3324_v28 = vsel %vm109_vm0, %v12995_v44, 0.0 }
 0x63d   :  { %v3319_v31 = vadd.f32 %v3318_v27, %v3317_v60  ;;  %v3419_v38 = vadd.f32 %v3418_v14, %v3417_v48  ;;  %v9299_v21 = vpop.f32.mrf.mxu0 }
 0x63e   :  { %v3320_v62 = vsel %vm109_vm0, %v12998_v35, 0.0  ;;  %v3374_v43 = vmul.f32 %v12998_v35, %v12998_v35  ;;  %v13019_v9 = vadd.f32 %v9299_v21, %v12849_v3  ;;  %v3426_v24 = vsel %vm109_vm0, %v3376_v61, 0.0 }
 0x63f   :  { %v3421_v41 = vadd.f32 %v3420_v10, %v3419_v38  ;;  %v3321_v45 = vadd.f32 %v3320_v62, %v3319_v31  ;;  %v3240_v8 = vpop.f32.mrf.mxu0 }
 0x640   :  { %v3422_v4 = vsel %vm109_vm0, %v3374_v43, 0.0  ;;  %v13013_v7 = vadd.f32 %v3240_v8, %v12849_v3  ;;  %v3379_v14 = vmul.f32 %v13019_v9, %v13019_v9  ;;  %v3330_v62 = vsel %vm109_vm0, %v13019_v9, 0.0 }
 0x641   :  { %v3323_v50 = vadd.f32 %v3322_v0, %v3321_v45  ;;  %v3423_v16 = vadd.f32 %v3422_v4, %v3421_v41  ;;  %v9300_v59 = vpop.f32.mrf.mxu0 }
 0x642   :  { %v3377_v54 = vmul.f32 %v13013_v7, %v13013_v7  ;;  %v3326_v19 = vsel %vm109_vm0, %v13013_v7, 0.0  ;;  %v13027_v58 = vadd.f32 %v9300_v59, %v12849_v3  ;;  %v3432_v4 = vsel %vm109_vm0, %v3379_v14, 0.0 }
 0x643   :  { %v3425_v26 = vadd.f32 %v3424_v29, %v3423_v16  ;;  %v3325_v1 = vadd.f32 %v3324_v28, %v3323_v50  ;;  %v3243_v12 = vpop.f32.mrf.mxu0 }
 0x644   :  { %v13030_v18 = vadd.f32 %v3243_v12, %v12849_v3  ;;  %v3428_v27 = vsel %vm109_vm0, %v3377_v54, 0.0  ;;  %v3380_v43 = vmul.f32 %v13027_v58, %v13027_v58  ;;  %v3332_v50 = vsel %vm109_vm0, %v13027_v58, 0.0 }
 0x645   :  { %v3327_v48 = vadd.f32 %v3326_v19, %v3325_v1  ;;  %v3427_v60 = vadd.f32 %v3426_v24, %v3425_v26  ;;  %v9303_v57 = vpop.f32.mrf.mxu0 }
 0x646   :  { %v3328_v31 = vsel %vm109_vm0, %v13030_v18, 0.0  ;;  %v3378_v38 = vmul.f32 %v13030_v18, %v13030_v18  ;;  %v13051_v16 = vadd.f32 %v9303_v57, %v12849_v3  ;;  %v3434_v26 = vsel %vm109_vm0, %v3380_v43, 0.0 }
 0x647   :  { %v3429_v21 = vadd.f32 %v3428_v27, %v3427_v60  ;;  %v3329_v47 = vadd.f32 %v3328_v31, %v3327_v48  ;;  %v3256_v10 = vpop.f32.mrf.mxu0 }
 0x648   :  { %v3430_v41 = vsel %vm109_vm0, %v3378_v38, 0.0  ;;  %v13045_v45 = vadd.f32 %v3256_v10, %v12849_v3  ;;  %v3383_v57 = vmul.f32 %v13051_v16, %v13051_v16  ;;  %v3338_v10 = vsel %vm109_vm0, %v13051_v16, 0.0 }
 0x649   :  { %v3331_v8 = vadd.f32 %v3330_v62, %v3329_v47  ;;  %v3431_v0 = vadd.f32 %v3430_v41, %v3429_v21  ;;  %v9304_v61 = vpop.f32.mrf.mxu0 }
 0x64a   :  { %v3381_v59 = vmul.f32 %v13045_v45, %v13045_v45  ;;  %v3334_v1 = vsel %vm109_vm0, %v13045_v45, 0.0  ;;  %v13059_v12 = vadd.f32 %v9304_v61, %v12849_v3 }
 0x64b   :  { %v3433_v29 = vadd.f32 %v3432_v4, %v3431_v0  ;;  %v3333_v28 = vadd.f32 %v3332_v50, %v3331_v8  ;;  %v3259_v54 = vpop.f32.mrf.mxu0  ;;  %v3440_v4 = vsel %vm109_vm0, %v3383_v57, 0.0 }
 0x64c   :  { %v13062_v24 = vadd.f32 %v3259_v54, %v12849_v3  ;;  %v3436_v14 = vsel %vm109_vm0, %v3381_v59, 0.0  ;;  %v3384_v62 = vmul.f32 %v13059_v12, %v13059_v12  ;;  %v3340_v50 = vsel %vm109_vm0, %v13059_v12, 0.0 }
 0x64d   :  { %v3335_v19 = vadd.f32 %v3334_v1, %v3333_v28  ;;  %v3435_v48 = vadd.f32 %v3434_v26, %v3433_v29  ;;  %v9307_v60 = vpop.f32.mrf.mxu0 }
 0x64e   :  { %v3336_v27 = vsel %vm109_vm0, %v13062_v24, 0.0  ;;  %v3382_v31 = vmul.f32 %v13062_v24, %v13062_v24  ;;  %v13083_v59 = vadd.f32 %v9307_v60, %v12849_v3  ;;  %v3442_v1 = vsel %vm109_vm0, %v3384_v62, 0.0 }
 0x64f   :  { %v3437_v38 = vadd.f32 %v3436_v14, %v3435_v48  ;;  %v3337_v21 = vadd.f32 %v3336_v27, %v3335_v19  ;;  %v3272_v47 = vpop.f32.mrf.mxu0 }
 0x650   :  { %v3438_v43 = vsel %vm109_vm0, %v3382_v31, 0.0  ;;  %v13077_v41 = vadd.f32 %v3272_v47, %v12849_v3  ;;  %v3387_v27 = vmul.f32 %v13083_v59, %v13083_v59  ;;  %v3346_v62 = vsel %vm109_vm0, %v13083_v59, 0.0 }
 0x651   :  { %v3339_v8 = vadd.f32 %v3338_v10, %v3337_v21  ;;  %v3439_v0 = vadd.f32 %v3438_v43, %v3437_v38  ;;  %v9308_v61 = vpop.f32.mrf.mxu0 }
 0x652   :  { %v3385_v29 = vmul.f32 %v13077_v41, %v13077_v41  ;;  %v3342_v19 = vsel %vm109_vm0, %v13077_v41, 0.0  ;;  %v13091_v48 = vadd.f32 %v9308_v61, %v12849_v3  ;;  %v3448_v61 = vsel %vm109_vm0, %v3387_v27, 0.0 }
 0x653   :  { %v3441_v28 = vadd.f32 %v3440_v4, %v3439_v0  ;;  %v3341_v54 = vadd.f32 %v3340_v50, %v3339_v8  ;;  %v3275_v26 = vpop.f32.mrf.mxu0 }
 0x654   :  { %v13094_v57 = vadd.f32 %v3275_v26, %v12849_v3  ;;  %v3444_v31 = vsel %vm109_vm0, %v3385_v29, 0.0  ;;  %v3388_v3 = vmul.f32 %v13091_v48, %v13091_v48  ;;  %v3348_v4 = vsel %vm109_vm0, %v13091_v48, 0.0 }
 0x655   :  { %v3343_v14 = vadd.f32 %v3342_v19, %v3341_v54  ;;  %v3443_v60 = vadd.f32 %v3442_v1, %v3441_v28 }
 0x656   :  { %v3344_v38 = vsel %vm109_vm0, %v13094_v57, 0.0  ;;  %v3386_v21 = vmul.f32 %v13094_v57, %v13094_v57  ;;  %v3450_v28 = vsel %vm109_vm0, %v3388_v3, 0.0 }
 0x657   :  { %v3445_v47 = vadd.f32 %v3444_v31, %v3443_v60  ;;  %v3345_v10 = vadd.f32 %v3344_v38, %v3343_v14 }
 0x658   :  { %v3446_v43 = vsel %vm109_vm0, %v3386_v21, 0.0 }
 0x659   :  { %v3347_v8 = vadd.f32 %v3346_v62, %v3345_v10  ;;  %v3447_v0 = vadd.f32 %v3446_v43, %v3445_v47 }
 0x65b   :  { %v3349_v50 = vadd.f32 %v3348_v4, %v3347_v8  ;;  %v3449_v29 = vadd.f32 %v3448_v61, %v3447_v0 }
 0x65d   :  { %v3350_v54 = vrot.slane %v3349_v50, 4  ;;  %v3451_v26 = vadd.f32 %v3450_v28, %v3449_v29 }
 0x65f   :  { %v3351_v1 = vadd.f32 %v3350_v54, %v3349_v50  ;;  %v3452_v19 = vrot.slane %v3451_v26, 4 }
 0x661   :  { %v3352_v14 = vrot.slane %v3351_v1, 2  ;;  %v3453_v60 = vadd.f32 %v3452_v19, %v3451_v26 }
 0x663   :  { %v3353_v31 = vadd.f32 %v3352_v14, %v3351_v1  ;;  %v3454_v38 = vrot.slane %v3453_v60, 2 }
 0x665   :  { %v3354_v21 = vrot.slane %v3353_v31, 1  ;;  %v3455_v10 = vadd.f32 %v3454_v38, %v3453_v60 }
 0x667   :  { %v3355_v47 = vadd.f32 %v3354_v21, %v3353_v31  ;;  %v3456_v62 = vrot.slane %v3455_v10, 1 }
 0x669   :  { %v13112_v27 = vmul.f32 0.00390625, %v3355_v47  ;;  %v3457_v43 = vadd.f32 %v3456_v62, %v3455_v10 }
 0x66b   :  { %v3458_v63 = vmul.f32 0.00390625, %v3457_v43  ;;  %v3459_v8 = vmul.f32 %v13112_v27, %v13112_v27  ;;  %v3490_v3 = vsub.f32 %v13094_v57, %v13112_v27  ;;  %v3487_v4 = vsub.f32 %v13051_v16, %v13112_v27 }
 0x66c   :  { %v3488_v50 = vsub.f32 %v13059_v12, %v13112_v27  ;;  %v3489_v29 = vsub.f32 %v13077_v41, %v13112_v27  ;;  %v3491_v28 = vsub.f32 %v13083_v59, %v13112_v27  ;;  %v3492_v54 = vsub.f32 %v13091_v48, %v13112_v27 }
 0x66d   :  { %v3460_v0 = vsub.f32 %v3458_v63, %v3459_v8  ;;  %v3461_v63 = vsub.f32 %v12852_v13, %v13112_v27  ;;  %v3462_v57 = vsub.f32 %v12868_v39, %v13112_v27  ;;  %v3463_v16 = vsub.f32 %v12858_v56, %v13112_v27 }
 0x66e   :  { %v3464_v12 = vsub.f32 %v12865_v30, %v13112_v27  ;;  %v3465_v41 = vsub.f32 %v12885_v36, %v13112_v27  ;;  %v3466_v59 = vsub.f32 %v12902_v23, %v13112_v27  ;;  %v3467_v48 = vsub.f32 %v12891_v2, %v13112_v27 }
 0x66f   :  { %v3493_v61 = vadd.f32 1e-05, %v3460_v0  ;;  %v3468_v13 = vsub.f32 %v12899_v46, %v13112_v27  ;;  %v3469_v39 = vsub.f32 %v12917_v40, %v13112_v27  ;;  %v3470_v56 = vsub.f32 %v12934_v11, %v13112_v27 }
 0x670   :  { %v3471_v30 = vsub.f32 %v12923_v5, %v13112_v27  ;;  %v3472_v36 = vsub.f32 %v12931_v25, %v13112_v27  ;;  %v3473_v23 = vsub.f32 %v12949_v15, %v13112_v27  ;;  %v3474_v2 = vsub.f32 %v12966_v55, %v13112_v27  ;;  %v13169_v15 = vld [vmem:[%s16903_s14 + $0x21] ss:$0 sm:$0xff] }
 0x671   :  { %9673 = vrsqrt.f32 %v3493_v61  ;;  %v3475_v46 = vsub.f32 %v12955_v52, %v13112_v27  ;;  %v3476_v40 = vsub.f32 %v12963_v22, %v13112_v27  ;;  %v3477_v11 = vsub.f32 %v12981_v49, %v13112_v27 }
 0x672   :  { %v3478_v5 = vsub.f32 %v12998_v35, %v13112_v27  ;;  %v3479_v25 = vsub.f32 %v12987_v37, %v13112_v27  ;;  %v3480_v52 = vsub.f32 %v12995_v44, %v13112_v27  ;;  %v3481_v22 = vsub.f32 %v13013_v7, %v13112_v27 }
 0x673   :  { %v3482_v55 = vsub.f32 %v13030_v18, %v13112_v27  ;;  %v3483_v49 = vsub.f32 %v13019_v9, %v13112_v27  ;;  %v3484_v37 = vsub.f32 %v13027_v58, %v13112_v27  ;;  %v3485_v1 = vsub.f32 %v13045_v45, %v13112_v27 }
 0x674   :  { %v3486_v19 = vsub.f32 %v13062_v24, %v13112_v27 }
 0x67e   :  { %v9674_v26 = vpop.eup %9673 }
 0x67f   :  { %v3524_v35 = vmul.f32 %v9674_v26, %v3490_v3  ;;  %v3495_v44 = vmul.f32 %v9674_v26, %v3461_v63  ;;  %v3496_v14 = vmul.f32 %v9674_v26, %v3462_v57  ;;  %v3497_v60 = vmul.f32 %v9674_v26, %v3463_v16 }
 0x680   :  { %v3498_v7 = vmul.f32 %v9674_v26, %v3464_v12  ;;  %v3499_v18 = vmul.f32 %v9674_v26, %v3465_v41  ;;  %v3500_v38 = vmul.f32 %v9674_v26, %v3466_v59  ;;  %v3501_v9 = vmul.f32 %v9674_v26, %v3467_v48 }
 0x681   :  { %v13186_v31 = vmul.f32 %v13169_v15, %v3524_v35  ;;  %v3502_v21 = vmul.f32 %v9674_v26, %v3468_v13  ;;  %v3503_v10 = vmul.f32 %v9674_v26, %v3469_v39  ;;  %v3504_v47 = vmul.f32 %v9674_v26, %v3470_v56 }
 0x682   :  { %v3505_v58 = vmul.f32 %v9674_v26, %v3471_v30  ;;  %v3506_v62 = vmul.f32 %v9674_v26, %v3472_v36  ;;  %v3507_v43 = vmul.f32 %v9674_v26, %v3473_v23  ;;  %v3508_v45 = vmul.f32 %v9674_v26, %v3474_v2 }
 0x683   :  { %v3509_v8 = vmul.f32 %v9674_v26, %v3475_v46  ;;  %v3510_v3 = vmul.f32 %v9674_v26, %v3476_v40  ;;  %v3511_v24 = vmul.f32 %v9674_v26, %v3477_v11  ;;  %v3512_v27 = vmul.f32 %v9674_v26, %v3478_v5 }
 0x684   :  { %v3513_v0 = vmul.f32 %v9674_v26, %v3479_v25  ;;  %v3514_v61 = vmul.f32 %v9674_v26, %v3480_v52  ;;  %v3515_v63 = vmul.f32 %v9674_v26, %v3481_v22  ;;  %v3516_v57 = vmul.f32 %v9674_v26, %v3482_v55  ;;  %v13219_v55 = vld [vmem:[%s16903_s14 + $0x22] ss:$0 sm:$0xff] }
 0x685   :  { %v3517_v16 = vmul.f32 %v9674_v26, %v3483_v49  ;;  %v3518_v12 = vmul.f32 %v9674_v26, %v3484_v37  ;;  %v3519_v41 = vmul.f32 %v9674_v26, %v3485_v1  ;;  %v3520_v59 = vmul.f32 %v9674_v26, %v3486_v19 }
 0x686   :  { %v3525_v48 = vmul.f32 %v9674_v26, %v3491_v28  ;;  %v3521_v13 = vmul.f32 %v9674_v26, %v3487_v4  ;;  %v3522_v39 = vmul.f32 %v9674_v26, %v3488_v50  ;;  %v3523_v56 = vmul.f32 %v9674_v26, %v3489_v29 }
 0x687   :  { %v3526_v30 = vmul.f32 %v9674_v26, %v3492_v54  ;;  %v3528_v36 = vmul.f32 %v13169_v15, %v3495_v44  ;;  %v3529_v23 = vmul.f32 %v13169_v15, %v3496_v14  ;;  %v3530_v2 = vmul.f32 %v13169_v15, %v3497_v60 }
 0x688   :  { %v3531_v46 = vmul.f32 %v13169_v15, %v3498_v7  ;;  %v3532_v40 = vmul.f32 %v13169_v15, %v3499_v18  ;;  %v3533_v11 = vmul.f32 %v13169_v15, %v3500_v38  ;;  %v3534_v5 = vmul.f32 %v13169_v15, %v3501_v9 }
 0x689   :  { %v3535_v28 = vmul.f32 %v13169_v15, %v3502_v21  ;;  %v3536_v4 = vmul.f32 %v13169_v15, %v3503_v10  ;;  %v3537_v50 = vmul.f32 %v13169_v15, %v3504_v47  ;;  %v13199_v29 = vmul.f32 %v13169_v15, %v3505_v58 }
 0x68a   :  { %v13202_v54 = vmul.f32 %v13169_v15, %v3506_v62  ;;  %v13205_v25 = vmul.f32 %v13169_v15, %v3507_v43  ;;  %v13208_v26 = vmul.f32 %v13169_v15, %v3508_v45  ;;  %v13211_v52 = vmul.f32 %v13169_v15, %v3509_v8 }
 0x68b   :  { %v13214_v22 = vmul.f32 %v13169_v15, %v3510_v3  ;;  %v13222_v49 = vmul.f32 %v13169_v15, %v3511_v24  ;;  %v3546_v35 = vmul.f32 %v13169_v15, %v3513_v0  ;;  %v3547_v37 = vmul.f32 %v13169_v15, %v3514_v61 }
 0x68c   :  { %v3550_v1 = vmul.f32 %v13169_v15, %v3517_v16  ;;  %v13228_v19 = vmul.f32 %v13169_v15, %v3512_v27  ;;  %v13231_v44 = vmul.f32 %v13169_v15, %v3515_v63  ;;  %v3551_v14 = vmul.f32 %v13169_v15, %v3518_v12 }
 0x68d   :  { %v3554_v60 = vmul.f32 %v13169_v15, %v3521_v13  ;;  %v13236_v7 = vmul.f32 %v13169_v15, %v3516_v57  ;;  %v3555_v18 = vmul.f32 %v13169_v15, %v3522_v39  ;;  %v3558_v38 = vmul.f32 %v13169_v15, %v3525_v48 }
 0x68e   :  { %v3559_v9 = vmul.f32 %v13169_v15, %v3526_v30  ;;  %v3561_v21 = vadd.f32 %v13219_v55, %v3528_v36  ;;  %v3562_v10 = vadd.f32 %v13219_v55, %v3529_v23  ;;  %v3563_v47 = vadd.f32 %v13219_v55, %v3530_v2 }
 0x68f   :  { %v3564_v58 = vadd.f32 %v13219_v55, %v3531_v46  ;;  %v3579_v62 = vadd.f32 %v13219_v55, %v3546_v35  ;;  %v3580_v43 = vadd.f32 %v13219_v55, %v3547_v37  ;;  %v3583_v45 = vadd.f32 %v13219_v55, %v3550_v1 }
 0x690   :  { %v3584_v8 = vadd.f32 %v13219_v55, %v3551_v14  ;;  %v3552_v3 = vmul.f32 %v13169_v15, %v3519_v41  ;;  %v3553_v24 = vmul.f32 %v13169_v15, %v3520_v59  ;;  %v13252_v27 = vmul.f32 %v13169_v15, %v3523_v56 }
 0x691   :  { %v13255_v0 = vadd.f32 %v13219_v55, %v3554_v60  ;;  %v3593_v61 = vmax.f32 %v3561_v21, 0.0  ;;  %v3594_v63 = vmax.f32 %v3562_v10, 0.0  ;;  %v3595_v57 = vmax.f32 %v3563_v47, 0.0 }
 0x692   :  { %v3596_v16 = vmax.f32 %v3564_v58, 0.0  ;;  %v3588_v12 = vadd.f32 %v13219_v55, %v3555_v18  ;;  %v13259_v48 = vadd.f32 %v13219_v55, %v3558_v38  ;;  %v13262_v13 = vadd.f32 %v13219_v55, %v3559_v9 }
 0x693   :  { %v3611_v41 = vmax.f32 %v3579_v62, 0.0  ;;  %v3612_v59 = vmax.f32 %v3580_v43, 0.0  ;;  %v3615_v39 = vmax.f32 %v3583_v45, 0.0  ;;  %v3616_v15 = vmax.f32 %v3584_v8, 0.0 }
 0x694   :  { %v3619_v56 = vmax.f32 %v13255_v0, 0.0  ;;  %v3625_v30 = vpack.c.bf16 %v3594_v63, %v3593_v61  ;;  %v3626_v36 = vpack.c.bf16 %v3596_v16, %v3595_v57  ;;  %v3565_v23 = vadd.f32 %v13219_v55, %v3532_v40 }
 0x695   :  { %v3566_v2 = vadd.f32 %v13219_v55, %v3533_v11  ;;  %v3567_v46 = vadd.f32 %v13219_v55, %v3534_v5  ;;  %v3568_v35 = vadd.f32 %v13219_v55, %v3535_v28  ;;  %v3569_v37 = vadd.f32 %v13219_v55, %v3536_v4 }
 0x696   :  { %v3570_v1 = vadd.f32 %v13219_v55, %v3537_v50  ;;  %v3620_v14 = vmax.f32 %v3588_v12, 0.0  ;;  %v3623_v60 = vmax.f32 %v13259_v48, 0.0  ;;  %9311 = vmatprep.mubr.msk.bf16.mxu1 %vm109_vm0, %v3625_v30  ;;  %v3597_v18 = vmax.f32 %v3565_v23, 0.0 }
 0x697   :  { %v3598_v38 = vmax.f32 %v3566_v2, 0.0  ;;  %9312 = vmatmul.mubr.msk.bf16.vlgmr.msra.gmra.mxu1 %vm109_vm0, %v3626_v36  ;;  %v3599_v40 = vmax.f32 %v3567_v46, 0.0  ;;  %v3600_v9 = vmax.f32 %v3568_v35, 0.0  ;;  %v3601_v11 = vmax.f32 %v3569_v37, 0.0 }
 0x698   :  { %v3602_v21 = vmax.f32 %v3570_v1, 0.0  ;;  %v3624_v5 = vmax.f32 %v13262_v13, 0.0  ;;  %9378 = vmatpush3.bf16.msra.mxu1 %v12860_v34  ;;  %v3571_v4 = vadd.f32 %v13219_v55, %v13199_v29  ;;  %v3573_v50 = vadd.f32 %v13219_v55, %v13205_v25 }
 0x699   :  { %v3627_v28 = vpack.c.bf16 %v3598_v38, %v3597_v18  ;;  %v3628_v10 = vpack.c.bf16 %v3600_v9, %v3599_v40  ;;  %v3572_v47 = vadd.f32 %v13219_v55, %v13202_v54  ;;  %v3574_v58 = vadd.f32 %v13219_v55, %v13208_v26  ;;  %v4785_v9 = vld [vmem:[%s16890_s1 + $0x8] sm:$0xff] }
 0x69a   :  { %v3575_v62 = vadd.f32 %v13219_v55, %v13211_v52  ;;  %v3629_v43 = vpack.c.bf16 %v3602_v21, %v3601_v11  ;;  %v3605_v34 = vmax.f32 %v3573_v50, 0.0  ;;  %v3576_v29 = vadd.f32 %v13219_v55, %v13214_v22  ;;  %v4784_v11 = vld [vmem:[%s16890_s1] sm:$0xff]  ;;  %v4787_v50 = vld [vmem:[%s16890_s1 + $0x18] sm:$0xff] }
 0x69b   :  { %9315 = vmatprep.mubr.msk.bf16.mxu1 %vm109_vm0, %v3627_v28  ;;  %v3577_v25 = vadd.f32 %v13219_v55, %v13222_v49  ;;  %v3606_v45 = vmax.f32 %v3574_v58, 0.0  ;;  %v3578_v54 = vadd.f32 %v13219_v55, %v13228_v19  ;;  %v3634_v0 = vpack.c.bf16 %v3612_v59, %v3611_v41 }
 0x69c   :  { %v3607_v8 = vmax.f32 %v3575_v62, 0.0  ;;  %v3608_v26 = vmax.f32 %v3576_v29, 0.0  ;;  %v3581_v52 = vadd.f32 %v13219_v55, %v13231_v44  ;;  %v3582_v63 = vadd.f32 %v13219_v55, %v13236_v7  ;;  %v4786_v62 = vld [vmem:[%s16890_s1 + $0x10] sm:$0xff]  ;;  %v4788_v29 = vld [vmem:[%s16890_s1 + $0x20] sm:$0xff] }
 0x69d   :  { %v3609_v61 = vmax.f32 %v3577_v25, 0.0  ;;  %v3631_v57 = vpack.c.bf16 %v3606_v45, %v3605_v34  ;;  %v3610_v16 = vmax.f32 %v3578_v54, 0.0  ;;  %v3636_v22 = vpack.c.bf16 %v3616_v15, %v3615_v39 }
 0x69e   :  { %v3585_v12 = vadd.f32 %v13219_v55, %v3552_v3  ;;  %v3632_v49 = vpack.c.bf16 %v3608_v26, %v3607_v8  ;;  %v3613_v48 = vmax.f32 %v3581_v52, 0.0  ;;  %v3614_v13 = vmax.f32 %v3582_v63, 0.0  ;;  %v4791_v63 = vld [vmem:[%s16890_s1 + $0x38] sm:$0xff] }
 0x69f   :  { %v3586_v30 = vadd.f32 %v13219_v55, %v3553_v24  ;;  %9316 = vmatmul.mubr.msk.bf16.gmra.mxu1 %vm109_vm0, %v3628_v10  ;;  %v3633_v19 = vpack.c.bf16 %v3610_v16, %v3609_v61  ;;  %v3638_v59 = vpack.c.bf16 %v3620_v14, %v3619_v56  ;;  %v3589_v44 = vadd.f32 %v13219_v55, %v13252_v27  ;;  %v4949_v27 = vpop.permute.xlu1 %4948  ;;  %v4945_v56 = vpop.permute.xlu0 %4944  ;;  %v4793_v16 = vld [vmem:[%s16890_s1 + $0x48] sm:$0xff] }
 0x6a0   :  { %v3617_v41 = vmax.f32 %v3585_v12, 0.0  ;;  %9319 = vmatprep.mubr.msk.bf16.mxu1 %vm109_vm0, %v3629_v43  ;;  %v3635_v7 = vpack.c.bf16 %v3614_v13, %v3613_v48  ;;  %v3590_v3 = vadd.f32 %v13219_v55, %v13186_v31  ;;  %v3640_v39 = vpack.c.bf16 %v3624_v5, %v3623_v60 }
 0x6a1   :  { %v3618_v36 = vmax.f32 %v3586_v30, 0.0  ;;  %v3603_v15 = vmax.f32 %v3571_v4, 0.0  ;;  %v3604_v23 = vmax.f32 %v3572_v47, 0.0  ;;  %v3621_v2 = vmax.f32 %v3589_v44, 0.0  ;;  %v4789_v47 = vld [vmem:[%s16890_s1 + $0x28] sm:$0xff]  ;;  %v4792_v30 = vld [vmem:[%s16890_s1 + $0x40] sm:$0xff] }
 0x6a2   :  { %v3622_v46 = vmax.f32 %v3590_v3, 0.0  ;;  %v5040_v4 = vmul.f32 %v4945_v56, %v4784_v11  ;;  %v5042_v54 = vmul.f32 %v4949_v27, %v4786_v62  ;;  %v17250_v11 = vld [vmem:[#allocation15_spill] sm:$0xff] }
 0x6a3   :  { %v3637_v24 = vpack.c.bf16 %v3618_v36, %v3617_v41  ;;  %v3630_v37 = vpack.c.bf16 %v3604_v23, %v3603_v15  ;;  %v4951_v1 = vpop.permute.xlu1 %4950  ;;  %v4947_v14 = vpop.permute.xlu0 %4946  ;;  %v4795_v15 = vld [vmem:[%s16890_s1 + $0x58] sm:$0xff]  ;;  %v17247_v23 = vld [vmem:[#allocation5_spill] sm:$0xff]  ;;  %v4798_v62 = vld [vmem:[%s16890_s1 + $0x70] sm:$0xff] }
 0x6a4   :  { %v3639_v35 = vpack.c.bf16 %v3622_v46, %v3621_v2  ;;  %v5041_v5 = vmul.f32 %v4947_v14, %v4785_v9  ;;  %v5072_v43 = vadd.f32 %v5040_v4, %v12224_v20  ;;  %v5043_v34 = vmul.f32 %v4951_v1, %v4787_v50  ;;  %v17248_v46 = vld [vmem:[#allocation7_spill] sm:$0xff]  ;;  %v4796_v1 = vld [vmem:[%s16890_s1 + $0x60] sm:$0xff]  ;;  %v17251_v4 = vld [vmem:[#allocation8_spill] sm:$0xff] }
 0x6a6   :  { %v5073_v10 = vadd.f32 %v5041_v5, %v12232_v42  ;;  %v5075_v26 = vadd.f32 %v5043_v34, %v12228_v17 }
 0x6a7   :  { %9320 = vmatmul.mubr.msk.bf16.gmra.mxu1 %vm109_vm0, %v3630_v37  ;;  %v4955_v31 = vpop.permute.xlu1 %4954  ;;  %v4953_v55 = vpop.permute.xlu0 %4952  ;;  %v4794_v37 = vld [vmem:[%s16890_s1 + $0x50] sm:$0xff] }
 0x6a8   :  { %9323 = vmatprep.mubr.msk.bf16.mxu1 %vm109_vm0, %v3631_v57  ;;  %v5104_v45 = vpack.c.bf16 %v5073_v10, %v5072_v43  ;;  %v5045_v8 = vmul.f32 %v4955_v31, %v4789_v47  ;;  %v5074_v57 = vadd.f32 %v5042_v54, %v12220_v51  ;;  %v17252_v47 = vld [vmem:[#allocation12_spill] sm:$0xff] }
 0x6aa   :  { %v5077_v52 = vadd.f32 %v5045_v8, %v12250_v53  ;;  %v5105_v48 = vpack.c.bf16 %v5075_v26, %v5074_v57  ;;  %v17253_v26 = vld [vmem:[#allocation13_spill] sm:$0xff]  ;;  %v17254_v57 = vld [vmem:[#allocation19_spill] sm:$0xff] }
 0x6ab   :  { %v4959_v60 = vpop.permute.xlu1 %4958  ;;  %v4957_v18 = vpop.permute.xlu0 %4956 }
 0x6ac   :  { %v5047_v13 = vmul.f32 %v4959_v60, %v4791_v63 }
 0x6ae   :  { %v5079_v36 = vadd.f32 %v5047_v13, %v12247_v33  ;;  %v17256_v13 = vld [vmem:[#allocation14_spill] sm:$0xff] }
 0x6af   :  { %9324 = vmatmul.mubr.msk.bf16.gmra.mxu1 %vm109_vm0, %v3632_v49  ;;  %v4963_v38 = vpop.permute.xlu1 %4962  ;;  %v4961_v40 = vpop.permute.xlu0 %4960  ;;  %v4790_v49 = vld [vmem:[%s16890_s1 + $0x30] sm:$0xff] }
 0x6b0   :  { %9327 = vmatprep.mubr.msk.bf16.mxu1 %vm109_vm0, %v3633_v19  ;;  %v5049_v41 = vmul.f32 %v4963_v38, %v4793_v16 }
 0x6b3   :  { %v4967_v21 = vpop.permute.xlu1 %4966  ;;  %v4965_v28 = vpop.permute.xlu0 %4964 }
 0x6b4   :  { %v5051_v56 = vmul.f32 %v4967_v21, %v4795_v15  ;;  %v5050_v60 = vmul.f32 %v4965_v28, %v4794_v37  ;;  %v4799_v21 = vld [vmem:[%s16890_s1 + $0x78] sm:$0xff]  ;;  %v4801_v28 = vld [vmem:[%s16890_s1 + $0x88] sm:$0xff]  ;;  %v17258_v37 = vld [vmem:[#allocation23_spill] sm:$0xff] }
 0x6b6   :  { %v5082_v50 = vadd.f32 %v5050_v60, %v17251_v4 }
 0x6b7   :  { %9328 = vmatmul.mubr.msk.bf16.gmra.mxu1 %vm109_vm0, %v3634_v0  ;;  %v4971_v58 = vpop.permute.xlu1 %4970  ;;  %v4969_v25 = vpop.permute.xlu0 %4968  ;;  %v5044_v0 = vmul.f32 %v4953_v55, %v4788_v29  ;;  %v4800_v29 = vld [vmem:[%s16890_s1 + $0x80] sm:$0xff] }
 0x6b8   :  { %9331 = vmatprep.mubr.msk.bf16.mxu1 %vm109_vm0, %v3635_v7  ;;  %v5048_v7 = vmul.f32 %v4961_v40, %v4792_v30  ;;  %v5052_v38 = vmul.f32 %v4969_v25, %v4796_v1  ;;  %v17249_v40 = vld [vmem:[#allocation9_spill] sm:$0xff] }
 0x6b9   :  { %v5076_v12 = vadd.f32 %v5044_v0, %v12242_v32  ;;  %v5083_v9 = vadd.f32 %v5051_v56, %v17249_v40  ;;  %v4807_v56 = vld [vmem:[%s16890_s1 + $0xb8] sm:$0xff]  ;;  %v17259_v1 = vld [vmem:[#allocation17_spill] sm:$0xff] }
 0x6bb   :  { %v4975_v61 = vpop.permute.xlu1 %4974  ;;  %v5106_v19 = vpack.c.bf16 %v5077_v52, %v5076_v12  ;;  %v5109_v43 = vpack.c.bf16 %v5083_v9, %v5082_v50  ;;  %v17255_v12 = vld [vmem:[#allocation11_spill] sm:$0xff] }
 0x6bc   :  { %v5055_v34 = vmul.f32 %v4975_v61, %v4799_v21  ;;  %v4803_v61 = vld [vmem:[%s16890_s1 + $0x98] sm:$0xff] }
 0x6be   :  { %v5087_v52 = vadd.f32 %v5055_v34, %v17253_v26 }
 0x6bf   :  { %9332 = vmatmul.mubr.msk.bf16.gmra.mxu1 %vm109_vm0, %v3636_v22  ;;  %v4973_v22 = vpop.permute.xlu0 %4972  ;;  %v4979_v44 = vpop.permute.xlu1 %4978 }
 0x6c0   :  { %9335 = vmatprep.mubr.msk.bf16.mxu1 %vm109_vm0, %v3637_v24  ;;  %v4797_v24 = vld [vmem:[%s16890_s1 + $0x68] sm:$0xff]  ;;  %v5057_v8 = vmul.f32 %v4979_v44, %v4801_v28  ;;  %v5054_v54 = vmul.f32 %v4973_v22, %v4798_v62  ;;  %v4804_v44 = vld [vmem:[%s16890_s1 + $0xa0] sm:$0xff] }
 0x6c1   :  { %v5053_v55 = vmul.f32 %v4971_v58, %v4797_v24  ;;  %v5084_v58 = vadd.f32 %v5052_v38, %v17252_v47  ;;  %v4805_v22 = vld [vmem:[%s16890_s1 + $0xa8] sm:$0xff] }
 0x6c2   :  { %v5089_v16 = vadd.f32 %v5057_v8, %v17254_v57  ;;  %v17263_v8 = vld [vmem:[#allocation21_spill] sm:$0xff] }
 0x6c3   :  { %v4977_v3 = vpop.permute.xlu0 %4976  ;;  %v4983_v14 = vpop.permute.xlu1 %4982  ;;  %v5085_v5 = vadd.f32 %v5053_v55, %v17250_v11  ;;  %v17260_v55 = vld [vmem:[#allocation18_spill] sm:$0xff] }
 0x6c4   :  { %v5056_v0 = vmul.f32 %v4977_v3, %v4800_v29  ;;  %v17262_v29 = vld [vmem:[#allocation32_spill] sm:$0xff] }
 0x6c6   :  { %v5088_v30 = vadd.f32 %v5056_v0, %v17256_v13  ;;  %v4813_v0 = vld [vmem:[%s16890_s1 + $0xe8] sm:$0xff] }
 0x6c7   :  { %9336 = vmatmul.mubr.msk.bf16.gmra.mxu1 %vm109_vm0, %v3638_v59  ;;  %v5046_v59 = vmul.f32 %v4957_v18, %v4790_v49  ;;  %v4981_v18 = vpop.permute.xlu0 %4980  ;;  %v4987_v10 = vpop.permute.xlu1 %4986  ;;  %v5086_v49 = vadd.f32 %v5054_v54, %v17255_v12 }
 0x6c8   :  { %9339 = vmatprep.mubr.msk.bf16.mxu1 %vm109_vm0, %v3639_v35  ;;  %v5080_v35 = vadd.f32 %v5048_v7, %v17248_v46  ;;  %v5112_v7 = vpack.c.bf16 %v5089_v16, %v5088_v30 }
 0x6c9   :  { %v5078_v2 = vadd.f32 %v5046_v59, %v17247_v23  ;;  %v5059_v59 = vmul.f32 %v4983_v14, %v4803_v61  ;;  %v4810_v61 = vld [vmem:[%s16890_s1 + $0xd0] sm:$0xff] }
 0x6cb   :  { %v5107_v27 = vpack.c.bf16 %v5079_v36, %v5078_v2  ;;  %v4985_v25 = vpop.permute.xlu0 %4984  ;;  %v4991_v63 = vpop.permute.xlu1 %4990  ;;  %v5061_v36 = vmul.f32 %v4987_v10, %v4805_v22  ;;  %v17257_v2 = vld [vmem:[#allocation16_spill] sm:$0xff] }
 0x6cc   :  { %v5060_v15 = vmul.f32 %v4985_v25, %v4804_v44  ;;  %v5091_v24 = vadd.f32 %v5059_v59, %v17257_v2  ;;  %v5063_v9 = vmul.f32 %v4991_v63, %v4807_v56  ;;  %v17264_v63 = vld [vmem:[#allocation30_spill] sm:$0xff] }
 0x6cd   :  { %v17268_v56 = vld [vmem:[#allocation34_spill] sm:$0xff] }
 0x6ce   :  { %v5092_v60 = vadd.f32 %v5060_v15, %v17260_v55  ;;  %v4815_v15 = vld [vmem:[%s16890_s1 + $0xf8] sm:$0xff] }
 0x6cf   :  { %9340 = vmatmul.mubr.msk.bf16.gmra.mxu1 %vm109_vm0, %v3640_v39  ;;  %v5081_v39 = vadd.f32 %v5049_v41, %v12267_v6  ;;  %v5111_v41 = vpack.c.bf16 %v5087_v52, %v5086_v49 }
 0x6d0   :  { %9379 = vmatprep.mubr.msk.bf16.mxu1 %vm4431_vm3, %v5104_v45  ;;  %v5110_v45 = vpack.c.bf16 %v5085_v5, %v5084_v58  ;;  %v4808_v5 = vld [vmem:[%s16890_s1 + $0xc0] sm:$0xff] }
 0x6d1   :  { %v5108_v31 = vpack.c.bf16 %v5081_v39, %v5080_v35  ;;  %v4995_v39 = vpop.permute.xlu1 %4994 }
 0x6d5   :  { %v4999_v21 = vpop.permute.xlu1 %4998 }
 0x6d7   :  { %9380 = vmatmul.mubr.msk.bf16.vlgmr.msra.gmra.mxu1 %vm4431_vm3, %v5105_v48  ;;  %v4989_v48 = vpop.permute.xlu0 %4988 }
 0x6d8   :  { %9383 = vmatprep.mubr.msk.bf16.mxu1 %vm4431_vm3, %v5106_v19  ;;  %v4802_v19 = vld [vmem:[%s16890_s1 + $0x90] sm:$0xff] }
 0x6d9   :  { %v5058_v3 = vmul.f32 %v4981_v18, %v4802_v19  ;;  %v4806_v18 = vld [vmem:[%s16890_s1 + $0xb0] sm:$0xff]  ;;  %v5003_v52 = vpop.permute.xlu1 %5002 }
 0x6da   :  { %v5062_v10 = vmul.f32 %v4989_v48, %v4806_v18  ;;  %v4812_v48 = vld [vmem:[%s16890_s1 + $0xe0] sm:$0xff] }
 0x6db   :  { %v4993_v35 = vpop.permute.xlu0 %4992  ;;  %v5090_v14 = vadd.f32 %v5058_v3, %v17259_v1  ;;  %v17266_v3 = vld [vmem:[#allocation36_spill] sm:$0xff] }
 0x6dc   :  { %v5064_v62 = vmul.f32 %v4993_v35, %v4808_v5  ;;  %v5094_v54 = vadd.f32 %v5062_v10, %v17263_v8  ;;  %v17267_v35 = vld [vmem:[#allocation24_spill] sm:$0xff] }
 0x6dd   :  { %v5113_v38 = vpack.c.bf16 %v5091_v24, %v5090_v14  ;;  %v5007_v24 = vpop.permute.xlu1 %5006 }
 0x6de   :  { %v5096_v16 = vadd.f32 %v5064_v62, %v17264_v63  ;;  %v9579_v62 = vld [vmem:[%s16899_s10] sm:$0xff]   ;;  %s9967_s10 = smov 12  }
 0x6df   :  { %9384 = vmatmul.mubr.msk.bf16.gmra.mxu1 %vm4431_vm3, %v5107_v27  ;;  %v5093_v27 = vadd.f32 %v5061_v36, %v17258_v37  ;;  %v4997_v58 = vpop.permute.xlu0 %4996  ;;  %9343 = vmatprep.subr.bf16.mxu0 %v9579_v62 }
 0x6e0   :  { %9387 = vmatprep.mubr.msk.bf16.mxu1 %vm4431_vm3, %v5108_v31  ;;  %v4809_v31 = vld [vmem:[%s16890_s1 + $0xc8] sm:$0xff]  ;;  %v5066_v59 = vmul.f32 %v4997_v58, %v4810_v61  ;;  %9344 = vmatpush3.bf16.msra.mxu0 %v9579_v62 }
 0x6e1   :  { %v5114_v50 = vpack.c.bf16 %v5093_v27, %v5092_v60  ;;  %v5065_v28 = vmul.f32 %v4995_v39, %v4809_v31  ;;  %v4814_v31 = vld [vmem:[%s16890_s1 + $0xf0] sm:$0xff] }
 0x6e2   :  { %v5098_v27 = vadd.f32 %v5066_v59, %v17267_v35 }
 0x6e3   :  { %v5097_v25 = vadd.f32 %v5065_v28, %v17262_v29  ;;  %v5001_v30 = vpop.permute.xlu0 %5000  ;;  %v17270_v28 = vld [vmem:[#allocation33_spill] sm:$0xff] }
 0x6e4   :  { %v5068_v44 = vmul.f32 %v5001_v30, %v4812_v48 }
 0x6e5   :  { %v5116_v19 = vpack.c.bf16 %v5097_v25, %v5096_v16  ;;  %v13466_v25 = vld [vmem:[%s16903_s14 + $0x23] ss:$0 sm:$0xff] }
 0x6e6   :  { %v5100_v14 = vadd.f32 %v5068_v44, %v17268_v56 }
 0x6e7   :  { %9388 = vmatmul.mubr.msk.bf16.gmra.mxu1 %vm4431_vm3, %v5109_v43  ;;  %v17261_v43 = vld [vmem:[#allocation20_spill] sm:$0xff]  ;;  %v5005_v60 = vpop.permute.xlu0 %5004 }
 0x6e8   :  { %9391 = vmatprep.mubr.msk.bf16.mxu1 %vm4431_vm3, %v5110_v45  ;;  %v5095_v34 = vadd.f32 %v5063_v9, %v17261_v43  ;;  %v4811_v45 = vld [vmem:[%s16890_s1 + $0xd8] sm:$0xff]  ;;  %v5070_v5 = vmul.f32 %v5005_v60, %v4814_v31 }
 0x6e9   :  { %v5067_v22 = vmul.f32 %v4999_v21, %v4811_v45  ;;  %v17269_v21 = vld [vmem:[#allocation35_spill] sm:$0xff] }
 0x6ea   :  { %v5115_v49 = vpack.c.bf16 %v5095_v34, %v5094_v54  ;;  %v5102_v10 = vadd.f32 %v5070_v5, %v17270_v28 }
 0x6ef   :  { %9392 = vmatmul.mubr.msk.bf16.gmra.mxu1 %vm4431_vm3, %v5111_v41  ;;  %v5069_v41 = vmul.f32 %v5003_v52, %v4813_v0 }
 0x6f0   :  { %9395 = vmatprep.mubr.msk.bf16.mxu1 %vm4431_vm3, %v5112_v7  ;;  %v17265_v7 = vld [vmem:[#allocation31_spill] sm:$0xff] }
 0x6f1   :  { %v5099_v36 = vadd.f32 %v5067_v22, %v17265_v7  ;;  %v5101_v39 = vadd.f32 %v5069_v41, %v17266_v3 }
 0x6f3   :  { %v5117_v18 = vpack.c.bf16 %v5099_v36, %v5098_v27  ;;  %v5118_v9 = vpack.c.bf16 %v5101_v39, %v5100_v14 }
 0x6f7   :  { %9396 = vmatmul.mubr.msk.bf16.gmra.mxu1 %vm4431_vm3, %v5113_v38  ;;  %v5071_v38 = vmul.f32 %v5007_v24, %v4815_v15 }
 0x6f8   :  { %9399 = vmatprep.mubr.msk.bf16.mxu1 %vm4431_vm3, %v5114_v50 }
 0x6f9   :  { %v5103_v50 = vadd.f32 %v5071_v38, %v17269_v21 }
 0x6fb   :  { %v5119_v58 = vpack.c.bf16 %v5103_v50, %v5102_v10 }
 0x6ff   :  { %9400 = vmatmul.mubr.msk.bf16.gmra.mxu1 %vm4431_vm3, %v5115_v49 }
 0x700   :  { %9403 = vmatprep.mubr.msk.bf16.mxu1 %vm4431_vm3, %v5116_v19 }
 0x707   :  { %9404 = vmatmul.mubr.msk.bf16.gmra.mxu1 %vm4431_vm3, %v5117_v18 }
 0x708   :  { %9407 = vmatprep.mubr.msk.bf16.mxu1 %vm4431_vm3, %v5118_v9 }
 0x70f   :  { %9408 = vmatmul.mubr.msk.bf16.gmra.mxu1 %vm4431_vm3, %v5119_v58 }
 0x757   :  { %v9313_v34 = vpop.f32.mrf.mxu1 }
 0x758   :  { %v13472_v52 = vadd.f32 %v9313_v34, %v13466_v25 }
 0x759   :  { %v3732_v45 = vpop.f32.mrf.mxu1 }
 0x75a   :  { %v13469_v54 = vadd.f32 %v3732_v45, %v13466_v25  ;;  %v3931_v30 = vmul.f32 %v13472_v52, %v13472_v52  ;;  %v3862_v44 = vsel %vm109_vm0, %v13472_v52, 0.0 }
 0x75b   :  { %v9314_v0 = vpop.f32.mrf.mxu1 }
 0x75c   :  { %v3929_v61 = vmul.f32 %v13469_v54, %v13469_v54  ;;  %v13477_v49 = vadd.f32 %v9314_v0, %v13466_v25  ;;  %v3859_v19 = vsel %vm109_vm0, %v13469_v54, 0.0  ;;  %v3964_v38 = vsel %vm109_vm0, %v3931_v30, 0.0 }
 0x75d   :  { %v3735_v16 = vpop.f32.mrf.mxu1 }
 0x75e   :  { %v13480_v22 = vadd.f32 %v3735_v16, %v13466_v25  ;;  %v3961_v15 = vsel %vm109_vm0, %v3929_v61, 0.0  ;;  %v3932_v24 = vmul.f32 %v13477_v49, %v13477_v49  ;;  %v3864_v9 = vsel %vm109_vm0, %v13477_v49, 0.0 }
 0x75f   :  { %v9317_v48 = vpop.f32.mrf.mxu1 }
 0x760   :  { %v3860_v41 = vsel %vm109_vm0, %v13480_v22, 0.0  ;;  %v3930_v59 = vmul.f32 %v13480_v22, %v13480_v22  ;;  %v13503_v5 = vadd.f32 %v9317_v48, %v13466_v25  ;;  %v3966_v34 = vsel %vm109_vm0, %v3932_v24, 0.0 }
 0x761   :  { %v3861_v36 = vadd.f32 %v3860_v41, %v3859_v19  ;;  %v3748_v39 = vpop.f32.mrf.mxu1 }
 0x762   :  { %v3962_v27 = vsel %vm109_vm0, %v3930_v59, 0.0  ;;  %v13497_v14 = vadd.f32 %v3748_v39, %v13466_v25  ;;  %v3935_v19 = vmul.f32 %v13503_v5, %v13503_v5  ;;  %v3870_v24 = vsel %vm109_vm0, %v13503_v5, 0.0 }
 0x763   :  { %v3863_v31 = vadd.f32 %v3862_v44, %v3861_v36  ;;  %v3963_v60 = vadd.f32 %v3962_v27, %v3961_v15  ;;  %v9318_v18 = vpop.f32.mrf.mxu1 }
 0x764   :  { %v3933_v50 = vmul.f32 %v13497_v14, %v13497_v14  ;;  %v3866_v45 = vsel %vm109_vm0, %v13497_v14, 0.0  ;;  %v13511_v0 = vadd.f32 %v9318_v18, %v13466_v25 }
 0x765   :  { %v3965_v10 = vadd.f32 %v3964_v38, %v3963_v60  ;;  %v3865_v58 = vadd.f32 %v3864_v9, %v3863_v31  ;;  %v3751_v62 = vpop.f32.mrf.mxu1 }
 0x766   :  { %v13514_v16 = vadd.f32 %v3751_v62, %v13466_v25  ;;  %v3968_v41 = vsel %vm109_vm0, %v3933_v50, 0.0  ;;  %v3936_v27 = vmul.f32 %v13511_v0, %v13511_v0  ;;  %v3972_v50 = vsel %vm109_vm0, %v3935_v19, 0.0 }
 0x767   :  { %v3867_v61 = vadd.f32 %v3866_v45, %v3865_v58  ;;  %v3967_v48 = vadd.f32 %v3966_v34, %v3965_v10  ;;  %v9321_v30 = vpop.f32.mrf.mxu1  ;;  %v3872_v10 = vsel %vm109_vm0, %v13511_v0, 0.0 }
 0x768   :  { %v3868_v59 = vsel %vm109_vm0, %v13514_v16, 0.0  ;;  %v3934_v44 = vmul.f32 %v13514_v16, %v13514_v16  ;;  %v13535_v58 = vadd.f32 %v9321_v30, %v13466_v25 }
 0x769   :  { %v3969_v36 = vadd.f32 %v3968_v41, %v3967_v48  ;;  %v3869_v39 = vadd.f32 %v3868_v59, %v3867_v61  ;;  %v3764_v15 = vpop.f32.mrf.mxu1  ;;  %v3974_v48 = vsel %vm109_vm0, %v3936_v27, 0.0 }
 0x76a   :  { %v3970_v31 = vsel %vm109_vm0, %v3934_v44, 0.0  ;;  %v13529_v60 = vadd.f32 %v3764_v15, %v13466_v25 }
 0x76b   :  { %v3871_v18 = vadd.f32 %v3870_v24, %v3869_v39  ;;  %v3971_v38 = vadd.f32 %v3970_v31, %v3969_v36  ;;  %v9322_v9 = vpop.f32.mrf.mxu1  ;;  %v3939_v39 = vmul.f32 %v13535_v58, %v13535_v58 }
 0x76c   :  { %v3937_v62 = vmul.f32 %v13529_v60, %v13529_v60  ;;  %v3874_v41 = vsel %vm109_vm0, %v13529_v60, 0.0  ;;  %v13543_v59 = vadd.f32 %v9322_v9, %v13466_v25  ;;  %v9582_v9 = vld [vmem:[%s16901_s12 + $0x4] ss:$8 sps:$4 sm:$0xff]  }
 0x76d   :  { %v3973_v34 = vadd.f32 %v3972_v50, %v3971_v38  ;;  %v3873_v45 = vadd.f32 %v3872_v10, %v3871_v18  ;;  %v3767_v61 = vpop.f32.mrf.mxu1  ;;  %v3878_v50 = vsel %vm109_vm0, %v13535_v58, 0.0  ;;  %5776 = vmatprep.subr.bf16.mxu0 %v9582_v9 }
 0x76e   :  { %v13546_v19 = vadd.f32 %v3767_v61, %v13466_v25  ;;  %v3976_v15 = vsel %vm109_vm0, %v3937_v62, 0.0  ;;  %v3940_v10 = vmul.f32 %v13543_v59, %v13543_v59 }
 0x76f   :  { %v3875_v44 = vadd.f32 %v3874_v41, %v3873_v45  ;;  %v3975_v30 = vadd.f32 %v3974_v48, %v3973_v34  ;;  %v9325_v36 = vpop.f32.mrf.mxu1  ;;  %v3980_v41 = vsel %vm109_vm0, %v3939_v39, 0.0 }
 0x770   :  { %v3876_v24 = vsel %vm109_vm0, %v13546_v19, 0.0  ;;  %v3938_v27 = vmul.f32 %v13546_v19, %v13546_v19 }
 0x771   :  { %v3977_v31 = vadd.f32 %v3976_v15, %v3975_v30  ;;  %v3877_v18 = vadd.f32 %v3876_v24, %v3875_v44  ;;  %v3780_v38 = vpop.f32.mrf.mxu1  ;;  %v3880_v44 = vsel %vm109_vm0, %v13543_v59, 0.0  ;;  %v13570_v30 = vadd.f32 %v9325_v36, %v13466_v25 }
 0x772   :  { %v3978_v62 = vsel %vm109_vm0, %v3938_v27, 0.0  ;;  %v13564_v34 = vadd.f32 %v3780_v38, %v13466_v25  ;;  %v3982_v38 = vsel %vm109_vm0, %v3940_v10, 0.0 }
 0x773   :  { %v3879_v45 = vadd.f32 %v3878_v50, %v3877_v18  ;;  %v3979_v61 = vadd.f32 %v3978_v62, %v3977_v31  ;;  %v9326_v48 = vpop.f32.mrf.mxu1  ;;  %v3943_v62 = vmul.f32 %v13570_v30, %v13570_v30 }
 0x774   :  { %v3941_v15 = vmul.f32 %v13564_v34, %v13564_v34  ;;  %v3882_v31 = vsel %vm109_vm0, %v13564_v34, 0.0  ;;  %v13578_v18 = vadd.f32 %v9326_v48, %v13466_v25 }
 0x775   :  { %v3981_v24 = vadd.f32 %v3980_v41, %v3979_v61  ;;  %v3881_v27 = vadd.f32 %v3880_v44, %v3879_v45  ;;  %v3783_v28 = vpop.f32.mrf.mxu1  ;;  %v3988_v56 = vsel %vm109_vm0, %v3943_v62, 0.0 }
 0x776   :  { %v13581_v39 = vadd.f32 %v3783_v28, %v13466_v25  ;;  %v3984_v45 = vsel %vm109_vm0, %v3941_v15, 0.0  ;;  %v3886_v28 = vsel %vm109_vm0, %v13570_v30, 0.0 }
 0x777   :  { %v3883_v9 = vadd.f32 %v3882_v31, %v3881_v27  ;;  %v3983_v36 = vadd.f32 %v3982_v38, %v3981_v24  ;;  %v9329_v50 = vpop.f32.mrf.mxu1  ;;  %v3944_v24 = vmul.f32 %v13578_v18, %v13578_v18 }
 0x778   :  { %v3884_v10 = vsel %vm109_vm0, %v13581_v39, 0.0  ;;  %v3942_v61 = vmul.f32 %v13581_v39, %v13581_v39 }
 0x779   :  { %v3985_v41 = vadd.f32 %v3984_v45, %v3983_v36  ;;  %v3885_v48 = vadd.f32 %v3884_v10, %v3883_v9  ;;  %v3796_v44 = vpop.f32.mrf.mxu1  ;;  %v3888_v9 = vsel %vm109_vm0, %v13578_v18, 0.0  ;;  %v13602_v36 = vadd.f32 %v9329_v50, %v13466_v25 }
 0x77a   :  { %v3986_v27 = vsel %vm109_vm0, %v3942_v61, 0.0  ;;  %v13596_v38 = vadd.f32 %v3796_v44, %v13466_v25  ;;  %v3990_v44 = vsel %vm109_vm0, %v3944_v24, 0.0 }
 0x77b   :  { %v3887_v15 = vadd.f32 %v3886_v28, %v3885_v48  ;;  %v3987_v31 = vadd.f32 %v3986_v27, %v3985_v41  ;;  %v9330_v21 = vpop.f32.mrf.mxu1  ;;  %v3947_v35 = vmul.f32 %v13602_v36, %v13602_v36 }
 0x77c   :  { %v3945_v45 = vmul.f32 %v13596_v38, %v13596_v38  ;;  %v3890_v41 = vsel %vm109_vm0, %v13596_v38, 0.0  ;;  %v13610_v48 = vadd.f32 %v9330_v21, %v13466_v25 }
 0x77d   :  { %v3989_v10 = vadd.f32 %v3988_v56, %v3987_v31  ;;  %v3889_v3 = vadd.f32 %v3888_v9, %v3887_v15  ;;  %v3799_v61 = vpop.f32.mrf.mxu1  ;;  %v3996_v63 = vsel %vm109_vm0, %v3947_v35, 0.0 }
 0x77e   :  { %v13613_v62 = vadd.f32 %v3799_v61, %v13466_v25  ;;  %v3992_v56 = vsel %vm109_vm0, %v3945_v45, 0.0  ;;  %v3894_v61 = vsel %vm109_vm0, %v13602_v36, 0.0 }
 0x77f   :  { %v3891_v28 = vadd.f32 %v3890_v41, %v3889_v3  ;;  %v3991_v50 = vadd.f32 %v3990_v44, %v3989_v10  ;;  %v9333_v27 = vpop.f32.mrf.mxu1  ;;  %v3948_v3 = vmul.f32 %v13610_v48, %v13610_v48 }
 0x780   :  { %v3892_v24 = vsel %vm109_vm0, %v13613_v62, 0.0  ;;  %v3946_v15 = vmul.f32 %v13613_v62, %v13613_v62 }
 0x781   :  { %v3993_v31 = vadd.f32 %v3992_v56, %v3991_v50  ;;  %v3893_v21 = vadd.f32 %v3892_v24, %v3891_v28  ;;  %v3812_v9 = vpop.f32.mrf.mxu1  ;;  %v3896_v28 = vsel %vm109_vm0, %v13610_v48, 0.0  ;;  %v13634_v50 = vadd.f32 %v9333_v27, %v13466_v25 }
 0x782   :  { %v3994_v10 = vsel %vm109_vm0, %v3946_v15, 0.0  ;;  %v13628_v44 = vadd.f32 %v3812_v9, %v13466_v25  ;;  %v3998_v9 = vsel %vm109_vm0, %v3948_v3, 0.0 }
 0x783   :  { %v3895_v45 = vadd.f32 %v3894_v61, %v3893_v21  ;;  %v3995_v41 = vadd.f32 %v3994_v10, %v3993_v31  ;;  %v9334_v7 = vpop.f32.mrf.mxu1  ;;  %v3951_v8 = vmul.f32 %v13634_v50, %v13634_v50 }
 0x784   :  { %v3949_v56 = vmul.f32 %v13628_v44, %v13628_v44  ;;  %v3898_v31 = vsel %vm109_vm0, %v13628_v44, 0.0  ;;  %v13642_v21 = vadd.f32 %v9334_v7, %v13466_v25 }
 0x785   :  { %v3997_v24 = vadd.f32 %v3996_v63, %v3995_v41  ;;  %v3897_v29 = vadd.f32 %v3896_v28, %v3895_v45  ;;  %v3815_v15 = vpop.f32.mrf.mxu1  ;;  %v4004_v55 = vsel %vm109_vm0, %v3951_v8, 0.0 }
 0x786   :  { %v13645_v35 = vadd.f32 %v3815_v15, %v13466_v25  ;;  %v4000_v63 = vsel %vm109_vm0, %v3949_v56, 0.0  ;;  %v3902_v15 = vsel %vm109_vm0, %v13634_v50, 0.0 }
 0x787   :  { %v3899_v61 = vadd.f32 %v3898_v31, %v3897_v29  ;;  %v3999_v27 = vadd.f32 %v3998_v9, %v3997_v24  ;;  %v9337_v10 = vpop.f32.mrf.mxu1  ;;  %v3952_v29 = vmul.f32 %v13642_v21, %v13642_v21 }
 0x788   :  { %v3900_v3 = vsel %vm109_vm0, %v13645_v35, 0.0  ;;  %v3950_v45 = vmul.f32 %v13645_v35, %v13645_v35 }
 0x789   :  { %v4001_v41 = vadd.f32 %v4000_v63, %v3999_v27  ;;  %v3901_v7 = vadd.f32 %v3900_v3, %v3899_v61  ;;  %v3828_v28 = vpop.f32.mrf.mxu1  ;;  %v3904_v61 = vsel %vm109_vm0, %v13642_v21, 0.0  ;;  %v13666_v27 = vadd.f32 %v9337_v10, %v13466_v25 }
 0x78a   :  { %v4002_v24 = vsel %vm109_vm0, %v3950_v45, 0.0  ;;  %v13660_v9 = vadd.f32 %v3828_v28, %v13466_v25  ;;  %v4006_v28 = vsel %vm109_vm0, %v3952_v29, 0.0 }
 0x78b   :  { %v3903_v56 = vadd.f32 %v3902_v15, %v3901_v7  ;;  %v4003_v31 = vadd.f32 %v4002_v24, %v4001_v41  ;;  %v9338_v43 = vpop.f32.mrf.mxu1  ;;  %v3955_v1 = vmul.f32 %v13666_v27, %v13666_v27 }
 0x78c   :  { %v3953_v63 = vmul.f32 %v13660_v9, %v13660_v9  ;;  %v3906_v41 = vsel %vm109_vm0, %v13660_v9, 0.0  ;;  %v13674_v7 = vadd.f32 %v9338_v43, %v13466_v25 }
 0x78d   :  { %v4005_v3 = vadd.f32 %v4004_v55, %v4003_v31  ;;  %v3905_v37 = vadd.f32 %v3904_v61, %v3903_v56  ;;  %v3831_v45 = vpop.f32.mrf.mxu1  ;;  %v4012_v13 = vsel %vm109_vm0, %v3955_v1, 0.0 }
 0x78e   :  { %v13677_v8 = vadd.f32 %v3831_v45, %v13466_v25  ;;  %v4008_v55 = vsel %vm109_vm0, %v3953_v63, 0.0  ;;  %v3910_v45 = vsel %vm109_vm0, %v13666_v27, 0.0 }
 0x78f   :  { %v3907_v15 = vadd.f32 %v3906_v41, %v3905_v37  ;;  %v4007_v10 = vadd.f32 %v4006_v28, %v4005_v3  ;;  %v9341_v24 = vpop.f32.mrf.mxu1  ;;  %v3956_v37 = vmul.f32 %v13674_v7, %v13674_v7 }
 0x790   :  { %v3908_v29 = vsel %vm109_vm0, %v13677_v8, 0.0  ;;  %v3954_v56 = vmul.f32 %v13677_v8, %v13677_v8 }
 0x791   :  { %v4009_v31 = vadd.f32 %v4008_v55, %v4007_v10  ;;  %v3909_v43 = vadd.f32 %v3908_v29, %v3907_v15  ;;  %v3844_v61 = vpop.f32.mrf.mxu1  ;;  %v3912_v15 = vsel %vm109_vm0, %v13674_v7, 0.0  ;;  %v13698_v10 = vadd.f32 %v9341_v24, %v13466_v25  ;;  %v13714_v24 = vld [vmem:[%s16903_s14 + $0x27] ss:$0 sm:$0xff] }
 0x792   :  { %v4010_v3 = vsel %vm109_vm0, %v3954_v56, 0.0  ;;  %v13692_v28 = vadd.f32 %v3844_v61, %v13466_v25  ;;  %v4014_v61 = vsel %vm109_vm0, %v3956_v37, 0.0 }
 0x793   :  { %v3911_v63 = vadd.f32 %v3910_v45, %v3909_v43  ;;  %v4011_v41 = vadd.f32 %v4010_v3, %v4009_v31  ;;  %v9342_v2 = vpop.f32.mrf.mxu1  ;;  %v3959_v37 = vmul.f32 %v13698_v10, %v13698_v10 }
 0x794   :  { %v3957_v55 = vmul.f32 %v13692_v28, %v13692_v28  ;;  %v3914_v31 = vsel %vm109_vm0, %v13692_v28, 0.0  ;;  %v13706_v43 = vadd.f32 %v9342_v2, %v13466_v25 }
 0x795   :  { %v4013_v29 = vadd.f32 %v4012_v13, %v4011_v41  ;;  %v3913_v57 = vadd.f32 %v3912_v15, %v3911_v63  ;;  %v3847_v56 = vpop.f32.mrf.mxu1 }
 0x796   :  { %v13709_v1 = vadd.f32 %v3847_v56, %v13466_v25  ;;  %v4016_v63 = vsel %vm109_vm0, %v3957_v55, 0.0 }
 0x797   :  { %v3915_v45 = vadd.f32 %v3914_v31, %v3913_v57  ;;  %v4015_v13 = vadd.f32 %v4014_v61, %v4013_v29  ;;  %v9381_v3 = vpop.f32.mrf.mxu1  ;;  %v3918_v57 = vsel %vm109_vm0, %v13698_v10, 0.0  ;;  %v3960_v29 = vmul.f32 %v13706_v43, %v13706_v43 }
 0x798   :  { %v3916_v2 = vsel %vm109_vm0, %v13709_v1, 0.0  ;;  %v3958_v25 = vmul.f32 %v13709_v1, %v13709_v1  ;;  %v13724_v56 = vadd.f32 %v9381_v3, %v13714_v24 }
 0x799   :  { %v4017_v41 = vadd.f32 %v4016_v63, %v4015_v13  ;;  %v3917_v15 = vadd.f32 %v3916_v2, %v3915_v45  ;;  %v5208_v12 = vpop.f32.mrf.mxu1  ;;  %v4020_v45 = vsel %vm109_vm0, %v3959_v37, 0.0  ;;  %v3920_v13 = vsel %vm109_vm0, %v13706_v43, 0.0 }
 0x79a   :  { %17271 = vst [vmem:[#allocation37_spill] sm:$0xff] %v13724_v56  ;;  %v4018_v55 = vsel %vm109_vm0, %v3958_v25, 0.0  ;;  %v13732_v61 = vadd.f32 %v5208_v12, %v13714_v24  ;;  %v5407_v11 = vmul.f32 %v13724_v56, %v13724_v56  ;;  %v4022_v12 = vsel %vm109_vm0, %v3960_v29, 0.0 }
 0x79b   :  { %v3919_v31 = vadd.f32 %v3918_v57, %v3917_v15  ;;  %v4019_v26 = vadd.f32 %v4018_v55, %v4017_v41  ;;  %v9382_v47 = vpop.f32.mrf.mxu1 }
 0x79c   :  { %17272 = vst [vmem:[#allocation38_spill] sm:$0xff] %v13732_v61  ;;  %v13738_v3 = vadd.f32 %v9382_v47, %v13714_v24  ;;  %v5405_v41 = vmul.f32 %v13732_v61, %v13732_v61  ;;  %v5338_v47 = vsel %vm109_vm0, %v13724_v56, 0.0 }
 0x79d   :  { %v3921_v63 = vadd.f32 %v3920_v13, %v3919_v31  ;;  %v4021_v2 = vadd.f32 %v4020_v45, %v4019_v26  ;;  %v5211_v25 = vpop.f32.mrf.mxu1  ;;  %v5335_v26 = vsel %vm109_vm0, %v13732_v61, 0.0 }
 0x79e   :  { %17273 = vst [vmem:[#allocation39_spill] sm:$0xff] %v13738_v3  ;;  %v13746_v15 = vadd.f32 %v5211_v25, %v13714_v24  ;;  %v5408_v31 = vmul.f32 %v13738_v3, %v13738_v3  ;;  %v5437_v46 = vsel %vm109_vm0, %v5405_v41, 0.0  ;;  %v5340_v6 = vsel %vm109_vm0, %v13738_v3, 0.0 }
 0x79f   :  { %v3922_v37 = vrot.slane %v3921_v63, 4  ;;  %v4023_v57 = vadd.f32 %v4022_v12, %v4021_v2  ;;  %v9385_v55 = vpop.f32.mrf.mxu1  ;;  %v5440_v12 = vsel %vm109_vm0, %v5407_v11, 0.0 }
 0x7a0   :  { %17274 = vst [vmem:[#allocation40_spill] sm:$0xff] %v13746_v15  ;;  %v5336_v29 = vsel %vm109_vm0, %v13746_v15, 0.0  ;;  %v5406_v45 = vmul.f32 %v13746_v15, %v13746_v15  ;;  %v13759_v13 = vadd.f32 %v9385_v55, %v13714_v24 }
 0x7a1   :  { %v3923_v2 = vadd.f32 %v3922_v37, %v3921_v63  ;;  %v4024_v25 = vrot.slane %v4023_v57, 4  ;;  %v5337_v4 = vadd.f32 %v5336_v29, %v5335_v26  ;;  %v5224_v40 = vpop.f32.mrf.mxu1  ;;  %v5442_v37 = vsel %vm109_vm0, %v5408_v31, 0.0 }
 0x7a2   :  { %17275 = vst [vmem:[#allocation41_spill] sm:$0xff] %v13759_v13  ;;  %v5438_v23 = vsel %vm109_vm0, %v5406_v45, 0.0  ;;  %v13767_v33 = vadd.f32 %v5224_v40, %v13714_v24  ;;  %v5346_v11 = vsel %vm109_vm0, %v13759_v13, 0.0 }
 0x7a3   :  { %v3924_v32 = vrot.slane %v3923_v2, 2  ;;  %v4025_v53 = vadd.f32 %v4024_v25, %v4023_v57  ;;  %v5339_v55 = vadd.f32 %v5338_v47, %v5337_v4  ;;  %v5439_v51 = vadd.f32 %v5438_v23, %v5437_v46  ;;  %v9386_v63 = vpop.f32.mrf.mxu1 }
 0x7a4   :  { %17276 = vst [vmem:[#allocation42_spill] sm:$0xff] %v13767_v33  ;;  %v5409_v41 = vmul.f32 %v13767_v33, %v13767_v33  ;;  %v13775_v26 = vadd.f32 %v9386_v63, %v13714_v24  ;;  %v5411_v23 = vmul.f32 %v13759_v13, %v13759_v13  ;;  %v5342_v46 = vsel %vm109_vm0, %v13767_v33, 0.0 }
 0x7a5   :  { %v3925_v29 = vadd.f32 %v3924_v32, %v3923_v2  ;;  %v4026_v45 = vrot.slane %v4025_v53, 2  ;;  %v5441_v40 = vadd.f32 %v5440_v12, %v5439_v51  ;;  %v5341_v17 = vadd.f32 %v5340_v6, %v5339_v55  ;;  %v5227_v20 = vpop.f32.mrf.mxu1 }
 0x7a6   :  { %17277 = vst [vmem:[#allocation43_spill] sm:$0xff] %v13775_v26  ;;  %v5412_v4 = vmul.f32 %v13775_v26, %v13775_v26  ;;  %v13784_v57 = vadd.f32 %v5227_v20, %v13714_v24  ;;  %v5444_v51 = vsel %vm109_vm0, %v5409_v41, 0.0 }
 0x7a7   :  { %v3926_v47 = vrot.slane %v3925_v29, 1  ;;  %v4027_v31 = vadd.f32 %v4026_v45, %v4025_v53  ;;  %v5343_v25 = vadd.f32 %v5342_v46, %v5341_v17  ;;  %v5443_v32 = vadd.f32 %v5442_v37, %v5441_v40  ;;  %v9389_v2 = vpop.f32.mrf.mxu1 }
 0x7a8   :  { %17278 = vst [vmem:[#allocation44_spill] sm:$0xff] %v13784_v57  ;;  %v5344_v6 = vsel %vm109_vm0, %v13784_v57, 0.0  ;;  %v5410_v12 = vmul.f32 %v13784_v57, %v13784_v57  ;;  %v13792_v55 = vadd.f32 %v9389_v2, %v13714_v24  ;;  %v5448_v17 = vsel %vm109_vm0, %v5411_v23, 0.0 }
 0x7a9   :  { %v3927_v63 = vadd.f32 %v3926_v47, %v3925_v29  ;;  %v4028_v42 = vrot.slane %v4027_v31, 1  ;;  %v5445_v20 = vadd.f32 %v5444_v51, %v5443_v32  ;;  %v5345_v13 = vadd.f32 %v5344_v6, %v5343_v25  ;;  %v5240_v33 = vpop.f32.mrf.mxu1 }
 0x7aa   :  { %17279 = vst [vmem:[#allocation45_spill] sm:$0xff] %v13792_v55  ;;  %v5446_v53 = vsel %vm109_vm0, %v5410_v12, 0.0  ;;  %v5415_v37 = vmul.f32 %v13792_v55, %v13792_v55  ;;  %v13799_v41 = vadd.f32 %v5240_v33, %v13714_v24  ;;  %v5348_v29 = vsel %vm109_vm0, %v13775_v26, 0.0 }
 0x7ab   :  { %v13801_v45 = vmul.f32 0.00390625, %v3927_v63  ;;  %v4029_v40 = vadd.f32 %v4028_v42, %v4027_v31  ;;  %v5450_v46 = vsel %vm109_vm0, %v5412_v4, 0.0  ;;  %v9390_v47 = vpop.f32.mrf.mxu1  ;;  %v5347_v25 = vadd.f32 %v5346_v11, %v5345_v13 }
 0x7ac   :  { %17280 = vst [vmem:[#allocation46_spill] sm:$0xff] %v13799_v41  ;;  %v5447_v32 = vadd.f32 %v5446_v53, %v5445_v20  ;;  %v13808_v23 = vsel %vm109_vm0, %v13792_v55, 0.0  ;;  %v13811_v2 = vsel %vm109_vm0, %v5415_v37, 0.0  ;;  %v5350_v4 = vsel %vm109_vm0, %v13799_v41, 0.0 }
 0x7ad   :  { %v4030_v33 = vmul.f32 0.00390625, %v4029_v40  ;;  %v4031_v51 = vmul.f32 %v13801_v45, %v13801_v45  ;;  %v5243_v31 = vpop.f32.mrf.mxu1  ;;  %v5413_v6 = vmul.f32 %v13799_v41, %v13799_v41  ;;  %v13826_v12 = vadd.f32 %v9390_v47, %v13714_v24 }
 0x7ae   :  { %v5349_v55 = vadd.f32 %v5348_v29, %v5347_v25  ;;  %v13887_v53 = vadd.f32 %v5243_v31, %v13714_v24  ;;  %v17290_v15 = vsub.f32 %v13469_v54, %v13801_v45 }
 0x7af   :  { %17281 = vst [vmem:[#allocation47_spill] sm:$0xff] %v13826_v12  ;;  %v4032_v63 = vsub.f32 %v4030_v33, %v4031_v51  ;;  %v9393_v40 = vpop.f32.mrf.mxu1  ;;  %v5416_v20 = vmul.f32 %v13826_v12, %v13826_v12  ;;  %v5452_v25 = vsel %vm109_vm0, %v5413_v6, 0.0 }
 0x7b0   :  { %17282 = vst [vmem:[#allocation48_spill] sm:$0xff] %v13887_v53  ;;  %v13890_v47 = vadd.f32 %v9393_v40, %v13714_v24  ;;  %v5351_v26 = vadd.f32 %v5350_v4, %v5349_v55  ;;  %v5414_v31 = vmul.f32 %v13887_v53, %v13887_v53 }
 0x7b1   :  { %v4065_v51 = vadd.f32 1e-05, %v4032_v63  ;;  %v5256_v11 = vpop.f32.mrf.mxu1 }
 0x7b2   :  { %17283 = vst [vmem:[#allocation49_spill] sm:$0xff] %v13890_v47  ;;  %v13893_v57 = vadd.f32 %v5256_v11, %v13714_v24  ;;  %v5458_v11 = vsel %vm109_vm0, %v5416_v20, 0.0 }
 0x7b3   :  { %9675 = vrsqrt.f32 %v4065_v51  ;;  %v9394_v13 = vpop.f32.mrf.mxu1  ;;  %v5449_v51 = vadd.f32 %v5448_v17, %v5447_v32  ;;  %v5352_v32 = vsel %vm109_vm0, %v13887_v53, 0.0  ;;  %v17289_v53 = vsub.f32 %v13709_v1, %v13801_v45 }
 0x7b4   :  { %17284 = vst [vmem:[#allocation50_spill] sm:$0xff] %v13893_v57  ;;  %v13896_v17 = vadd.f32 %v9394_v13, %v13714_v24  ;;  %v5353_v4 = vadd.f32 %v5352_v32, %v5351_v26  ;;  %v5419_v13 = vmul.f32 %v13890_v47, %v13890_v47  ;;  %v5417_v6 = vmul.f32 %v13893_v57, %v13893_v57 }
 0x7b5   :  { %v5259_v42 = vpop.f32.mrf.mxu1  ;;  %v5451_v33 = vadd.f32 %v5450_v46, %v5449_v51  ;;  %v5356_v46 = vsel %vm109_vm0, %v13826_v12, 0.0  ;;  %v5454_v51 = vsel %vm109_vm0, %v5414_v31, 0.0  ;;  %v13918_v26 = vsel %vm109_vm0, %v13890_v47, 0.0 }
 0x7b6   :  { %17285 = vst [vmem:[#allocation51_spill] sm:$0xff] %v13896_v17  ;;  %v5420_v63 = vmul.f32 %v13896_v17, %v13896_v17  ;;  %v13921_v32 = vadd.f32 %v5259_v42, %v13714_v24  ;;  %v5358_v20 = vsel %vm109_vm0, %v13893_v57, 0.0  ;;  %v13927_v31 = vsel %vm109_vm0, %v13896_v17, 0.0 }
 0x7b7   :  { %v9397_v41 = vpop.f32.mrf.mxu1  ;;  %v5453_v55 = vadd.f32 %v5452_v25, %v5451_v33  ;;  %v5355_v33 = vadd.f32 %v13808_v23, %v5353_v4  ;;  %v13939_v42 = vsel %vm109_vm0, %v5419_v13, 0.0  ;;  %v13944_v12 = vsel %vm109_vm0, %v5417_v6, 0.0 }
 0x7b8   :  { %17286 = vst [vmem:[#allocation52_spill] sm:$0xff] %v13921_v32  ;;  %v13930_v37 = vadd.f32 %v9397_v41, %v13714_v24  ;;  %v5418_v57 = vmul.f32 %v13921_v32, %v13921_v32  ;;  %v13947_v41 = vsel %vm109_vm0, %v5420_v63, 0.0  ;;  %v17292_v1 = vsub.f32 %v13472_v52, %v13801_v45 }
 0x7b9   :  { %v5272_v40 = vpop.f32.mrf.mxu1  ;;  %v5455_v25 = vadd.f32 %v5454_v51, %v5453_v55  ;;  %v5357_v51 = vadd.f32 %v5356_v46, %v5355_v33  ;;  %v13962_v33 = vld [vmem:[%s16903_s14 + $0x24] ss:$0 sm:$0xff] }
 0x7ba   :  { %17287 = vst [vmem:[#allocation53_spill] sm:$0xff] %v13930_v37  ;;  %v13933_v23 = vadd.f32 %v5272_v40, %v13714_v24  ;;  %v13951_v40 = vsel %vm109_vm0, %v13921_v32, 0.0  ;;  %v13968_v63 = vmul.f32 %v13930_v37, %v13930_v37 }
 0x7bb   :  { %v9398_v29 = vpop.f32.mrf.mxu1  ;;  %v5457_v4 = vadd.f32 %v13811_v2, %v5455_v25  ;;  %v13955_v2 = vsel %vm109_vm0, %v13930_v37, 0.0  ;;  %v13964_v6 = vadd.f32 %v5358_v20, %v5357_v51  ;;  %v13984_v20 = vsel %vm109_vm0, %v5418_v57, 0.0 }
 0x7bc   :  { %17288 = vst [vmem:[#allocation54_spill] sm:$0xff] %v13933_v23  ;;  %v13972_v25 = vsel %vm109_vm0, %v13933_v23, 0.0  ;;  %v13976_v32 = vmul.f32 %v13933_v23, %v13933_v23  ;;  %v13987_v51 = vadd.f32 %v9398_v29, %v13714_v24  ;;  %v17291_v37 = vsub.f32 %v13480_v22, %v13801_v45 }
 0x7bd   :  { %v13935_v55 = vpop.f32.mrf.mxu1  ;;  %v13981_v56 = vadd.f32 %v5458_v11, %v5457_v4  ;;  %v17293_v11 = vsub.f32 %v13477_v49, %v13801_v45  ;;  %v17295_v29 = vsub.f32 %v13497_v14, %v13801_v45  ;;  %v17298_v49 = vsub.f32 %v13511_v0, %v13801_v45 }
 0x7be   :  { %v17300_v14 = vsub.f32 %v13546_v19, %v13801_v45  ;;  %v17303_v0 = vsub.f32 %v13564_v34, %v13801_v45  ;;  %v17305_v19 = vsub.f32 %v13570_v30, %v13801_v45  ;;  %v17308_v34 = vsub.f32 %v13613_v62, %v13801_v45 }
 0x7bf   :  { %v13957_v13 = vpop.f32.mrf.mxu1  ;;  %v17310_v30 = vsub.f32 %v13610_v48, %v13801_v45  ;;  %v17313_v62 = vsub.f32 %v13634_v50, %v13801_v45  ;;  %v17315_v48 = vsub.f32 %v13660_v9, %v13801_v45  ;;  %v17318_v50 = vsub.f32 %v13666_v27, %v13801_v45 }
 0x7c0   :  { %v9676_v46 = vpop.eup %9675  ;;  %v17320_v9 = vsub.f32 %v13692_v28, %v13801_v45 }
 0x7c1   :  { %v4096_v3 = vmul.f32 %v9676_v46, %v17289_v53  ;;  %v4067_v61 = vmul.f32 %v9676_v46, %v17290_v15  ;;  %v4068_v23 = vmul.f32 %v9676_v46, %v17291_v37  ;;  %v4069_v53 = vmul.f32 %v9676_v46, %v17292_v1  ;;  %v14013_v1 = vpop.f32.mrf.mxu1 }
 0x7c2   :  { %v4070_v57 = vmul.f32 %v9676_v46, %v17293_v11  ;;  %v4071_v54 = vmul.f32 %v9676_v46, %v17295_v29  ;;  %v17296_v15 = vsub.f32 %v13514_v16, %v13801_v45  ;;  %v17297_v37 = vsub.f32 %v13503_v5, %v13801_v45 }
 0x7c3   :  { %v14002_v4 = vmul.f32 %v13962_v33, %v4096_v3  ;;  %v4074_v11 = vmul.f32 %v9676_v46, %v17298_v49  ;;  %v17299_v3 = vsub.f32 %v13529_v60, %v13801_v45  ;;  %v4076_v29 = vmul.f32 %v9676_v46, %v17300_v14  ;;  %v14063_v47 = vpop.f32.mrf.mxu1 }
 0x7c4   :  { %v4072_v22 = vmul.f32 %v9676_v46, %v17296_v15  ;;  %v4073_v52 = vmul.f32 %v9676_v46, %v17297_v37  ;;  %v17301_v16 = vsub.f32 %v13535_v58, %v13801_v45  ;;  %v17302_v5 = vsub.f32 %v13543_v59, %v13801_v45 }
 0x7c5   :  { %17294 = vst [vmem:[#allocation55_spill] sm:$0xff] %v14002_v4  ;;  %v4075_v17 = vmul.f32 %v9676_v46, %v17299_v3  ;;  %v4079_v49 = vmul.f32 %v9676_v46, %v17303_v0  ;;  %v17304_v60 = vsub.f32 %v13581_v39, %v13801_v45  ;;  %v4081_v14 = vmul.f32 %v9676_v46, %v17305_v19 }
 0x7c6   :  { %v4077_v15 = vmul.f32 %v9676_v46, %v17301_v16  ;;  %v4078_v37 = vmul.f32 %v9676_v46, %v17302_v5  ;;  %v17306_v58 = vsub.f32 %v13578_v18, %v13801_v45  ;;  %v17307_v59 = vsub.f32 %v13596_v38, %v13801_v45 }
 0x7c7   :  { %v4080_v3 = vmul.f32 %v9676_v46, %v17304_v60  ;;  %v4084_v0 = vmul.f32 %v9676_v46, %v17308_v34  ;;  %v17309_v39 = vsub.f32 %v13602_v36, %v13801_v45  ;;  %v4086_v19 = vmul.f32 %v9676_v46, %v17310_v30 }
 0x7c8   :  { %v4082_v16 = vmul.f32 %v9676_v46, %v17306_v58  ;;  %v4083_v5 = vmul.f32 %v9676_v46, %v17307_v59  ;;  %v17311_v18 = vsub.f32 %v13628_v44, %v13801_v45  ;;  %v17312_v38 = vsub.f32 %v13645_v35, %v13801_v45 }
 0x7c9   :  { %v4085_v60 = vmul.f32 %v9676_v46, %v17309_v39  ;;  %v4089_v34 = vmul.f32 %v9676_v46, %v17313_v62  ;;  %v17314_v36 = vsub.f32 %v13642_v21, %v13801_v45  ;;  %v4091_v30 = vmul.f32 %v9676_v46, %v17315_v48 }
 0x7ca   :  { %v4087_v58 = vmul.f32 %v9676_v46, %v17311_v18  ;;  %v4088_v59 = vmul.f32 %v9676_v46, %v17312_v38  ;;  %v17316_v44 = vsub.f32 %v13677_v8, %v13801_v45  ;;  %v17317_v35 = vsub.f32 %v13698_v10, %v13801_v45 }
 0x7cb   :  { %v4090_v39 = vmul.f32 %v9676_v46, %v17314_v36  ;;  %v4093_v62 = vmul.f32 %v9676_v46, %v17318_v50  ;;  %v17319_v21 = vsub.f32 %v13674_v7, %v13801_v45  ;;  %v4095_v48 = vmul.f32 %v9676_v46, %v17320_v9 }
 0x7cc   :  { %v4092_v18 = vmul.f32 %v9676_v46, %v17316_v44  ;;  %v4097_v38 = vmul.f32 %v9676_v46, %v17317_v35  ;;  %v17321_v8 = vsub.f32 %v13706_v43, %v13801_v45  ;;  %v14090_v4 = vmul.f32 %v13962_v33, %v4067_v61  ;;  %v14105_v45 = vpop.f32.mrf.mxu1 }
 0x7cd   :  { %v4094_v36 = vmul.f32 %v9676_v46, %v17319_v21  ;;  %v14093_v10 = vmul.f32 %v13962_v33, %v4068_v23  ;;  %v4102_v27 = vmul.f32 %v13962_v33, %v4069_v53  ;;  %v4103_v35 = vmul.f32 %v13962_v33, %v4070_v57 }
 0x7ce   :  { %v4098_v44 = vmul.f32 %v9676_v46, %v17321_v8  ;;  %v14098_v7 = vmul.f32 %v13962_v33, %v4071_v54  ;;  %v14101_v28 = vmul.f32 %v13962_v33, %v4072_v22  ;;  %v4106_v50 = vmul.f32 %v13962_v33, %v4073_v52  ;;  %v14144_v21 = vpop.f32.mrf.mxu1 }
 0x7cf   :  { %v4107_v43 = vmul.f32 %v13962_v33, %v4074_v11  ;;  %v14108_v61 = vmul.f32 %v13962_v33, %v4075_v17  ;;  %v14111_v23 = vmul.f32 %v13962_v33, %v4076_v29  ;;  %v4110_v46 = vmul.f32 %v13962_v33, %v4077_v15  ;;  %v14126_v17 = vld [vmem:[%s16903_s14 + $0x25] ss:$0 sm:$0xff] }
 0x7d0   :  { %v4111_v53 = vmul.f32 %v13962_v33, %v4078_v37  ;;  %v14116_v57 = vmul.f32 %v13962_v33, %v4079_v49  ;;  %v14119_v54 = vmul.f32 %v13962_v33, %v4080_v3  ;;  %v4114_v22 = vmul.f32 %v13962_v33, %v4081_v14  ;;  %v5304_v8 = vpop.f32.mrf.mxu1 }
 0x7d1   :  { %v4115_v52 = vmul.f32 %v13962_v33, %v4082_v16  ;;  %v14129_v11 = vmul.f32 %v13962_v33, %v4083_v5  ;;  %v14132_v29 = vmul.f32 %v13962_v33, %v4084_v0  ;;  %v4118_v15 = vmul.f32 %v13962_v33, %v4085_v60 }
 0x7d2   :  { %v4119_v37 = vmul.f32 %v13962_v33, %v4086_v19  ;;  %v14137_v49 = vmul.f32 %v13962_v33, %v4087_v58  ;;  %v14140_v3 = vmul.f32 %v13962_v33, %v4088_v59  ;;  %v4122_v14 = vmul.f32 %v13962_v33, %v4089_v34 }
 0x7d3   :  { %v4123_v16 = vmul.f32 %v13962_v33, %v4090_v39  ;;  %v14147_v5 = vmul.f32 %v13962_v33, %v4091_v30  ;;  %v14150_v0 = vmul.f32 %v13962_v33, %v4092_v18  ;;  %v4126_v60 = vmul.f32 %v13962_v33, %v4093_v62 }
 0x7d4   :  { %v4127_v19 = vmul.f32 %v13962_v33, %v4094_v36  ;;  %v14155_v58 = vmul.f32 %v13962_v33, %v4095_v48  ;;  %v4130_v59 = vmul.f32 %v13962_v33, %v4097_v38  ;;  %v4131_v34 = vmul.f32 %v13962_v33, %v4098_v44 }
 0x7d5   :  { %v4135_v39 = vadd.f32 %v14126_v17, %v4102_v27  ;;  %v4136_v9 = vadd.f32 %v14126_v17, %v4103_v35  ;;  %v14162_v30 = vadd.f32 %v14126_v17, %v4106_v50  ;;  %v14165_v18 = vadd.f32 %v14126_v17, %v4107_v43 }
 0x7d6   :  { %17322 = vst [vmem:[#allocation56_spill] sm:$0xff] %v14155_v58  ;;  %v14168_v62 = vadd.f32 %v14126_v17, %v4110_v46  ;;  %v14171_v36 = vadd.f32 %v14126_v17, %v4111_v53  ;;  %v14174_v38 = vadd.f32 %v14126_v17, %v4114_v22  ;;  %v14177_v33 = vadd.f32 %v14126_v17, %v4115_v52  ;;  %v9406_v58 = vpop.f32.mrf.mxu1 }
 0x7d7   :  { %v14180_v48 = vadd.f32 %v14126_v17, %v4118_v15  ;;  %v14183_v44 = vadd.f32 %v14126_v17, %v4119_v37  ;;  %v14186_v27 = vadd.f32 %v14126_v17, %v4122_v14  ;;  %v14189_v35 = vadd.f32 %v14126_v17, %v4123_v16 }
 0x7d8   :  { %v14192_v50 = vadd.f32 %v14126_v17, %v4126_v60  ;;  %v14195_v43 = vadd.f32 %v14126_v17, %v4127_v19  ;;  %v14198_v46 = vadd.f32 %v14126_v17, %v4130_v59  ;;  %v14201_v53 = vadd.f32 %v14126_v17, %v4131_v34 }
 0x7d9   :  { %v4167_v22 = vmax.f32 %v4135_v39, 0.0  ;;  %v4168_v52 = vmax.f32 %v4136_v9, 0.0  ;;  %v5461_v60 = vadd.f32 %v13944_v12, %v13981_v56  ;;  %v5361_v19 = vadd.f32 %v13951_v40, %v13964_v6  ;;  %v5307_v40 = vpop.f32.mrf.mxu1 }
 0x7da   :  { %v5424_v39 = vmul.f32 %v13987_v51, %v13987_v51  ;;  %v14227_v15 = vadd.f32 %v13935_v55, %v13714_v24  ;;  %v14233_v56 = vadd.f32 %v13957_v13, %v13714_v24  ;;  %v14237_v12 = vadd.f32 %v14013_v1, %v13714_v24 }
 0x7db   :  { %v14221_v16 = vpack.c.bf16 %v4168_v52, %v4167_v22  ;;  %v5363_v37 = vadd.f32 %v13918_v26, %v5361_v19  ;;  %v5463_v14 = vadd.f32 %v13984_v20, %v5461_v60  ;;  %v5472_v6 = vsel %vm109_vm0, %v13968_v63, 0.0  ;;  %v9409_v19 = vpop.f32.mrf.mxu1 }
 0x7dc   :  { %17323 = vst [vmem:[#allocation57_spill] sm:$0xff] %v14233_v56  ;;  %17324 = vst [vmem:[#allocation58_spill] sm:$0xff] %v14237_v12  ;;  %v5468_v55 = vsel %vm109_vm0, %v13976_v32, 0.0  ;;  %v5422_v26 = vmul.f32 %v14227_v15, %v14227_v15  ;;  %v14247_v20 = vadd.f32 %v14063_v47, %v13714_v24  ;;  %v5372_v1 = vsel %vm109_vm0, %v13987_v51, 0.0 }
 0x7dd   :  { %v5465_v13 = vadd.f32 %v13939_v42, %v5463_v14  ;;  %v5365_v22 = vadd.f32 %v13927_v31, %v5363_v37  ;;  %v5474_v52 = vsel %vm109_vm0, %v5424_v39, 0.0  ;;  %v5368_v63 = vsel %vm109_vm0, %v14227_v15, 0.0 }
 0x7de   :  { %17325 = vst [vmem:[#allocation59_spill] sm:$0xff] %v14247_v20  ;;  %v5378_v32 = vsel %vm109_vm0, %v14233_v56, 0.0  ;;  %v5427_v60 = vmul.f32 %v14233_v56, %v14233_v56  ;;  %v5425_v47 = vmul.f32 %v14237_v12, %v14237_v12  ;;  %v5470_v37 = vsel %vm109_vm0, %v5422_v26, 0.0 }
 0x7df   :  { %v5367_v42 = vadd.f32 %v13972_v25, %v5365_v22  ;;  %v5467_v31 = vadd.f32 %v13947_v41, %v5465_v13  ;;  %v5428_v14 = vmul.f32 %v14247_v20, %v14247_v20  ;;  %v5374_v39 = vsel %vm109_vm0, %v14237_v12, 0.0 }
 0x7e0   :  { %v14271_v59 = vadd.f32 %v14105_v45, %v13714_v24  ;;  %v14275_v9 = vadd.f32 %v14144_v21, %v13714_v24  ;;  %v14278_v25 = vadd.f32 %v5304_v8, %v13714_v24  ;;  %v5380_v13 = vsel %vm109_vm0, %v14247_v20, 0.0 }
 0x7e1   :  { %v5469_v41 = vadd.f32 %v5468_v55, %v5467_v31  ;;  %v5369_v26 = vadd.f32 %v5368_v63, %v5367_v42  ;;  %v4133_v22 = vadd.f32 %v14126_v17, %v14090_v4  ;;  %v5480_v34 = vsel %vm109_vm0, %v5427_v60, 0.0  ;;  %v5320_v42 = vpop.f32.mrf.mxu1 }
 0x7e2   :  { %17326 = vst [vmem:[#allocation60_spill] sm:$0xff] %v14271_v59  ;;  %17327 = vst [vmem:[#allocation61_spill] sm:$0xff] %v14275_v9  ;;  %v5476_v45 = vsel %vm109_vm0, %v5425_v47, 0.0  ;;  %v5482_v56 = vsel %vm109_vm0, %v5428_v14, 0.0  ;;  %v5376_v21 = vsel %vm109_vm0, %v14271_v59, 0.0  ;;  %v5426_v55 = vmul.f32 %v14271_v59, %v14271_v59 }
 0x7e3   :  { %17328 = vst [vmem:[#allocation62_spill] sm:$0xff] %v14278_v25  ;;  %v5371_v8 = vadd.f32 %v13955_v2, %v5369_v26  ;;  %v5471_v12 = vadd.f32 %v5470_v37, %v5469_v41  ;;  %v5431_v63 = vmul.f32 %v14275_v9, %v14275_v9  ;;  %v14296_v4 = vsel %vm109_vm0, %v14275_v9, 0.0 }
 0x7e4   :  { %v5382_v60 = vsel %vm109_vm0, %v14278_v25, 0.0  ;;  %v4134_v47 = vadd.f32 %v14126_v17, %v14093_v10  ;;  %v4165_v31 = vmax.f32 %v4133_v22, 0.0  ;;  %v5429_v14 = vmul.f32 %v14278_v25, %v14278_v25 }
 0x7e5   :  { %v5473_v2 = vadd.f32 %v5472_v6, %v5471_v12  ;;  %v5373_v37 = vadd.f32 %v5372_v1, %v5371_v8  ;;  %v14305_v41 = vadd.f32 %v9406_v58, %v13714_v24  ;;  %v4137_v9 = vadd.f32 %v14126_v17, %v14098_v7  ;;  %v9410_v1 = vpop.f32.mrf.mxu1  ;;  %v9580_v7 = vld [vmem:[%s16901_s12] ss:$8 sps:$4 sm:$0xff]  }
 0x7e6   :  { %v4166_v26 = vmax.f32 %v4134_v47, 0.0  ;;  %v4138_v20 = vadd.f32 %v14126_v17, %v14101_v28  ;;  %v14312_v59 = vadd.f32 %v5307_v40, %v13714_v24  ;;  %v5478_v12 = vsel %vm109_vm0, %v5426_v55, 0.0 }
 0x7e7   :  { %v5375_v10 = vadd.f32 %v5374_v39, %v5373_v37  ;;  %v5475_v22 = vadd.f32 %v5474_v52, %v5473_v2  ;;  %v5488_v6 = vsel %vm109_vm0, %v5431_v63, 0.0  ;;  %v5432_v58 = vmul.f32 %v14305_v41, %v14305_v41 }
 0x7e8   :  { %v4197_v8 = vpack.c.bf16 %v4166_v26, %v4165_v31  ;;  %v4169_v47 = vmax.f32 %v4137_v9, 0.0  ;;  %v4170_v28 = vmax.f32 %v4138_v20, 0.0  ;;  %v5484_v39 = vsel %vm109_vm0, %v5429_v14, 0.0  ;;  %v5323_v26 = vpop.f32.mrf.mxu1 }
 0x7e9   :  { %v5477_v25 = vadd.f32 %v5476_v45, %v5475_v22  ;;  %v5377_v40 = vadd.f32 %v5376_v21, %v5375_v10  ;;  %v5430_v52 = vmul.f32 %v14312_v59, %v14312_v59  ;;  %v14326_v63 = vadd.f32 %v9409_v19, %v13714_v24 }
 0x7ea   :  { %9345 = vmatprep.mubr.msk.bf16.mxu0 %vm109_vm0, %v4197_v8  ;;  %v4199_v55 = vpack.c.bf16 %v4170_v28, %v4169_v47  ;;  %v14329_v31 = vadd.f32 %v5320_v42, %v13714_v24  ;;  %v14332_v2 = vadd.f32 %v9410_v1, %v13714_v24  ;;  %v5388_v45 = vsel %vm109_vm0, %v14305_v41, 0.0 }
 0x7eb   :  { %v5379_v9 = vadd.f32 %v5378_v32, %v5377_v40  ;;  %v5479_v20 = vadd.f32 %v5478_v12, %v5477_v25  ;;  %9346 = vmatmul.mubr.msk.bf16.vlgmr.msra.gmra.mxu0 %vm109_vm0, %v14221_v16  ;;  %v5384_v21 = vsel %vm109_vm0, %v14312_v59, 0.0  ;;  %v5490_v19 = vsel %vm109_vm0, %v5432_v58, 0.0 }
 0x7ec   :  { %5777 = vmatpush1.bf16.msra.mxu0 %v9580_v7  ;;  %9349 = vmatprep.mubr.msk.bf16.mxu0 %vm109_vm0, %v4199_v55  ;;  %v5486_v42 = vsel %vm109_vm0, %v5430_v52, 0.0  ;;  %v5433_v32 = vmul.f32 %v14329_v31, %v14329_v31  ;;  %v17329_v25 = vmax.f32 %v14162_v30, 0.0  ;;  %v17330_v37 = vmax.f32 %v14165_v18, 0.0 }
 0x7ed   :  { %v5481_v16 = vadd.f32 %v5480_v34, %v5479_v20  ;;  %v5381_v10 = vadd.f32 %v5380_v13, %v5379_v9  ;;  %v5394_v22 = vsel %vm109_vm0, %v14326_v63, 0.0  ;;  %v5435_v12 = vmul.f32 %v14326_v63, %v14326_v63 }
 0x7ee   :  { %v4200_v14 = vpack.c.bf16 %v17330_v37, %v17329_v25  ;;  %v5390_v1 = vsel %vm109_vm0, %v14329_v31, 0.0  ;;  %v14357_v8 = vmul.f32 %v14332_v2, %v14332_v2  ;;  %v4141_v30 = vadd.f32 %v14126_v17, %v14108_v61 }
 0x7ef   :  { %v4142_v18 = vadd.f32 %v14126_v17, %v14111_v23  ;;  %v5383_v34 = vadd.f32 %v5382_v60, %v5381_v10  ;;  %v5483_v13 = vadd.f32 %v5482_v56, %v5481_v16  ;;  %v5492_v58 = vsel %vm109_vm0, %v5433_v32, 0.0 }
 0x7f0   :  { %v14365_v7 = vadd.f32 %v5323_v26, %v13714_v24  ;;  %v4173_v47 = vmax.f32 %v4141_v30, 0.0  ;;  %v17331_v40 = vmax.f32 %v14168_v62, 0.0  ;;  %v17332_v52 = vmax.f32 %v14171_v36, 0.0 }
 0x7f1   :  { %v4174_v28 = vmax.f32 %v4142_v18, 0.0  ;;  %v4145_v61 = vadd.f32 %v14126_v17, %v14116_v57  ;;  %v5485_v9 = vadd.f32 %v5484_v39, %v5483_v13  ;;  %v5385_v20 = vadd.f32 %v5384_v21, %v5383_v34 }
 0x7f2   :  { %v4202_v55 = vpack.c.bf16 %v17332_v52, %v17331_v40  ;;  %v5392_v23 = vsel %vm109_vm0, %v14365_v7, 0.0  ;;  %v5434_v56 = vmul.f32 %v14365_v7, %v14365_v7  ;;  %v4146_v60 = vadd.f32 %v14126_v17, %v14119_v54 }
 0x7f3   :  { %v4201_v24 = vpack.c.bf16 %v4174_v28, %v4173_v47  ;;  %v4177_v32 = vmax.f32 %v4145_v61, 0.0  ;;  %v17333_v62 = vmax.f32 %v14174_v38, 0.0  ;;  %v17334_v36 = vmax.f32 %v14177_v33, 0.0  ;;  %9350 = vmatmul.mubr.msk.bf16.gmra.mxu0 %vm109_vm0, %v4200_v14  ;;  %v17341_v61 = vld [vmem:[#allocation56_spill] sm:$0xff] }
 0x7f4   :  { %v5387_v57 = vadd.f32 %v14296_v4, %v5385_v20  ;;  %v5487_v39 = vadd.f32 %v5486_v42, %v5485_v9  ;;  %v5494_v21 = vsel %vm109_vm0, %v5434_v56, 0.0  ;;  %v4149_v37 = vadd.f32 %v14126_v17, %v14129_v11  ;;  %v17342_v56 = vld [vmem:[#allocation55_spill] sm:$0xff] }
 0x7f5   :  { %v4204_v25 = vpack.c.bf16 %v17334_v36, %v17333_v62  ;;  %9353 = vmatprep.mubr.msk.bf16.mxu0 %vm109_vm0, %v4201_v24  ;;  %v4178_v26 = vmax.f32 %v4146_v60, 0.0  ;;  %v4150_v54 = vadd.f32 %v14126_v17, %v14132_v29  ;;  %v17335_v38 = vmax.f32 %v14180_v48, 0.0 }
 0x7f6   :  { %v17336_v33 = vmax.f32 %v14183_v44, 0.0  ;;  %v4153_v4 = vadd.f32 %v14126_v17, %v14137_v49  ;;  %v5489_v42 = vadd.f32 %v5488_v6, %v5487_v39  ;;  %v5389_v14 = vadd.f32 %v5388_v45, %v5387_v57 }
 0x7f7   :  { %v4181_v10 = vmax.f32 %v4149_v37, 0.0  ;;  %v4154_v11 = vadd.f32 %v14126_v17, %v14140_v3  ;;  %v4203_v30 = vpack.c.bf16 %v4178_v26, %v4177_v32  ;;  %v4182_v18 = vmax.f32 %v4150_v54, 0.0 }
 0x7f8   :  { %v4206_v16 = vpack.c.bf16 %v17336_v33, %v17335_v38  ;;  %v4185_v34 = vmax.f32 %v4153_v4, 0.0  ;;  %v17337_v13 = vmax.f32 %v14186_v27, 0.0  ;;  %v17338_v29 = vmax.f32 %v14189_v35, 0.0 }
 0x7f9   :  { %v5391_v47 = vadd.f32 %v5390_v1, %v5389_v14  ;;  %v5491_v44 = vadd.f32 %v5490_v19, %v5489_v42  ;;  %v4186_v28 = vmax.f32 %v4154_v11, 0.0  ;;  %v4157_v49 = vadd.f32 %v14126_v17, %v14147_v5 }
 0x7fa   :  { %v4208_v48 = vpack.c.bf16 %v17338_v29, %v17337_v13  ;;  %v4205_v6 = vpack.c.bf16 %v4182_v18, %v4181_v10  ;;  %v4158_v45 = vadd.f32 %v14126_v17, %v14150_v0  ;;  %v17339_v3 = vmax.f32 %v14192_v50, 0.0 }
 0x7fb   :  { %v17340_v40 = vmax.f32 %v14195_v43, 0.0  ;;  %v4161_v27 = vadd.f32 %v14126_v17, %v17341_v61  ;;  %v5493_v35 = vadd.f32 %v5492_v58, %v5491_v44  ;;  %v5393_v9 = vadd.f32 %v5392_v23, %v5391_v47  ;;  %9354 = vmatmul.mubr.msk.bf16.gmra.mxu0 %vm109_vm0, %v4202_v55  ;;  %v17346_v47 = vld [vmem:[#allocation60_spill] sm:$0xff] }
 0x7fc   :  { %v4207_v1 = vpack.c.bf16 %v4186_v28, %v4185_v34  ;;  %v4189_v19 = vmax.f32 %v4157_v49, 0.0  ;;  %v4190_v20 = vmax.f32 %v4158_v45, 0.0  ;;  %v4162_v5 = vadd.f32 %v14126_v17, %v17342_v56  ;;  %9357 = vmatprep.mubr.msk.bf16.mxu0 %vm109_vm0, %v4203_v30  ;;  %v17347_v28 = vld [vmem:[#allocation57_spill] sm:$0xff]  ;;  %v17348_v49 = vld [vmem:[#allocation59_spill] sm:$0xff] }
 0x7fd   :  { %v4210_v52 = vpack.c.bf16 %v17340_v40, %v17339_v3  ;;  %v4193_v24 = vmax.f32 %v4161_v27, 0.0  ;;  %v17343_v60 = vmax.f32 %v14198_v46, 0.0  ;;  %v17344_v0 = vmax.f32 %v14201_v53, 0.0  ;;  %v17350_v3 = vld [vmem:[#allocation61_spill] sm:$0xff] }
 0x7fe   :  { %v5395_v32 = vadd.f32 %v5394_v22, %v5393_v9  ;;  %v5495_v43 = vadd.f32 %v5494_v21, %v5493_v35  ;;  %v5496_v62 = vsel %vm109_vm0, %v5435_v12, 0.0  ;;  %v5396_v58 = vsel %vm109_vm0, %v14332_v2, 0.0  ;;  %v14471_v9 = vld [vmem:[%s16903_s14 + $0x30] ss:$0 sm:$0xff] }
 0x7ff   :  { %v4212_v50 = vpack.c.bf16 %v17344_v0, %v17343_v60  ;;  %v4209_v23 = vpack.c.bf16 %v4190_v20, %v4189_v19  ;;  %v4194_v36 = vmax.f32 %v4162_v5, 0.0  ;;  %v5498_v46 = vsel %vm109_vm0, %v14357_v8, 0.0  ;;  %v17353_v20 = vld [vmem:[#allocation54_spill] sm:$0xff]  ;;  %v17354_v5 = vld [vmem:[#allocation53_spill] sm:$0xff] }
 0x800   :  { %v5397_v17 = vadd.f32 %v5396_v58, %v5395_v32  ;;  %v5497_v57 = vadd.f32 %v5496_v62, %v5495_v43  ;;  %v9962_v60 = vmov 0  }
 0x801   :  { %v4211_v53 = vpack.c.bf16 %v4194_v36, %v4193_v24 }
 0x802   :  { %v5398_v39 = vrot.slane %v5397_v17, 4  ;;  %v5499_v22 = vadd.f32 %v5498_v46, %v5497_v57 }
 0x803   :  { %9358 = vmatmul.mubr.msk.bf16.gmra.mxu0 %vm109_vm0, %v4204_v25 }
 0x804   :  { %v5399_v21 = vadd.f32 %v5398_v39, %v5397_v17  ;;  %v5500_v37 = vrot.slane %v5499_v22, 4  ;;  %9361 = vmatprep.mubr.msk.bf16.mxu0 %vm109_vm0, %v4205_v6  ;;  %v17355_v17 = vld [vmem:[#allocation38_spill] sm:$0xff] }
 0x806   :  { %v5400_v55 = vrot.slane %v5399_v21, 2  ;;  %v5501_v26 = vadd.f32 %v5500_v37, %v5499_v22 }
 0x808   :  { %v5401_v12 = vadd.f32 %v5400_v55, %v5399_v21  ;;  %v5502_v54 = vrot.slane %v5501_v26, 2 }
 0x80a   :  { %v5402_v38 = vrot.slane %v5401_v12, 1  ;;  %v5503_v33 = vadd.f32 %v5502_v54, %v5501_v26 }
 0x80b   :  { %9362 = vmatmul.mubr.msk.bf16.gmra.mxu0 %vm109_vm0, %v4206_v16  ;;  %v17345_v16 = vld [vmem:[#allocation58_spill] sm:$0xff] }
 0x80c   :  { %v5403_v4 = vadd.f32 %v5402_v38, %v5401_v12  ;;  %v5504_v42 = vrot.slane %v5503_v33, 1  ;;  %9365 = vmatprep.mubr.msk.bf16.mxu0 %vm109_vm0, %v4207_v1  ;;  %v17352_v1 = vld [vmem:[#allocation51_spill] sm:$0xff] }
 0x80e   :  { %v14428_v14 = vmul.f32 0.00390625, %v5403_v4  ;;  %v5505_v8 = vadd.f32 %v5504_v42, %v5503_v33  ;;  %v17356_v33 = vld [vmem:[#allocation40_spill] sm:$0xff] }
 0x810   :  { %v5506_v10 = vmul.f32 0.00390625, %v5505_v8  ;;  %v5507_v11 = vmul.f32 %v14428_v14, %v14428_v14  ;;  %v5538_v25 = vsub.f32 %v14365_v7, %v14428_v14  ;;  %v5526_v34 = vsub.f32 %v14227_v15, %v14428_v14  ;;  %v17349_v15 = vld [vmem:[#allocation62_spill] sm:$0xff] }
 0x811   :  { %v5528_v13 = vsub.f32 %v13987_v51, %v14428_v14  ;;  %v5529_v29 = vsub.f32 %v17345_v16, %v14428_v14  ;;  %v5530_v44 = vsub.f32 %v17346_v47, %v14428_v14  ;;  %v5531_v7 = vsub.f32 %v17347_v28, %v14428_v14 }
 0x812   :  { %v5508_v30 = vsub.f32 %v5506_v10, %v5507_v11  ;;  %v5532_v6 = vsub.f32 %v17348_v49, %v14428_v14  ;;  %v5533_v45 = vsub.f32 %v17349_v15, %v14428_v14  ;;  %v5534_v51 = vsub.f32 %v14312_v59, %v14428_v14 }
 0x813   :  { %9366 = vmatmul.mubr.msk.bf16.gmra.mxu0 %vm109_vm0, %v4208_v48  ;;  %v5535_v40 = vsub.f32 %v17350_v3, %v14428_v14  ;;  %v5536_v48 = vsub.f32 %v14305_v41, %v14428_v14  ;;  %v5537_v61 = vsub.f32 %v14329_v31, %v14428_v14  ;;  %v5539_v27 = vsub.f32 %v14326_v63, %v14428_v14  ;;  %v14477_v63 = vld [vmem:[%s16903_s14 + $0x31] ss:$0 sm:$0xff] }
 0x814   :  { %v5541_v18 = vadd.f32 1e-05, %v5508_v30  ;;  %9369 = vmatprep.mubr.msk.bf16.mxu0 %vm109_vm0, %v4209_v23  ;;  %v5540_v35 = vsub.f32 %v14332_v2, %v14428_v14  ;;  %v17351_v2 = vld [vmem:[#allocation49_spill] sm:$0xff]  ;;  %v5524_v19 = vsub.f32 %v17352_v1, %v14428_v14  ;;  %v5525_v56 = vsub.f32 %v17353_v20, %v14428_v14 }
 0x815   :  { %v5527_v24 = vsub.f32 %v17354_v5, %v14428_v14  ;;  %v5509_v57 = vsub.f32 %v17355_v17, %v14428_v14  ;;  %v5510_v4 = vsub.f32 %v17356_v33, %v14428_v14  ;;  %v17359_v17 = vld [vmem:[#allocation42_spill] sm:$0xff] }
 0x816   :  { %9677 = vrsqrt.f32 %v5541_v18 }
 0x81b   :  { %9370 = vmatmul.mubr.msk.bf16.gmra.mxu0 %vm109_vm0, %v4210_v52  ;;  %v5523_v52 = vsub.f32 %v17351_v2, %v14428_v14 }
 0x81c   :  { %9373 = vmatprep.mubr.msk.bf16.mxu0 %vm109_vm0, %v4211_v53 }
 0x823   :  { %v14466_v59 = vpop.eup %9677  ;;  %9374 = vmatmul.mubr.msk.bf16.gmra.mxu0 %vm109_vm0, %v4212_v50 }
 0x824   :  { %v5572_v41 = vmul.f32 %v14466_v59, %v5538_v25  ;;  %5794 = vmatprep.mubr.bf16.mxu0 %v9962_v60  ;;  %v5557_v32 = vmul.f32 %v14466_v59, %v5523_v52  ;;  %v5558_v43 = vmul.f32 %v14466_v59, %v5524_v19  ;;  %v5559_v62 = vmul.f32 %v14466_v59, %v5525_v56 }
 0x825   :  { %v5560_v58 = vmul.f32 %v14466_v59, %v5526_v34  ;;  %v5561_v23 = vmul.f32 %v14466_v59, %v5527_v24  ;;  %v5562_v50 = vmul.f32 %v14466_v59, %v5528_v13  ;;  %v5563_v36 = vmul.f32 %v14466_v59, %v5529_v29 }
 0x826   :  { %v5605_v31 = vmul.f32 %v14471_v9, %v5572_v41  ;;  %v5564_v46 = vmul.f32 %v14466_v59, %v5530_v44  ;;  %v5565_v53 = vmul.f32 %v14466_v59, %v5531_v7  ;;  %v5566_v39 = vmul.f32 %v14466_v59, %v5532_v6 }
 0x827   :  { %v5567_v22 = vmul.f32 %v14466_v59, %v5533_v45  ;;  %v5568_v21 = vmul.f32 %v14466_v59, %v5534_v51  ;;  %v5569_v37 = vmul.f32 %v14466_v59, %v5535_v40  ;;  %v5570_v55 = vmul.f32 %v14466_v59, %v5536_v48  ;;  %v17357_v51 = vld [vmem:[#allocation37_spill] sm:$0xff]  ;;  %v17358_v40 = vld [vmem:[#allocation39_spill] sm:$0xff] }
 0x828   :  { %v14491_v0 = vadd.f32 %v14477_v63, %v5605_v31  ;;  %v5543_v26 = vmul.f32 %v14466_v59, %v5509_v57  ;;  %v5571_v12 = vmul.f32 %v14466_v59, %v5537_v61  ;;  %v5573_v54 = vmul.f32 %v14466_v59, %v5539_v27 }
 0x829   :  { %v5574_v38 = vmul.f32 %v14466_v59, %v5540_v35  ;;  %v5544_v42 = vmul.f32 %v14466_v59, %v5510_v4  ;;  %v5592_v10 = vmul.f32 %v14471_v9, %v5559_v62  ;;  %v5593_v11 = vmul.f32 %v14471_v9, %v5560_v58 }
 0x82a   :  { %v5576_v8 = vmul.f32 %v14471_v9, %v5543_v26  ;;  %v5594_v25 = vmul.f32 %v14471_v9, %v5561_v23  ;;  %v5595_v30 = vmul.f32 %v14471_v9, %v5562_v50  ;;  %v5596_v18 = vmul.f32 %v14471_v9, %v5563_v36 }
 0x82b   :  { %v5597_v34 = vmul.f32 %v14471_v9, %v5564_v46  ;;  %v5598_v13 = vmul.f32 %v14471_v9, %v5565_v53  ;;  %v5599_v16 = vmul.f32 %v14471_v9, %v5566_v39  ;;  %v5600_v29 = vmul.f32 %v14471_v9, %v5567_v22  ;;  %v17360_v22 = vld [vmem:[#allocation44_spill] sm:$0xff] }
 0x82c   :  { %v5601_v47 = vmul.f32 %v14471_v9, %v5568_v21  ;;  %v5602_v44 = vmul.f32 %v14471_v9, %v5569_v37  ;;  %v5603_v28 = vmul.f32 %v14471_v9, %v5570_v55  ;;  %v5604_v7 = vmul.f32 %v14471_v9, %v5571_v12 }
 0x82d   :  { %v5577_v49 = vmul.f32 %v14471_v9, %v5544_v42  ;;  %v5590_v6 = vmul.f32 %v14471_v9, %v5557_v32  ;;  %v5606_v15 = vmul.f32 %v14471_v9, %v5573_v54  ;;  %v5607_v45 = vmul.f32 %v14471_v9, %v5574_v38 }
 0x82e   :  { %v5511_v3 = vsub.f32 %v17357_v51, %v14428_v14  ;;  %v5512_v48 = vsub.f32 %v17358_v40, %v14428_v14  ;;  %v5591_v35 = vmul.f32 %v14471_v9, %v5558_v43  ;;  %v5609_v41 = vadd.f32 %v14477_v63, %v5576_v8 }
 0x82f   :  { %v5610_v31 = vadd.f32 %v14477_v63, %v5577_v49  ;;  %v5623_v2 = vadd.f32 %v14477_v63, %v5590_v6  ;;  %v5625_v52 = vadd.f32 %v14477_v63, %v5592_v10  ;;  %v5626_v1 = vadd.f32 %v14477_v63, %v5593_v11 }
 0x830   :  { %v5545_v61 = vmul.f32 %v14466_v59, %v5511_v3  ;;  %v5546_v27 = vmul.f32 %v14466_v59, %v5512_v48  ;;  %v5627_v19 = vadd.f32 %v14477_v63, %v5594_v25  ;;  %v5628_v20 = vadd.f32 %v14477_v63, %v5595_v30 }
 0x831   :  { %v5629_v56 = vadd.f32 %v14477_v63, %v5596_v18  ;;  %v5630_v5 = vadd.f32 %v14477_v63, %v5597_v34  ;;  %v5631_v24 = vadd.f32 %v14477_v63, %v5598_v13  ;;  %v5632_v32 = vadd.f32 %v14477_v63, %v5599_v16 }
 0x832   :  { %v5633_v43 = vadd.f32 %v14477_v63, %v5600_v29  ;;  %v5634_v62 = vadd.f32 %v14477_v63, %v5601_v47  ;;  %v5635_v58 = vadd.f32 %v14477_v63, %v5602_v44  ;;  %v5636_v23 = vadd.f32 %v14477_v63, %v5603_v28 }
 0x833   :  { %v5637_v50 = vadd.f32 %v14477_v63, %v5604_v7  ;;  %v5639_v36 = vadd.f32 %v14477_v63, %v5606_v15  ;;  %v5513_v57 = vsub.f32 %v17359_v17, %v14428_v14  ;;  %v5624_v46 = vadd.f32 %v14477_v63, %v5591_v35  ;;  %v17363_v17 = vld [vmem:[#allocation46_spill] sm:$0xff] }
 0x834   :  { %v5640_v53 = vadd.f32 %v14477_v63, %v5607_v45  ;;  %v5670_v39 = vmax.f32 %v14491_v0, 0.0  ;;  %v5514_v21 = vsub.f32 %v17360_v22, %v14428_v14  ;;  %v5578_v55 = vmul.f32 %v14471_v9, %v5545_v61 }
 0x835   :  { %v5547_v37 = vmul.f32 %v14466_v59, %v5513_v57  ;;  %v5579_v26 = vmul.f32 %v14471_v9, %v5546_v27  ;;  %v5641_v12 = vmax.f32 %v5609_v41, 0.0  ;;  %v5642_v54 = vmax.f32 %v5610_v31, 0.0 }
 0x836   :  { %v5655_v38 = vmax.f32 %v5623_v2, 0.0  ;;  %v5656_v33 = vmax.f32 %v5624_v46, 0.0  ;;  %v5657_v4 = vmax.f32 %v5625_v52, 0.0  ;;  %v5658_v42 = vmax.f32 %v5626_v1, 0.0  ;;  %v17361_v1 = vld [vmem:[#allocation41_spill] sm:$0xff]  ;;  %v17364_v46 = vld [vmem:[#allocation48_spill] sm:$0xff] }
 0x837   :  { %v5659_v8 = vmax.f32 %v5627_v19, 0.0  ;;  %v5660_v10 = vmax.f32 %v5628_v20, 0.0  ;;  %v5661_v11 = vmax.f32 %v5629_v56, 0.0  ;;  %v5662_v25 = vmax.f32 %v5630_v5, 0.0  ;;  %v17362_v20 = vld [vmem:[#allocation43_spill] sm:$0xff] }
 0x838   :  { %v5663_v0 = vmax.f32 %v5631_v24, 0.0  ;;  %v5664_v30 = vmax.f32 %v5632_v32, 0.0  ;;  %v5665_v18 = vmax.f32 %v5633_v43, 0.0  ;;  %v5666_v34 = vmax.f32 %v5634_v62, 0.0 }
 0x839   :  { %v5667_v13 = vmax.f32 %v5635_v58, 0.0  ;;  %v5668_v16 = vmax.f32 %v5636_v23, 0.0  ;;  %v5669_v29 = vmax.f32 %v5637_v50, 0.0  ;;  %v5671_v47 = vmax.f32 %v5639_v36, 0.0 }
 0x83a   :  { %v5672_v44 = vmax.f32 %v5640_v53, 0.0  ;;  %v5548_v28 = vmul.f32 %v14466_v59, %v5514_v21  ;;  %v5611_v7 = vadd.f32 %v14477_v63, %v5578_v55  ;;  %v5612_v49 = vadd.f32 %v14477_v63, %v5579_v26 }
 0x83b   :  { %v5673_v6 = vpack.c.bf16 %v5642_v54, %v5641_v12  ;;  %v14571_v15 = vpack.c.bf16 %v5656_v33, %v5655_v38  ;;  %v14574_v45 = vpack.c.bf16 %v5658_v42, %v5657_v4  ;;  %v14576_v51 = vpack.c.bf16 %v5660_v10, %v5659_v8  ;;  %v17365_v33 = vld [vmem:[#allocation45_spill] sm:$0xff]  ;;  %v17366_v42 = vld [vmem:[#allocation47_spill] sm:$0xff] }
 0x83c   :  { %v14578_v3 = vpack.c.bf16 %v5662_v25, %v5661_v11  ;;  %v14580_v40 = vpack.c.bf16 %v5664_v30, %v5663_v0  ;;  %v14583_v48 = vpack.c.bf16 %v5666_v34, %v5665_v18  ;;  %v14585_v61 = vpack.c.bf16 %v5668_v16, %v5667_v13 }
 0x83d   :  { %8508 = vmatmul.mubr.msk.bf16.vlgmr.msra.gmra.mxu0 %vm109_vm0, %v5673_v6  ;;  %v14587_v27 = vpack.c.bf16 %v5670_v39, %v5669_v29  ;;  %v14589_v35 = vpack.c.bf16 %v5672_v44, %v5671_v47  ;;  %v5580_v41 = vmul.f32 %v14471_v9, %v5547_v37  ;;  %v5581_v31 = vmul.f32 %v14471_v9, %v5548_v28  ;;  %v17367_v29 = vld [vmem:[#allocation50_spill] sm:$0xff]  ;;  %v17368_v44 = vld [vmem:[#allocation52_spill] sm:$0xff] }
 0x83e   :  { %5804 = vmatprep.mubr.bf16.mxu0 %v9962_v60  ;;  %v5643_v2 = vmax.f32 %v5611_v7, 0.0  ;;  %v5644_v52 = vmax.f32 %v5612_v49, 0.0  ;;  %v5515_v19 = vsub.f32 %v17361_v1, %v14428_v14  ;;  %v5516_v56 = vsub.f32 %v17362_v20, %v14428_v14 }
 0x83f   :  { %v5613_v32 = vadd.f32 %v14477_v63, %v5580_v41  ;;  %v5614_v43 = vadd.f32 %v14477_v63, %v5581_v31  ;;  %v5517_v57 = vsub.f32 %v17363_v17, %v14428_v14  ;;  %v5518_v53 = vsub.f32 %v17364_v46, %v14428_v14 }
 0x840   :  { %v5549_v5 = vmul.f32 %v14466_v59, %v5515_v19  ;;  %v5550_v24 = vmul.f32 %v14466_v59, %v5516_v56  ;;  %v5674_v62 = vpack.c.bf16 %v5644_v52, %v5643_v2  ;;  %v5519_v4 = vsub.f32 %v17365_v33, %v14428_v14 }
 0x841   :  { %v5645_v50 = vmax.f32 %v5613_v32, 0.0  ;;  %v5646_v36 = vmax.f32 %v5614_v43, 0.0  ;;  %v5551_v39 = vmul.f32 %v14466_v59, %v5517_v57  ;;  %v5552_v22 = vmul.f32 %v14466_v59, %v5518_v53 }
 0x842   :  { %v5582_v58 = vmul.f32 %v14471_v9, %v5549_v5  ;;  %v5583_v23 = vmul.f32 %v14471_v9, %v5550_v24  ;;  %v5520_v8 = vsub.f32 %v17366_v42, %v14428_v14  ;;  %v5553_v10 = vmul.f32 %v14466_v59, %v5519_v4 }
 0x843   :  { %v5675_v55 = vpack.c.bf16 %v5646_v36, %v5645_v50  ;;  %v5584_v26 = vmul.f32 %v14471_v9, %v5551_v39  ;;  %v5585_v12 = vmul.f32 %v14471_v9, %v5552_v22  ;;  %v5521_v47 = vsub.f32 %v17367_v29, %v14428_v14 }
 0x844   :  { %v5615_v21 = vadd.f32 %v14477_v63, %v5582_v58  ;;  %v5616_v37 = vadd.f32 %v14477_v63, %v5583_v23  ;;  %v5554_v11 = vmul.f32 %v14466_v59, %v5520_v8  ;;  %v5586_v18 = vmul.f32 %v14471_v9, %v5553_v10 }
 0x845   :  { %8509 = vmatmul.mubr.msk.bf16.gmra.mxu0 %vm109_vm0, %v5674_v62  ;;  %v5617_v25 = vadd.f32 %v14477_v63, %v5584_v26  ;;  %v5618_v0 = vadd.f32 %v14477_v63, %v5585_v12  ;;  %v5522_v28 = vsub.f32 %v17368_v44, %v14428_v14  ;;  %v5555_v7 = vmul.f32 %v14466_v59, %v5521_v47 }
 0x846   :  { %5814 = vmatprep.mubr.bf16.mxu0 %v9962_v60  ;;  %v5647_v54 = vmax.f32 %v5615_v21, 0.0  ;;  %v5648_v38 = vmax.f32 %v5616_v37, 0.0  ;;  %v5587_v34 = vmul.f32 %v14471_v9, %v5554_v11  ;;  %v5619_v6 = vadd.f32 %v14477_v63, %v5586_v18 }
 0x847   :  { %v5649_v13 = vmax.f32 %v5617_v25, 0.0  ;;  %v5650_v16 = vmax.f32 %v5618_v0, 0.0  ;;  %v5556_v49 = vmul.f32 %v14466_v59, %v5522_v28  ;;  %v5588_v2 = vmul.f32 %v14471_v9, %v5555_v7 }
 0x848   :  { %v5676_v30 = vpack.c.bf16 %v5648_v38, %v5647_v54  ;;  %v5620_v41 = vadd.f32 %v14477_v63, %v5587_v34  ;;  %v5651_v1 = vmax.f32 %v5619_v6, 0.0 }
 0x849   :  { %v5677_v31 = vpack.c.bf16 %v5650_v16, %v5649_v13  ;;  %v5589_v52 = vmul.f32 %v14471_v9, %v5556_v49  ;;  %v5621_v14 = vadd.f32 %v14477_v63, %v5588_v2 }
 0x84a   :  { %v5652_v19 = vmax.f32 %v5620_v41, 0.0 }
 0x84b   :  { %v5622_v20 = vadd.f32 %v14477_v63, %v5589_v52  ;;  %v5653_v56 = vmax.f32 %v5621_v14, 0.0  ;;  %v14671_v63 = vld [vmem:[%s16903_s14 + $0x26] ss:$0 sm:$0xff] }
 0x84c   :  { %v5678_v59 = vpack.c.bf16 %v5652_v19, %v5651_v1 }
 0x84d   :  { %8510 = vmatmul.mubr.msk.bf16.gmra.mxu0 %vm109_vm0, %v5675_v55  ;;  %v5654_v5 = vmax.f32 %v5622_v20, 0.0 }
 0x84e   :  { %5824 = vmatprep.mubr.bf16.mxu0 %v9962_v60 }
 0x84f   :  { %v5679_v24 = vpack.c.bf16 %v5654_v5, %v5653_v56 }
 0x855   :  { %8511 = vmatmul.mubr.msk.bf16.gmra.mxu0 %vm109_vm0, %v5676_v30 }
 0x856   :  { %5834 = vmatprep.mubr.bf16.mxu0 %v9962_v60 }
 0x85d   :  { %8512 = vmatmul.mubr.msk.bf16.gmra.mxu0 %vm109_vm0, %v5677_v31 }
 0x85e   :  { %5844 = vmatprep.mubr.bf16.mxu0 %v9962_v60 }
 0x865   :  { %8513 = vmatmul.mubr.msk.bf16.gmra.mxu0 %vm109_vm0, %v5678_v59 }
 0x866   :  { %5854 = vmatprep.mubr.bf16.mxu0 %v9962_v60 }
 0x86d   :  { %8514 = vmatmul.mubr.msk.bf16.gmra.mxu0 %vm109_vm0, %v5679_v24 }
 0x86e   :  { %5864 = vmatprep.mubr.bf16.mxu0 %v9962_v60 }
 0x875   :  { %8515 = vmatmul.mubr.msk.bf16.gmra.mxu0 %vm109_vm0, %v14571_v15 }
 0x876   :  { %5874 = vmatprep.mubr.bf16.mxu0 %v9962_v60 }
 0x87d   :  { %8516 = vmatmul.mubr.msk.bf16.gmra.mxu0 %vm109_vm0, %v14574_v45 }
 0x87e   :  { %5884 = vmatprep.mubr.bf16.mxu0 %v9962_v60 }
 0x885   :  { %8517 = vmatmul.mubr.msk.bf16.gmra.mxu0 %vm109_vm0, %v14576_v51 }
 0x886   :  { %5894 = vmatprep.mubr.bf16.mxu0 %v9962_v60 }
 0x88d   :  { %8518 = vmatmul.mubr.msk.bf16.gmra.mxu0 %vm109_vm0, %v14578_v3 }
 0x88e   :  { %5904 = vmatprep.mubr.bf16.mxu0 %v9962_v60 }
 0x895   :  { %8519 = vmatmul.mubr.msk.bf16.gmra.mxu0 %vm109_vm0, %v14580_v40 }
 0x896   :  { %5914 = vmatprep.mubr.bf16.mxu0 %v9962_v60 }
 0x89d   :  { %8520 = vmatmul.mubr.msk.bf16.gmra.mxu0 %vm109_vm0, %v14583_v48 }
 0x89e   :  { %5924 = vmatprep.mubr.bf16.mxu0 %v9962_v60 }
 0x8a5   :  { %8521 = vmatmul.mubr.msk.bf16.gmra.mxu0 %vm109_vm0, %v14585_v61 }
 0x8a6   :  { %5934 = vmatprep.mubr.bf16.mxu0 %v9962_v60 }
 0x8ab   :  { %v9347_v9 = vpop.f32.mrf.mxu0 }
 0x8ac   :  { %v14677_v3 = vadd.f32 %v9347_v9, %v14671_v63 }
 0x8ad   :  { %v4304_v15 = vpop.f32.mrf.mxu0  ;;  %8522 = vmatmul.mubr.msk.bf16.gmra.mxu0 %vm109_vm0, %v14587_v27 }
 0x8ae   :  { %v14674_v45 = vadd.f32 %v4304_v15, %v14671_v63  ;;  %5944 = vmatprep.mubr.bf16.mxu0 %v9962_v60  ;;  %v4438_v58 = vsel %vm4431_vm3, %v14677_v3, -inf }
 0x8af   :  { %v9348_v51 = vpop.f32.mrf.mxu0 }
 0x8b0   :  { %v4432_v40 = vsel %vm4431_vm3, %v14674_v45, -inf  ;;  %v14688_v43 = vadd.f32 %v9348_v51, %v14671_v63 }
 0x8b1   :  { %v4307_v48 = vpop.f32.mrf.mxu0  ;;  %4433 = vmax.xlane.f32.xlu0 %v4432_v40 }
 0x8b2   :  { %v14682_v61 = vadd.f32 %v4307_v48, %v14671_v63  ;;  %v4441_v17 = vsel %vm4431_vm3, %v14688_v43, -inf }
 0x8b3   :  { %v9351_v32 = vpop.f32.mrf.mxu0 }
 0x8b4   :  { %v4435_v62 = vsel %vm4431_vm3, %v14682_v61, -inf  ;;  %v14698_v27 = vadd.f32 %v9351_v32, %v14671_v63 }
 0x8b5   :  { %v4320_v23 = vpop.f32.mrf.mxu0  ;;  %4436 = vmax.xlane.f32.xlu1 %v4435_v62  ;;  %4439 = vmax.xlane.f32.xlu0 %v4438_v58 }
 0x8b6   :  { %v14695_v50 = vadd.f32 %v4320_v23, %v14671_v63  ;;  %8523 = vmatmul.mubr.msk.bf16.gmra.mxu0 %vm109_vm0, %v14589_v35  ;;  %v4450_v22 = vsel %vm4431_vm3, %v14698_v27, -inf }
 0x8b7   :  { %v9352_v36 = vpop.f32.mrf.mxu0 }
 0x8b8   :  { %v4444_v60 = vsel %vm4431_vm3, %v14695_v50, -inf  ;;  %v14710_v39 = vadd.f32 %v9352_v36, %v14671_v63 }
 0x8b9   :  { %v4323_v57 = vpop.f32.mrf.mxu0  ;;  %4445 = vmax.xlane.f32.xlu1 %v4444_v60  ;;  %4442 = vmax.xlane.f32.xlu0 %v4441_v17 }
 0x8ba   :  { %v14705_v46 = vadd.f32 %v4323_v57, %v14671_v63  ;;  %v4453_v54 = vsel %vm4431_vm3, %v14710_v39, -inf }
 0x8bb   :  { %v9355_v53 = vpop.f32.mrf.mxu0 }
 0x8bc   :  { %v4447_v21 = vsel %vm4431_vm3, %v14705_v46, -inf  ;;  %v14720_v12 = vadd.f32 %v9355_v53, %v14671_v63 }
 0x8bd   :  { %v4336_v37 = vpop.f32.mrf.mxu0  ;;  %4451 = vmax.xlane.f32.xlu1 %v4450_v22  ;;  %4448 = vmax.xlane.f32.xlu0 %v4447_v21 }
 0x8be   :  { %v14717_v55 = vadd.f32 %v4336_v37, %v14671_v63  ;;  %v4462_v8 = vsel %vm4431_vm3, %v14720_v12, -inf }
 0x8bf   :  { %v9356_v26 = vpop.f32.mrf.mxu0 }
 0x8c0   :  { %v4456_v35 = vsel %vm4431_vm3, %v14717_v55, -inf  ;;  %v14730_v42 = vadd.f32 %v9356_v26, %v14671_v63 }
 0x8c1   :  { %v4339_v38 = vpop.f32.mrf.mxu0  ;;  %4457 = vmax.xlane.f32.xlu1 %v4456_v35  ;;  %4454 = vmax.xlane.f32.xlu0 %v4453_v54 }
 0x8c2   :  { %v14727_v33 = vadd.f32 %v4339_v38, %v14671_v63  ;;  %v4465_v34 = vsel %vm4431_vm3, %v14730_v42, -inf }
 0x8c3   :  { %v9359_v4 = vpop.f32.mrf.mxu0 }
 0x8c4   :  { %v4459_v10 = vsel %vm4431_vm3, %v14727_v33, -inf  ;;  %v14740_v30 = vadd.f32 %v9359_v4, %v14671_v63 }
 0x8c5   :  { %v4352_v11 = vpop.f32.mrf.mxu0  ;;  %4463 = vmax.xlane.f32.xlu1 %v4462_v8  ;;  %4460 = vmax.xlane.f32.xlu0 %v4459_v10 }
 0x8c6   :  { %v14737_v25 = vadd.f32 %v4352_v11, %v14671_v63  ;;  %v4474_v44 = vsel %vm4431_vm3, %v14740_v30, -inf }
 0x8c7   :  { %v9360_v0 = vpop.f32.mrf.mxu0 }
 0x8c8   :  { %v4468_v18 = vsel %vm4431_vm3, %v14737_v25, -inf  ;;  %v14750_v47 = vadd.f32 %v9360_v0, %v14671_v63 }
 0x8c9   :  { %v4355_v13 = vpop.f32.mrf.mxu0  ;;  %4469 = vmax.xlane.f32.xlu1 %v4468_v18  ;;  %4466 = vmax.xlane.f32.xlu0 %v4465_v34 }
 0x8ca   :  { %v14747_v16 = vadd.f32 %v4355_v13, %v14671_v63  ;;  %v4477_v2 = vsel %vm4431_vm3, %v14750_v47, -inf }
 0x8cb   :  { %v9363_v29 = vpop.f32.mrf.mxu0 }
 0x8cc   :  { %v4471_v28 = vsel %vm4431_vm3, %v14747_v16, -inf  ;;  %v14760_v41 = vadd.f32 %v9363_v29, %v14671_v63 }
 0x8cd   :  { %v4368_v7 = vpop.f32.mrf.mxu0  ;;  %4475 = vmax.xlane.f32.xlu1 %v4474_v44  ;;  %4472 = vmax.xlane.f32.xlu0 %v4471_v28 }
 0x8ce   :  { %v14757_v49 = vadd.f32 %v4368_v7, %v14671_v63  ;;  %v4486_v20 = vsel %vm4431_vm3, %v14760_v41, -inf }
 0x8cf   :  { %v9364_v6 = vpop.f32.mrf.mxu0 }
 0x8d0   :  { %v4480_v31 = vsel %vm4431_vm3, %v14757_v49, -inf  ;;  %v14770_v14 = vadd.f32 %v9364_v6, %v14671_v63  ;;  %v9583_v6 = vld [vmem:[%s16902_s13 + $0x78] sm:$0xff]  }
 0x8d1   :  { %v4371_v52 = vpop.f32.mrf.mxu0  ;;  %4481 = vmax.xlane.f32.xlu1 %v4480_v31  ;;  %4478 = vmax.xlane.f32.xlu0 %v4477_v2  ;;  %v9585_v31 = vld [vmem:[%s16902_s13 + $0x70] sm:$0xff]  }
 0x8d2   :  { %v14767_v1 = vadd.f32 %v4371_v52, %v14671_v63  ;;  %v4489_v51 = vsel %vm4431_vm3, %v14770_v14, -inf  ;;  %8846 = vmatprep.subr.bf16.mxu1 %v9583_v6  ;;  %v9586_v2 = vld [vmem:[%s16902_s13 + $0x30] sm:$0xff]  }
 0x8d3   :  { %v9367_v19 = vpop.f32.mrf.mxu0 }
 0x8d4   :  { %v4483_v59 = vsel %vm4431_vm3, %v14767_v1, -inf  ;;  %v14780_v9 = vadd.f32 %v9367_v19, %v14671_v63 }
 0x8d5   :  { %v4384_v56 = vpop.f32.mrf.mxu0  ;;  %4487 = vmax.xlane.f32.xlu1 %v4486_v20  ;;  %4484 = vmax.xlane.f32.xlu0 %v4483_v59 }
 0x8d6   :  { %v14777_v5 = vadd.f32 %v4384_v56, %v14671_v63  ;;  %v4498_v58 = vsel %vm4431_vm3, %v14780_v9, -inf }
 0x8d7   :  { %v9368_v24 = vpop.f32.mrf.mxu0 }
 0x8d8   :  { %v4492_v15 = vsel %vm4431_vm3, %v14777_v5, -inf  ;;  %v14790_v62 = vadd.f32 %v9368_v24, %v14671_v63 }
 0x8d9   :  { %v4387_v40 = vpop.f32.mrf.mxu0  ;;  %4493 = vmax.xlane.f32.xlu1 %v4492_v15  ;;  %4490 = vmax.xlane.f32.xlu0 %v4489_v51 }
 0x8da   :  { %v14787_v48 = vadd.f32 %v4387_v40, %v14671_v63  ;;  %v4501_v22 = vsel %vm4431_vm3, %v14790_v62, -inf  ;;  %v17019_v40 = vlaneseq }
 0x8db   :  { %v9371_v32 = vpop.f32.mrf.mxu0 }
 0x8dc   :  { %v4495_v23 = vsel %vm4431_vm3, %v14787_v48, -inf  ;;  %v14800_v57 = vadd.f32 %v9371_v32, %v14671_v63 }
 0x8dd   :  { %v4400_v36 = vpop.f32.mrf.mxu0  ;;  %4499 = vmax.xlane.f32.xlu1 %v4498_v58  ;;  %4496 = vmax.xlane.f32.xlu0 %v4495_v23  ;;  %v14851_v23 = vshrl.u32 %v17019_v40, 7 }
 0x8de   :  { %v14797_v60 = vadd.f32 %v4400_v36, %v14671_v63  ;;  %v4510_v54 = vsel %vm4431_vm3, %v14800_v57, -inf }
 0x8df   :  { %v9372_v17 = vpop.f32.mrf.mxu0  ;;  %17374 = vst [vmem:[#allocation59_spill] sm:$0xff] %v14851_v23 }
 0x8e0   :  { %v4504_v53 = vsel %vm4431_vm3, %v14797_v60, -inf  ;;  %v14810_v35 = vadd.f32 %v9372_v17, %v14671_v63 }
 0x8e1   :  { %v4403_v21 = vpop.f32.mrf.mxu0  ;;  %4505 = vmax.xlane.f32.xlu1 %v4504_v53  ;;  %4502 = vmax.xlane.f32.xlu0 %v4501_v22  ;;  %v14854_v53 = vsub.s32 0, %v14851_v23 }
 0x8e2   :  { %v14807_v37 = vadd.f32 %v4403_v21, %v14671_v63  ;;  %17369 = vst [vmem:[#allocation56_spill] sm:$0xff] %v14810_v35  ;;  %v4513_v18 = vsel %vm4431_vm3, %v14810_v35, -inf  ;;  %v8505_v21 = vld [vmem:[%s16903_s14 + $0x32] ss:$8 sm:$0x3] }
 0x8e3   :  { %v9375_v26 = vpop.f32.mrf.mxu0  ;;  %17375 = vst [vmem:[#allocation62_spill] sm:$0xff] %v14854_v53 }
 0x8e4   :  { %v4507_v38 = vsel %vm4431_vm3, %v14807_v37, -inf  ;;  %v14820_v11 = vadd.f32 %v9375_v26, %v14671_v63  ;;  %v14860_v26 = vsub.s32 1, %v14851_v23 }
 0x8e5   :  { %v4416_v4 = vpop.f32.mrf.mxu0  ;;  %4511 = vmax.xlane.f32.xlu1 %v4510_v54  ;;  %4508 = vmax.xlane.f32.xlu0 %v4507_v38  ;;  %v14863_v38 = vrot.slane %v8505_v21, %v14854_v53 }
 0x8e6   :  { %v14817_v8 = vadd.f32 %v4416_v4, %v14671_v63  ;;  %17371 = vst [vmem:[#allocation58_spill] sm:$0xff] %v14820_v11  ;;  %v4522_v44 = vsel %vm4431_vm3, %v14820_v11, -inf  ;;  %17376 = vst [vmem:[#allocation61_spill] sm:$0xff] %v14860_v26 }
 0x8e7   :  { %v9376_v10 = vpop.f32.mrf.mxu0 }
 0x8e8   :  { %17370 = vst [vmem:[#allocation55_spill] sm:$0xff] %v14817_v8  ;;  %v4516_v0 = vsel %vm4431_vm3, %v14817_v8, -inf  ;;  %v14830_v29 = vadd.f32 %v9376_v10, %v14671_v63  ;;  %v14866_v10 = vrot.slane %v8505_v21, %v14860_v26 }
 0x8e9   :  { %v4419_v34 = vpop.f32.mrf.mxu0  ;;  %4517 = vmax.xlane.f32.xlu1 %v4516_v0  ;;  %4514 = vmax.xlane.f32.xlu0 %v4513_v18 }
 0x8ea   :  { %v14827_v13 = vadd.f32 %v4419_v34, %v14671_v63  ;;  %17373 = vst [vmem:[#allocation57_spill] sm:$0xff] %v14830_v29  ;;  %v4525_v7 = vsel %vm4431_vm3, %v14830_v29, -inf  ;;  %v9584_v63 = vld [vmem:[%s16902_s13 + $0x38] sm:$0xff]  }
 0x8eb   :  { %8847 = vmatpush3.bf16.msra.mxu1 %v9584_v63 }
 0x8ec   :  { %17372 = vst [vmem:[#allocation60_spill] sm:$0xff] %v14827_v13  ;;  %v4519_v28 = vsel %vm4431_vm3, %v14827_v13, -inf  ;;  %8848 = vmatprep.subr.bf16.mxu1 %v9585_v31 }
 0x8ed   :  { %4523 = vmax.xlane.f32.xlu1 %v4522_v44  ;;  %4520 = vmax.xlane.f32.xlu0 %v4519_v28 }
 0x8ef   :  { %8849 = vmatpush3.bf16.msra.mxu1 %v9586_v2 }
 0x8f1   :  { %4526 = vmax.xlane.f32.xlu0 %v4525_v7 }
 0x8fd   :  { %v5796_v52 = vpop.f32.mrf.mxu0 }
 0x8fe   :  { %v14875_v44 = vadd.f32 %v5796_v52, %v14863_v38 }
 0x8ff   :  { %v5798_v19 = vpop.f32.mrf.mxu0 }
 0x900   :  { %17379 = vst [vmem:[#allocation54_spill] sm:$0xff] %v14875_v44  ;;  %v14881_v6 = vadd.f32 %v5798_v19, %v14866_v10  ;;  %v6031_v19 = vmul.f32 %v14875_v44, %v14875_v44 }
 0x901   :  { %v5800_v20 = vpop.f32.mrf.mxu0 }
 0x902   :  { %v14869_v0 = vadd.f32 %v5800_v20, %v14863_v38  ;;  %17380 = vst [vmem:[#allocation53_spill] sm:$0xff] %v14881_v6 }
 0x903   :  { %v5802_v59 = vpop.f32.mrf.mxu0 }
 0x904   :  { %17377 = vst [vmem:[#allocation49_spill] sm:$0xff] %v14869_v0  ;;  %v14872_v34 = vadd.f32 %v5802_v59, %v14866_v10  ;;  %v6033_v31 = vmul.f32 %v14869_v0, %v14869_v0  ;;  %v5955_v40 = vadd.f32 %v14869_v0, %v14875_v44 }
 0x905   :  { %v5806_v56 = vpop.f32.mrf.mxu0 }
 0x906   :  { %17378 = vst [vmem:[#allocation51_spill] sm:$0xff] %v14872_v34  ;;  %v14878_v28 = vadd.f32 %v5806_v56, %v14863_v38  ;;  %v6034_v52 = vmul.f32 %v14872_v34, %v14872_v34  ;;  %v6095_v53 = vadd.f32 %v6033_v31, %v6031_v19  ;;  %v5992_v29 = vadd.f32 %v14872_v34, %v14881_v6 }
 0x907   :  { %v5808_v24 = vpop.f32.mrf.mxu0 }
 0x908   :  { %v14884_v63 = vadd.f32 %v5808_v24, %v14866_v10  ;;  %v6035_v56 = vmul.f32 %v14878_v28, %v14878_v28  ;;  %v5956_v0 = vadd.f32 %v5955_v40, %v14878_v28 }
 0x909   :  { %v5810_v15 = vpop.f32.mrf.mxu0 }
 0x90a   :  { %17381 = vst [vmem:[#allocation38_spill] sm:$0xff] %v14884_v63  ;;  %v14889_v2 = vadd.f32 %v5810_v15, %v14863_v38  ;;  %v6032_v15 = vmul.f32 %v14881_v6, %v14881_v6  ;;  %v6096_v31 = vadd.f32 %v6095_v53, %v6035_v56  ;;  %v5993_v19 = vadd.f32 %v5992_v29, %v14884_v63 }
 0x90b   :  { %v5812_v51 = vpop.f32.mrf.mxu0 }
 0x90c   :  { %v14894_v59 = vadd.f32 %v5812_v51, %v14866_v10  ;;  %v6036_v51 = vmul.f32 %v14884_v63, %v14884_v63  ;;  %v6132_v35 = vadd.f32 %v6034_v52, %v6032_v15  ;;  %v5957_v52 = vadd.f32 %v5956_v0, %v14889_v2 }
 0x90d   :  { %v5816_v32 = vpop.f32.mrf.mxu0 }
 0x90e   :  { %17382 = vst [vmem:[#allocation40_spill] sm:$0xff] %v14894_v59  ;;  %v14901_v24 = vadd.f32 %v5816_v32, %v14863_v38  ;;  %v6037_v32 = vmul.f32 %v14889_v2, %v14889_v2  ;;  %v6038_v44 = vmul.f32 %v14894_v59, %v14894_v59  ;;  %v6133_v8 = vadd.f32 %v6132_v35, %v6036_v51 }
 0x90f   :  { %v5818_v58 = vpop.f32.mrf.mxu0  ;;  %v5994_v53 = vadd.f32 %v5993_v19, %v14894_v59 }
 0x910   :  { %v14910_v26 = vadd.f32 %v5818_v58, %v14866_v10  ;;  %v6039_v34 = vmul.f32 %v14901_v24, %v14901_v24  ;;  %v6134_v63 = vadd.f32 %v6133_v8, %v6038_v44  ;;  %v5958_v35 = vadd.f32 %v5957_v52, %v14901_v24  ;;  %v9587_v8 = vld [vmem:[%s16902_s13 + $0x68] sm:$0xff]  }
 0x911   :  { %v5820_v36 = vpop.f32.mrf.mxu0  ;;  %8850 = vmatprep.subr.bf16.mxu1 %v9587_v8 }
 0x912   :  { %17383 = vst [vmem:[#allocation37_spill] sm:$0xff] %v14910_v26  ;;  %v14917_v13 = vadd.f32 %v5820_v36, %v14863_v38  ;;  %v6040_v40 = vmul.f32 %v14910_v26, %v14910_v26 }
 0x913   :  { %v5822_v17 = vpop.f32.mrf.mxu0 }
 0x914   :  { %17384 = vst [vmem:[#allocation39_spill] sm:$0xff] %v14917_v13  ;;  %v14923_v58 = vadd.f32 %v5822_v17, %v14866_v10  ;;  %v6097_v17 = vadd.f32 %v6096_v31, %v6037_v32  ;;  %v6041_v29 = vmul.f32 %v14917_v13, %v14917_v13  ;;  %v5995_v32 = vadd.f32 %v5994_v53, %v14910_v26 }
 0x915   :  { %v5826_v22 = vpop.f32.mrf.mxu0  ;;  %v6135_v44 = vadd.f32 %v6134_v63, %v6040_v40  ;;  %v5959_v52 = vadd.f32 %v5958_v35, %v14917_v13 }
 0x916   :  { %17385 = vst [vmem:[#allocation42_spill] sm:$0xff] %v14923_v58  ;;  %v14929_v6 = vadd.f32 %v5826_v22, %v14863_v38  ;;  %v6042_v0 = vmul.f32 %v14923_v58, %v14923_v58  ;;  %v5996_v53 = vadd.f32 %v5995_v32, %v14923_v58 }
 0x917   :  { %v5828_v54 = vpop.f32.mrf.mxu0 }
 0x918   :  { %v14935_v15 = vadd.f32 %v5828_v54, %v14866_v10  ;;  %v6098_v54 = vadd.f32 %v6097_v17, %v6039_v34  ;;  %v6043_v31 = vmul.f32 %v14929_v6, %v14929_v6  ;;  %v9588_v17 = vld [vmem:[%s16902_s13 + $0x28] sm:$0xff]   ;;  %v6136_v35 = vadd.f32 %v6135_v44, %v6042_v0  ;;  %v9589_v0 = vld [vmem:[%s16902_s13 + $0x60] sm:$0xff]  }
 0x919   :  { %v5830_v4 = vpop.f32.mrf.mxu0  ;;  %v5960_v59 = vadd.f32 %v5959_v52, %v14929_v6  ;;  %8851 = vmatpush3.bf16.msra.mxu1 %v9588_v17  ;;  %v9590_v17 = vld [vmem:[%s16902_s13 + $0x20] sm:$0xff]  }
 0x91a   :  { %17386 = vst [vmem:[#allocation44_spill] sm:$0xff] %v14935_v15  ;;  %v14941_v56 = vadd.f32 %v5830_v4, %v14863_v38  ;;  %8852 = vmatprep.subr.bf16.mxu1 %v9589_v0 }
 0x91b   :  { %v5832_v18 = vpop.f32.mrf.mxu0 }
 0x91c   :  { %v14947_v51 = vadd.f32 %v5832_v18, %v14866_v10  ;;  %v6044_v18 = vmul.f32 %v14935_v15, %v14935_v15  ;;  %v6045_v26 = vmul.f32 %v14941_v56, %v14941_v56  ;;  %v5961_v52 = vadd.f32 %v5960_v59, %v14941_v56 }
 0x91d   :  { %v5836_v7 = vpop.f32.mrf.mxu0  ;;  %8853 = vmatpush3.bf16.msra.mxu1 %v9590_v17  ;;  %v9592_v17 = vld [vmem:[%s16902_s13 + $0x18] sm:$0xff]  }
 0x91e   :  { %17387 = vst [vmem:[#allocation41_spill] sm:$0xff] %v14947_v51  ;;  %v14953_v19 = vadd.f32 %v5836_v7, %v14863_v38  ;;  %v6099_v7 = vadd.f32 %v6098_v54, %v6041_v29  ;;  %v5997_v54 = vadd.f32 %v5996_v53, %v14935_v15  ;;  %v6137_v44 = vadd.f32 %v6136_v35, %v6044_v18 }
 0x91f   :  { %v5838_v20 = vpop.f32.mrf.mxu0 }
 0x920   :  { %v14962_v34 = vadd.f32 %v5838_v20, %v14866_v10  ;;  %v6046_v20 = vmul.f32 %v14947_v51, %v14947_v51  ;;  %v6100_v29 = vadd.f32 %v6099_v7, %v6043_v31  ;;  %v6047_v32 = vmul.f32 %v14953_v19, %v14953_v19 }
 0x921   :  { %v5840_v21 = vpop.f32.mrf.mxu0  ;;  %v5998_v7 = vadd.f32 %v5997_v54, %v14947_v51  ;;  %v5962_v15 = vadd.f32 %v5961_v52, %v14953_v19 }
 0x922   :  { %17388 = vst [vmem:[#allocation43_spill] sm:$0xff] %v14962_v34  ;;  %v14971_v63 = vadd.f32 %v5840_v21, %v14863_v38  ;;  %v6138_v35 = vadd.f32 %v6137_v44, %v6046_v20  ;;  %v9591_v20 = vld [vmem:[%s16902_s13 + $0x58] sm:$0xff]  }
 0x923   :  { %v5842_v11 = vpop.f32.mrf.mxu0  ;;  %8854 = vmatprep.subr.bf16.mxu1 %v9591_v20 }
 0x924   :  { %v14977_v13 = vadd.f32 %v5842_v11, %v14866_v10  ;;  %v6048_v11 = vmul.f32 %v14962_v34, %v14962_v34  ;;  %v6049_v53 = vmul.f32 %v14971_v63, %v14971_v63  ;;  %v5963_v52 = vadd.f32 %v5962_v15, %v14971_v63  ;;  %8855 = vmatpush3.bf16.msra.mxu1 %v9592_v17  ;;  %v9594_v17 = vld [vmem:[%s16902_s13 + $0x10] sm:$0xff]  }
 0x925   :  { %v5846_v36 = vpop.f32.mrf.mxu0 }
 0x926   :  { %17389 = vst [vmem:[#allocation46_spill] sm:$0xff] %v14977_v13  ;;  %v14983_v21 = vadd.f32 %v5846_v36, %v14863_v38  ;;  %v6101_v36 = vadd.f32 %v6100_v29, %v6045_v26  ;;  %v5999_v29 = vadd.f32 %v5998_v7, %v14962_v34  ;;  %v6139_v44 = vadd.f32 %v6138_v35, %v6048_v11 }
 0x927   :  { %v5848_v22 = vpop.f32.mrf.mxu0 }
 0x928   :  { %17390 = vst [vmem:[#allocation48_spill] sm:$0xff] %v14983_v21  ;;  %v14992_v31 = vadd.f32 %v5848_v22, %v14866_v10  ;;  %v6050_v22 = vmul.f32 %v14977_v13, %v14977_v13  ;;  %v6102_v26 = vadd.f32 %v6101_v36, %v6047_v32  ;;  %v6051_v54 = vmul.f32 %v14983_v21, %v14983_v21 }
 0x929   :  { %v5850_v4 = vpop.f32.mrf.mxu0  ;;  %v6000_v36 = vadd.f32 %v5999_v29, %v14977_v13  ;;  %v5964_v34 = vadd.f32 %v5963_v52, %v14983_v21 }
 0x92a   :  { %17391 = vst [vmem:[#allocation45_spill] sm:$0xff] %v14992_v31  ;;  %v15001_v18 = vadd.f32 %v5850_v4, %v14863_v38  ;;  %v6140_v35 = vadd.f32 %v6139_v44, %v6050_v22  ;;  %v9593_v22 = vld [vmem:[%s16902_s13 + $0x50] sm:$0xff]  }
 0x92b   :  { %v5852_v40 = vpop.f32.mrf.mxu0  ;;  %v6001_v29 = vadd.f32 %v6000_v36, %v14992_v31  ;;  %8856 = vmatprep.subr.bf16.mxu1 %v9593_v22 }
 0x92c   :  { %17392 = vst [vmem:[#allocation47_spill] sm:$0xff] %v15001_v18  ;;  %v15007_v58 = vadd.f32 %v5852_v40, %v14866_v10  ;;  %v6052_v40 = vmul.f32 %v14992_v31, %v14992_v31  ;;  %v6053_v7 = vmul.f32 %v15001_v18, %v15001_v18  ;;  %v5965_v52 = vadd.f32 %v5964_v34, %v15001_v18 }
 0x92d   :  { %v5856_v8 = vpop.f32.mrf.mxu0  ;;  %8857 = vmatpush3.bf16.msra.mxu1 %v9594_v17 }
 0x92e   :  { %17393 = vst [vmem:[#allocation50_spill] sm:$0xff] %v15007_v58  ;;  %v15013_v4 = vadd.f32 %v5856_v8, %v14863_v38  ;;  %v6103_v8 = vadd.f32 %v6102_v26, %v6049_v53  ;;  %v6141_v44 = vadd.f32 %v6140_v35, %v6052_v40 }
 0x92f   :  { %v5858_v59 = vpop.f32.mrf.mxu0 }
 0x930   :  { %v15022_v32 = vadd.f32 %v5858_v59, %v14866_v10  ;;  %v6054_v59 = vmul.f32 %v15007_v58, %v15007_v58  ;;  %v6104_v26 = vadd.f32 %v6103_v8, %v6051_v54  ;;  %v5966_v35 = vadd.f32 %v5965_v52, %v15013_v4 }
 0x931   :  { %v5860_v0 = vpop.f32.mrf.mxu0 }
 0x932   :  { %17394 = vst [vmem:[#allocation52_spill] sm:$0xff] %v15022_v32  ;;  %v15031_v11 = vadd.f32 %v5860_v0, %v14863_v38  ;;  %v6055_v0 = vmul.f32 %v15013_v4, %v15013_v4  ;;  %v6105_v8 = vadd.f32 %v6104_v26, %v6053_v7  ;;  %v6142_v34 = vadd.f32 %v6141_v44, %v6054_v59  ;;  %v9595_v59 = vld [vmem:[%s16902_s13 + $0x48] sm:$0xff]  }
 0x933   :  { %v5862_v15 = vpop.f32.mrf.mxu0  ;;  %8858 = vmatprep.subr.bf16.mxu1 %v9595_v59 }
 0x934   :  { %17395 = vst [vmem:[#allocation63_spill] sm:$0xff] %v15031_v11  ;;  %v15037_v51 = vadd.f32 %v5862_v15, %v14866_v10  ;;  %v6056_v15 = vmul.f32 %v15022_v32, %v15022_v32  ;;  %v6057_v36 = vmul.f32 %v15031_v11, %v15031_v11  ;;  %v6106_v7 = vadd.f32 %v6105_v8, %v6055_v0  ;;  %v9596_v0 = vld [vmem:[%s16902_s13 + $0x8] sm:$0xff]  }
 0x935   :  { %v5866_v13 = vpop.f32.mrf.mxu0  ;;  %8859 = vmatpush3.bf16.msra.mxu1 %v9596_v0 }
 0x936   :  { %17396 = vst [vmem:[#allocation64_spill] sm:$0xff] %v15037_v51  ;;  %v15050_v54 = vadd.f32 %v5866_v13, %v14863_v38  ;;  %v6058_v13 = vmul.f32 %v15037_v51, %v15037_v51  ;;  %v6143_v44 = vadd.f32 %v6142_v34, %v6056_v15 }
 0x938   :  { %v6059_v52 = vmul.f32 %v15050_v54, %v15050_v54  ;;  %v6144_v15 = vadd.f32 %v6143_v44, %v6058_v13 }
 0x93a   :  { %v4434_v53 = vpop.xlane.xlu0 %4433 }
 0x93b   :  { %v4528_v20 = vsub.f32 %v14674_v45, %v4434_v53  ;;  %v6002_v45 = vadd.f32 %v6001_v29, %v15007_v58  ;;  %v5868_v53 = vpop.f32.mrf.mxu0 }
 0x93c   :  { %v15062_v31 = vadd.f32 %v5868_v53, %v14866_v10 }
 0x93d   :  { %v4560_v40 = vmul.f32 1.442695, %v4528_v20  ;;  %v5870_v26 = vpop.f32.mrf.mxu0  ;;  %v6003_v22 = vadd.f32 %v6002_v45, %v15022_v32 }
 0x93e   :  { %17397 = vst [vmem:[#allocation65_spill] sm:$0xff] %v15062_v31  ;;  %v4437_v18 = vpop.xlane.xlu1 %4436  ;;  %v4440_v21 = vpop.xlane.xlu0 %4439  ;;  %v15073_v53 = vadd.f32 %v5870_v26, %v14863_v38  ;;  %v6060_v45 = vmul.f32 %v15062_v31, %v15062_v31 }
 0x93f   :  { %9679 = vpow2.f32 %v4560_v40  ;;  %v4529_v29 = vsub.f32 %v14682_v61, %v4437_v18  ;;  %v4530_v20 = vsub.f32 %v14677_v3, %v4440_v21  ;;  %v5967_v61 = vadd.f32 %v5966_v35, %v15031_v11  ;;  %v5872_v21 = vpop.f32.mrf.mxu0  ;;  %v9598_v35 = vld [vmem:[%s16902_s13] sm:$0xff]  }
 0x940   :  { %v6107_v3 = vadd.f32 %v6106_v7, %v6057_v36  ;;  %v6004_v8 = vadd.f32 %v6003_v22, %v15037_v51  ;;  %v15083_v40 = vadd.f32 %v5872_v21, %v14866_v10  ;;  %v9597_v36 = vld [vmem:[%s16902_s13 + $0x40] sm:$0xff]   ;;  %v6061_v13 = vmul.f32 %v15073_v53, %v15073_v53 }
 0x941   :  { %v4562_v18 = vmul.f32 1.442695, %v4529_v29  ;;  %v4564_v17 = vmul.f32 1.442695, %v4530_v20  ;;  %v5876_v7 = vpop.f32.mrf.mxu0  ;;  %v5968_v59 = vadd.f32 %v5967_v61, %v15050_v54  ;;  %8860 = vmatprep.subr.bf16.mxu1 %v9597_v36  ;;  %v6145_v58 = vadd.f32 %v6144_v15, %v6060_v45 }
 0x942   :  { %17398 = vst [vmem:[#allocation66_spill] sm:$0xff] %v15083_v40  ;;  %v4446_v34 = vpop.xlane.xlu1 %4445  ;;  %v4443_v26 = vpop.xlane.xlu0 %4442  ;;  %v6108_v22 = vadd.f32 %v6107_v3, %v6059_v52  ;;  %v6005_v44 = vadd.f32 %v6004_v8, %v15062_v31  ;;  %v15098_v0 = vadd.f32 %v5876_v7, %v14863_v38  ;;  %v6062_v21 = vmul.f32 %v15083_v40, %v15083_v40 }
 0x943   :  { %9681 = vpow2.f32 %v4562_v18  ;;  %v4532_v29 = vsub.f32 %v14695_v50, %v4446_v34  ;;  %v4531_v20 = vsub.f32 %v14688_v43, %v4443_v26  ;;  %v5878_v51 = vpop.f32.mrf.mxu0  ;;  %v5969_v50 = vadd.f32 %v5968_v59, %v15073_v53  ;;  %8861 = vmatpush3.bf16.msra.mxu1 %v9598_v35 }
 0x944   :  { %9683 = vpow2.f32 %v4564_v17  ;;  %v15104_v43 = vadd.f32 %v5878_v51, %v14866_v10  ;;  %v17399_v3 = vlaneseq  ;;  %v6109_v34 = vadd.f32 %v6108_v22, %v6061_v13 }
 0x945   :  { %v4568_v32 = vmul.f32 1.442695, %v4532_v29  ;;  %v4566_v18 = vmul.f32 1.442695, %v4531_v20  ;;  %v5880_v26 = vpop.f32.mrf.mxu0  ;;  %v6006_v15 = vadd.f32 %v6005_v44, %v15083_v40  ;;  %v6063_v45 = vmul.f32 %v15098_v0, %v15098_v0 }
 0x946   :  { %v4452_v52 = vpop.xlane.xlu1 %4451  ;;  %v4449_v61 = vpop.xlane.xlu0 %4448  ;;  %v15107_v8 = vand.u32 127, %v17399_v3  ;;  %v15115_v51 = vadd.f32 %v5880_v26, %v14863_v38  ;;  %v6146_v29 = vadd.f32 %v6145_v58, %v6062_v21  ;;  %v15125_v44 = vadd.s32 1, %v14851_v23 }
 0x947   :  { %9685 = vpow2.f32 %v4568_v32  ;;  %v4534_v36 = vsub.f32 %v14698_v27, %v4452_v52  ;;  %v4533_v17 = vsub.f32 %v14705_v46, %v4449_v61  ;;  %v5882_v20 = vpop.f32.mrf.mxu0  ;;  %v5970_v32 = vadd.f32 %v5969_v50, %v15098_v0 }
 0x948   :  { %17400 = vst [vmem:[#allocation67_spill] sm:$0xff] %v15107_v8  ;;  %9687 = vpow2.f32 %v4566_v18  ;;  %v6064_v27 = vmul.f32 %v15104_v43, %v15104_v43  ;;  %v15122_v46 = vadd.f32 %v5882_v20, %v14866_v10  ;;  %v6065_v58 = vmul.f32 %v15115_v51, %v15115_v51 }
 0x949   :  { %v4572_v35 = vmul.f32 1.442695, %v4534_v36  ;;  %v4570_v13 = vmul.f32 1.442695, %v4533_v17  ;;  %v5886_v21 = vpop.f32.mrf.mxu0  ;;  %v6110_v61 = vadd.f32 %v6109_v34, %v6063_v45  ;;  %v6007_v3 = vadd.f32 %v6006_v15, %v15104_v43 }
 0x94a   :  { %v4458_v59 = vpop.xlane.xlu1 %4457  ;;  %v4455_v22 = vpop.xlane.xlu0 %4454  ;;  %v6066_v26 = vmul.f32 %v15122_v46, %v15122_v46  ;;  %v15137_v36 = vadd.f32 %v5886_v21, %v14863_v38 }
 0x94b   :  { %9689 = vpow2.f32 %v4572_v35  ;;  %v4536_v18 = vsub.f32 %v14717_v55, %v4458_v59  ;;  %v4535_v50 = vsub.f32 %v14710_v39, %v4455_v22  ;;  %v5888_v17 = vpop.f32.mrf.mxu0  ;;  %v6147_v35 = vadd.f32 %v6146_v29, %v6064_v27 }
 0x94c   :  { %v15131_v52 = vpop.eup %9679  ;;  %9691 = vpow2.f32 %v4570_v13  ;;  %v5971_v39 = vadd.f32 %v5970_v32, %v15115_v51  ;;  %v15143_v34 = vadd.f32 %v5888_v17, %v14866_v10  ;;  %v6111_v22 = vadd.f32 %v6110_v61, %v6065_v58 }
 0x94d   :  { %17401 = vst [vmem:[#allocation68_spill] sm:$0xff] %v15131_v52  ;;  %v4576_v20 = vmul.f32 1.442695, %v4536_v18  ;;  %v4574_v7 = vmul.f32 1.442695, %v4535_v50  ;;  %v4624_v55 = vsel %vm4431_vm3, %v15131_v52, 0.0  ;;  %v5890_v21 = vpop.f32.mrf.mxu0  ;;  %v6008_v29 = vadd.f32 %v6007_v3, %v15122_v46 }
 0x94e   :  { %17402 = vst [vmem:[#allocation69_spill] sm:$0xff] %v15143_v34  ;;  %v4464_v15 = vpop.xlane.xlu1 %4463  ;;  %4625 = vadd.xlane.f32.xlu1 %v4624_v55  ;;  %v4461_v45 = vpop.xlane.xlu0 %4460  ;;  %v6148_v32 = vadd.f32 %v6147_v35, %v6066_v26  ;;  %v6067_v27 = vmul.f32 %v15137_v36, %v15137_v36  ;;  %v15154_v17 = vadd.f32 %v5890_v21, %v14863_v38 }
 0x94f   :  { %9693 = vpow2.f32 %v4576_v20  ;;  %v4538_v13 = vsub.f32 %v14720_v12, %v4464_v15  ;;  %v4537_v18 = vsub.f32 %v14727_v33, %v4461_v45  ;;  %v5892_v55 = vpop.f32.mrf.mxu0  ;;  %v5972_v33 = vadd.f32 %v5971_v39, %v15137_v36 }
 0x950   :  { %v15148_v50 = vpop.eup %9681  ;;  %9695 = vpow2.f32 %v4574_v7  ;;  %v6068_v3 = vmul.f32 %v15143_v34, %v15143_v34  ;;  %v6069_v26 = vmul.f32 %v15154_v17, %v15154_v17  ;;  %v15166_v35 = vadd.f32 %v5892_v55, %v14866_v10 }
 0x951   :  { %17403 = vst [vmem:[#allocation70_spill] sm:$0xff] %v15148_v50  ;;  %v4580_v58 = vmul.f32 1.442695, %v4538_v13  ;;  %v4578_v61 = vmul.f32 1.442695, %v4537_v18  ;;  %v4627_v12 = vsel %vm4431_vm3, %v15148_v50, 0.0  ;;  %v15158_v20 = vpop.eup %9683  ;;  %v5896_v45 = vpop.f32.mrf.mxu0  ;;  %v6112_v59 = vadd.f32 %v6111_v22, %v6067_v27 }
 0x952   :  { %17404 = vst [vmem:[#allocation71_spill] sm:$0xff] %v15158_v20  ;;  %v4470_v15 = vpop.xlane.xlu1 %4469  ;;  %4628 = vadd.xlane.f32.xlu0 %v4627_v12  ;;  %v4467_v7 = vpop.xlane.xlu0 %4466  ;;  %v4630_v13 = vsel %vm4431_vm3, %v15158_v20, 0.0  ;;  %v6009_v50 = vadd.f32 %v6008_v29, %v15143_v34  ;;  %v6070_v55 = vmul.f32 %v15166_v35, %v15166_v35  ;;  %v15178_v12 = vadd.f32 %v5896_v45, %v14863_v38 }
 0x953   :  { %9697 = vpow2.f32 %v4580_v58  ;;  %v4540_v21 = vsub.f32 %v14737_v25, %v4470_v15  ;;  %v4539_v39 = vsub.f32 %v14730_v42, %v4467_v7  ;;  %4631 = vadd.xlane.f32.xlu1 %v4630_v13  ;;  %v5898_v58 = vpop.f32.mrf.mxu0  ;;  %v6149_v7 = vadd.f32 %v6148_v32, %v6068_v3 }
 0x954   :  { %v15172_v18 = vpop.eup %9685  ;;  %9699 = vpow2.f32 %v4578_v61  ;;  %v5973_v22 = vadd.f32 %v5972_v33, %v15154_v17  ;;  %v6113_v29 = vadd.f32 %v6112_v59, %v6069_v26  ;;  %v15186_v27 = vadd.f32 %v5898_v58, %v14866_v10 }
 0x955   :  { %17405 = vst [vmem:[#allocation72_spill] sm:$0xff] %v15172_v18  ;;  %v4584_v25 = vmul.f32 1.442695, %v4540_v21  ;;  %v4582_v15 = vmul.f32 1.442695, %v4539_v39  ;;  %v4636_v20 = vsel %vm4431_vm3, %v15172_v18, 0.0  ;;  %v15182_v42 = vpop.eup %9687  ;;  %v5900_v34 = vpop.f32.mrf.mxu0  ;;  %v6010_v32 = vadd.f32 %v6009_v50, %v15166_v35 }
 0x956   :  { %17406 = vst [vmem:[#allocation73_spill] sm:$0xff] %v15182_v42  ;;  %17407 = vst [vmem:[#allocation74_spill] sm:$0xff] %v15186_v27  ;;  %v4476_v52 = vpop.xlane.xlu1 %4475  ;;  %v4473_v45 = vpop.xlane.xlu0 %4472  ;;  %v4633_v21 = vsel %vm4431_vm3, %v15182_v42, 0.0  ;;  %v6150_v33 = vadd.f32 %v6149_v7, %v6070_v55  ;;  %v6071_v59 = vmul.f32 %v15178_v12, %v15178_v12  ;;  %v15198_v3 = vadd.f32 %v5900_v34, %v14863_v38 }
 0x957   :  { %9701 = vpow2.f32 %v4584_v25  ;;  %v4542_v61 = vsub.f32 %v14740_v30, %v4476_v52  ;;  %v4541_v13 = vsub.f32 %v14747_v16, %v4473_v45  ;;  %4637 = vadd.xlane.f32.xlu1 %v4636_v20  ;;  %v5902_v26 = vpop.f32.mrf.mxu0  ;;  %4634 = vadd.xlane.f32.xlu0 %v4633_v21  ;;  %v5974_v50 = vadd.f32 %v5973_v22, %v15178_v12 }
 0x958   :  { %v15192_v39 = vpop.eup %9689  ;;  %9703 = vpow2.f32 %v4582_v15  ;;  %v6072_v55 = vmul.f32 %v15186_v27, %v15186_v27  ;;  %v6073_v34 = vmul.f32 %v15198_v3, %v15198_v3  ;;  %v15210_v20 = vadd.f32 %v5902_v26, %v14866_v10 }
 0x959   :  { %17408 = vst [vmem:[#allocation75_spill] sm:$0xff] %v15192_v39  ;;  %v4588_v30 = vmul.f32 1.442695, %v4542_v61  ;;  %v4586_v52 = vmul.f32 1.442695, %v4541_v13  ;;  %v4642_v16 = vsel %vm4431_vm3, %v15192_v39, 0.0  ;;  %v15202_v58 = vpop.eup %9691  ;;  %v5906_v7 = vpop.f32.mrf.mxu0  ;;  %v6114_v13 = vadd.f32 %v6113_v29, %v6071_v59 }
 0x95a   :  { %17409 = vst [vmem:[#allocation76_spill] sm:$0xff] %v15202_v58  ;;  %17410 = vst [vmem:[#allocation77_spill] sm:$0xff] %v15210_v20  ;;  %v4482_v25 = vpop.xlane.xlu1 %4481  ;;  %v4479_v15 = vpop.xlane.xlu0 %4478  ;;  %v4639_v61 = vsel %vm4431_vm3, %v15202_v58, 0.0  ;;  %v6011_v39 = vadd.f32 %v6010_v32, %v15186_v27  ;;  %v6074_v26 = vmul.f32 %v15210_v20, %v15210_v20  ;;  %v15222_v42 = vadd.f32 %v5906_v7, %v14863_v38 }
 0x95b   :  { %9705 = vpow2.f32 %v4588_v30  ;;  %v4544_v45 = vsub.f32 %v14757_v49, %v4482_v25  ;;  %v4543_v22 = vsub.f32 %v14750_v47, %v4479_v15  ;;  %4643 = vadd.xlane.f32.xlu1 %v4642_v16  ;;  %v5908_v30 = vpop.f32.mrf.mxu0  ;;  %4640 = vadd.xlane.f32.xlu0 %v4639_v61  ;;  %v6151_v29 = vadd.f32 %v6150_v33, %v6072_v55 }
 0x95c   :  { %v15216_v21 = vpop.eup %9693  ;;  %9707 = vpow2.f32 %v4586_v52  ;;  %v5975_v32 = vadd.f32 %v5974_v50, %v15198_v3  ;;  %v6115_v59 = vadd.f32 %v6114_v13, %v6073_v34  ;;  %v15230_v58 = vadd.f32 %v5908_v30, %v14866_v10 }
 0x95d   :  { %17411 = vst [vmem:[#allocation78_spill] sm:$0xff] %v15216_v21  ;;  %v4592_v49 = vmul.f32 1.442695, %v4544_v45  ;;  %v4590_v25 = vmul.f32 1.442695, %v4543_v22  ;;  %v4648_v47 = vsel %vm4431_vm3, %v15216_v21, 0.0  ;;  %v15226_v15 = vpop.eup %9695  ;;  %v5910_v16 = vpop.f32.mrf.mxu0  ;;  %v6012_v33 = vadd.f32 %v6011_v39, %v15210_v20 }
 0x95e   :  { %17412 = vst [vmem:[#allocation79_spill] sm:$0xff] %v15226_v15  ;;  %17413 = vst [vmem:[#allocation80_spill] sm:$0xff] %v15230_v58  ;;  %v4488_v7 = vpop.xlane.xlu1 %4487  ;;  %v4485_v18 = vpop.xlane.xlu0 %4484  ;;  %v4645_v45 = vsel %vm4431_vm3, %v15226_v15, 0.0  ;;  %v6152_v50 = vadd.f32 %v6151_v29, %v6074_v26  ;;  %v6075_v55 = vmul.f32 %v15222_v42, %v15222_v42  ;;  %v15242_v34 = vadd.f32 %v5910_v16, %v14863_v38  ;;  %v17477_v40 = vld [vmem:[#allocation74_spill] sm:$0xff] }
 0x95f   :  { %9709 = vpow2.f32 %v4592_v49  ;;  %v4546_v52 = vsub.f32 %v14760_v41, %v4488_v7  ;;  %v4545_v61 = vsub.f32 %v14767_v1, %v4485_v18  ;;  %4649 = vadd.xlane.f32.xlu1 %v4648_v47  ;;  %v5912_v13 = vpop.f32.mrf.mxu0  ;;  %4646 = vadd.xlane.f32.xlu0 %v4645_v45  ;;  %v5976_v39 = vadd.f32 %v5975_v32, %v15222_v42 }
 0x960   :  { %v15236_v22 = vpop.eup %9697  ;;  %9711 = vpow2.f32 %v4590_v25  ;;  %v6076_v26 = vmul.f32 %v15230_v58, %v15230_v58  ;;  %v6077_v49 = vmul.f32 %v15242_v34, %v15242_v34  ;;  %v15254_v47 = vadd.f32 %v5912_v13, %v14866_v10 }
 0x961   :  { %17414 = vst [vmem:[#allocation81_spill] sm:$0xff] %v15236_v22  ;;  %v4596_v41 = vmul.f32 1.442695, %v4546_v52  ;;  %v4594_v30 = vmul.f32 1.442695, %v4545_v61  ;;  %v4654_v1 = vsel %vm4431_vm3, %v15236_v22, 0.0  ;;  %v15246_v18 = vpop.eup %9699  ;;  %v5916_v7 = vpop.f32.mrf.mxu0  ;;  %v6116_v61 = vadd.f32 %v6115_v59, %v6075_v55 }
 0x962   :  { %17415 = vst [vmem:[#allocation82_spill] sm:$0xff] %v15246_v18  ;;  %v4494_v25 = vpop.xlane.xlu1 %4493  ;;  %v4491_v29 = vpop.xlane.xlu0 %4490  ;;  %v4651_v52 = vsel %vm4431_vm3, %v15246_v18, 0.0  ;;  %v6013_v22 = vadd.f32 %v6012_v33, %v15230_v58  ;;  %v6078_v13 = vmul.f32 %v15254_v47, %v15254_v47  ;;  %v15266_v15 = vadd.f32 %v5916_v7, %v14863_v38 }
 0x963   :  { %9713 = vpow2.f32 %v4596_v41  ;;  %v4548_v16 = vsub.f32 %v14777_v5, %v4494_v25  ;;  %v4547_v32 = vsub.f32 %v14770_v14, %v4491_v29  ;;  %4655 = vadd.xlane.f32.xlu1 %v4654_v1  ;;  %v5918_v41 = vpop.f32.mrf.mxu0  ;;  %4652 = vadd.xlane.f32.xlu0 %v4651_v52  ;;  %v6153_v59 = vadd.f32 %v6152_v50, %v6076_v26 }
 0x964   :  { %v15260_v45 = vpop.eup %9701  ;;  %9715 = vpow2.f32 %v4594_v30  ;;  %v5977_v33 = vadd.f32 %v5976_v39, %v15242_v34  ;;  %v6117_v55 = vadd.f32 %v6116_v61, %v6077_v49  ;;  %v15274_v18 = vadd.f32 %v5918_v41, %v14866_v10 }
 0x965   :  { %17416 = vst [vmem:[#allocation83_spill] sm:$0xff] %v15260_v45  ;;  %v4600_v5 = vmul.f32 1.442695, %v4548_v16  ;;  %v4598_v25 = vmul.f32 1.442695, %v4547_v32  ;;  %v4660_v14 = vsel %vm4431_vm3, %v15260_v45, 0.0  ;;  %v15270_v29 = vpop.eup %9703  ;;  %v5920_v1 = vpop.f32.mrf.mxu0  ;;  %v6014_v50 = vadd.f32 %v6013_v22, %v15254_v47 }
 0x966   :  { %17417 = vst [vmem:[#allocation84_spill] sm:$0xff] %v15270_v29  ;;  %v4500_v7 = vpop.xlane.xlu1 %4499  ;;  %v4497_v21 = vpop.xlane.xlu0 %4496  ;;  %v4657_v16 = vsel %vm4431_vm3, %v15270_v29, 0.0  ;;  %v6154_v39 = vadd.f32 %v6153_v59, %v6078_v13  ;;  %v6079_v26 = vmul.f32 %v15266_v15, %v15266_v15  ;;  %v15286_v49 = vadd.f32 %v5920_v1, %v14863_v38 }
 0x967   :  { %9717 = vpow2.f32 %v4600_v5  ;;  %v4550_v30 = vsub.f32 %v14780_v9, %v4500_v7  ;;  %v4549_v52 = vsub.f32 %v14787_v48, %v4497_v21  ;;  %4661 = vadd.xlane.f32.xlu1 %v4660_v14  ;;  %v5922_v61 = vpop.f32.mrf.mxu0  ;;  %4658 = vadd.xlane.f32.xlu0 %v4657_v16  ;;  %v5978_v22 = vadd.f32 %v5977_v33, %v15266_v15 }
 0x968   :  { %v15280_v32 = vpop.eup %9705  ;;  %9719 = vpow2.f32 %v4598_v25  ;;  %v6080_v13 = vmul.f32 %v15274_v18, %v15274_v18  ;;  %v6081_v5 = vmul.f32 %v15286_v49, %v15286_v49  ;;  %v15298_v14 = vadd.f32 %v5922_v61, %v14866_v10 }
 0x969   :  { %17418 = vst [vmem:[#allocation85_spill] sm:$0xff] %v15280_v32  ;;  %v4604_v9 = vmul.f32 1.442695, %v4550_v30  ;;  %v4602_v41 = vmul.f32 1.442695, %v4549_v52  ;;  %v4666_v48 = vsel %vm4431_vm3, %v15280_v32, 0.0  ;;  %v15290_v21 = vpop.eup %9707  ;;  %v5926_v7 = vpop.f32.mrf.mxu0  ;;  %v6118_v52 = vadd.f32 %v6117_v55, %v6079_v26 }
 0x96a   :  { %17419 = vst [vmem:[#allocation86_spill] sm:$0xff] %v15290_v21  ;;  %v4506_v25 = vpop.xlane.xlu1 %4505  ;;  %v4503_v59 = vpop.xlane.xlu0 %4502  ;;  %v4663_v30 = vsel %vm4431_vm3, %v15290_v21, 0.0  ;;  %v6015_v32 = vadd.f32 %v6014_v50, %v15274_v18  ;;  %v6082_v61 = vmul.f32 %v15298_v14, %v15298_v14  ;;  %v15310_v29 = vadd.f32 %v5926_v7, %v14863_v38 }
 0x96b   :  { %9721 = vpow2.f32 %v4604_v9  ;;  %v4552_v1 = vsub.f32 %v14797_v60, %v4506_v25  ;;  %v4551_v33 = vsub.f32 %v14790_v62, %v4503_v59  ;;  %4667 = vadd.xlane.f32.xlu1 %v4666_v48  ;;  %v5928_v9 = vpop.f32.mrf.mxu0  ;;  %4664 = vadd.xlane.f32.xlu0 %v4663_v30  ;;  %v6155_v55 = vadd.f32 %v6154_v39, %v6080_v13 }
 0x96c   :  { %v15304_v16 = vpop.eup %9709  ;;  %9723 = vpow2.f32 %v4602_v41  ;;  %v5979_v50 = vadd.f32 %v5978_v22, %v15286_v49  ;;  %v6119_v26 = vadd.f32 %v6118_v52, %v6081_v5  ;;  %v15318_v21 = vadd.f32 %v5928_v9, %v14866_v10 }
 0x96d   :  { %17420 = vst [vmem:[#allocation87_spill] sm:$0xff] %v15304_v16  ;;  %v4608_v60 = vmul.f32 1.442695, %v4552_v1  ;;  %v4606_v25 = vmul.f32 1.442695, %v4551_v33  ;;  %v4672_v62 = vsel %vm4431_vm3, %v15304_v16, 0.0  ;;  %v15314_v59 = vpop.eup %9711  ;;  %v5930_v48 = vpop.f32.mrf.mxu0  ;;  %v6016_v5 = vadd.f32 %v6015_v32, %v15298_v14 }
 0x96e   :  { %17421 = vst [vmem:[#allocation88_spill] sm:$0xff] %v15314_v59  ;;  %v4512_v7 = vpop.xlane.xlu1 %4511  ;;  %v4509_v45 = vpop.xlane.xlu0 %4508  ;;  %v4669_v1 = vsel %vm4431_vm3, %v15314_v59, 0.0  ;;  %v17422_v33 = vmul.u32 16, %v14851_v23  ;;  %v17425_v22 = vmul.u32 16, %v15125_v44  ;;  %v6156_v52 = vadd.f32 %v6155_v55, %v6082_v61 }
 0x96f   :  { %9725 = vpow2.f32 %v4608_v60  ;;  %v4554_v41 = vsub.f32 %v14800_v57, %v4512_v7  ;;  %v4553_v30 = vsub.f32 %v14807_v37, %v4509_v45  ;;  %v6083_v37 = vmul.f32 %v15310_v29, %v15310_v29  ;;  %4673 = vadd.xlane.f32.xlu1 %v4672_v62  ;;  %v5932_v9 = vpop.f32.mrf.mxu0  ;;  %4670 = vadd.xlane.f32.xlu0 %v4669_v1  ;;  %v17430_v1 = vld [vmem:[#allocation55_spill] sm:$0xff] }
 0x970   :  { %vm15327_vm4 = vcmp.ge.s32.totalorder %v15107_v8, %v17422_v33  ;;  %vm15334_vm5 = vcmp.lt.s32.totalorder %v15107_v8, %v17425_v22  ;;  %v15338_v57 = vpop.eup %9713  ;;  %v15344_v45 = vadd.f32 %v5930_v48, %v14863_v38  ;;  %9727 = vpow2.f32 %v4606_v25 }
 0x971   :  { %17428 = vst [vmem:[#allocation89_spill] sm:$0xff] %v15338_v57  ;;  %v4612_v44 = vmul.f32 1.442695, %v4554_v41  ;;  %v4610_v60 = vmul.f32 1.442695, %v4553_v30  ;;  %v4678_v7 = vsel %vm4431_vm3, %v15338_v57, 0.0  ;;  %v15348_v33 = vpop.eup %9715  ;;  %v5980_v32 = vadd.f32 %v5979_v50, %v15310_v29  ;;  %v5936_v41 = vpop.f32.mrf.mxu0  ;;  %vm7048_vm6 = vmand %vm15327_vm4, %vm15334_vm5 }
 0x972   :  { %17429 = vst [vmem:[#allocation90_spill] sm:$0xff] %v15348_v33  ;;  %v6084_v61 = vmul.f32 %v15318_v21, %v15318_v21  ;;  %v6085_v55 = vmul.f32 %v15344_v45, %v15344_v45  ;;  %v15356_v62 = vadd.f32 %v5932_v9, %v14866_v10  ;;  %v4518_v25 = vpop.xlane.xlu1 %4517  ;;  %v4515_v48 = vpop.xlane.xlu0 %4514  ;;  %v4675_v22 = vsel %vm4431_vm3, %v15348_v33, 0.0  ;;  %v17431_v57 = vld [vmem:[#allocation56_spill] sm:$0xff] }
 0x973   :  { %9729 = vpow2.f32 %v4612_v44  ;;  %v4556_v30 = vsub.f32 %v17430_v1, %v4518_v25  ;;  %v4555_v50 = vsub.f32 %v17431_v57, %v4515_v48  ;;  %v6120_v16 = vadd.f32 %v6119_v26, %v6083_v37  ;;  %4679 = vadd.xlane.f32.xlu1 %v4678_v7  ;;  %v5938_v44 = vpop.f32.mrf.mxu0  ;;  %4676 = vadd.xlane.f32.xlu0 %v4675_v22 }
 0x974   :  { %v15362_v59 = vpop.eup %9717  ;;  %v6017_v8 = vadd.f32 %v6016_v5, %v15318_v21  ;;  %v6086_v9 = vmul.f32 %v15356_v62, %v15356_v62  ;;  %v15368_v23 = vadd.f32 %v5936_v41, %v14863_v38  ;;  %9731 = vpow2.f32 %v4610_v60  ;;  %v17434_v60 = vld [vmem:[#allocation58_spill] sm:$0xff] }
 0x975   :  { %17432 = vst [vmem:[#allocation55_spill] sm:$0xff] %v15362_v59  ;;  %v4616_v25 = vmul.f32 1.442695, %v4556_v30  ;;  %v4614_v1 = vmul.f32 1.442695, %v4555_v50  ;;  %v4684_v57 = vsel %vm4431_vm3, %v15362_v59, 0.0  ;;  %v15372_v48 = vpop.eup %9719  ;;  %v6157_v26 = vadd.f32 %v6156_v52, %v6084_v61  ;;  %v5940_v7 = vpop.f32.mrf.mxu0 }
 0x976   :  { %17433 = vst [vmem:[#allocation56_spill] sm:$0xff] %v15372_v48  ;;  %v5981_v5 = vadd.f32 %v5980_v32, %v15344_v45  ;;  %v6121_v37 = vadd.f32 %v6120_v16, %v6085_v55  ;;  %v15376_v33 = vadd.f32 %v5938_v44, %v14866_v10  ;;  %v4524_v41 = vpop.xlane.xlu1 %4523  ;;  %v4521_v58 = vpop.xlane.xlu0 %4520  ;;  %v4681_v22 = vsel %vm4431_vm3, %v15372_v48, 0.0  ;;  %v17435_v50 = vld [vmem:[#allocation60_spill] sm:$0xff] }
 0x977   :  { %9733 = vpow2.f32 %v4616_v25  ;;  %v4558_v30 = vsub.f32 %v17434_v60, %v4524_v41  ;;  %v4557_v59 = vsub.f32 %v17435_v50, %v4521_v58  ;;  %v6018_v52 = vadd.f32 %v6017_v8, %v15356_v62  ;;  %4685 = vadd.xlane.f32.xlu1 %v4684_v57  ;;  %v5942_v55 = vpop.f32.mrf.mxu0  ;;  %4682 = vadd.xlane.f32.xlu0 %v4681_v22 }
 0x978   :  { %v15382_v20 = vpop.eup %9721  ;;  %v6158_v32 = vadd.f32 %v6157_v26, %v6086_v9  ;;  %v6087_v16 = vmul.f32 %v15368_v23, %v15368_v23  ;;  %v15388_v61 = vadd.f32 %v5940_v7, %v14863_v38  ;;  %9735 = vpow2.f32 %v4614_v1  ;;  %v17439_v7 = vld [vmem:[#allocation57_spill] sm:$0xff] }
 0x979   :  { %17436 = vst [vmem:[#allocation58_spill] sm:$0xff] %v15382_v20  ;;  %v4620_v44 = vmul.f32 1.442695, %v4558_v30  ;;  %v4618_v25 = vmul.f32 1.442695, %v4557_v59  ;;  %v4690_v58 = vsel %vm4431_vm3, %v15382_v20, 0.0  ;;  %v15392_v41 = vpop.eup %9723  ;;  %v5982_v8 = vadd.f32 %v5981_v5, %v15368_v23  ;;  %v5946_v59 = vpop.f32.mrf.mxu0 }
 0x97a   :  { %17437 = vst [vmem:[#allocation60_spill] sm:$0xff] %v15392_v41  ;;  %v6088_v9 = vmul.f32 %v15376_v33, %v15376_v33  ;;  %v6089_v26 = vmul.f32 %v15388_v61, %v15388_v61  ;;  %v15400_v57 = vadd.f32 %v5942_v55, %v14866_v10  ;;  %v4527_v1 = vpop.xlane.xlu0 %4526  ;;  %v4687_v5 = vsel %vm4431_vm3, %v15392_v41, 0.0  ;;  %v17478_v41 = vld [vmem:[#allocation77_spill] sm:$0xff] }
 0x97b   :  { %9737 = vpow2.f32 %v4620_v44  ;;  %v4559_v60 = vsub.f32 %v17439_v7, %v4527_v1  ;;  %v6122_v22 = vadd.f32 %v6121_v37, %v6087_v16  ;;  %v6019_v50 = vadd.f32 %v6018_v52, %v15376_v33  ;;  %4691 = vadd.xlane.f32.xlu1 %v4690_v58  ;;  %v5948_v48 = vpop.f32.mrf.mxu0  ;;  %4688 = vadd.xlane.f32.xlu0 %v4687_v5 }
 0x97c   :  { %17438 = vst [vmem:[#allocation91_spill] sm:$0xff] %v15400_v57  ;;  %v15409_v30 = vpop.eup %9725  ;;  %v6090_v55 = vmul.f32 %v15400_v57, %v15400_v57  ;;  %v15415_v20 = vadd.f32 %v5946_v59, %v14863_v38  ;;  %9739 = vpow2.f32 %v4618_v25  ;;  %v9963_v27 = vmov 0.0  }
 0x97d   :  { %17440 = vst [vmem:[#allocation57_spill] sm:$0xff] %v15409_v30  ;;  %v4622_v44 = vmul.f32 1.442695, %v4559_v60  ;;  %v8574_v37 = vsel %vm7048_vm6, 1.0, %v9963_v27  ;;  %v15422_v52 = vpop.eup %9727  ;;  %v6159_v16 = vadd.f32 %v6158_v32, %v6088_v9  ;;  %v5983_v1 = vadd.f32 %v5982_v8, %v15388_v61  ;;  %v5950_v5 = vpop.f32.mrf.mxu0 }
 0x97e   :  { %17441 = vst [vmem:[#allocation92_spill] sm:$0xff] %v15422_v52  ;;  %v6091_v58 = vmul.f32 %v15415_v20, %v15415_v20  ;;  %v15428_v25 = vadd.f32 %v5948_v48, %v14866_v10  ;;  %9411 = vmatprep.subr.msk.mxu0 %vm7234_vm7, %v8574_v37  ;;  %v6123_v59 = vadd.f32 %v6122_v22, %v6089_v26  ;;  %v4696_v27 = vsel %vm4431_vm3, %v15409_v30, 0.0 }
 0x97f   :  { %9741 = vpow2.f32 %v4622_v44  ;;  %9412 = vmatpush3.msk.msra.mxu0 %vm7234_vm7, %v8574_v37  ;;  %v4693_v39 = vsel %vm4431_vm3, %v15422_v52, 0.0  ;;  %v6020_v32 = vadd.f32 %v6019_v50, %v15400_v57  ;;  %v5984_v8 = vadd.f32 %v5983_v1, %v15415_v20  ;;  %4697 = vadd.xlane.f32.xlu1 %v4696_v27  ;;  %v5952_v60 = vpop.f32.mrf.mxu0 }
 0x980   :  { %17442 = vst [vmem:[#allocation93_spill] sm:$0xff] %v15428_v25  ;;  %v15434_v13 = vpop.eup %9729  ;;  %v6092_v48 = vmul.f32 %v15428_v25, %v15428_v25  ;;  %v15441_v9 = vadd.f32 %v5950_v5, %v14863_v38  ;;  %v6160_v26 = vadd.f32 %v6159_v16, %v6090_v55  ;;  %v6124_v7 = vadd.f32 %v6123_v59, %v6091_v58 }
 0x981   :  { %17443 = vst [vmem:[#allocation94_spill] sm:$0xff] %v15434_v13  ;;  %4694 = vadd.xlane.f32.xlu0 %v4693_v39  ;;  %v4702_v22 = vsel %vm4431_vm3, %v15434_v13, 0.0  ;;  %v15445_v44 = vpop.eup %9731  ;;  %v6021_v50 = vadd.f32 %v6020_v32, %v15428_v25  ;;  %v15452_v38 = vadd.f32 %v5952_v60, %v14866_v10 }
 0x982   :  { %17444 = vst [vmem:[#allocation95_spill] sm:$0xff] %v15445_v44  ;;  %v5985_v37 = vadd.f32 %v5984_v8, %v15441_v9  ;;  %v6093_v1 = vmul.f32 %v15441_v9, %v15441_v9  ;;  %v6161_v5 = vadd.f32 %v6160_v26, %v6092_v48  ;;  %v4699_v55 = vsel %vm4431_vm3, %v15445_v44, 0.0 }
 0x983   :  { %17445 = vst [vmem:[#allocation96_spill] sm:$0xff] %v15452_v38  ;;  %v6022_v27 = vadd.f32 %v6021_v50, %v15452_v38  ;;  %v6094_v39 = vmul.f32 %v15452_v38, %v15452_v38  ;;  %4703 = vadd.xlane.f32.xlu1 %v4702_v22 }
 0x984   :  { %v15456_v16 = vpop.eup %9733  ;;  %v5986_v58 = vrot.slane %v5985_v37, 4  ;;  %v6125_v59 = vadd.f32 %v6124_v7, %v6093_v1 }
 0x985   :  { %17446 = vst [vmem:[#allocation97_spill] sm:$0xff] %v15456_v16  ;;  %4700 = vadd.xlane.f32.xlu0 %v4699_v55  ;;  %v4708_v32 = vsel %vm4431_vm3, %v15456_v16, 0.0  ;;  %v15463_v10 = vpop.eup %9735  ;;  %v6023_v26 = vrot.slane %v6022_v27, 4  ;;  %v6162_v60 = vadd.f32 %v6161_v5, %v6094_v39 }
 0x986   :  { %17447 = vst [vmem:[#allocation98_spill] sm:$0xff] %v15463_v10  ;;  %v5987_v8 = vadd.f32 %v5986_v58, %v5985_v37  ;;  %v6126_v48 = vrot.slane %v6125_v59, 4  ;;  %v4705_v44 = vsel %vm4431_vm3, %v15463_v10, 0.0 }
 0x987   :  { %v6024_v13 = vadd.f32 %v6023_v26, %v6022_v27  ;;  %v6163_v52 = vrot.slane %v6162_v60, 4  ;;  %4709 = vadd.xlane.f32.xlu1 %v4708_v32 }
 0x988   :  { %v15467_v7 = vpop.eup %9737  ;;  %v5988_v50 = vrot.slane %v5987_v8, 2  ;;  %v6127_v1 = vadd.f32 %v6126_v48, %v6125_v59 }
 0x989   :  { %17448 = vst [vmem:[#allocation99_spill] sm:$0xff] %v15467_v7  ;;  %4706 = vadd.xlane.f32.xlu0 %v4705_v44  ;;  %v4714_v22 = vsel %vm4431_vm3, %v15467_v7, 0.0  ;;  %v15471_v55 = vpop.eup %9739  ;;  %v6025_v16 = vrot.slane %v6024_v13, 2  ;;  %v6164_v5 = vadd.f32 %v6163_v52, %v6162_v60  ;;  %v8524_v52 = vld [vmem:[%s16903_s14 + $0x33] ss:$8 sm:$0x3] }
 0x98a   :  { %17449 = vst [vmem:[#allocation100_spill] sm:$0xff] %v15471_v55  ;;  %v5989_v37 = vadd.f32 %v5988_v50, %v5987_v8  ;;  %v6128_v58 = vrot.slane %v6127_v1, 2  ;;  %v4711_v39 = vsel %vm4431_vm3, %v15471_v55, 0.0 }
 0x98b   :  { %v6026_v27 = vadd.f32 %v6025_v16, %v6024_v13  ;;  %4715 = vadd.xlane.f32.xlu1 %v4714_v22  ;;  %v6165_v32 = vrot.slane %v6164_v5, 2  ;;  %v8525_v13 = vld [vmem:[%s16903_s14 + $0x34] ss:$8 sm:$0x3]  ;;  %v17451_v22 = vld [vmem:[#allocation62_spill] sm:$0xff] }
 0x98c   :  { %v15475_v10 = vpop.eup %9741  ;;  %v5990_v30 = vrot.slane %v5989_v37, 1  ;;  %v6129_v59 = vadd.f32 %v6128_v58, %v6127_v1  ;;  %v17452_v58 = vld [vmem:[#allocation61_spill] sm:$0xff] }
 0x98d   :  { %17450 = vst [vmem:[#allocation101_spill] sm:$0xff] %v15475_v10  ;;  %4712 = vadd.xlane.f32.xlu0 %v4711_v39  ;;  %v4717_v26 = vsel %vm4431_vm3, %v15475_v10, 0.0  ;;  %v6027_v60 = vrot.slane %v6026_v27, 1  ;;  %v6166_v55 = vadd.f32 %v6165_v32, %v6164_v5  ;;  %v15495_v39 = vrot.slane %v8524_v52, %v17452_v58 }
 0x98e   :  { %v5991_v44 = vadd.f32 %v5990_v30, %v5989_v37  ;;  %v6130_v48 = vrot.slane %v6129_v59, 1  ;;  %v15492_v37 = vrot.slane %v8524_v52, %v17451_v22  ;;  %v15498_v32 = vrot.slane %v8525_v13, %v17451_v22 }
 0x98f   :  { %17453 = vst [vmem:[#allocation62_spill] sm:$0xff] %v15495_v39  ;;  %v6028_v5 = vadd.f32 %v6027_v60, %v6026_v27  ;;  %v6167_v7 = vrot.slane %v6166_v55, 1  ;;  %v17459_v27 = vld [vmem:[#allocation48_spill] sm:$0xff]  ;;  %v17460_v60 = vld [vmem:[#allocation47_spill] sm:$0xff]  ;;  %v17471_v39 = vld [vmem:[#allocation45_spill] sm:$0xff] }
 0x990   :  { %v15479_v8 = vmul.f32 0.00390625, %v5991_v44  ;;  %v6131_v50 = vadd.f32 %v6130_v48, %v6129_v59  ;;  %17454 = vst [vmem:[#allocation61_spill] sm:$0xff] %v15498_v32  ;;  %v15501_v44 = vrot.slane %v8525_v13, %v17452_v58  ;;  %v17456_v48 = vld [vmem:[#allocation54_spill] sm:$0xff]  ;;  %v17458_v13 = vld [vmem:[#allocation39_spill] sm:$0xff] }
 0x991   :  { %4718 = vadd.xlane.f32.xlu0 %v4717_v26  ;;  %v17469_v58 = vld [vmem:[#allocation43_spill] sm:$0xff]  ;;  %v17472_v32 = vld [vmem:[#allocation50_spill] sm:$0xff] }
 0x992   :  { %v6169_v16 = vmul.f32 0.00390625, %v6131_v50  ;;  %v6171_v30 = vmul.f32 %v15479_v8, %v15479_v8  ;;  %17455 = vst [vmem:[#allocation102_spill] sm:$0xff] %v15501_v44  ;;  %v17457_v50 = vld [vmem:[#allocation49_spill] sm:$0xff]  ;;  %v6203_v1 = vsub.f32 %v15050_v54, %v15479_v8  ;;  %v6209_v22 = vsub.f32 %v15115_v51, %v15479_v8  ;;  %v17470_v44 = vld [vmem:[#allocation46_spill] sm:$0xff] }
 0x993   :  { %v6213_v54 = vsub.f32 %v15154_v17, %v15479_v8  ;;  %v17476_v17 = vsub.f32 %v15441_v9, %v15479_v8  ;;  %v17484_v11 = vsub.f32 %v14889_v2, %v15479_v8  ;;  %v17485_v38 = vsub.f32 %v14901_v24, %v15479_v8 }
 0x994   :  { %v6173_v59 = vsub.f32 %v6169_v16, %v6171_v30  ;;  %v6205_v16 = vsub.f32 %v15073_v53, %v15479_v8  ;;  %v6207_v30 = vsub.f32 %v15098_v0, %v15479_v8  ;;  %v6215_v53 = vsub.f32 %v15178_v12, %v15479_v8  ;;  %v17461_v0 = vld [vmem:[#allocation53_spill] sm:$0xff] }
 0x995   :  { %v17489_v2 = vsub.f32 %v14953_v19, %v15479_v8  ;;  %v17490_v24 = vsub.f32 %v14971_v63, %v15479_v8  ;;  %v17492_v19 = vsub.f32 %v15198_v3, %v15479_v8  ;;  %v17493_v63 = vsub.f32 %v15222_v42, %v15479_v8 }
 0x996   :  { %v6239_v52 = vadd.f32 1e-05, %v6173_v59  ;;  %v15549_v59 = vmul.f32 0.00390625, %v6028_v5  ;;  %v17496_v3 = vsub.f32 %v15286_v49, %v15479_v8  ;;  %v17497_v42 = vsub.f32 %v15310_v29, %v15479_v8 }
 0x997   :  { %v17500_v49 = vsub.f32 %v17459_v27, %v15479_v8 }
 0x998   :  { %9743 = vrsqrt.f32 %v6239_v52  ;;  %v6168_v52 = vadd.f32 %v6167_v7, %v6166_v55  ;;  %v6172_v5 = vmul.f32 %v15549_v59, %v15549_v59  ;;  %v6211_v55 = vsub.f32 %v15137_v36, %v15479_v8  ;;  %v17475_v36 = vld [vmem:[#allocation69_spill] sm:$0xff]  ;;  %v17479_v7 = vld [vmem:[#allocation80_spill] sm:$0xff] }
 0x99a   :  { %v6170_v26 = vmul.f32 0.00390625, %v6168_v52  ;;  %v17483_v52 = vsub.f32 %v14878_v28, %v15479_v8  ;;  %v17488_v28 = vsub.f32 %v14941_v56, %v15479_v8 }
 0x99c   :  { %v6174_v51 = vsub.f32 %v6170_v26, %v6172_v5  ;;  %v17468_v26 = vld [vmem:[#allocation41_spill] sm:$0xff]  ;;  %v17480_v5 = vsub.f32 %v17456_v48, %v15479_v8 }
 0x99e   :  { %v6240_v10 = vadd.f32 1e-05, %v6174_v51 }
 0x9a0   :  { %9745 = vrsqrt.f32 %v6240_v10 }
 0x9a5   :  { %v9744_v51 = vpop.eup %9743 }
 0x9a6   :  { %v6305_v12 = vmul.f32 %v9744_v51, %v17476_v17  ;;  %v6243_v9 = vmul.f32 %v9744_v51, %v17480_v5  ;;  %v17481_v17 = vsub.f32 %v17457_v50, %v15479_v8  ;;  %v6247_v31 = vmul.f32 %v9744_v51, %v17483_v52 }
 0x9a7   :  { %v6249_v25 = vmul.f32 %v9744_v51, %v17484_v11  ;;  %v6251_v48 = vmul.f32 %v9744_v51, %v17485_v38  ;;  %v17486_v5 = vsub.f32 %v17458_v13, %v15479_v8  ;;  %v6257_v52 = vmul.f32 %v9744_v51, %v17488_v28 }
 0x9a8   :  { %v6245_v10 = vmul.f32 %v9744_v51, %v17481_v17  ;;  %v15643_v57 = vmul.f32 %v15492_v37, %v6305_v12  ;;  %v17487_v12 = vsub.f32 %v14929_v6, %v15479_v8  ;;  %v6259_v11 = vmul.f32 %v9744_v51, %v17489_v2 }
 0x9a9   :  { %v6253_v50 = vmul.f32 %v9744_v51, %v17486_v5  ;;  %v6261_v38 = vmul.f32 %v9744_v51, %v17490_v24  ;;  %v15671_v13 = vmul.f32 %v9744_v51, %v6205_v16  ;;  %v15673_v5 = vmul.f32 %v9744_v51, %v6207_v30 }
 0x9aa   :  { %17482 = vst [vmem:[#allocation54_spill] sm:$0xff] %v15643_v57  ;;  %v6255_v17 = vmul.f32 %v9744_v51, %v17487_v12  ;;  %v15669_v57 = vmul.f32 %v9744_v51, %v6203_v1  ;;  %v15675_v6 = vmul.f32 %v9744_v51, %v6209_v22  ;;  %v15677_v12 = vmul.f32 %v9744_v51, %v6211_v55 }
 0x9ab   :  { %17491 = vst [vmem:[#allocation49_spill] sm:$0xff] %v15671_v13  ;;  %v15679_v56 = vmul.f32 %v9744_v51, %v6213_v54  ;;  %v15681_v28 = vmul.f32 %v9744_v51, %v6215_v53  ;;  %v15686_v2 = vmul.f32 %v9744_v51, %v17492_v19  ;;  %v15691_v1 = vmul.f32 %v9744_v51, %v17493_v63 }
 0x9ac   :  { %v17494_v16 = vsub.f32 %v15242_v34, %v15479_v8  ;;  %v17495_v22 = vsub.f32 %v15266_v15, %v15479_v8  ;;  %v15706_v54 = vmul.f32 %v9744_v51, %v17496_v3  ;;  %v15711_v53 = vmul.f32 %v9744_v51, %v17497_v42 }
 0x9ad   :  { %v17498_v34 = vsub.f32 %v15344_v45, %v15479_v8  ;;  %v17499_v15 = vsub.f32 %v15368_v23, %v15479_v8  ;;  %v6263_v63 = vmul.f32 %v9744_v51, %v17500_v49  ;;  %v17503_v45 = vsub.f32 %v15415_v20, %v15479_v8 }
 0x9ae   :  { %v15696_v30 = vmul.f32 %v9744_v51, %v17494_v16  ;;  %v15701_v55 = vmul.f32 %v9744_v51, %v17495_v22  ;;  %v17501_v16 = vsub.f32 %v17460_v60, %v15479_v8  ;;  %v17502_v22 = vsub.f32 %v15388_v61, %v15479_v8  ;;  %v9746_v61 = vpop.eup %9745 }
 0x9af   :  { %v15716_v24 = vmul.f32 %v9744_v51, %v17498_v34  ;;  %v15721_v19 = vmul.f32 %v9744_v51, %v17499_v15  ;;  %v6303_v42 = vmul.f32 %v9744_v51, %v17503_v45  ;;  %v17504_v23 = vsub.f32 %v15013_v4, %v15479_v8  ;;  %v17505_v15 = vld [vmem:[#allocation63_spill] sm:$0xff] }
 0x9b0   :  { %v6265_v29 = vmul.f32 %v9744_v51, %v17501_v16  ;;  %v6301_v3 = vmul.f32 %v9744_v51, %v17502_v22  ;;  %v17506_v27 = vsub.f32 %v17505_v15, %v15479_v8  ;;  %v6320_v60 = vmul.f32 %v15492_v37, %v6243_v9  ;;  %v17507_v8 = vld [vmem:[#allocation96_spill] sm:$0xff] }
 0x9b1   :  { %v15738_v34 = vmul.f32 %v9744_v51, %v17504_v23  ;;  %v6322_v16 = vmul.f32 %v15492_v37, %v6245_v10  ;;  %v15748_v22 = vmul.f32 %v15492_v37, %v6247_v31  ;;  %v15751_v20 = vmul.f32 %v15492_v37, %v6249_v25 }
 0x9b2   :  { %v15743_v49 = vmul.f32 %v9744_v51, %v17506_v27  ;;  %v15754_v4 = vmul.f32 %v15492_v37, %v6251_v48  ;;  %v15757_v45 = vmul.f32 %v15492_v37, %v6253_v50  ;;  %v17508_v51 = vsub.f32 %v17507_v8, %v15549_v59  ;;  %v17514_v50 = vld [vmem:[#allocation51_spill] sm:$0xff]  ;;  %v17516_v8 = vld [vmem:[#allocation38_spill] sm:$0xff] }
 0x9b3   :  { %v15765_v10 = vmul.f32 %v15492_v37, %v6255_v17  ;;  %v15768_v31 = vmul.f32 %v15492_v37, %v6257_v52  ;;  %v15771_v25 = vmul.f32 %v15492_v37, %v6259_v11  ;;  %v17513_v9 = vsub.f32 %v17461_v0, %v15549_v59  ;;  %v17519_v52 = vld [vmem:[#allocation40_spill] sm:$0xff] }
 0x9b4   :  { %v15762_v23 = vmul.f32 %v9746_v61, %v17508_v51  ;;  %v17515_v15 = vsub.f32 %v17514_v50, %v15549_v59  ;;  %v17517_v51 = vsub.f32 %v17516_v8, %v15549_v59  ;;  %v15783_v17 = vmul.f32 %v15492_v37, %v6261_v38 }
 0x9b5   :  { %17510 = vst [vmem:[#allocation48_spill] sm:$0xff] %v15765_v10  ;;  %17511 = vst [vmem:[#allocation47_spill] sm:$0xff] %v15768_v31  ;;  %v6244_v48 = vmul.f32 %v9746_v61, %v17513_v9  ;;  %v17520_v31 = vsub.f32 %v17519_v52, %v15549_v59  ;;  %v17523_v9 = vld [vmem:[#allocation42_spill] sm:$0xff]  ;;  %v17527_v38 = vsub.f32 %v17468_v26, %v15549_v59 }
 0x9b6   :  { %17509 = vst [vmem:[#allocation39_spill] sm:$0xff] %v15762_v23  ;;  %17512 = vst [vmem:[#allocation53_spill] sm:$0xff] %v15771_v25  ;;  %v6246_v27 = vmul.f32 %v9746_v61, %v17515_v15  ;;  %v6248_v23 = vmul.f32 %v9746_v61, %v17517_v51  ;;  %v17521_v25 = vld [vmem:[#allocation37_spill] sm:$0xff]  ;;  %v17524_v13 = vsub.f32 %v17523_v9, %v15549_v59  ;;  %v17525_v15 = vld [vmem:[#allocation44_spill] sm:$0xff] }
 0x9b7   :  { %17518 = vst [vmem:[#allocation41_spill] sm:$0xff] %v15783_v17  ;;  %v6250_v11 = vmul.f32 %v9746_v61, %v17520_v31  ;;  %v17522_v10 = vsub.f32 %v17521_v25, %v15549_v59  ;;  %v17526_v8 = vsub.f32 %v17525_v15, %v15549_v59  ;;  %v15804_v17 = vmul.f32 %v9746_v61, %v17527_v38 }
 0x9b8   :  { %v15794_v50 = vmul.f32 %v9746_v61, %v17524_v13  ;;  %v17528_v31 = vsub.f32 %v17469_v58, %v15549_v59  ;;  %v17530_v52 = vsub.f32 %v17471_v39, %v15549_v59  ;;  %v17531_v26 = vsub.f32 %v17472_v32, %v15549_v59 }
 0x9b9   :  { %v6252_v0 = vmul.f32 %v9746_v61, %v17522_v10  ;;  %v15799_v51 = vmul.f32 %v9746_v61, %v17526_v8  ;;  %v17529_v10 = vsub.f32 %v17470_v44, %v15549_v59  ;;  %v17532_v58 = vsub.f32 %v15104_v43, %v15549_v59 }
 0x9ba   :  { %v15809_v25 = vmul.f32 %v9746_v61, %v17528_v31  ;;  %v15819_v9 = vmul.f32 %v9746_v61, %v17530_v52  ;;  %v15824_v15 = vmul.f32 %v9746_v61, %v17531_v26  ;;  %v17533_v44 = vsub.f32 %v15122_v46, %v15549_v59 }
 0x9bb   :  { %v15814_v13 = vmul.f32 %v9746_v61, %v17529_v10  ;;  %v15829_v8 = vmul.f32 %v9746_v61, %v17532_v58  ;;  %v17534_v39 = vsub.f32 %v17475_v36, %v15549_v59  ;;  %v17535_v32 = vsub.f32 %v15166_v35, %v15549_v59 }
 0x9bc   :  { %v15834_v38 = vmul.f32 %v9746_v61, %v17533_v44  ;;  %v17536_v43 = vsub.f32 %v17477_v40, %v15549_v59  ;;  %v17537_v46 = vsub.f32 %v17478_v41, %v15549_v59  ;;  %v17538_v36 = vsub.f32 %v17479_v7, %v15549_v59 }
 0x9bd   :  { %v15839_v31 = vmul.f32 %v9746_v61, %v17534_v39  ;;  %v15844_v10 = vmul.f32 %v9746_v61, %v17535_v32  ;;  %v17539_v35 = vsub.f32 %v15254_v47, %v15549_v59  ;;  %v17540_v40 = vsub.f32 %v15274_v18, %v15549_v59 }
 0x9be   :  { %v15849_v52 = vmul.f32 %v9746_v61, %v17536_v43  ;;  %v15854_v26 = vmul.f32 %v9746_v61, %v17537_v46  ;;  %v15859_v58 = vmul.f32 %v9746_v61, %v17538_v36  ;;  %v17541_v41 = vsub.f32 %v15298_v14, %v15549_v59 }
 0x9bf   :  { %v15864_v44 = vmul.f32 %v9746_v61, %v17539_v35  ;;  %v15869_v39 = vmul.f32 %v9746_v61, %v17540_v40  ;;  %v17542_v7 = vsub.f32 %v15318_v21, %v15549_v59  ;;  %v17544_v47 = vsub.f32 %v15356_v62, %v15549_v59  ;;  %v17548_v35 = vld [vmem:[#allocation91_spill] sm:$0xff] }
 0x9c0   :  { %v15874_v32 = vmul.f32 %v9746_v61, %v17541_v41  ;;  %v17546_v18 = vsub.f32 %v15376_v33, %v15549_v59  ;;  %v17549_v14 = vsub.f32 %v17548_v35, %v15549_v59  ;;  %v17551_v41 = vld [vmem:[#allocation93_spill] sm:$0xff] }
 0x9c1   :  { %v15879_v43 = vmul.f32 %v9746_v61, %v17542_v7  ;;  %v15884_v46 = vmul.f32 %v9746_v61, %v17544_v47  ;;  %v17552_v21 = vsub.f32 %v17551_v41, %v15549_v59 }
 0x9c2   :  { %v15889_v36 = vmul.f32 %v9746_v61, %v17546_v18  ;;  %v15894_v40 = vmul.f32 %v9746_v61, %v17549_v14 }
 0x9c3   :  { %17543 = vst [vmem:[#allocation43_spill] sm:$0xff] %v15879_v43  ;;  %17545 = vst [vmem:[#allocation46_spill] sm:$0xff] %v15884_v46  ;;  %v15899_v7 = vmul.f32 %v9746_v61, %v17552_v21  ;;  %v17554_v43 = vld [vmem:[#allocation52_spill] sm:$0xff] }
 0x9c4   :  { %17547 = vst [vmem:[#allocation45_spill] sm:$0xff] %v15889_v36  ;;  %17550 = vst [vmem:[#allocation50_spill] sm:$0xff] %v15894_v40  ;;  %v17555_v62 = vsub.f32 %v17554_v43, %v15549_v59  ;;  %v17556_v46 = vld [vmem:[#allocation64_spill] sm:$0xff]  ;;  %v17558_v36 = vld [vmem:[#allocation65_spill] sm:$0xff]  ;;  %v15925_v43 = vmul.f32 %v15492_v37, %v6265_v29  ;;  %v15980_v29 = vmul.f32 %v15492_v37, %v6301_v3 }
 0x9c5   :  { %17553 = vst [vmem:[#allocation69_spill] sm:$0xff] %v15899_v7  ;;  %v17557_v33 = vsub.f32 %v17556_v46, %v15549_v59  ;;  %v17559_v35 = vsub.f32 %v17558_v36, %v15549_v59  ;;  %v17560_v40 = vld [vmem:[#allocation66_spill] sm:$0xff]  ;;  %v15922_v7 = vmul.f32 %v15492_v37, %v6263_v63  ;;  %v15929_v46 = vmul.f32 %v15492_v37, %v15673_v5 }
 0x9c6   :  { %v15904_v47 = vmul.f32 %v9746_v61, %v17555_v62  ;;  %v17561_v41 = vsub.f32 %v17560_v40, %v15549_v59  ;;  %v15933_v36 = vmul.f32 %v15492_v37, %v15675_v6  ;;  %v15937_v62 = vmul.f32 %v15492_v37, %v15677_v12  ;;  %17565 = vst [vmem:[#allocation63_spill] sm:$0xff] %v15980_v29 }
 0x9c7   :  { %v15909_v18 = vmul.f32 %v9746_v61, %v17557_v33  ;;  %v15914_v14 = vmul.f32 %v9746_v61, %v17559_v35  ;;  %v15941_v59 = vmul.f32 %v15492_v37, %v15679_v56  ;;  %v15945_v63 = vmul.f32 %v15492_v37, %v15681_v28 }
 0x9c8   :  { %v15919_v21 = vmul.f32 %v9746_v61, %v17561_v41  ;;  %v15949_v5 = vmul.f32 %v15492_v37, %v15686_v2  ;;  %v15953_v6 = vmul.f32 %v15492_v37, %v15691_v1  ;;  %v15957_v12 = vmul.f32 %v15492_v37, %v15696_v30  ;;  %v17569_v41 = vld [vmem:[#allocation102_spill] sm:$0xff] }
 0x9c9   :  { %v15961_v56 = vmul.f32 %v15492_v37, %v15701_v55  ;;  %v15965_v28 = vmul.f32 %v15492_v37, %v15706_v54  ;;  %v15969_v2 = vmul.f32 %v15492_v37, %v15711_v53  ;;  %v15973_v1 = vmul.f32 %v15492_v37, %v15716_v24  ;;  %v17567_v54 = vld [vmem:[#allocation61_spill] sm:$0xff]  ;;  %v17568_v53 = vld [vmem:[#allocation62_spill] sm:$0xff] }
 0x9ca   :  { %v15977_v30 = vmul.f32 %v15492_v37, %v15721_v19  ;;  %v15983_v55 = vmul.f32 %v15492_v37, %v6303_v42  ;;  %v6397_v61 = vadd.f32 %v17567_v54, %v6320_v60  ;;  %v6399_v40 = vadd.f32 %v17567_v54, %v6322_v16 }
 0x9cb   :  { %17562 = vst [vmem:[#allocation74_spill] sm:$0xff] %v15969_v2  ;;  %17563 = vst [vmem:[#allocation77_spill] sm:$0xff] %v15973_v1  ;;  %v6321_v33 = vmul.f32 %v17568_v53, %v6244_v48  ;;  %v15990_v24 = vmul.f32 %v15492_v37, %v15738_v34  ;;  %v6323_v35 = vmul.f32 %v17568_v53, %v6246_v27 }
 0x9cc   :  { %17564 = vst [vmem:[#allocation80_spill] sm:$0xff] %v15977_v30  ;;  %17566 = vst [vmem:[#allocation96_spill] sm:$0xff] %v15983_v55  ;;  %v6325_v19 = vmul.f32 %v17568_v53, %v6248_v23  ;;  %v6327_v3 = vmul.f32 %v17568_v53, %v6250_v11  ;;  %v15997_v42 = vmul.f32 %v15492_v37, %v15743_v49  ;;  %v6461_v49 = vmax.f32 %v6397_v61, 0.0 }
 0x9cd   :  { %v6398_v60 = vadd.f32 %v17569_v41, %v6321_v33  ;;  %v6401_v16 = vadd.f32 %v17567_v54, %v15748_v22  ;;  %v6403_v48 = vadd.f32 %v17567_v54, %v15751_v20  ;;  %v16006_v34 = vmul.f32 %v15492_v37, %v15669_v57 }
 0x9ce   :  { %v6400_v23 = vadd.f32 %v17569_v41, %v6323_v35  ;;  %v6402_v27 = vadd.f32 %v17569_v41, %v6325_v19  ;;  %v6404_v11 = vadd.f32 %v17569_v41, %v6327_v3  ;;  %v6463_v55 = vmax.f32 %v6399_v40, 0.0 }
 0x9cf   :  { %v6462_v29 = vmax.f32 %v6398_v60, 0.0  ;;  %v6329_v33 = vmul.f32 %v17568_v53, %v6252_v0  ;;  %v6331_v20 = vmul.f32 %v17568_v53, %v15794_v50  ;;  %v6465_v2 = vmax.f32 %v6401_v16, 0.0  ;;  %v17570_v16 = vld [vmem:[#allocation49_spill] sm:$0xff] }
 0x9d0   :  { %v6464_v30 = vmax.f32 %v6400_v23, 0.0  ;;  %v6466_v22 = vmax.f32 %v6402_v27, 0.0  ;;  %v6468_v1 = vmax.f32 %v6404_v11, 0.0  ;;  %v6467_v57 = vmax.f32 %v6403_v48, 0.0 }
 0x9d1   :  { %v6405_v35 = vadd.f32 %v17567_v54, %v15754_v4  ;;  %v6407_v19 = vadd.f32 %v17567_v54, %v15757_v45  ;;  %v6406_v61 = vadd.f32 %v17569_v41, %v6329_v33  ;;  %v6408_v40 = vadd.f32 %v17569_v41, %v6331_v20 }
 0x9d2   :  { %v6526_v3 = vpack.c.bf16 %v6464_v30, %v6462_v29  ;;  %v6333_v0 = vmul.f32 %v17568_v53, %v15799_v51  ;;  %v6525_v60 = vpack.c.bf16 %v6463_v55, %v6461_v49  ;;  %v6335_v50 = vmul.f32 %v17568_v53, %v15804_v17  ;;  %v17571_v30 = vld [vmem:[#allocation48_spill] sm:$0xff]  ;;  %v17572_v51 = vld [vmem:[#allocation47_spill] sm:$0xff] }
 0x9d3   :  { %v6469_v23 = vmax.f32 %v6405_v35, 0.0  ;;  %v6471_v27 = vmax.f32 %v6407_v19, 0.0  ;;  %v6350_v4 = vmul.f32 %v15492_v37, %v17570_v16  ;;  %v6528_v48 = vpack.c.bf16 %v6468_v1, %v6466_v22 }
 0x9d4   :  { %6718 = vmatprep.mubr.bf16.mxu1 %v6526_v3  ;;  %v6410_v45 = vadd.f32 %v17569_v41, %v6333_v0  ;;  %v6409_v29 = vadd.f32 %v17567_v54, %v17571_v30  ;;  %v6412_v11 = vadd.f32 %v17569_v41, %v6335_v50  ;;  %v6411_v55 = vadd.f32 %v17567_v54, %v17572_v51  ;;  %v17573_v3 = vld [vmem:[#allocation53_spill] sm:$0xff] }
 0x9d5   :  { %6719 = vmatmul.mubr.bf16.vlgmr.msra.gmra.mxu1 %v6525_v60  ;;  %v6337_v49 = vmul.f32 %v17568_v53, %v15809_v25  ;;  %v6339_v17 = vmul.f32 %v17568_v53, %v15814_v13  ;;  %v6527_v37 = vpack.c.bf16 %v6467_v57, %v6465_v2  ;;  %v6470_v1 = vmax.f32 %v6406_v61, 0.0  ;;  %v17574_v50 = vld [vmem:[#allocation41_spill] sm:$0xff] }
 0x9d6   :  { %6726 = vmatprep.mubr.bf16.mxu1 %v6528_v48  ;;  %v6472_v33 = vmax.f32 %v6408_v40, 0.0  ;;  %v6529_v22 = vpack.c.bf16 %v6471_v27, %v6469_v23  ;;  %v6474_v20 = vmax.f32 %v6410_v45, 0.0  ;;  %v6413_v0 = vadd.f32 %v17567_v54, %v17573_v3 }
 0x9d7   :  { %v6414_v35 = vadd.f32 %v17569_v41, %v6337_v49  ;;  %v6416_v19 = vadd.f32 %v17569_v41, %v6339_v17  ;;  %v6473_v60 = vmax.f32 %v6409_v29, 0.0  ;;  %v6415_v25 = vadd.f32 %v17567_v54, %v17574_v50 }
 0x9d8   :  { %v6341_v13 = vmul.f32 %v17568_v53, %v15819_v9  ;;  %v6343_v2 = vmul.f32 %v17568_v53, %v15824_v15  ;;  %v6476_v57 = vmax.f32 %v6412_v11, 0.0  ;;  %v6475_v61 = vmax.f32 %v6411_v55, 0.0 }
 0x9d9   :  { %v6478_v40 = vmax.f32 %v6414_v35, 0.0  ;;  %v6480_v23 = vmax.f32 %v6416_v19, 0.0  ;;  %v6477_v27 = vmax.f32 %v6413_v0, 0.0  ;;  %v6417_v45 = vadd.f32 %v17567_v54, %v15922_v7 }
 0x9da   :  { %v6418_v16 = vadd.f32 %v17569_v41, %v6341_v13  ;;  %v6420_v48 = vadd.f32 %v17569_v41, %v6343_v2  ;;  %v6479_v30 = vmax.f32 %v6415_v25, 0.0  ;;  %v6419_v29 = vadd.f32 %v17567_v54, %v15925_v43 }
 0x9db   :  { %v6345_v9 = vmul.f32 %v17568_v53, %v15904_v47  ;;  %v6347_v15 = vmul.f32 %v17568_v53, %v15909_v18  ;;  %v6530_v11 = vpack.c.bf16 %v6472_v33, %v6470_v1  ;;  %v6481_v49 = vmax.f32 %v6417_v45, 0.0 }
 0x9dc   :  { %v6482_v51 = vmax.f32 %v6418_v16, 0.0  ;;  %v6484_v55 = vmax.f32 %v6420_v48, 0.0  ;;  %v6483_v17 = vmax.f32 %v6419_v29, 0.0  ;;  %v16060_v19 = vadd.f32 %v17567_v54, %v15990_v24 }
 0x9dd   :  { %6727 = vmatmul.mubr.bf16.gmra.mxu1 %v6527_v37  ;;  %v6422_v35 = vadd.f32 %v17569_v41, %v6345_v9  ;;  %v6424_v7 = vadd.f32 %v17569_v41, %v6347_v15  ;;  %v16062_v43 = vpack.c.bf16 %v6475_v61, %v6473_v60  ;;  %v16066_v47 = vadd.f32 %v17567_v54, %v15997_v42 }
 0x9de   :  { %6734 = vmatprep.mubr.bf16.mxu1 %v6530_v11  ;;  %v6349_v18 = vmul.f32 %v17568_v53, %v15914_v14  ;;  %v6351_v37 = vmul.f32 %v17568_v53, %v15919_v21  ;;  %v6532_v1 = vpack.c.bf16 %v6476_v57, %v6474_v20  ;;  %v16072_v33 = vpack.c.bf16 %v6480_v23, %v6478_v40 }
 0x9df   :  { %v16074_v3 = vpack.c.bf16 %v6479_v30, %v6477_v27  ;;  %v16076_v24 = vpack.c.bf16 %v6484_v55, %v6482_v51  ;;  %v16078_v0 = vpack.c.bf16 %v6483_v17, %v6481_v49  ;;  %v6486_v60 = vmax.f32 %v6422_v35, 0.0  ;;  %v4629_v55 = vpop.xlane.xlu0 %4628 }
 0x9e0   :  { %v6488_v50 = vmax.f32 %v6424_v7, 0.0  ;;  %v6425_v42 = vadd.f32 %v17567_v54, %v16006_v34  ;;  %v6485_v25 = vmax.f32 %v16060_v19, 0.0  ;;  %v6427_v14 = vadd.f32 %v17567_v54, %v6350_v4 }
 0x9e1   :  { %v6353_v21 = vmul.f32 %v17568_v53, %v15829_v8  ;;  %v6355_v20 = vmul.f32 %v17568_v53, %v15834_v38  ;;  %v6487_v13 = vmax.f32 %v16066_v47, 0.0  ;;  %v16090_v2 = vadd.f32 %v17569_v41, %v6349_v18  ;;  %v4626_v38 = vpop.xlane.xlu1 %4625 }
 0x9e2   :  { %v16093_v57 = vadd.f32 %v17569_v41, %v6351_v37  ;;  %v6489_v61 = vmax.f32 %v6425_v42, 0.0  ;;  %v6491_v34 = vmax.f32 %v6427_v14, 0.0  ;;  %v6429_v8 = vadd.f32 %v17567_v54, %v15929_v46 }
 0x9e3   :  { %v6430_v40 = vadd.f32 %v17569_v41, %v6353_v21  ;;  %v6432_v4 = vadd.f32 %v17569_v41, %v6355_v20  ;;  %v16099_v23 = vpack.c.bf16 %v6488_v50, %v6486_v60  ;;  %v6431_v27 = vadd.f32 %v17567_v54, %v15933_v36 }
 0x9e4   :  { %v6357_v16 = vmul.f32 %v17568_v53, %v15839_v31  ;;  %v6359_v48 = vmul.f32 %v17568_v53, %v15844_v10  ;;  %v16107_v45 = vpack.c.bf16 %v6491_v34, %v6489_v61  ;;  %9747 = vrcp.f32 %v4626_v38 }
 0x9e5   :  { %6735 = vmatmul.mubr.bf16.gmra.mxu1 %v6529_v22  ;;  %v6494_v30 = vmax.f32 %v6430_v40, 0.0  ;;  %v6496_v29 = vmax.f32 %v6432_v4, 0.0  ;;  %v6493_v46 = vmax.f32 %v6429_v8, 0.0  ;;  %v6495_v9 = vmax.f32 %v6431_v27, 0.0 }
 0x9e6   :  { %6742 = vmatprep.mubr.bf16.mxu1 %v6532_v1  ;;  %v6434_v15 = vadd.f32 %v17569_v41, %v6357_v16  ;;  %v6436_v11 = vadd.f32 %v17569_v41, %v6359_v48  ;;  %v6433_v31 = vadd.f32 %v17567_v54, %v15937_v62  ;;  %v6435_v10 = vadd.f32 %v17567_v54, %v15941_v59  ;;  %v4632_v62 = vpop.xlane.xlu1 %4631 }
 0x9e7   :  { %v16111_v36 = vpack.c.bf16 %v6496_v29, %v6494_v30  ;;  %v6361_v22 = vmul.f32 %v17568_v53, %v15849_v52  ;;  %v16119_v51 = vpack.c.bf16 %v6495_v9, %v6493_v46  ;;  %v6363_v35 = vmul.f32 %v17568_v53, %v15854_v26 }
 0x9e8   :  { %v6498_v49 = vmax.f32 %v6434_v15, 0.0  ;;  %v6500_v17 = vmax.f32 %v6436_v11, 0.0  ;;  %9749 = vrcp.f32 %v4629_v55  ;;  %v6497_v7 = vmax.f32 %v6433_v31, 0.0 }
 0x9e9   :  { %v6499_v18 = vmax.f32 %v6435_v10, 0.0  ;;  %v6438_v37 = vadd.f32 %v17569_v41, %v6361_v22  ;;  %v6440_v59 = vadd.f32 %v17569_v41, %v6363_v35  ;;  %v6437_v52 = vadd.f32 %v17567_v54, %v15945_v63  ;;  %v17576_v22 = vld [vmem:[#allocation46_spill] sm:$0xff] }
 0x9ea   :  { %v16124_v1 = vpack.c.bf16 %v6500_v17, %v6498_v49  ;;  %v6439_v60 = vadd.f32 %v17567_v54, %v15949_v5  ;;  %9751 = vrcp.f32 %v4632_v62  ;;  %v6365_v42 = vmul.f32 %v17568_v53, %v15859_v58  ;;  %v4638_v58 = vpop.xlane.xlu1 %4637  ;;  %v17577_v17 = vld [vmem:[#allocation68_spill] sm:$0xff] }
 0x9eb   :  { %v16131_v50 = vpack.c.bf16 %v6499_v18, %v6497_v7  ;;  %v6502_v26 = vmax.f32 %v6438_v37, 0.0  ;;  %v6504_v14 = vmax.f32 %v6440_v59, 0.0  ;;  %v6501_v21 = vmax.f32 %v6437_v52, 0.0  ;;  %v17578_v52 = vld [vmem:[#allocation74_spill] sm:$0xff] }
 0x9ec   :  { %v6503_v20 = vmax.f32 %v6439_v60, 0.0  ;;  %v6367_v61 = vmul.f32 %v17568_v53, %v15864_v44  ;;  %v6442_v63 = vadd.f32 %v17569_v41, %v6365_v42  ;;  %v6441_v5 = vadd.f32 %v17567_v54, %v15953_v6  ;;  %v4635_v6 = vpop.xlane.xlu0 %4634 }
 0x9ed   :  { %6743 = vmatmul.mubr.bf16.gmra.mxu1 %v16062_v43  ;;  %v6443_v34 = vadd.f32 %v17567_v54, %v15957_v12  ;;  %v6369_v40 = vmul.f32 %v17568_v53, %v15869_v39  ;;  %v16146_v4 = vpack.c.bf16 %v6504_v14, %v6502_v26  ;;  %v6371_v43 = vmul.f32 %v17568_v53, %v15874_v32  ;;  %v17575_v32 = vld [vmem:[#allocation43_spill] sm:$0xff]  ;;  %v17579_v26 = vld [vmem:[#allocation77_spill] sm:$0xff] }
 0x9ee   :  { %6750 = vmatprep.mubr.bf16.mxu1 %v16072_v33  ;;  %v16148_v8 = vpack.c.bf16 %v6503_v20, %v6501_v21  ;;  %v6444_v44 = vadd.f32 %v17569_v41, %v6367_v61  ;;  %9753 = vrcp.f32 %v4638_v58  ;;  %v6506_v38 = vmax.f32 %v6442_v63, 0.0  ;;  %v4644_v15 = vpop.xlane.xlu1 %4643  ;;  %v17582_v58 = vld [vmem:[#allocation70_spill] sm:$0xff] }
 0x9ef   :  { %v6505_v27 = vmax.f32 %v6441_v5, 0.0  ;;  %v6507_v12 = vmax.f32 %v6443_v34, 0.0  ;;  %9755 = vrcp.f32 %v4635_v6  ;;  %v6446_v39 = vadd.f32 %v17569_v41, %v6369_v40  ;;  %v17581_v5 = vld [vmem:[#allocation50_spill] sm:$0xff] }
 0x9f0   :  { %v6508_v16 = vmax.f32 %v6444_v44, 0.0  ;;  %v6448_v33 = vadd.f32 %v17569_v41, %v6371_v43  ;;  %v6445_v30 = vadd.f32 %v17567_v54, %v15961_v56  ;;  %v6447_v29 = vadd.f32 %v17567_v54, %v15965_v28  ;;  %v4641_v49 = vpop.xlane.xlu0 %4640 }
 0x9f1   :  { %v16155_v48 = vpack.c.bf16 %v6507_v12, %v6505_v27  ;;  %v6373_v46 = vmul.f32 %v17568_v53, %v17575_v32  ;;  %v9748_v9 = vpop.eup %9747  ;;  %v6510_v31 = vmax.f32 %v6446_v39, 0.0  ;;  %v6375_v55 = vmul.f32 %v17568_v53, %v17576_v22  ;;  %v17585_v32 = vld [vmem:[#allocation59_spill] sm:$0xff] }
 0x9f2   :  { %v16163_v11 = vpack.c.bf16 %v6508_v16, %v6506_v38  ;;  %v6512_v10 = vmax.f32 %v6448_v33, 0.0  ;;  %9757 = vrcp.f32 %v4644_v15  ;;  %v16168_v35 = vmul.f32 %v9748_v9, %v17577_v17  ;;  %v4650_v21 = vpop.xlane.xlu1 %4649  ;;  %v17583_v16 = vld [vmem:[#allocation71_spill] sm:$0xff] }
 0x9f3   :  { %v6509_v56 = vmax.f32 %v6445_v30, 0.0  ;;  %v6511_v7 = vmax.f32 %v6447_v29, 0.0  ;;  %9759 = vrcp.f32 %v4641_v49  ;;  %v6450_v18 = vadd.f32 %v17569_v41, %v6373_v46  ;;  %v17584_v30 = vld [vmem:[#allocation80_spill] sm:$0xff] }
 0x9f4   :  { %v16170_v28 = vpack.c.bf16 %v6512_v10, %v6510_v31  ;;  %v6452_v37 = vadd.f32 %v17569_v41, %v6375_v55  ;;  %v6490_v62 = vmax.f32 %v16090_v2, 0.0  ;;  %9413 = vmatprep.mubr.msk.f32.mxu0 %vm4431_vm3, %v16168_v35  ;;  %v6449_v60 = vadd.f32 %v17567_v54, %v17578_v52  ;;  %v4647_v40 = vpop.xlane.xlu0 %4646  ;;  %v17586_v10 = vld [vmem:[#allocation63_spill] sm:$0xff]  ;;  %v17587_v55 = vld [vmem:[#allocation69_spill] sm:$0xff] }
 0x9f5   :  { %6751 = vmatmul.mubr.bf16.gmra.mxu1 %v16074_v3  ;;  %v16178_v59 = vpack.c.bf16 %v6511_v7, %v6509_v56  ;;  %v6451_v42 = vadd.f32 %v17567_v54, %v17579_v26  ;;  %v9750_v14 = vpop.eup %9749  ;;  %v6514_v20 = vmax.f32 %v6450_v18, 0.0  ;;  %v17580_v3 = vld [vmem:[#allocation45_spill] sm:$0xff]  ;;  %v6379_v34 = vmul.f32 %v17568_v53, %v17581_v5  ;;  %v17588_v7 = vld [vmem:[#allocation39_spill] sm:$0xff] }
 0x9f6   :  { %6758 = vmatprep.mubr.bf16.mxu1 %v16076_v24  ;;  %v6516_v61 = vmax.f32 %v6452_v37, 0.0  ;;  %v6377_v63 = vmul.f32 %v17568_v53, %v17580_v3  ;;  %9761 = vrcp.f32 %v4650_v21  ;;  %v4753_v44 = vmul.f32 %v9750_v14, %v17582_v58  ;;  %v4656_v9 = vpop.xlane.xlu1 %4655  ;;  %v17589_v37 = vld [vmem:[#allocation96_spill] sm:$0xff] }
 0x9f7   :  { %v6513_v43 = vmax.f32 %v6449_v60, 0.0  ;;  %v6515_v6 = vmax.f32 %v6451_v42, 0.0  ;;  %v9752_v38 = vpop.eup %9751  ;;  %9763 = vrcp.f32 %v4647_v40  ;;  %v6456_v12 = vadd.f32 %v17569_v41, %v6379_v34  ;;  %v17592_v40 = vld [vmem:[#allocation73_spill] sm:$0xff] }
 0x9f8   :  { %v16190_v27 = vpack.c.bf16 %v6516_v61, %v6514_v20  ;;  %v6454_v24 = vadd.f32 %v17569_v41, %v6377_v63  ;;  %v4754_v39 = vmul.f32 %v9752_v38, %v17583_v16  ;;  %7818 = vrot.lane.b32.xlu0 %v4753_v44, %s9964_s23  ;;  %9414 = vmatmul.mubr.msk.f32.vlgmr.msra.gmra.mxu0 %vm4431_vm3, %v4753_v44  ;;  %v7057_v46 = vadd.s32 56, %v17585_v32  ;;  %v4653_v17 = vpop.xlane.xlu0 %4652  ;;  %v17590_v20 = vld [vmem:[#allocation72_spill] sm:$0xff]  ;;  %v17591_v63 = vld [vmem:[#allocation54_spill] sm:$0xff]  ;;  %v17594_v16 = vld [vmem:[#allocation75_spill] sm:$0xff] }
 0x9f9   :  { %v16197_v33 = vpack.c.bf16 %v6515_v6, %v6513_v43  ;;  %v6453_v29 = vadd.f32 %v17567_v54, %v17584_v30  ;;  %v6520_v31 = vmax.f32 %v6456_v12, 0.0  ;;  %v6455_v22 = vadd.f32 %v17567_v54, %v17586_v10  ;;  %v17593_v6 = vld [vmem:[#allocation67_spill] sm:$0xff] }
 0x9fa   :  { %v6518_v15 = vmax.f32 %v6454_v24, 0.0  ;;  %v6381_v49 = vmul.f32 %v17568_v53, %v17587_v55  ;;  %9765 = vrcp.f32 %v4656_v9  ;;  %7820 = vrot.lane.b32.xlu1 %v4754_v39, %s9964_s23  ;;  %9416 = vmatprep.mubr.msk.f32.mxu0 %vm4431_vm3, %v4754_v39  ;;  %v6383_v18 = vmul.f32 %v17568_v53, %v17588_v7  ;;  %v4662_v34 = vpop.xlane.xlu1 %4661  ;;  %v17600_v7 = vld [vmem:[#allocation81_spill] sm:$0xff] }
 0x9fb   :  { %v6517_v56 = vmax.f32 %v6453_v29, 0.0  ;;  %v6457_v52 = vadd.f32 %v17567_v54, %v17589_v37  ;;  %v9754_v60 = vpop.eup %9753  ;;  %9767 = vrcp.f32 %v4653_v17  ;;  %v6519_v42 = vmax.f32 %v6455_v22, 0.0  ;;  %v17595_v29 = vld [vmem:[#allocation76_spill] sm:$0xff] }
 0x9fc   :  { %v16212_v26 = vpack.c.bf16 %v6520_v31, %v6518_v15  ;;  %v6458_v14 = vadd.f32 %v17569_v41, %v6381_v49  ;;  %v9756_v21 = vpop.eup %9755  ;;  %v4756_v61 = vmul.f32 %v9754_v60, %v17590_v20  ;;  %v6460_v3 = vadd.f32 %v17569_v41, %v6383_v18  ;;  %v4659_v24 = vpop.xlane.xlu0 %4658  ;;  %v17599_v49 = vld [vmem:[#allocation79_spill] sm:$0xff] }
 0x9fd   :  { %6759 = vmatmul.mubr.bf16.gmra.mxu1 %v16078_v0  ;;  %v6459_v53 = vadd.f32 %v17567_v54, %v17591_v63  ;;  %v6521_v5 = vmax.f32 %v6457_v52, 0.0  ;;  %v4755_v58 = vmul.f32 %v9756_v21, %v17592_v40  ;;  %v16222_v44 = vpack.c.bf16 %v6519_v42, %v6517_v56  ;;  %v17601_v52 = vld [vmem:[#allocation82_spill] sm:$0xff]  ;;  %v17602_v20 = vld [vmem:[#allocation83_spill] sm:$0xff]  ;;  %v17603_v63 = vld [vmem:[#allocation84_spill] sm:$0xff] }
 0x9fe   :  { %6766 = vmatprep.mubr.bf16.mxu1 %v16099_v23  ;;  %v6522_v43 = vmax.f32 %v6458_v14, 0.0  ;;  %v7065_v38 = vsub.s32 %v7057_v46, %v17593_v6  ;;  %v6492_v0 = vmax.f32 %v16093_v57, 0.0  ;;  %9769 = vrcp.f32 %v4662_v34  ;;  %7816 = vrot.lane.b32.xlu1 %v16168_v35, %s9964_s23  ;;  %v4668_v35 = vpop.xlane.xlu1 %4667  ;;  %v17604_v40 = vld [vmem:[#allocation85_spill] sm:$0xff] }
 0x9ff   :  { %v6524_v41 = vmax.f32 %v6460_v3, 0.0  ;;  %v6523_v54 = vmax.f32 %v6459_v53, 0.0  ;;  %v9758_v12 = vpop.eup %9757  ;;  %9771 = vrcp.f32 %v4659_v24  ;;  %9417 = vmatmul.mubr.msk.f32.gmra.mxu0 %vm4431_vm3, %v4755_v58  ;;  %v6537_v9 = vpack.c.bf16 %v6487_v13, %v6485_v25  ;;  %v17598_v25 = vld [vmem:[#allocation78_spill] sm:$0xff] }
 0xa00   :  { %vm7073_vm8 = vcmp.eq.s32.totalorder %v7065_v38, 0  ;;  %vm7081_vm9 = vcmp.eq.s32.totalorder %v7065_v38, 16  ;;  %vm7089_vm10 = vcmp.eq.s32.totalorder %v7065_v38, 32  ;;  %v9760_v23 = vpop.eup %9759  ;;  %9419 = vmatprep.mubr.msk.f32.mxu0 %vm4431_vm3, %v4756_v61  ;;  %v4758_v39 = vmul.f32 %v9758_v12, %v17594_v16  ;;  %v4665_v15 = vpop.xlane.xlu0 %4664  ;;  %v17607_v16 = vld [vmem:[#allocation88_spill] sm:$0xff] }
 0xa01   :  { %v16231_v57 = vpack.c.bf16 %v6524_v41, %v6522_v43  ;;  %v16233_v30 = vpack.c.bf16 %v6523_v54, %v6521_v5  ;;  %vm7097_vm11 = vcmp.eq.s32.totalorder %v7065_v38, 48  ;;  %vm7105_vm12 = vmor %vm7073_vm8, %vm7081_vm9  ;;  %v4757_v46 = vmul.f32 %v9760_v23, %v17595_v29  ;;  %v17606_v54 = vld [vmem:[#allocation87_spill] sm:$0xff] }
 0xa02   :  { %vm7113_vm13 = vmor %vm7105_vm12, %vm7089_vm10  ;;  %9773 = vrcp.f32 %v4668_v35  ;;  %7828 = vrot.lane.b32.xlu0 %v4758_v39, %s9964_s23  ;;  %7822 = vrot.lane.b32.xlu1 %v4755_v58, %s9964_s23  ;;  %v6540_v22 = vpack.c.bf16 %v6492_v0, %v6490_v62  ;;  %v9965_v19 = vmov 1.0   ;;  %v4674_v55 = vpop.xlane.xlu1 %4673 }
 0xa03   :  { %vm16242_vm14 = vmor %vm7113_vm13, %vm7097_vm11  ;;  %v9762_v10 = vpop.eup %9761  ;;  %9775 = vrcp.f32 %v4665_v15  ;;  %9420 = vmatmul.mubr.msk.f32.gmra.mxu0 %vm4431_vm3, %v4757_v46 }
 0xa04   :  { %9525 = vmatprep.subr.msk.mxu1 %vm16242_vm14, %v9965_v19  ;;  %v9764_v47 = vpop.eup %9763  ;;  %9422 = vmatprep.mubr.msk.f32.mxu0 %vm4431_vm3, %v4758_v39  ;;  %v4760_v13 = vmul.f32 %v9762_v10, %v17598_v25  ;;  %9777 = vrcp.f32 %v4674_v55  ;;  %v4671_v2 = vpop.xlane.xlu0 %4670  ;;  %v17610_v25 = vld [vmem:[#allocation55_spill] sm:$0xff] }
 0xa05   :  { %6767 = vmatmul.mubr.bf16.gmra.mxu1 %v6537_v9  ;;  %v4759_v17 = vmul.f32 %v9764_v47, %v17599_v49  ;;  %9461 = vmatprep.subr.msk.mxu0 %vm16242_vm14, %v9965_v19  ;;  %9779 = vrcp.f32 %v4671_v2  ;;  %v17611_v49 = vld [vmem:[#allocation56_spill] sm:$0xff] }
 0xa06   :  { %6774 = vmatprep.mubr.bf16.mxu1 %v6540_v22  ;;  %9533 = vmatpush3.msk.msra.mxu1 %vm16242_vm14, %v9965_v19  ;;  %v4680_v37 = vpop.xlane.xlu1 %4679 }
 0xa07   :  { %7824 = vrot.lane.b32.xlu0 %v4756_v61, %s9964_s23  ;;  %v9766_v62 = vpop.eup %9765  ;;  %7830 = vrot.lane.b32.xlu1 %v4759_v17, %s9964_s23  ;;  %9781 = vrcp.f32 %v4680_v37 }
 0xa08   :  { %9423 = vmatmul.mubr.msk.f32.gmra.mxu0 %vm4431_vm3, %v4759_v17  ;;  %v9768_v56 = vpop.eup %9767  ;;  %v4762_v18 = vmul.f32 %v9766_v62, %v17600_v7  ;;  %v4677_v42 = vpop.xlane.xlu0 %4676 }
 0xa09   :  { %9425 = vmatprep.mubr.msk.f32.mxu0 %vm4431_vm3, %v4760_v13  ;;  %9462 = vmatpush3.msk.msra.mxu0 %vm16242_vm14, %v9965_v19  ;;  %v4761_v60 = vmul.f32 %v9768_v56, %v17601_v52  ;;  %9783 = vrcp.f32 %v4677_v42  ;;  %v17612_v56 = vld [vmem:[#allocation58_spill] sm:$0xff] }
 0xa0a   :  { %v4686_v3 = vpop.xlane.xlu1 %4685 }
 0xa0b   :  { %7836 = vrot.lane.b32.xlu0 %v4762_v18, %s9964_s23  ;;  %v9770_v14 = vpop.eup %9769  ;;  %7826 = vrot.lane.b32.xlu1 %v4757_v46, %s9964_s23  ;;  %9785 = vrcp.f32 %v4686_v3  ;;  %v17608_v46 = vld [vmem:[#allocation89_spill] sm:$0xff] }
 0xa0c   :  { %9426 = vmatmul.mubr.msk.f32.gmra.mxu0 %vm4431_vm3, %v4761_v60  ;;  %v9772_v21 = vpop.eup %9771  ;;  %v4764_v61 = vmul.f32 %v9770_v14, %v17602_v20  ;;  %v4683_v5 = vpop.xlane.xlu0 %4682  ;;  %v17614_v14 = vld [vmem:[#allocation57_spill] sm:$0xff]  ;;  %v17615_v20 = vld [vmem:[#allocation92_spill] sm:$0xff] }
 0xa0d   :  { %6775 = vmatmul.mubr.bf16.gmra.mxu1 %v16107_v45  ;;  %9428 = vmatprep.mubr.msk.f32.mxu0 %vm4431_vm3, %v4762_v18  ;;  %v4763_v53 = vmul.f32 %v9772_v21, %v17603_v63  ;;  %9787 = vrcp.f32 %v4683_v5 }
 0xa0e   :  { %6782 = vmatprep.mubr.bf16.mxu1 %v16111_v36  ;;  %v4692_v43 = vpop.xlane.xlu1 %4691  ;;  %v17605_v36 = vld [vmem:[#allocation86_spill] sm:$0xff] }
 0xa0f   :  { %7832 = vrot.lane.b32.xlu0 %v4760_v13, %s9964_s23  ;;  %v9774_v34 = vpop.eup %9773  ;;  %7838 = vrot.lane.b32.xlu1 %v4763_v53, %s9964_s23  ;;  %9789 = vrcp.f32 %v4692_v43 }
 0xa10   :  { %9429 = vmatmul.mubr.msk.f32.gmra.mxu0 %vm4431_vm3, %v4763_v53  ;;  %v9776_v45 = vpop.eup %9775  ;;  %v4766_v58 = vmul.f32 %v9774_v34, %v17604_v40  ;;  %v4689_v0 = vpop.xlane.xlu0 %4688  ;;  %v17617_v34 = vld [vmem:[#allocation95_spill] sm:$0xff] }
 0xa11   :  { %9431 = vmatprep.mubr.msk.f32.mxu0 %vm4431_vm3, %v4764_v61  ;;  %v4765_v38 = vmul.f32 %v9776_v45, %v17605_v36  ;;  %v9778_v24 = vpop.eup %9777  ;;  %9791 = vrcp.f32 %v4689_v0  ;;  %v17619_v36 = vld [vmem:[#allocation98_spill] sm:$0xff]  ;;  %v7056_v0 = vadd.s32 48, %v17585_v32 }
 0xa12   :  { %v9780_v41 = vpop.eup %9779  ;;  %v4768_v12 = vmul.f32 %v9778_v24, %v17606_v54  ;;  %v4698_v23 = vpop.xlane.xlu1 %4697  ;;  %v17620_v54 = vld [vmem:[#allocation99_spill] sm:$0xff] }
 0xa13   :  { %7844 = vrot.lane.b32.xlu0 %v4766_v58, %s9964_s23  ;;  %7834 = vrot.lane.b32.xlu1 %v4761_v60, %s9964_s23  ;;  %v4767_v39 = vmul.f32 %v9780_v41, %v17607_v16  ;;  %9793 = vrcp.f32 %v4698_v23  ;;  %v7064_v41 = vsub.s32 %v7056_v0, %v17593_v6  ;;  %v17621_v23 = vld [vmem:[#allocation100_spill] sm:$0xff] }
 0xa14   :  { %9432 = vmatmul.mubr.msk.f32.gmra.mxu0 %vm4431_vm3, %v4765_v38  ;;  %v4695_v35 = vpop.xlane.xlu0 %4694  ;;  %v9782_v29 = vpop.eup %9781 }
 0xa15   :  { %6783 = vmatmul.mubr.bf16.gmra.mxu1 %v16119_v51  ;;  %9434 = vmatprep.mubr.msk.f32.mxu0 %vm4431_vm3, %v4766_v58  ;;  %9795 = vrcp.f32 %v4695_v35  ;;  %v4770_v9 = vmul.f32 %v9782_v29, %v17608_v46  ;;  %v17618_v58 = vld [vmem:[#allocation97_spill] sm:$0xff]  ;;  %vm7072_vm15 = vcmp.eq.s32.totalorder %v7064_v41, 0  ;;  %vm7080_vm0 = vcmp.eq.s32.totalorder %v7064_v41, 16 }
 0xa16   :  { %6790 = vmatprep.mubr.bf16.mxu1 %v16124_v1  ;;  %v9784_v51 = vpop.eup %9783  ;;  %v4704_v15 = vpop.xlane.xlu1 %4703  ;;  %v17609_v1 = vld [vmem:[#allocation90_spill] sm:$0xff]  ;;  %vm7088_vm2 = vcmp.eq.s32.totalorder %v7064_v41, 32  ;;  %vm7096_vm4 = vcmp.eq.s32.totalorder %v7064_v41, 48  ;;  %vm7104_vm5 = vmor %vm7072_vm15, %vm7080_vm0  ;;  %v7058_v46 = vsub.s32 %v17585_v32, %v17593_v6 }
 0xa17   :  { %7840 = vrot.lane.b32.xlu0 %v4764_v61, %s9964_s23  ;;  %7846 = vrot.lane.b32.xlu1 %v4767_v39, %s9964_s23  ;;  %v4769_v31 = vmul.f32 %v9784_v51, %v17609_v1  ;;  %9797 = vrcp.f32 %v4704_v15  ;;  %vm7112_vm6 = vmor %vm7104_vm5, %vm7088_vm2  ;;  %v7051_v51 = vadd.s32 8, %v17585_v32 }
 0xa18   :  { %9435 = vmatmul.mubr.msk.f32.gmra.mxu0 %vm4431_vm3, %v4767_v39  ;;  %v4701_v10 = vpop.xlane.xlu0 %4700  ;;  %v9786_v22 = vpop.eup %9785  ;;  %vm7120_vm7 = vmor %vm7112_vm6, %vm7096_vm4  ;;  %v17622_v39 = vld [vmem:[#allocation101_spill] sm:$0xff] }
 0xa19   :  { %9437 = vmatprep.mubr.msk.f32.mxu0 %vm4431_vm3, %v4768_v12  ;;  %9799 = vrcp.f32 %v4701_v10  ;;  %v4772_v13 = vmul.f32 %v9786_v22, %v17610_v25  ;;  %9526 = vmatprep.subr.msk.mxu1 %vm7120_vm7, %v9965_v19 }
 0xa1a   :  { %v9788_v47 = vpop.eup %9787  ;;  %v4710_v55 = vpop.xlane.xlu1 %4709  ;;  %9534 = vmatpush3.msk.msra.mxu1 %vm7120_vm7, %v9965_v19  ;;  %9463 = vmatprep.subr.msk.mxu0 %vm7120_vm7, %v9965_v19 }
 0xa1b   :  { %7852 = vrot.lane.b32.xlu0 %v4770_v9, %s9964_s23  ;;  %7842 = vrot.lane.b32.xlu1 %v4765_v38, %s9964_s23  ;;  %v4771_v17 = vmul.f32 %v9788_v47, %v17611_v49  ;;  %9801 = vrcp.f32 %v4710_v55 }
 0xa1c   :  { %9438 = vmatmul.mubr.msk.f32.gmra.mxu0 %vm4431_vm3, %v4769_v31  ;;  %v4707_v2 = vpop.xlane.xlu0 %4706  ;;  %v9790_v62 = vpop.eup %9789 }
 0xa1d   :  { %6791 = vmatmul.mubr.bf16.gmra.mxu1 %v16131_v50  ;;  %9440 = vmatprep.mubr.msk.f32.mxu0 %vm4431_vm3, %v4770_v9  ;;  %9803 = vrcp.f32 %v4707_v2  ;;  %v4774_v7 = vmul.f32 %v9790_v62, %v17612_v56  ;;  %v7059_v9 = vsub.s32 %v7051_v51, %v17593_v6 }
 0xa1e   :  { %6798 = vmatprep.mubr.bf16.mxu1 %v16146_v4  ;;  %v9792_v50 = vpop.eup %9791  ;;  %v4716_v18 = vpop.xlane.xlu1 %4715  ;;  %v17613_v4 = vld [vmem:[#allocation60_spill] sm:$0xff]  ;;  %9464 = vmatpush3.msk.msra.mxu0 %vm7120_vm7, %v9965_v19 }
 0xa1f   :  { %7848 = vrot.lane.b32.xlu0 %v4768_v12, %s9964_s23  ;;  %7854 = vrot.lane.b32.xlu1 %v4771_v17, %s9964_s23  ;;  %v4773_v37 = vmul.f32 %v9792_v50, %v17613_v4  ;;  %9805 = vrcp.f32 %v4716_v18 }
 0xa20   :  { %9441 = vmatmul.mubr.msk.f32.gmra.mxu0 %vm4431_vm3, %v4771_v17  ;;  %v4713_v52 = vpop.xlane.xlu0 %4712  ;;  %v9794_v60 = vpop.eup %9793 }
 0xa21   :  { %9443 = vmatprep.mubr.msk.f32.mxu0 %vm4431_vm3, %v4772_v13  ;;  %9807 = vrcp.f32 %v4713_v52  ;;  %v4776_v21 = vmul.f32 %v9794_v60, %v17614_v14 }
 0xa22   :  { %v9796_v42 = vpop.eup %9795 }
 0xa23   :  { %7860 = vrot.lane.b32.xlu0 %v4774_v7, %s9964_s23  ;;  %7850 = vrot.lane.b32.xlu1 %v4769_v31, %s9964_s23  ;;  %v4775_v61 = vmul.f32 %v9796_v42, %v17615_v20 }
 0xa24   :  { %9444 = vmatmul.mubr.msk.f32.gmra.mxu0 %vm4431_vm3, %v4773_v37  ;;  %v4719_v3 = vpop.xlane.xlu0 %4718  ;;  %v9798_v63 = vpop.eup %9797 }
 0xa25   :  { %6799 = vmatmul.mubr.bf16.gmra.mxu1 %v16148_v8  ;;  %9446 = vmatprep.mubr.msk.f32.mxu0 %vm4431_vm3, %v4774_v7  ;;  %9809 = vrcp.f32 %v4719_v3  ;;  %v17616_v8 = vld [vmem:[#allocation94_spill] sm:$0xff] }
 0xa26   :  { %6806 = vmatprep.mubr.bf16.mxu1 %v16163_v11  ;;  %v9800_v53 = vpop.eup %9799  ;;  %v4778_v5 = vmul.f32 %v9798_v63, %v17616_v8 }
 0xa27   :  { %7856 = vrot.lane.b32.xlu0 %v4772_v13, %s9964_s23  ;;  %7862 = vrot.lane.b32.xlu1 %v4775_v61, %s9964_s23  ;;  %v4777_v45 = vmul.f32 %v9800_v53, %v17617_v34 }
 0xa28   :  { %9447 = vmatmul.mubr.msk.f32.gmra.mxu0 %vm4431_vm3, %v4775_v61  ;;  %v9802_v11 = vpop.eup %9801 }
 0xa29   :  { %9449 = vmatprep.mubr.msk.f32.mxu0 %vm4431_vm3, %v4776_v21  ;;  %v4780_v43 = vmul.f32 %v9802_v11, %v17618_v58 }
 0xa2a   :  { %v9804_v40 = vpop.eup %9803 }
 0xa2b   :  { %7868 = vrot.lane.b32.xlu0 %v4778_v5, %s9964_s23  ;;  %7858 = vrot.lane.b32.xlu1 %v4773_v37, %s9964_s23  ;;  %v4779_v38 = vmul.f32 %v9804_v40, %v17619_v36 }
 0xa2c   :  { %9450 = vmatmul.mubr.msk.f32.gmra.mxu0 %vm4431_vm3, %v4777_v45  ;;  %v9806_v24 = vpop.eup %9805 }
 0xa2d   :  { %6807 = vmatmul.mubr.bf16.gmra.mxu1 %v16155_v48  ;;  %9452 = vmatprep.mubr.msk.f32.mxu0 %vm4431_vm3, %v4778_v5  ;;  %v4782_v12 = vmul.f32 %v9806_v24, %v17620_v54 }
 0xa2e   :  { %6814 = vmatprep.mubr.bf16.mxu1 %v16170_v28  ;;  %v9808_v48 = vpop.eup %9807 }
 0xa2f   :  { %7864 = vrot.lane.b32.xlu0 %v4776_v21, %s9964_s23  ;;  %7870 = vrot.lane.b32.xlu1 %v4779_v38, %s9964_s23  ;;  %v4781_v28 = vmul.f32 %v9808_v48, %v17621_v23 }
 0xa30   :  { %9453 = vmatmul.mubr.msk.f32.gmra.mxu0 %vm4431_vm3, %v4779_v38 }
 0xa31   :  { %9455 = vmatprep.mubr.msk.f32.mxu0 %vm4431_vm3, %v4780_v43 }
 0xa32   :  { %v9810_v16 = vpop.eup %9809 }
 0xa33   :  { %7876 = vrot.lane.b32.xlu0 %v4782_v12, %s9964_s23  ;;  %7866 = vrot.lane.b32.xlu1 %v4777_v45, %s9964_s23  ;;  %v4783_v35 = vmul.f32 %v9810_v16, %v17622_v39 }
 0xa34   :  { %9456 = vmatmul.mubr.msk.f32.gmra.mxu0 %vm4431_vm3, %v4781_v28 }
 0xa35   :  { %6815 = vmatmul.mubr.bf16.gmra.mxu1 %v16178_v59  ;;  %9458 = vmatprep.mubr.msk.f32.mxu0 %vm4431_vm3, %v4782_v12  ;;  %v7055_v59 = vadd.s32 40, %v17585_v32 }
 0xa36   :  { %6822 = vmatprep.mubr.bf16.mxu1 %v16190_v27 }
 0xa37   :  { %7872 = vrot.lane.b32.xlu0 %v4780_v43, %s9964_s23  ;;  %7878 = vrot.lane.b32.xlu1 %v4783_v35, %s9964_s23  ;;  %v7063_v27 = vsub.s32 %v7055_v59, %v17593_v6 }
 0xa38   :  { %9459 = vmatmul.mubr.msk.f32.gmra.mxu0 %vm4431_vm3, %v4783_v35 }
 0xa39   :  { %vm7071_vm8 = vcmp.eq.s32.totalorder %v7063_v27, 0  ;;  %vm7079_vm9 = vcmp.eq.s32.totalorder %v7063_v27, 16  ;;  %vm7087_vm10 = vcmp.eq.s32.totalorder %v7063_v27, 32 }
 0xa3a   :  { %vm7103_vm11 = vmor %vm7071_vm8, %vm7079_vm9  ;;  %vm7067_vm9 = vcmp.eq.s32.totalorder %v7059_v9, 0 }
 0xa3b   :  { %7874 = vrot.lane.b32.xlu1 %v4781_v28, %s9964_s23  ;;  %vm7111_vm3 = vmor %vm7103_vm11, %vm7087_vm10  ;;  %vm7066_vm10 = vcmp.eq.s32.totalorder %v7058_v46, 0  ;;  %vm8201_vm11 = vcmask 97280  }
 0xa3c   :  { %9527 = vmatprep.subr.msk.mxu1 %vm7111_vm3, %v9965_v19  ;;  %9465 = vmatprep.subr.msk.mxu0 %vm7111_vm3, %v9965_v19 }
 0xa3d   :  { %6823 = vmatmul.mubr.bf16.gmra.mxu1 %v16197_v33  ;;  %9466 = vmatpush3.msk.msra.mxu0 %vm7111_vm3, %v9965_v19  ;;  %v7054_v33 = vadd.s32 32, %v17585_v32 }
 0xa3e   :  { %6830 = vmatprep.mubr.bf16.mxu1 %v16212_v26  ;;  %9535 = vmatpush3.msk.msra.mxu1 %vm7111_vm3, %v9965_v19  ;;  %vm8234_vm3 = vcmask 228352  }
 0xa3f   :  { %v7062_v26 = vsub.s32 %v7054_v33, %v17593_v6 }
 0xa41   :  { %vm7070_vm12 = vcmp.eq.s32.totalorder %v7062_v26, 0  ;;  %vm7078_vm13 = vcmp.eq.s32.totalorder %v7062_v26, 16  ;;  %vm7086_vm14 = vcmp.eq.s32.totalorder %v7062_v26, 32 }
 0xa42   :  { %vm7102_vm15 = vmor %vm7070_vm12, %vm7078_vm13  ;;  %vm8267_vm12 = vcmask 752640  }
 0xa43   :  { %vm7110_vm0 = vmor %vm7102_vm15, %vm7086_vm14 }
 0xa44   :  { %9528 = vmatprep.subr.msk.mxu1 %vm7110_vm0, %v9965_v19  ;;  %9467 = vmatprep.subr.msk.mxu0 %vm7110_vm0, %v9965_v19 }
 0xa45   :  { %6831 = vmatmul.mubr.bf16.gmra.mxu1 %v16222_v44  ;;  %9468 = vmatpush3.msk.msra.mxu0 %vm7110_vm0, %v9965_v19  ;;  %v7053_v44 = vadd.s32 24, %v17585_v32 }
 0xa46   :  { %6838 = vmatprep.mubr.bf16.mxu1 %v16231_v57  ;;  %9536 = vmatpush3.msk.msra.mxu1 %vm7110_vm0, %v9965_v19 }
 0xa47   :  { %v7061_v57 = vsub.s32 %v7053_v44, %v17593_v6 }
 0xa49   :  { %vm7069_vm2 = vcmp.eq.s32.totalorder %v7061_v57, 0  ;;  %vm7077_vm4 = vcmp.eq.s32.totalorder %v7061_v57, 16 }
 0xa4a   :  { %vm7101_vm5 = vmor %vm7069_vm2, %vm7077_vm4 }
 0xa4b   :  { %9529 = vmatprep.subr.msk.mxu1 %vm7101_vm5, %v9965_v19  ;;  %9469 = vmatprep.subr.msk.mxu0 %vm7101_vm5, %v9965_v19 }
 0xa4c   :  { %9537 = vmatpush3.msk.msra.mxu1 %vm7101_vm5, %v9965_v19  ;;  %9470 = vmatpush3.msk.msra.mxu0 %vm7101_vm5, %v9965_v19 }
 0xa4d   :  { %6839 = vmatmul.mubr.bf16.gmra.mxu1 %v16233_v30  ;;  %v7052_v30 = vadd.s32 16, %v17585_v32 }
 0xa4f   :  { %v7060_v29 = vsub.s32 %v7052_v30, %v17593_v6  ;;  %v16401_v6 = vld [vmem:[%s16903_s14 + $0x35] ss:$0 sm:$0xff]  ;;  %s9966_s14 = smov 28  }
 0xa51   :  { %vm7068_vm6 = vcmp.eq.s32.totalorder %v7060_v29, 0  ;;  %vm7076_vm7 = vcmp.eq.s32.totalorder %v7060_v29, 16 }
 0xa52   :  { %vm7100_vm8 = vmor %vm7068_vm6, %vm7076_vm7 }
 0xa53   :  { %9530 = vmatprep.subr.msk.mxu1 %vm7100_vm8, %v9965_v19  ;;  %9471 = vmatprep.subr.msk.mxu0 %vm7100_vm8, %v9965_v19 }
 0xa54   :  { %9538 = vmatpush3.msk.msra.mxu1 %vm7100_vm8, %v9965_v19  ;;  %9472 = vmatpush3.msk.msra.mxu0 %vm7100_vm8, %v9965_v19 }
 0xa55   :  { %9473 = vmatprep.subr.msk.mxu0 %vm7067_vm9, %v9965_v19  ;;  %9531 = vmatprep.subr.msk.mxu1 %vm7067_vm9, %v9965_v19 }
 0xa56   :  { %9474 = vmatpush3.msk.msra.mxu0 %vm7067_vm9, %v9965_v19  ;;  %9539 = vmatpush3.msk.msra.mxu1 %vm7067_vm9, %v9965_v19 }
 0xa57   :  { %9475 = vmatprep.subr.msk.mxu0 %vm7066_vm10, %v9965_v19  ;;  %9532 = vmatprep.subr.msk.mxu1 %vm7066_vm10, %v9965_v19 }
 0xa58   :  { %9476 = vmatpush3.msk.msra.mxu0 %vm7066_vm10, %v9965_v19  ;;  %9540 = vmatpush3.msk.msra.mxu1 %vm7066_vm10, %v9965_v19 }
 0xa95   :  { %v8862_v32 = vpop.f32.mrf.mxu1 }
 0xa97   :  { %v8863_v15 = vpop.f32.mrf.mxu1 }
 0xa98   :  { %v8864_v1 = vadd.f32 %v8863_v15, %v8862_v32 }
 0xa99   :  { %v8865_v31 = vpop.f32.mrf.mxu1 }
 0xa9a   :  { %v6721_v10 = vadd.f32 %v8864_v1, %v16401_v6 }
 0xa9b   :  { %v8866_v22 = vpop.f32.mrf.mxu1 }
 0xa9c   :  { %v8542_v47 = vmul.f32 -1.442695, %v6721_v10  ;;  %v8867_v25 = vadd.f32 %v8866_v22, %v8865_v31 }
 0xa9d   :  { %v8868_v13 = vpop.f32.mrf.mxu1 }
 0xa9e   :  { %9811 = vpow2.f32 %v8542_v47  ;;  %v6724_v55 = vadd.f32 %v8867_v25, %v16401_v6 }
 0xa9f   :  { %v8869_v49 = vpop.f32.mrf.mxu1 }
 0xaa0   :  { %v8543_v19 = vmul.f32 -1.442695, %v6724_v55  ;;  %v8870_v17 = vadd.f32 %v8869_v49, %v8868_v13 }
 0xaa1   :  { %v8871_v2 = vpop.f32.mrf.mxu1 }
 0xaa2   :  { %9813 = vpow2.f32 %v8543_v19  ;;  %v6729_v62 = vadd.f32 %v8870_v17, %v16401_v6 }
 0xaa3   :  { %v8872_v50 = vpop.f32.mrf.mxu1 }
 0xaa4   :  { %v8544_v56 = vmul.f32 -1.442695, %v6729_v62  ;;  %v8873_v7 = vadd.f32 %v8872_v50, %v8871_v2 }
 0xaa5   :  { %v8874_v18 = vpop.f32.mrf.mxu1 }
 0xaa6   :  { %9815 = vpow2.f32 %v8544_v56  ;;  %v6732_v4 = vadd.f32 %v8873_v7, %v16401_v6 }
 0xaa7   :  { %v8875_v37 = vpop.f32.mrf.mxu1 }
 0xaa8   :  { %v8545_v52 = vmul.f32 -1.442695, %v6732_v4  ;;  %v8876_v60 = vadd.f32 %v8875_v37, %v8874_v18 }
 0xaa9   :  { %v8877_v42 = vpop.f32.mrf.mxu1 }
 0xaaa   :  { %9817 = vpow2.f32 %v8545_v52  ;;  %v6737_v14 = vadd.f32 %v8876_v60, %v16401_v6 }
 0xaab   :  { %v9812_v21 = vpop.eup %9811  ;;  %v8878_v20 = vpop.f32.mrf.mxu1 }
 0xaac   :  { %v6943_v61 = vadd.f32 1.0, %v9812_v21  ;;  %v8546_v3 = vmul.f32 -1.442695, %v6737_v14  ;;  %v8879_v63 = vadd.f32 %v8878_v20, %v8877_v42 }
 0xaad   :  { %v8880_v53 = vpop.f32.mrf.mxu1 }
 0xaae   :  { %9819 = vrcp.f32 %v6943_v61  ;;  %v6740_v8 = vadd.f32 %v8879_v63, %v16401_v6 }
 0xaaf   :  { %v9814_v5 = vpop.eup %9813  ;;  %9821 = vpow2.f32 %v8546_v3  ;;  %v8881_v34 = vpop.f32.mrf.mxu1 }
 0xab0   :  { %v6944_v45 = vadd.f32 1.0, %v9814_v5  ;;  %v8547_v11 = vmul.f32 -1.442695, %v6740_v8  ;;  %v8882_v40 = vadd.f32 %v8881_v34, %v8880_v53 }
 0xab1   :  { %v8883_v58 = vpop.f32.mrf.mxu1 }
 0xab2   :  { %9823 = vrcp.f32 %v6944_v45  ;;  %v6745_v43 = vadd.f32 %v8882_v40, %v16401_v6 }
 0xab3   :  { %v9816_v36 = vpop.eup %9815  ;;  %9825 = vpow2.f32 %v8547_v11  ;;  %v8884_v38 = vpop.f32.mrf.mxu1 }
 0xab4   :  { %v6945_v0 = vadd.f32 1.0, %v9816_v36  ;;  %v8548_v24 = vmul.f32 -1.442695, %v6745_v43  ;;  %v8885_v41 = vadd.f32 %v8884_v38, %v8883_v58 }
 0xab5   :  { %v8886_v48 = vpop.f32.mrf.mxu1 }
 0xab6   :  { %9827 = vrcp.f32 %v6945_v0  ;;  %v6748_v54 = vadd.f32 %v8885_v41, %v16401_v6 }
 0xab7   :  { %v9818_v12 = vpop.eup %9817  ;;  %9829 = vpow2.f32 %v8548_v24  ;;  %v8887_v23 = vpop.f32.mrf.mxu1 }
 0xab8   :  { %v6946_v28 = vadd.f32 1.0, %v9818_v12  ;;  %v8549_v16 = vmul.f32 -1.442695, %v6748_v54  ;;  %v8888_v39 = vadd.f32 %v8887_v23, %v8886_v48  ;;  %v9415_v59 = vpop.f32.mrf.mxu0 }
 0xab9   :  { %v8889_v35 = vpop.f32.mrf.mxu1 }
 0xaba   :  { %9831 = vrcp.f32 %v6946_v28  ;;  %v6753_v27 = vadd.f32 %v8888_v39, %v16401_v6  ;;  %v7304_v44 = vpop.f32.mrf.mxu0 }
 0xabb   :  { %v9820_v33 = vpop.eup %9819  ;;  %9833 = vpow2.f32 %v8549_v16  ;;  %v8890_v26 = vpop.f32.mrf.mxu1 }
 0xabc   :  { %v9822_v57 = vpop.eup %9821  ;;  %v8550_v30 = vmul.f32 -1.442695, %v6753_v27  ;;  %v8891_v29 = vadd.f32 %v8890_v26, %v8889_v35  ;;  %8072 = vrot.lane.b32.xlu0 %v9820_v33, %s9966_s14  ;;  %v7463_v51 = vmul.f32 %v9820_v33, %v7304_v44 }
 0xabd   :  { %v6947_v46 = vadd.f32 1.0, %v9822_v57  ;;  %v8892_v9 = vpop.f32.mrf.mxu1 }
 0xabe   :  { %9835 = vpow2.f32 %v8550_v30  ;;  %v6756_v32 = vadd.f32 %v8891_v29, %v16401_v6  ;;  %9477 = vmatprep.mubr.msk.f32.mxu0 %vm836_vm1, %v7463_v51 }
 0xabf   :  { %v9824_v15 = vpop.eup %9823  ;;  %9837 = vrcp.f32 %v6947_v46  ;;  %v8893_v1 = vpop.f32.mrf.mxu1 }
 0xac0   :  { %v9826_v31 = vpop.eup %9825  ;;  %v8551_v10 = vmul.f32 -1.442695, %v6756_v32  ;;  %v8894_v22 = vadd.f32 %v8893_v1, %v8892_v9  ;;  %8074 = vrot.lane.b32.xlu1 %v9824_v15, %s9966_s14  ;;  %v7464_v47 = vmul.f32 %v9824_v15, %v9415_v59  ;;  %v9418_v25 = vpop.f32.mrf.mxu0 }
 0xac1   :  { %v6948_v13 = vadd.f32 1.0, %v9826_v31  ;;  %v8895_v55 = vpop.f32.mrf.mxu1 }
 0xac2   :  { %9839 = vpow2.f32 %v8551_v10  ;;  %v6761_v49 = vadd.f32 %v8894_v22, %v16401_v6  ;;  %v7314_v19 = vpop.f32.mrf.mxu0  ;;  %9478 = vmatmul.mubr.msk.f32.vlgmr.msra.gmra.mxu0 %vm836_vm1, %v7464_v47 }
 0xac3   :  { %v9828_v17 = vpop.eup %9827  ;;  %9841 = vrcp.f32 %v6948_v13  ;;  %v8896_v2 = vpop.f32.mrf.mxu1 }
 0xac4   :  { %v9830_v62 = vpop.eup %9829  ;;  %v8552_v50 = vmul.f32 -1.442695, %v6761_v49  ;;  %v8897_v56 = vadd.f32 %v8896_v2, %v8895_v55  ;;  %8076 = vrot.lane.b32.xlu0 %v9828_v17, %s9966_s14  ;;  %v7465_v7 = vmul.f32 %v9828_v17, %v7314_v19  ;;  %v9421_v37 = vpop.f32.mrf.mxu0 }
 0xac5   :  { %v6949_v18 = vadd.f32 1.0, %v9830_v62  ;;  %v8898_v4 = vpop.f32.mrf.mxu1 }
 0xac6   :  { %9843 = vpow2.f32 %v8552_v50  ;;  %v6764_v52 = vadd.f32 %v8897_v56, %v16401_v6  ;;  %9480 = vmatprep.mubr.msk.f32.mxu0 %vm836_vm1, %v7465_v7  ;;  %v7324_v53 = vpop.f32.mrf.mxu0 }
 0xac7   :  { %v9832_v60 = vpop.eup %9831  ;;  %9845 = vrcp.f32 %v6949_v18  ;;  %v8899_v42 = vpop.f32.mrf.mxu1 }
 0xac8   :  { %v9834_v14 = vpop.eup %9833  ;;  %v8553_v21 = vmul.f32 -1.442695, %v6764_v52  ;;  %v8900_v20 = vadd.f32 %v8899_v42, %v8898_v4  ;;  %8078 = vrot.lane.b32.xlu1 %v9832_v60, %s9966_s14  ;;  %v7466_v61 = vmul.f32 %v9832_v60, %v9418_v25  ;;  %v9424_v38 = vpop.f32.mrf.mxu0 }
 0xac9   :  { %v6950_v3 = vadd.f32 1.0, %v9834_v14  ;;  %v8901_v63 = vpop.f32.mrf.mxu1 }
 0xaca   :  { %9847 = vpow2.f32 %v8553_v21  ;;  %v6769_v8 = vadd.f32 %v8900_v20, %v16401_v6  ;;  %9481 = vmatmul.mubr.msk.f32.gmra.mxu0 %vm836_vm1, %v7466_v61  ;;  %v7334_v39 = vpop.f32.mrf.mxu0 }
 0xacb   :  { %v9836_v5 = vpop.eup %9835  ;;  %9849 = vrcp.f32 %v6950_v3  ;;  %v8902_v34 = vpop.f32.mrf.mxu1 }
 0xacc   :  { %v9838_v45 = vpop.eup %9837  ;;  %v6951_v11 = vadd.f32 1.0, %v9836_v5  ;;  %v8554_v40 = vmul.f32 -1.442695, %v6769_v8  ;;  %v8903_v58 = vadd.f32 %v8902_v34, %v8901_v63  ;;  %v9427_v51 = vpop.f32.mrf.mxu0 }
 0xacd   :  { %8080 = vrot.lane.b32.xlu0 %v9838_v45, %s9966_s14  ;;  %v8904_v43 = vpop.f32.mrf.mxu1  ;;  %v7467_v36 = vmul.f32 %v9838_v45, %v7324_v53 }
 0xace   :  { %9851 = vrcp.f32 %v6951_v11  ;;  %v6772_v0 = vadd.f32 %v8903_v58, %v16401_v6  ;;  %v7344_v25 = vpop.f32.mrf.mxu0 }
 0xacf   :  { %v9840_v24 = vpop.eup %9839  ;;  %9853 = vpow2.f32 %v8554_v40  ;;  %v8905_v41 = vpop.f32.mrf.mxu1  ;;  %9483 = vmatprep.mubr.msk.f32.mxu0 %vm836_vm1, %v7467_v36 }
 0xad0   :  { %v9842_v48 = vpop.eup %9841  ;;  %v6952_v54 = vadd.f32 1.0, %v9840_v24  ;;  %v8555_v12 = vmul.f32 -1.442695, %v6772_v0  ;;  %v8906_v23 = vadd.f32 %v8905_v41, %v8904_v43  ;;  %v9430_v7 = vpop.f32.mrf.mxu0 }
 0xad1   :  { %8082 = vrot.lane.b32.xlu1 %v9842_v48, %s9966_s14  ;;  %v8907_v28 = vpop.f32.mrf.mxu1  ;;  %v7468_v16 = vmul.f32 %v9842_v48, %v9421_v37 }
 0xad2   :  { %9855 = vrcp.f32 %v6952_v54  ;;  %v6777_v35 = vadd.f32 %v8906_v23, %v16401_v6  ;;  %v7354_v61 = vpop.f32.mrf.mxu0 }
 0xad3   :  { %v9844_v59 = vpop.eup %9843  ;;  %9857 = vpow2.f32 %v8555_v12  ;;  %v8908_v27 = vpop.f32.mrf.mxu1  ;;  %9484 = vmatmul.mubr.msk.f32.gmra.mxu0 %vm836_vm1, %v7468_v16 }
 0xad4   :  { %v9846_v33 = vpop.eup %9845  ;;  %v6953_v26 = vadd.f32 1.0, %v9844_v59  ;;  %v8556_v44 = vmul.f32 -1.442695, %v6777_v35  ;;  %v8909_v57 = vadd.f32 %v8908_v27, %v8907_v28  ;;  %v9433_v58 = vpop.f32.mrf.mxu0 }
 0xad5   :  { %8084 = vrot.lane.b32.xlu0 %v9846_v33, %s9966_s14  ;;  %v8910_v30 = vpop.f32.mrf.mxu1  ;;  %v7469_v29 = vmul.f32 %v9846_v33, %v7334_v39 }
 0xad6   :  { %9859 = vrcp.f32 %v6953_v26  ;;  %v6780_v46 = vadd.f32 %v8909_v57, %v16401_v6  ;;  %v7364_v23 = vpop.f32.mrf.mxu0 }
 0xad7   :  { %v9848_v9 = vpop.eup %9847  ;;  %9861 = vpow2.f32 %v8556_v44  ;;  %v8911_v32 = vpop.f32.mrf.mxu1  ;;  %9486 = vmatprep.mubr.msk.f32.mxu1 %vm836_vm1, %v7469_v29 }
 0xad8   :  { %v9850_v15 = vpop.eup %9849  ;;  %v6954_v1 = vadd.f32 1.0, %v9848_v9  ;;  %v8557_v31 = vmul.f32 -1.442695, %v6780_v46  ;;  %v8912_v10 = vadd.f32 %v8911_v32, %v8910_v30  ;;  %v9436_v57 = vpop.f32.mrf.mxu0 }
 0xad9   :  { %8086 = vrot.lane.b32.xlu1 %v9850_v15, %s9966_s14  ;;  %v8913_v22 = vpop.f32.mrf.mxu1  ;;  %v7470_v47 = vmul.f32 %v9850_v15, %v9424_v38 }
 0xada   :  { %9863 = vrcp.f32 %v6954_v1  ;;  %v6785_v13 = vadd.f32 %v8912_v10, %v16401_v6  ;;  %v7374_v10 = vpop.f32.mrf.mxu0 }
 0xadb   :  { %v9852_v55 = vpop.eup %9851  ;;  %9865 = vpow2.f32 %v8557_v31  ;;  %v8914_v49 = vpop.f32.mrf.mxu1  ;;  %9487 = vmatmul.mubr.msk.f32.vlgmr.msra.gmra.mxu1 %vm836_vm1, %v7470_v47 }
 0xadc   :  { %v9854_v19 = vpop.eup %9853  ;;  %v8558_v17 = vmul.f32 -1.442695, %v6785_v13  ;;  %v8915_v2 = vadd.f32 %v8914_v49, %v8913_v22  ;;  %8088 = vrot.lane.b32.xlu0 %v9852_v55, %s9966_s14  ;;  %v7471_v62 = vmul.f32 %v9852_v55, %v7344_v25 }
 0xadd   :  { %v6955_v50 = vadd.f32 1.0, %v9854_v19  ;;  %v8916_v56 = vpop.f32.mrf.mxu1 }
 0xade   :  { %9867 = vpow2.f32 %v8558_v17  ;;  %v6788_v18 = vadd.f32 %v8915_v2, %v16401_v6  ;;  %9489 = vmatprep.mubr.msk.f32.mxu1 %vm836_vm1, %v7471_v62  ;;  %v9439_v62 = vpop.f32.mrf.mxu0 }
 0xadf   :  { %v9856_v4 = vpop.eup %9855  ;;  %9869 = vrcp.f32 %v6955_v50  ;;  %v8917_v37 = vpop.f32.mrf.mxu1 }
 0xae0   :  { %v9858_v52 = vpop.eup %9857  ;;  %v8559_v60 = vmul.f32 -1.442695, %v6788_v18  ;;  %v8918_v42 = vadd.f32 %v8917_v37, %v8916_v56  ;;  %8090 = vrot.lane.b32.xlu1 %v9856_v4, %s9966_s14  ;;  %v7472_v14 = vmul.f32 %v9856_v4, %v9427_v51 }
 0xae1   :  { %v6956_v21 = vadd.f32 1.0, %v9858_v52  ;;  %v8919_v20 = vpop.f32.mrf.mxu1 }
 0xae2   :  { %9871 = vpow2.f32 %v8559_v60  ;;  %v6793_v3 = vadd.f32 %v8918_v42, %v16401_v6  ;;  %9490 = vmatmul.mubr.msk.f32.gmra.mxu1 %vm836_vm1, %v7472_v14  ;;  %v7384_v14 = vpop.f32.mrf.mxu0 }
 0xae3   :  { %v9860_v63 = vpop.eup %9859  ;;  %9873 = vrcp.f32 %v6956_v21  ;;  %v8920_v53 = vpop.f32.mrf.mxu1 }
 0xae4   :  { %v9862_v8 = vpop.eup %9861  ;;  %v8560_v5 = vmul.f32 -1.442695, %v6793_v3  ;;  %v8921_v34 = vadd.f32 %v8920_v53, %v8919_v20  ;;  %8092 = vrot.lane.b32.xlu0 %v9860_v63, %s9966_s14  ;;  %v7473_v45 = vmul.f32 %v9860_v63, %v7354_v61 }
 0xae5   :  { %v6957_v11 = vadd.f32 1.0, %v9862_v8  ;;  %v8922_v40 = vpop.f32.mrf.mxu1 }
 0xae6   :  { %9875 = vpow2.f32 %v8560_v5  ;;  %v6796_v43 = vadd.f32 %v8921_v34, %v16401_v6  ;;  %9492 = vmatprep.mubr.msk.f32.mxu1 %vm836_vm1, %v7473_v45  ;;  %v9442_v45 = vpop.f32.mrf.mxu0 }
 0xae7   :  { %v9864_v36 = vpop.eup %9863  ;;  %9877 = vrcp.f32 %v6957_v11  ;;  %v8923_v38 = vpop.f32.mrf.mxu1 }
 0xae8   :  { %v9866_v0 = vpop.eup %9865  ;;  %v8561_v24 = vmul.f32 -1.442695, %v6796_v43  ;;  %v8924_v41 = vadd.f32 %v8923_v38, %v8922_v40  ;;  %8094 = vrot.lane.b32.xlu1 %v9864_v36, %s9966_s14  ;;  %v7474_v48 = vmul.f32 %v9864_v36, %v9430_v7 }
 0xae9   :  { %v6958_v54 = vadd.f32 1.0, %v9866_v0  ;;  %v8925_v12 = vpop.f32.mrf.mxu1 }
 0xaea   :  { %9879 = vpow2.f32 %v8561_v24  ;;  %v6801_v28 = vadd.f32 %v8924_v41, %v16401_v6  ;;  %9493 = vmatmul.mubr.msk.f32.gmra.mxu1 %vm836_vm1, %v7474_v48  ;;  %v7394_v48 = vpop.f32.mrf.mxu0 }
 0xaeb   :  { %v9868_v16 = vpop.eup %9867  ;;  %9881 = vrcp.f32 %v6958_v54  ;;  %v8926_v39 = vpop.f32.mrf.mxu1 }
 0xaec   :  { %v9870_v35 = vpop.eup %9869  ;;  %v6959_v59 = vadd.f32 1.0, %v9868_v16  ;;  %v8562_v27 = vmul.f32 -1.442695, %v6801_v28  ;;  %v8927_v33 = vadd.f32 %v8926_v39, %v8925_v12 }
 0xaed   :  { %8096 = vrot.lane.b32.xlu0 %v9870_v35, %s9966_s14  ;;  %v8928_v26 = vpop.f32.mrf.mxu1  ;;  %v7475_v44 = vmul.f32 %v9870_v35, %v7364_v23 }
 0xaee   :  { %9883 = vrcp.f32 %v6959_v59  ;;  %v6804_v30 = vadd.f32 %v8927_v33, %v16401_v6 }
 0xaef   :  { %v9872_v29 = vpop.eup %9871  ;;  %9885 = vpow2.f32 %v8562_v27  ;;  %v8929_v51 = vpop.f32.mrf.mxu1  ;;  %9495 = vmatprep.mubr.msk.f32.mxu1 %vm836_vm1, %v7475_v44 }
 0xaf0   :  { %v9874_v46 = vpop.eup %9873  ;;  %v6960_v9 = vadd.f32 1.0, %v9872_v29  ;;  %v8563_v32 = vmul.f32 -1.442695, %v6804_v30  ;;  %v8930_v15 = vadd.f32 %v8929_v51, %v8928_v26  ;;  %v9445_v26 = vpop.f32.mrf.mxu0 }
 0xaf1   :  { %8098 = vrot.lane.b32.xlu1 %v9874_v46, %s9966_s14  ;;  %v8931_v1 = vpop.f32.mrf.mxu1  ;;  %v7476_v31 = vmul.f32 %v9874_v46, %v9433_v58 }
 0xaf2   :  { %9887 = vrcp.f32 %v6960_v9  ;;  %v6809_v22 = vadd.f32 %v8930_v15, %v16401_v6 }
 0xaf3   :  { %v9876_v47 = vpop.eup %9875  ;;  %9889 = vpow2.f32 %v8563_v32  ;;  %v8932_v25 = vpop.f32.mrf.mxu1  ;;  %9496 = vmatmul.mubr.msk.f32.gmra.mxu1 %vm836_vm1, %v7476_v31 }
 0xaf4   :  { %v9878_v13 = vpop.eup %9877  ;;  %v6961_v55 = vadd.f32 1.0, %v9876_v47  ;;  %v8564_v49 = vmul.f32 -1.442695, %v6809_v22  ;;  %v8933_v19 = vadd.f32 %v8932_v25, %v8931_v1  ;;  %v7404_v1 = vpop.f32.mrf.mxu0 }
 0xaf5   :  { %8100 = vrot.lane.b32.xlu0 %v9878_v13, %s9966_s14  ;;  %v8934_v17 = vpop.f32.mrf.mxu1  ;;  %v7477_v2 = vmul.f32 %v9878_v13, %v7374_v10 }
 0xaf6   :  { %9891 = vrcp.f32 %v6961_v55  ;;  %v6812_v50 = vadd.f32 %v8933_v19, %v16401_v6 }
 0xaf7   :  { %v9880_v56 = vpop.eup %9879  ;;  %9893 = vpow2.f32 %v8564_v49  ;;  %v8935_v7 = vpop.f32.mrf.mxu1  ;;  %9498 = vmatprep.mubr.msk.f32.mxu1 %vm836_vm1, %v7477_v2 }
 0xaf8   :  { %v9882_v18 = vpop.eup %9881  ;;  %v6962_v4 = vadd.f32 1.0, %v9880_v56  ;;  %v8565_v37 = vmul.f32 -1.442695, %v6812_v50  ;;  %v8936_v52 = vadd.f32 %v8935_v7, %v8934_v17  ;;  %v9448_v17 = vpop.f32.mrf.mxu0 }
 0xaf9   :  { %8102 = vrot.lane.b32.xlu1 %v9882_v18, %s9966_s14  ;;  %v8937_v60 = vpop.f32.mrf.mxu1  ;;  %v7478_v42 = vmul.f32 %v9882_v18, %v9436_v57 }
 0xafa   :  { %9895 = vrcp.f32 %v6962_v4  ;;  %v6817_v21 = vadd.f32 %v8936_v52, %v16401_v6 }
 0xafb   :  { %v9884_v20 = vpop.eup %9883  ;;  %9897 = vpow2.f32 %v8565_v37  ;;  %v8938_v61 = vpop.f32.mrf.mxu1  ;;  %9499 = vmatmul.mubr.msk.f32.gmra.mxu1 %vm836_vm1, %v7478_v42 }
 0xafc   :  { %v9886_v3 = vpop.eup %9885  ;;  %v8566_v63 = vmul.f32 -1.442695, %v6817_v21  ;;  %v8939_v53 = vadd.f32 %v8938_v61, %v8937_v60  ;;  %8104 = vrot.lane.b32.xlu0 %v9884_v20, %s9966_s14  ;;  %v7479_v8 = vmul.f32 %v9884_v20, %v7384_v14  ;;  %v7414_v60 = vpop.f32.mrf.mxu0 }
 0xafd   :  { %v6963_v5 = vadd.f32 1.0, %v9886_v3  ;;  %v8940_v34 = vpop.f32.mrf.mxu1 }
 0xafe   :  { %9899 = vpow2.f32 %v8566_v63  ;;  %v6820_v11 = vadd.f32 %v8939_v53, %v16401_v6  ;;  %9501 = vmatprep.mubr.msk.f32.mxu1 %vm836_vm1, %v7479_v8 }
 0xaff   :  { %v9888_v40 = vpop.eup %9887  ;;  %9901 = vrcp.f32 %v6963_v5  ;;  %v8941_v58 = vpop.f32.mrf.mxu1 }
 0xb00   :  { %v9890_v43 = vpop.eup %9889  ;;  %v8567_v36 = vmul.f32 -1.442695, %v6820_v11  ;;  %v8942_v38 = vadd.f32 %v8941_v58, %v8940_v34  ;;  %8106 = vrot.lane.b32.xlu1 %v9888_v40, %s9966_s14  ;;  %v7480_v0 = vmul.f32 %v9888_v40, %v9439_v62  ;;  %v9451_v5 = vpop.f32.mrf.mxu0 }
 0xb01   :  { %v6964_v24 = vadd.f32 1.0, %v9890_v43  ;;  %v8943_v41 = vpop.f32.mrf.mxu1 }
 0xb02   :  { %9903 = vpow2.f32 %v8567_v36  ;;  %v6825_v54 = vadd.f32 %v8942_v38, %v16401_v6  ;;  %9502 = vmatmul.mubr.msk.f32.gmra.mxu1 %vm836_vm1, %v7480_v0  ;;  %v7424_v43 = vpop.f32.mrf.mxu0 }
 0xb03   :  { %v9892_v12 = vpop.eup %9891  ;;  %9905 = vrcp.f32 %v6964_v24  ;;  %v8944_v23 = vpop.f32.mrf.mxu1 }
 0xb04   :  { %v9894_v28 = vpop.eup %9893  ;;  %v8568_v16 = vmul.f32 -1.442695, %v6825_v54  ;;  %v8945_v39 = vadd.f32 %v8944_v23, %v8943_v41  ;;  %8108 = vrot.lane.b32.xlu0 %v9892_v12, %s9966_s14  ;;  %v7481_v35 = vmul.f32 %v9892_v12, %v7394_v48  ;;  %v9454_v24 = vpop.f32.mrf.mxu0 }
 0xb05   :  { %v6965_v59 = vadd.f32 1.0, %v9894_v28  ;;  %v8946_v27 = vpop.f32.mrf.mxu1 }
 0xb06   :  { %9907 = vpow2.f32 %v8568_v16  ;;  %v6828_v33 = vadd.f32 %v8945_v39, %v16401_v6  ;;  %9504 = vmatprep.mubr.msk.f32.mxu1 %vm836_vm1, %v7481_v35  ;;  %v7434_v23 = vpop.f32.mrf.mxu0 }
 0xb07   :  { %v9896_v44 = vpop.eup %9895  ;;  %9909 = vrcp.f32 %v6965_v59  ;;  %v8947_v57 = vpop.f32.mrf.mxu1 }
 0xb08   :  { %v9898_v30 = vpop.eup %9897  ;;  %v8569_v29 = vmul.f32 -1.442695, %v6828_v33  ;;  %v8948_v51 = vadd.f32 %v8947_v57, %v8946_v27  ;;  %8110 = vrot.lane.b32.xlu1 %v9896_v44, %s9966_s14  ;;  %v7482_v46 = vmul.f32 %v9896_v44, %v9442_v45  ;;  %v9457_v33 = vpop.f32.mrf.mxu0 }
 0xb09   :  { %v6966_v9 = vadd.f32 1.0, %v9898_v30  ;;  %v8949_v32 = vpop.f32.mrf.mxu1 }
 0xb0a   :  { %9911 = vpow2.f32 %v8569_v29  ;;  %v6833_v15 = vadd.f32 %v8948_v51, %v16401_v6  ;;  %9505 = vmatmul.mubr.msk.f32.gmra.mxu1 %vm836_vm1, %v7482_v46  ;;  %v7444_v57 = vpop.f32.mrf.mxu0 }
 0xb0b   :  { %v9900_v31 = vpop.eup %9899  ;;  %9913 = vrcp.f32 %v6966_v9  ;;  %v8950_v10 = vpop.f32.mrf.mxu1 }
 0xb0c   :  { %v9902_v22 = vpop.eup %9901  ;;  %v6967_v47 = vadd.f32 1.0, %v9900_v31  ;;  %v8570_v25 = vmul.f32 -1.442695, %v6833_v15  ;;  %v8951_v13 = vadd.f32 %v8950_v10, %v8949_v32  ;;  %v9460_v51 = vpop.f32.mrf.mxu0 }
 0xb0d   :  { %8112 = vrot.lane.b32.xlu0 %v9902_v22, %s9966_s14  ;;  %v8952_v55 = vpop.f32.mrf.mxu1  ;;  %v7483_v49 = vmul.f32 %v9902_v22, %v7404_v1  ;;  %v16503_v10 = vpop.permute.xlu1 %7820 }
 0xb0e   :  { %9915 = vrcp.f32 %v6967_v47  ;;  %v6836_v19 = vadd.f32 %v8951_v13, %v16401_v6  ;;  %v7454_v32 = vpop.f32.mrf.mxu0 }
 0xb0f   :  { %v9904_v2 = vpop.eup %9903  ;;  %9917 = vpow2.f32 %v8570_v25  ;;  %v8953_v62 = vpop.f32.mrf.mxu1  ;;  %9507 = vmatprep.mubr.msk.f32.mxu1 %vm836_vm1, %v7483_v49 }
 0xb10   :  { %v9906_v50 = vpop.eup %9905  ;;  %v6968_v56 = vadd.f32 1.0, %v9904_v2  ;;  %v8571_v7 = vmul.f32 -1.442695, %v6836_v19  ;;  %v8954_v18 = vadd.f32 %v8953_v62, %v8952_v55  ;;  %v16509_v25 = vpop.permute.xlu0 %7818 }
 0xb11   :  { %v7484_v4 = vmul.f32 %v9906_v50, %v9445_v26  ;;  %8114 = vrot.lane.b32.xlu1 %v9906_v50, %s9966_s14  ;;  %v8955_v37 = vpop.f32.mrf.mxu1  ;;  %v16505_v22 = vpop.permute.xlu1 %7816 }
 0xb12   :  { %9919 = vrcp.f32 %v6968_v56  ;;  %v6841_v52 = vadd.f32 %v8954_v18, %v16401_v6 }
 0xb13   :  { %v9908_v42 = vpop.eup %9907  ;;  %9921 = vpow2.f32 %v8571_v7  ;;  %v8956_v14 = vpop.f32.mrf.mxu1  ;;  %9508 = vmatmul.mubr.msk.f32.gmra.mxu1 %vm836_vm1, %v7484_v4 }
 0xb14   :  { %v9910_v21 = vpop.eup %9909  ;;  %v6969_v20 = vadd.f32 1.0, %v9908_v42  ;;  %v8572_v61 = vmul.f32 -1.442695, %v6841_v52  ;;  %v8957_v3 = vadd.f32 %v8956_v14, %v8955_v37  ;;  %v16513_v55 = vpop.permute.xlu0 %7828 }
 0xb15   :  { %8116 = vrot.lane.b32.xlu0 %v9910_v21, %s9966_s14  ;;  %v7485_v63 = vmul.f32 %v9910_v21, %v7414_v60  ;;  %v16507_v47 = vpop.permute.xlu1 %7822 }
 0xb16   :  { %9923 = vrcp.f32 %v6969_v20  ;;  %v6844_v53 = vadd.f32 %v8957_v3, %v16401_v6 }
 0xb17   :  { %v9912_v8 = vpop.eup %9911  ;;  %9925 = vpow2.f32 %v8572_v61  ;;  %9510 = vmatprep.mubr.msk.f32.mxu1 %vm836_vm1, %v7485_v63 }
 0xb18   :  { %v9914_v34 = vpop.eup %9913  ;;  %v6970_v45 = vadd.f32 1.0, %v9912_v8  ;;  %v8573_v11 = vmul.f32 -1.442695, %v6844_v53  ;;  %v16517_v19 = vpop.permute.xlu0 %7824 }
 0xb19   :  { %v7486_v40 = vmul.f32 %v9914_v34, %v9448_v17  ;;  %8118 = vrot.lane.b32.xlu1 %v9914_v34, %s9966_s14  ;;  %v16511_v13 = vpop.permute.xlu1 %7830 }
 0xb1a   :  { %9927 = vrcp.f32 %v6970_v45 }
 0xb1b   :  { %v9916_v58 = vpop.eup %9915  ;;  %9929 = vpow2.f32 %v8573_v11  ;;  %9511 = vmatmul.mubr.msk.f32.gmra.mxu1 %vm836_vm1, %v7486_v40 }
 0xb1c   :  { %v9918_v36 = vpop.eup %9917  ;;  %v7487_v38 = vmul.f32 %v9916_v58, %v7424_v43  ;;  %8120 = vrot.lane.b32.xlu0 %v9916_v58, %s9966_s14  ;;  %v16521_v2 = vpop.permute.xlu0 %7836 }
 0xb1d   :  { %v6971_v6 = vadd.f32 1.0, %v9918_v36  ;;  %v16515_v49 = vpop.permute.xlu1 %7826 }
 0xb1e   :  { %9513 = vmatprep.mubr.msk.f32.mxu1 %vm836_vm1, %v7487_v38 }
 0xb1f   :  { %v9920_v0 = vpop.eup %9919  ;;  %9931 = vrcp.f32 %v6971_v6 }
 0xb20   :  { %v9922_v41 = vpop.eup %9921  ;;  %v7488_v48 = vmul.f32 %v9920_v0, %v9451_v5  ;;  %8122 = vrot.lane.b32.xlu1 %v9920_v0, %s9966_s14  ;;  %v16525_v50 = vpop.permute.xlu0 %7832 }
 0xb21   :  { %v6972_v54 = vadd.f32 1.0, %v9922_v41  ;;  %v16519_v17 = vpop.permute.xlu1 %7838 }
 0xb22   :  { %9514 = vmatmul.mubr.msk.f32.gmra.mxu1 %vm836_vm1, %v7488_v48 }
 0xb23   :  { %v9924_v12 = vpop.eup %9923  ;;  %9933 = vrcp.f32 %v6972_v54 }
 0xb24   :  { %v9926_v28 = vpop.eup %9925  ;;  %v7489_v16 = vmul.f32 %v9924_v12, %v7434_v23  ;;  %8124 = vrot.lane.b32.xlu0 %v9924_v12, %s9966_s14  ;;  %v16529_v7 = vpop.permute.xlu0 %7844 }
 0xb25   :  { %v6973_v39 = vadd.f32 1.0, %v9926_v28  ;;  %v16523_v62 = vpop.permute.xlu1 %7834 }
 0xb26   :  { %9516 = vmatprep.mubr.msk.f32.mxu1 %vm836_vm1, %v7489_v16 }
 0xb27   :  { %v9928_v35 = vpop.eup %9927  ;;  %9935 = vrcp.f32 %v6973_v39 }
 0xb28   :  { %v9930_v59 = vpop.eup %9929  ;;  %v7490_v27 = vmul.f32 %v9928_v35, %v9454_v24  ;;  %8126 = vrot.lane.b32.xlu1 %v9928_v35, %s9966_s14  ;;  %v16535_v52 = vpop.permute.xlu0 %7840 }
 0xb29   :  { %v6974_v26 = vadd.f32 1.0, %v9930_v59  ;;  %v16527_v56 = vpop.permute.xlu1 %7846 }
 0xb2a   :  { %9517 = vmatmul.mubr.msk.f32.gmra.mxu1 %vm836_vm1, %v7490_v27 }
 0xb2b   :  { %9937 = vrcp.f32 %v6974_v26 }
 0xb2c   :  { %v9932_v44 = vpop.eup %9931  ;;  %v16540_v21 = vpop.permute.xlu0 %7852 }
 0xb2d   :  { %v7491_v30 = vmul.f32 %v9932_v44, %v7444_v57  ;;  %8128 = vrot.lane.b32.xlu0 %v9932_v44, %s9966_s14  ;;  %v16532_v37 = vpop.permute.xlu1 %7842 }
 0xb2f   :  { %9519 = vmatprep.mubr.msk.f32.mxu1 %vm836_vm1, %v7491_v30 }
 0xb30   :  { %v9934_v29 = vpop.eup %9933  ;;  %v16545_v61 = vpop.permute.xlu0 %7848 }
 0xb31   :  { %v7492_v46 = vmul.f32 %v9934_v29, %v9457_v33  ;;  %8130 = vrot.lane.b32.xlu1 %v9934_v29, %s9966_s14  ;;  %v16537_v42 = vpop.permute.xlu1 %7854 }
 0xb33   :  { %9520 = vmatmul.mubr.msk.f32.gmra.mxu1 %vm836_vm1, %v7492_v46 }
 0xb34   :  { %v16495_v9 = vpop.eup %9935  ;;  %v16551_v8 = vpop.permute.xlu0 %7860 }
 0xb35   :  { %v7493_v15 = vmul.f32 %v16495_v9, %v7454_v32  ;;  %v16543_v20 = vpop.permute.xlu1 %7850 }
 0xb37   :  { %9522 = vmatprep.mubr.msk.f32.mxu1 %vm836_vm1, %v7493_v15 }
 0xb38   :  { %v16499_v1 = vpop.eup %9937  ;;  %v16557_v11 = vpop.permute.xlu0 %7856 }
 0xb39   :  { %v7494_v31 = vmul.f32 %v16499_v1, %v9460_v51  ;;  %v16549_v53 = vpop.permute.xlu1 %7862 }
 0xb3b   :  { %9523 = vmatmul.mubr.msk.f32.gmra.mxu1 %vm836_vm1, %v7494_v31  ;;  %vm8168_vm1 = vcmask 64512  }
 0xb3c   :  { %v16562_v36 = vpop.permute.xlu0 %7868 }
 0xb3d   :  { %v16554_v34 = vpop.permute.xlu1 %7858  ;;  %17624 = vst [vmem:[#allocation38_spill] sm:$0xff] %v16562_v36 }
 0xb40   :  { %v16567_v0 = vpop.permute.xlu0 %7864 }
 0xb41   :  { %v16559_v58 = vpop.permute.xlu1 %7870 }
 0xb42   :  { %17623 = vst [vmem:[#allocation51_spill] sm:$0xff] %v16559_v58 }
 0xb44   :  { %v16573_v48 = vpop.permute.xlu0 %7876 }
 0xb45   :  { %v16565_v38 = vpop.permute.xlu1 %7866  ;;  %17626 = vst [vmem:[#allocation37_spill] sm:$0xff] %v16573_v48 }
 0xb48   :  { %v16579_v28 = vpop.permute.xlu0 %7872 }
 0xb49   :  { %v16571_v41 = vpop.permute.xlu1 %7878  ;;  %17628 = vst [vmem:[#allocation44_spill] sm:$0xff] %v16579_v28 }
 0xb4a   :  { %17625 = vst [vmem:[#allocation40_spill] sm:$0xff] %v16571_v41 }
 0xb4c   :  { %v16583_v39 = vpop.permute.xlu0 %8072 }
 0xb4d   :  { %v16576_v12 = vpop.permute.xlu1 %7874 }
 0xb4e   :  { %17627 = vst [vmem:[#allocation42_spill] sm:$0xff] %v16576_v12  ;;  %v17634_v12 = vld [vmem:[#allocation26_spill] sm:$0xff] }
 0xb50   :  { %v16589_v33 = vpop.permute.xlu0 %8076 }
 0xb51   :  { %v16581_v16 = vpop.permute.xlu1 %8074 }
 0xb54   :  { %v16593_v57 = vpop.permute.xlu0 %8080 }
 0xb55   :  { %v16586_v59 = vpop.permute.xlu1 %8078 }
 0xb58   :  { %v16599_v51 = vpop.permute.xlu0 %8084 }
 0xb59   :  { %v16591_v26 = vpop.permute.xlu1 %8082 }
 0xb5c   :  { %v16603_v15 = vpop.permute.xlu0 %8088 }
 0xb5d   :  { %v16596_v29 = vpop.permute.xlu1 %8086 }
 0xb61   :  { %v16601_v46 = vpop.permute.xlu1 %8090 }
 0xb82   :  { %v9479_v18 = vpop.f32.mrf.mxu0 }
 0xb83   :  { %7946 = vrot.lane.b32.xlu1 %v9479_v18, %s9967_s10  ;;  %v16606_v18 = vpop.permute.xlu1 %8094 }
 0xb84   :  { %v7657_v4 = vpop.f32.mrf.mxu0 }
 0xb85   :  { %7944 = vrot.lane.b32.xlu0 %v7657_v4, %s9967_s10  ;;  %v16609_v4 = vpop.permute.xlu0 %8092 }
 0xb8a   :  { %v9482_v60 = vpop.f32.mrf.mxu0 }
 0xb8b   :  { %7950 = vrot.lane.b32.xlu1 %v9482_v60, %s9967_s10  ;;  %v16611_v60 = vpop.permute.xlu1 %8098 }
 0xb8c   :  { %v7667_v14 = vpop.f32.mrf.mxu0 }
 0xb8d   :  { %7948 = vrot.lane.b32.xlu0 %v7667_v14, %s9967_s10  ;;  %v16613_v14 = vpop.permute.xlu0 %8096 }
 0xb93   :  { %v9485_v3 = vpop.f32.mrf.mxu0 }
 0xb94   :  { %7954 = vrot.lane.b32.xlu1 %v9485_v3, %s9967_s10 }
 0xb95   :  { %v7677_v63 = vpop.f32.mrf.mxu0 }
 0xb96   :  { %7952 = vrot.lane.b32.xlu0 %v7677_v63, %s9967_s10  ;;  %v16616_v63 = vpop.permute.xlu1 %8102 }
 0xb9b   :  { %v9488_v5 = vpop.f32.mrf.mxu1 }
 0xb9c   :  { %7958 = vrot.lane.b32.xlu1 %v9488_v5, %s9967_s10 }
 0xb9d   :  { %v7687_v45 = vpop.f32.mrf.mxu1 }
 0xb9e   :  { %7956 = vrot.lane.b32.xlu0 %v7687_v45, %s9967_s10  ;;  %v16619_v45 = vpop.permute.xlu0 %8100 }
 0xba2   :  { %v9491_v40 = vpop.f32.mrf.mxu1 }
 0xba3   :  { %7962 = vrot.lane.b32.xlu1 %v9491_v40, %s9967_s10  ;;  %v16621_v40 = vpop.permute.xlu1 %8106 }
 0xba4   :  { %v7697_v43 = vpop.f32.mrf.mxu1 }
 0xba5   :  { %7960 = vrot.lane.b32.xlu0 %v7697_v43, %s9967_s10  ;;  %v16623_v43 = vpop.permute.xlu0 %8104 }
 0xbaa   :  { %v9494_v6 = vpop.f32.mrf.mxu1 }
 0xbab   :  { %7966 = vrot.lane.b32.xlu1 %v9494_v6, %s9967_s10 }
 0xbac   :  { %v7707_v24 = vpop.f32.mrf.mxu1 }
 0xbad   :  { %7964 = vrot.lane.b32.xlu0 %v7707_v24, %s9967_s10  ;;  %v16626_v24 = vpop.permute.xlu1 %8110 }
 0xbb3   :  { %v9497_v54 = vpop.f32.mrf.mxu1 }
 0xbb4   :  { %7970 = vrot.lane.b32.xlu1 %v9497_v54, %s9967_s10 }
 0xbb5   :  { %v7717_v23 = vpop.f32.mrf.mxu1 }
 0xbb6   :  { %7968 = vrot.lane.b32.xlu0 %v7717_v23, %s9967_s10  ;;  %v16629_v23 = vpop.permute.xlu0 %8108 }
 0xbbb   :  { %v9500_v35 = vpop.f32.mrf.mxu1 }
 0xbbc   :  { %7974 = vrot.lane.b32.xlu1 %v9500_v35, %s9967_s10  ;;  %v16631_v35 = vpop.permute.xlu1 %8114 }
 0xbbd   :  { %v7727_v27 = vpop.f32.mrf.mxu1 }
 0xbbe   :  { %7972 = vrot.lane.b32.xlu0 %v7727_v27, %s9967_s10 }
 0xbc2   :  { %v9503_v44 = vpop.f32.mrf.mxu1 }
 0xbc3   :  { %7978 = vrot.lane.b32.xlu1 %v9503_v44, %s9967_s10  ;;  %v16633_v44 = vpop.permute.xlu0 %8112 }
 0xbc4   :  { %v7737_v30 = vpop.f32.mrf.mxu1 }
 0xbc5   :  { %7976 = vrot.lane.b32.xlu0 %v7737_v30, %s9967_s10 }
 0xbca   :  { %v9506_v32 = vpop.f32.mrf.mxu1 }
 0xbcb   :  { %7982 = vrot.lane.b32.xlu1 %v9506_v32, %s9967_s10  ;;  %v16636_v32 = vpop.permute.xlu1 %8118 }
 0xbcc   :  { %v7747_v31 = vpop.f32.mrf.mxu1 }
 0xbcd   :  { %7980 = vrot.lane.b32.xlu0 %v7747_v31, %s9967_s10  ;;  %v16639_v31 = vpop.permute.xlu0 %8116 }
 0xbd3   :  { %v9509_v3 = vpop.f32.mrf.mxu1 }
 0xbd4   :  { %7986 = vrot.lane.b32.xlu1 %v9509_v3, %s9967_s10  ;;  %v16641_v3 = vpop.permute.xlu1 %8122 }
 0xbd5   :  { %v7757_v5 = vpop.f32.mrf.mxu1 }
 0xbd6   :  { %7984 = vrot.lane.b32.xlu0 %v7757_v5, %s9967_s10 }
 0xbd8   :  { %v16646_v48 = vpop.permute.xlu1 %8126 }
 0xbd9   :  { %17630 = vst [vmem:[#allocation93_spill] sm:$0xff] %v16646_v48 }
 0xbdb   :  { %v9512_v6 = vpop.f32.mrf.mxu1 }
 0xbdc   :  { %7990 = vrot.lane.b32.xlu1 %v9512_v6, %s9967_s10  ;;  %v16643_v6 = vpop.permute.xlu0 %8120  ;;  %v16651_v41 = vpop.permute.xlu1 %8130 }
 0xbdd   :  { %v7767_v54 = vpop.f32.mrf.mxu1  ;;  %17629 = vst [vmem:[#allocation91_spill] sm:$0xff] %v16643_v6  ;;  %17632 = vst [vmem:[#allocation64_spill] sm:$0xff] %v16651_v41  ;;  %v17635_v41 = vld [vmem:[#allocation22_spill] sm:$0xff] }
 0xbde   :  { %7988 = vrot.lane.b32.xlu0 %v7767_v54, %s9967_s10 }
 0xbe2   :  { %v9515_v27 = vpop.f32.mrf.mxu1 }
 0xbe3   :  { %7994 = vrot.lane.b32.xlu1 %v9515_v27, %s9967_s10  ;;  %v16649_v27 = vpop.permute.xlu0 %8124 }
 0xbe4   :  { %v7777_v30 = vpop.f32.mrf.mxu1  ;;  %17631 = vst [vmem:[#allocation52_spill] sm:$0xff] %v16649_v27 }
 0xbe5   :  { %7992 = vrot.lane.b32.xlu0 %v7777_v30, %s9967_s10 }
 0xbe7   :  { %v16653_v30 = vpop.permute.xlu0 %8128 }
 0xbe8   :  { %17633 = vst [vmem:[#allocation65_spill] sm:$0xff] %v16653_v30  ;;  %v8169_v30 = vsel %vm8168_vm1, %v17635_v41, %v16505_v22  ;;  %v17636_v22 = vld [vmem:[#allocation28_spill] sm:$0xff] }
 0xbe9   :  { %v8172_v41 = vsel %vm8168_vm1, %v17636_v22, %v16507_v47 }
 0xbea   :  { %v9518_v5 = vpop.f32.mrf.mxu1 }
 0xbeb   :  { %7998 = vrot.lane.b32.xlu1 %v9518_v5, %s9967_s10  ;;  %v8170_v5 = vsel %vm8168_vm1, %v17634_v12, %v16509_v25 }
 0xbec   :  { %v7787_v54 = vpop.f32.mrf.mxu1 }
 0xbed   :  { %7996 = vrot.lane.b32.xlu0 %v7787_v54, %s9967_s10 }
 0xbf3   :  { %v9521_v28 = vpop.f32.mrf.mxu1 }
 0xbf4   :  { %8002 = vrot.lane.b32.xlu1 %v9521_v28, %s9967_s10 }
 0xbf5   :  { %v7797_v36 = vpop.f32.mrf.mxu1  ;;  %v7947_v48 = vpop.permute.xlu1 %7946 }
 0xbf6   :  { %8000 = vrot.lane.b32.xlu0 %v7797_v36, %s9967_s10  ;;  %v8203_v54 = vsel %vm8201_vm11, %v8170_v5, %v7947_v48 }
 0xbf7   :  { %v8236_v27 = vsel %vm8234_vm3, %v8203_v54, %v16581_v16  ;;  %v7945_v28 = vpop.permute.xlu0 %7944 }
 0xbf8   :  { %v8269_v58 = vsel %vm8267_vm12, %v8236_v27, 0.0  ;;  %v8202_v6 = vsel %vm8201_vm11, %v8169_v30, %v7945_v28 }
 0xbf9   :  { %8301 = vst [vmem:[#allocation2 + $0x8] sm:$0xff] %v8269_v58  ;;  %v8235_v25 = vsel %vm8234_vm3, %v8202_v6, %v16583_v39  ;;  %v17637_v58 = vld [vmem:[#allocation25_spill] sm:$0xff] }
 0xbfa   :  { %v8268_v36 = vsel %vm8267_vm12, %v8235_v25, 0.0  ;;  %v8171_v39 = vsel %vm8168_vm1, %v17637_v58, %v16503_v10 }
 0xbfb   :  { %v9524_v12 = vpop.f32.mrf.mxu1  ;;  %8300 = vst [vmem:[#allocation2] sm:$0xff] %v8268_v36  ;;  %v17639_v36 = vld [vmem:[#allocation27_spill] sm:$0xff] }
 0xbfc   :  { %8006 = vrot.lane.b32.xlu1 %v9524_v12, %s9967_s10  ;;  %v8173_v12 = vsel %vm8168_vm1, %v17639_v36, %v16517_v19 }
 0xbfd   :  { %v7807_v48 = vpop.f32.mrf.mxu1  ;;  %v7951_v16 = vpop.permute.xlu1 %7950 }
 0xbfe   :  { %8004 = vrot.lane.b32.xlu0 %v7807_v48, %s9967_s10  ;;  %v8205_v27 = vsel %vm8201_vm11, %v8172_v41, %v7951_v16  ;;  %v17640_v16 = vld [vmem:[#allocation29_spill] sm:$0xff] }
 0xbff   :  { %v8238_v6 = vsel %vm8234_vm3, %v8205_v27, %v16586_v59  ;;  %v7949_v30 = vpop.permute.xlu0 %7948  ;;  %v17638_v59 = vld [vmem:[#allocation6_spill] sm:$0xff]  ;;  %v8176_v27 = vsel %vm8168_vm1, %v17640_v16, %v16511_v13 }
 0xc00   :  { %8134 = vrot.lane.b32.xlu1 %v16499_v1, %s9966_s14  ;;  %v8271_v5 = vsel %vm8267_vm12, %v8238_v6, 0.0  ;;  %v8204_v47 = vsel %vm8201_vm11, %v8171_v39, %v7949_v30  ;;  %v8174_v28 = vsel %vm8168_vm1, %v17638_v59, %v16515_v49 }
 0xc01   :  { %8303 = vst [vmem:[#allocation2 + $0x18] sm:$0xff] %v8271_v5  ;;  %v8237_v54 = vsel %vm8234_vm3, %v8204_v47, %v16589_v33 }
 0xc02   :  { %8132 = vrot.lane.b32.xlu0 %v16495_v9, %s9966_s14  ;;  %v8270_v10 = vsel %vm8267_vm12, %v8237_v54, 0.0  ;;  %v17642_v54 = vld [vmem:[#allocation10_spill] sm:$0xff] }
 0xc03   :  { %8302 = vst [vmem:[#allocation2 + $0x10] sm:$0xff] %v8270_v10  ;;  %v8178_v10 = vsel %vm8168_vm1, %v17642_v54, %v16523_v62 }
 0xc06   :  { %v7955_v25 = vpop.permute.xlu1 %7954 }
 0xc07   :  { %v8207_v1 = vsel %vm8201_vm11, %v8174_v28, %v7955_v25 }
 0xc08   :  { %v8240_v33 = vsel %vm8234_vm3, %v8207_v1, %v16591_v26  ;;  %v7953_v22 = vpop.permute.xlu0 %7952  ;;  %v17641_v26 = vld [vmem:[#allocation5_spill] sm:$0xff] }
 0xc09   :  { %v8273_v9 = vsel %vm8267_vm12, %v8240_v33, 0.0  ;;  %v8206_v41 = vsel %vm8201_vm11, %v8173_v12, %v7953_v22  ;;  %v8175_v39 = vsel %vm8168_vm1, %v17641_v26, %v16513_v55  ;;  %v17644_v33 = vld [vmem:[#allocation9_spill] sm:$0xff] }
 0xc0a   :  { %8305 = vst [vmem:[#allocation2 + $0x28] sm:$0xff] %v8273_v9  ;;  %v8239_v48 = vsel %vm8234_vm3, %v8206_v41, %v16593_v57  ;;  %v8180_v22 = vsel %vm8168_vm1, %v17644_v33, %v16519_v17 }
 0xc0b   :  { %v8272_v49 = vsel %vm8267_vm12, %v8239_v48, 0.0 }
 0xc0c   :  { %8304 = vst [vmem:[#allocation2 + $0x20] sm:$0xff] %v8272_v49 }
 0xc0e   :  { %v7959_v19 = vpop.permute.xlu1 %7958 }
 0xc0f   :  { %v8209_v58 = vsel %vm8201_vm11, %v8176_v27, %v7959_v19  ;;  %v17646_v19 = vld [vmem:[#allocation15_spill] sm:$0xff] }
 0xc10   :  { %v8242_v6 = vsel %vm8234_vm3, %v8209_v58, %v16596_v29  ;;  %v7957_v30 = vpop.permute.xlu0 %7956  ;;  %v17643_v29 = vld [vmem:[#allocation7_spill] sm:$0xff]  ;;  %v8182_v58 = vsel %vm8168_vm1, %v17646_v19, %v16532_v37 }
 0xc11   :  { %v8275_v57 = vsel %vm8267_vm12, %v8242_v6, 0.0  ;;  %v8208_v5 = vsel %vm8201_vm11, %v8175_v39, %v7957_v30  ;;  %v8177_v28 = vsel %vm8168_vm1, %v17643_v29, %v16525_v50 }
 0xc12   :  { %8307 = vst [vmem:[#allocation2 + $0x38] sm:$0xff] %v8275_v57  ;;  %v8241_v47 = vsel %vm8234_vm3, %v8208_v5, %v16599_v51 }
 0xc13   :  { %v8274_v13 = vsel %vm8267_vm12, %v8241_v47, 0.0  ;;  %v17648_v47 = vld [vmem:[#allocation13_spill] sm:$0xff] }
 0xc14   :  { %8306 = vst [vmem:[#allocation2 + $0x30] sm:$0xff] %v8274_v13  ;;  %v8184_v13 = vsel %vm8168_vm1, %v17648_v47, %v16527_v56 }
 0xc15   :  { %v7963_v55 = vpop.permute.xlu1 %7962 }
 0xc16   :  { %v8211_v59 = vsel %vm8201_vm11, %v8178_v10, %v7963_v55 }
 0xc17   :  { %v8244_v25 = vsel %vm8234_vm3, %v8211_v59, %v16601_v46  ;;  %v7961_v1 = vpop.permute.xlu0 %7960  ;;  %v17645_v46 = vld [vmem:[#allocation8_spill] sm:$0xff] }
 0xc18   :  { %v8277_v51 = vsel %vm8267_vm12, %v8244_v25, 0.0  ;;  %v8210_v36 = vsel %vm8201_vm11, %v8177_v28, %v7961_v1  ;;  %v8179_v41 = vsel %vm8168_vm1, %v17645_v46, %v16521_v2  ;;  %v17650_v25 = vld [vmem:[#allocation19_spill] sm:$0xff] }
 0xc19   :  { %8309 = vst [vmem:[#allocation2 + $0x48] sm:$0xff] %v8277_v51  ;;  %v8243_v12 = vsel %vm8234_vm3, %v8210_v36, %v16603_v15  ;;  %v8186_v1 = vsel %vm8168_vm1, %v17650_v25, %v16543_v20  ;;  %v17662_v25 = vld [vmem:[#allocation31_spill] sm:$0xff] }
 0xc1a   :  { %v8276_v62 = vsel %vm8267_vm12, %v8243_v12, 0.0 }
 0xc1b   :  { %8308 = vst [vmem:[#allocation2 + $0x40] sm:$0xff] %v8276_v62 }
 0xc1d   :  { %v7967_v50 = vpop.permute.xlu1 %7966 }
 0xc1e   :  { %v8213_v9 = vsel %vm8201_vm11, %v8180_v22, %v7967_v50  ;;  %v17652_v50 = vld [vmem:[#allocation16_spill] sm:$0xff] }
 0xc1f   :  { %v8246_v48 = vsel %vm8234_vm3, %v8213_v9, %v16606_v18  ;;  %v7965_v49 = vpop.permute.xlu0 %7964  ;;  %v17647_v18 = vld [vmem:[#allocation12_spill] sm:$0xff]  ;;  %v8188_v9 = vsel %vm8168_vm1, %v17652_v50, %v16537_v42 }
 0xc20   :  { %v8279_v15 = vsel %vm8267_vm12, %v8246_v48, 0.0  ;;  %v8212_v16 = vsel %vm8201_vm11, %v8179_v41, %v7965_v49  ;;  %v8181_v39 = vsel %vm8168_vm1, %v17647_v18, %v16535_v52 }
 0xc21   :  { %8311 = vst [vmem:[#allocation2 + $0x58] sm:$0xff] %v8279_v15  ;;  %v8245_v27 = vsel %vm8234_vm3, %v8212_v16, %v16609_v4 }
 0xc22   :  { %v8278_v17 = vsel %vm8267_vm12, %v8245_v27, 0.0  ;;  %v17654_v27 = vld [vmem:[#allocation23_spill] sm:$0xff] }
 0xc23   :  { %8310 = vst [vmem:[#allocation2 + $0x50] sm:$0xff] %v8278_v17  ;;  %v8190_v17 = vsel %vm8168_vm1, %v17654_v27, %v16554_v34 }
 0xc26   :  { %v7971_v2 = vpop.permute.xlu1 %7970 }
 0xc27   :  { %v8215_v26 = vsel %vm8201_vm11, %v8182_v58, %v7971_v2 }
 0xc28   :  { %v8248_v6 = vsel %vm8234_vm3, %v8215_v26, %v16611_v60  ;;  %v7969_v30 = vpop.permute.xlu0 %7968  ;;  %v17649_v60 = vld [vmem:[#allocation11_spill] sm:$0xff] }
 0xc29   :  { %v8281_v4 = vsel %vm8267_vm12, %v8248_v6, 0.0  ;;  %v8214_v57 = vsel %vm8201_vm11, %v8181_v39, %v7969_v30  ;;  %v8183_v10 = vsel %vm8168_vm1, %v17649_v60, %v16529_v7  ;;  %v17656_v6 = vld [vmem:[#allocation20_spill] sm:$0xff] }
 0xc2a   :  { %8313 = vst [vmem:[#allocation2 + $0x68] sm:$0xff] %v8281_v4  ;;  %v8247_v5 = vsel %vm8234_vm3, %v8214_v57, %v16613_v14  ;;  %v8192_v30 = vsel %vm8168_vm1, %v17656_v6, %v16549_v53  ;;  %v17675_v6 = vld [vmem:[#allocation37_spill] sm:$0xff] }
 0xc2b   :  { %v8280_v37 = vsel %vm8267_vm12, %v8247_v5, 0.0 }
 0xc2c   :  { %8312 = vst [vmem:[#allocation2 + $0x60] sm:$0xff] %v8280_v37 }
 0xc2e   :  { %v7975_v52 = vpop.permute.xlu1 %7974 }
 0xc2f   :  { %v8217_v54 = vsel %vm8201_vm11, %v8184_v13, %v7975_v52  ;;  %v17658_v52 = vld [vmem:[#allocation32_spill] sm:$0xff] }
 0xc30   :  { %v8250_v55 = vsel %vm8234_vm3, %v8217_v54, %v16616_v63  ;;  %v7973_v59 = vpop.permute.xlu0 %7972  ;;  %v17651_v63 = vld [vmem:[#allocation14_spill] sm:$0xff]  ;;  %v8194_v54 = vsel %vm8168_vm1, %v17658_v52, %v16565_v38 }
 0xc31   :  { %v8283_v14 = vsel %vm8267_vm12, %v8250_v55, 0.0  ;;  %v8216_v29 = vsel %vm8201_vm11, %v8183_v10, %v7973_v59  ;;  %v8185_v36 = vsel %vm8168_vm1, %v17651_v63, %v16545_v61 }
 0xc32   :  { %8315 = vst [vmem:[#allocation2 + $0x78] sm:$0xff] %v8283_v14  ;;  %v8249_v28 = vsel %vm8234_vm3, %v8216_v29, %v16619_v45  ;;  %v17660_v29 = vld [vmem:[#allocation91_spill] sm:$0xff] }
 0xc33   :  { %v8282_v56 = vsel %vm8267_vm12, %v8249_v28, 0.0 }
 0xc34   :  { %8314 = vst [vmem:[#allocation2 + $0x70] sm:$0xff] %v8282_v56  ;;  %v17661_v56 = vld [vmem:[#allocation51_spill] sm:$0xff] }
 0xc35   :  { %v7979_v7 = vpop.permute.xlu1 %7978 }
 0xc36   :  { %v8219_v51 = vsel %vm8201_vm11, %v8186_v1, %v7979_v7  ;;  %v8196_v1 = vsel %vm8168_vm1, %v17662_v25, %v17661_v56 }
 0xc37   :  { %v8252_v12 = vsel %vm8234_vm3, %v8219_v51, %v16621_v40  ;;  %v7977_v62 = vpop.permute.xlu0 %7976  ;;  %v17653_v40 = vld [vmem:[#allocation17_spill] sm:$0xff]  ;;  %v17664_v51 = vld [vmem:[#allocation24_spill] sm:$0xff] }
 0xc38   :  { %v8285_v45 = vsel %vm8267_vm12, %v8252_v12, 0.0  ;;  %v8218_v33 = vsel %vm8201_vm11, %v8185_v36, %v7977_v62  ;;  %v8187_v41 = vsel %vm8168_vm1, %v17653_v40, %v16540_v21  ;;  %v17665_v36 = vld [vmem:[#allocation93_spill] sm:$0xff] }
 0xc39   :  { %8317 = vst [vmem:[#allocation2 + $0x88] sm:$0xff] %v8285_v45  ;;  %v8251_v22 = vsel %vm8234_vm3, %v8218_v33, %v16623_v43 }
 0xc3a   :  { %v8284_v20 = vsel %vm8267_vm12, %v8251_v22, 0.0  ;;  %v17666_v22 = vld [vmem:[#allocation52_spill] sm:$0xff] }
 0xc3b   :  { %8316 = vst [vmem:[#allocation2 + $0x80] sm:$0xff] %v8284_v20 }
 0xc3d   :  { %v7983_v61 = vpop.permute.xlu1 %7982 }
 0xc3e   :  { %v8221_v46 = vsel %vm8201_vm11, %v8188_v9, %v7983_v61  ;;  %v17667_v9 = vld [vmem:[#allocation42_spill] sm:$0xff]  ;;  %v17668_v61 = vld [vmem:[#allocation36_spill] sm:$0xff] }
 0xc3f   :  { %v8254_v48 = vsel %vm8234_vm3, %v8221_v46, %v16626_v24  ;;  %v7981_v49 = vpop.permute.xlu0 %7980  ;;  %v17655_v24 = vld [vmem:[#allocation18_spill] sm:$0xff]  ;;  %v8198_v46 = vsel %vm8168_vm1, %v17668_v61, %v17667_v9 }
 0xc40   :  { %v8287_v43 = vsel %vm8267_vm12, %v8254_v48, 0.0  ;;  %v8220_v15 = vsel %vm8201_vm11, %v8187_v41, %v7981_v49  ;;  %v8189_v58 = vsel %vm8168_vm1, %v17655_v24, %v16557_v11  ;;  %v17669_v48 = vld [vmem:[#allocation44_spill] sm:$0xff]  ;;  %v17670_v49 = vld [vmem:[#allocation34_spill] sm:$0xff] }
 0xc41   :  { %8319 = vst [vmem:[#allocation2 + $0x98] sm:$0xff] %v8287_v43  ;;  %v8253_v16 = vsel %vm8234_vm3, %v8220_v15, %v16629_v23  ;;  %v8197_v43 = vsel %vm8168_vm1, %v17670_v49, %v17669_v48  ;;  %v17671_v15 = vld [vmem:[#allocation64_spill] sm:$0xff] }
 0xc42   :  { %v8286_v42 = vsel %vm8267_vm12, %v8253_v16, 0.0 }
 0xc43   :  { %8318 = vst [vmem:[#allocation2 + $0x90] sm:$0xff] %v8286_v42 }
 0xc46   :  { %v7987_v21 = vpop.permute.xlu1 %7986 }
 0xc47   :  { %v8223_v19 = vsel %vm8201_vm11, %v8190_v17, %v7987_v21  ;;  %v17672_v21 = vld [vmem:[#allocation65_spill] sm:$0xff] }
 0xc48   :  { %v8256_v2 = vsel %vm8234_vm3, %v8223_v19, %v16631_v35  ;;  %v7985_v26 = vpop.permute.xlu0 %7984  ;;  %v17657_v35 = vld [vmem:[#allocation21_spill] sm:$0xff] }
 0xc49   :  { %v8289_v23 = vsel %vm8267_vm12, %v8256_v2, 0.0  ;;  %v8222_v18 = vsel %vm8201_vm11, %v8189_v58, %v7985_v26  ;;  %v8191_v57 = vsel %vm8168_vm1, %v17657_v35, %v16551_v8  ;;  %v17673_v26 = vld [vmem:[#allocation40_spill] sm:$0xff] }
 0xc4a   :  { %8321 = vst [vmem:[#allocation2 + $0xa8] sm:$0xff] %v8289_v23  ;;  %v8255_v39 = vsel %vm8234_vm3, %v8222_v18, %v16633_v44  ;;  %v17674_v23 = vld [vmem:[#allocation35_spill] sm:$0xff] }
 0xc4b   :  { %v8288_v34 = vsel %vm8267_vm12, %v8255_v39, 0.0  ;;  %v8200_v18 = vsel %vm8168_vm1, %v17674_v23, %v17673_v26 }
 0xc4c   :  { %8320 = vst [vmem:[#allocation2 + $0xa0] sm:$0xff] %v8288_v34 }
 0xc4e   :  { %v7991_v11 = vpop.permute.xlu1 %7990 }
 0xc4f   :  { %v8225_v4 = vsel %vm8201_vm11, %v8192_v30, %v7991_v11  ;;  %v17676_v30 = vld [vmem:[#allocation33_spill] sm:$0xff] }
 0xc50   :  { %v8258_v5 = vsel %vm8234_vm3, %v8225_v4, %v16636_v32  ;;  %v7989_v37 = vpop.permute.xlu0 %7988  ;;  %v17659_v32 = vld [vmem:[#allocation30_spill] sm:$0xff]  ;;  %v8199_v11 = vsel %vm8168_vm1, %v17676_v30, %v17675_v6 }
 0xc51   :  { %v8291_v44 = vsel %vm8267_vm12, %v8258_v5, 0.0  ;;  %v8224_v47 = vsel %vm8201_vm11, %v8191_v57, %v7989_v37  ;;  %v8193_v10 = vsel %vm8168_vm1, %v17659_v32, %v16567_v0 }
 0xc52   :  { %8323 = vst [vmem:[#allocation2 + $0xb8] sm:$0xff] %v8291_v44  ;;  %v8257_v13 = vsel %vm8234_vm3, %v8224_v47, %v16639_v31 }
 0xc53   :  { %v8290_v53 = vsel %vm8267_vm12, %v8257_v13, 0.0 }
 0xc54   :  { %8322 = vst [vmem:[#allocation2 + $0xb0] sm:$0xff] %v8290_v53 }
 0xc55   :  { %v7995_v8 = vpop.permute.xlu1 %7994 }
 0xc56   :  { %v8227_v60 = vsel %vm8201_vm11, %v8194_v54, %v7995_v8 }
 0xc57   :  { %v8260_v55 = vsel %vm8234_vm3, %v8227_v60, %v16641_v3  ;;  %v7993_v59 = vpop.permute.xlu0 %7992  ;;  %v17663_v3 = vld [vmem:[#allocation38_spill] sm:$0xff] }
 0xc58   :  { %v8293_v31 = vsel %vm8267_vm12, %v8260_v55, 0.0  ;;  %v8226_v14 = vsel %vm8201_vm11, %v8193_v10, %v7993_v59  ;;  %v8195_v63 = vsel %vm8168_vm1, %v17664_v51, %v17663_v3 }
 0xc59   :  { %8325 = vst [vmem:[#allocation2 + $0xc8] sm:$0xff] %v8293_v31  ;;  %v8259_v28 = vsel %vm8234_vm3, %v8226_v14, %v17660_v29 }
 0xc5a   :  { %v8292_v38 = vsel %vm8267_vm12, %v8259_v28, 0.0 }
 0xc5b   :  { %8324 = vst [vmem:[#allocation2 + $0xc0] sm:$0xff] %v8292_v38 }
 0xc5d   :  { %v7999_v0 = vpop.permute.xlu1 %7998 }
 0xc5e   :  { %v8229_v7 = vsel %vm8201_vm11, %v8196_v1, %v7999_v0 }
 0xc5f   :  { %v8262_v12 = vsel %vm8234_vm3, %v8229_v7, %v17665_v36  ;;  %v7997_v62 = vpop.permute.xlu0 %7996 }
 0xc60   :  { %v8295_v45 = vsel %vm8267_vm12, %v8262_v12, 0.0  ;;  %v8228_v33 = vsel %vm8201_vm11, %v8195_v63, %v7997_v62 }
 0xc61   :  { %8327 = vst [vmem:[#allocation2 + $0xd8] sm:$0xff] %v8295_v45  ;;  %v8261_v20 = vsel %vm8234_vm3, %v8228_v33, %v17666_v22 }
 0xc62   :  { %v8294_v50 = vsel %vm8267_vm12, %v8261_v20, 0.0 }
 0xc63   :  { %8326 = vst [vmem:[#allocation2 + $0xd0] sm:$0xff] %v8294_v50 }
 0xc66   :  { %v8003_v40 = vpop.permute.xlu1 %8002 }
 0xc67   :  { %v8231_v41 = vsel %vm8201_vm11, %v8198_v46, %v8003_v40 }
 0xc68   :  { %v8264_v16 = vsel %vm8234_vm3, %v8231_v41, %v17671_v15  ;;  %v8001_v42 = vpop.permute.xlu0 %8000 }
 0xc69   :  { %v8297_v27 = vsel %vm8267_vm12, %v8264_v16, 0.0  ;;  %v8230_v17 = vsel %vm8201_vm11, %v8197_v43, %v8001_v42 }
 0xc6a   :  { %8329 = vst [vmem:[#allocation2 + $0xe8] sm:$0xff] %v8297_v27  ;;  %v8263_v19 = vsel %vm8234_vm3, %v8230_v17, %v17672_v21 }
 0xc6b   :  { %v8296_v24 = vsel %vm8267_vm12, %v8263_v19, 0.0 }
 0xc6c   :  { %8328 = vst [vmem:[#allocation2 + $0xe0] sm:$0xff] %v8296_v24 }
 0xc6e   :  { %v8007_v58 = vpop.permute.xlu1 %8006 }
 0xc6f   :  { %v8233_v39 = vsel %vm8201_vm11, %v8200_v18, %v8007_v58 }
 0xc70   :  { %v8005_v2 = vpop.permute.xlu0 %8004 }
 0xc71   :  { %v8232_v35 = vsel %vm8201_vm11, %v8199_v11, %v8005_v2 }
 0xc72   :  { %v8135_v34 = vpop.permute.xlu1 %8134 }
 0xc73   :  { %v8266_v4 = vsel %vm8234_vm3, %v8233_v39, %v8135_v34 }
 0xc74   :  { %v8299_v57 = vsel %vm8267_vm12, %v8266_v4, 0.0  ;;  %v8133_v5 = vpop.permute.xlu0 %8132 }
 0xc75   :  { %8331 = vst [vmem:[#allocation2 + $0xf8] sm:$0xff] %v8299_v57  ;;  %v8265_v37 = vsel %vm8234_vm3, %v8232_v35, %v8133_v5 }
 0xc76   :  { %v8298_v44 = vsel %vm8267_vm12, %v8265_v37, 0.0 }
 0xc77   :  { %8330 = vst [vmem:[#allocation2 + $0xf0] sm:$0xff] %v8298_v44 }
 0xc78   :  { %9950 = shalt.err (!%p9947_p4)
}
 0xc79   :  { %s9969_s0 = smov 128  }
 0xc7a   :  { %8343 = dma.vmem_to_hbm [thread:$0]  %s8338_s24, 4096, %s16904_s15, [#allocation3], %s9969_s0, %s9969_s0, %s9964_s23  }
 0xc7b   :  { %9959 = dma.done.wait [#allocation3], 4096  }
 0xc7c   :  { %9960 = vsyncadd [#allocation3], 4294963200 }
 0xc7d   :  { %8347 = vsyncpa [#allocation3], 1 }

</bundles_post_ra>
